<compile_context>
chip_gen: v7x
topology: tpu7x:2x2x1
jax: 0.10.0
libtpu: 0.0.40
codegen_flags: <defaults>
</compile_context>

<pallas_src>
import math

import jax
import jax.numpy as jnp
from jax.experimental import pallas as pl
from jax.experimental.pallas import tpu as pltpu

# ----------------------------- small config ---------------------------------
MIN_DEG_POINT = 0
MAX_DEG_POINT = 4            # pos_enc_dim = 2*3*4 = 24   (scaled down from 16)
DEG_VIEW = 2                 # view_enc_dim = 2*3*2 = 12
NETWIDTH = 32                # scaled down from 256
NETDEPTH = 8
SKIP = 4                     # skip connection after layer index 4
NUM_COARSE = 16              # scaled down from 128
NUM_FINE = 16

POS_ENC_DIM = 2 * 3 * (MAX_DEG_POINT - MIN_DEG_POINT)
VIEW_ENC_DIM = 2 * 3 * DEG_VIEW
X_DIM = POS_ENC_DIM + VIEW_ENC_DIM   # MLP input (pos enc + view enc) = 36

TILE = 1024                  # sample points per grid step (lane axis)

N_MATS = NETDEPTH + 4        # 8 trunk + density + feature + views + rgb = 12
OUT_PAD = 32                 # all output dims zero-padded to 32 rows
IN_PAD = 128                 # all input  dims zero-padded to 128 lanes

# Per-matrix contraction width used inside the kernel.  The rgb head (true
# in=16) is padded to 32 with zero weight columns so it can consume the full
# 32-row view-branch activation without extra slicing.
K_DIMS = (
    [X_DIM] + [NETWIDTH] * 4 + [NETWIDTH + X_DIM] + [NETWIDTH] * 2   # trunk
    + [NETWIDTH,                       # density_linear
       NETWIDTH,                       # feature_linear
       NETWIDTH + VIEW_ENC_DIM,        # views_linears[0]
       NETWIDTH]                       # rgb_linear (padded 16 -> 32)
)


# ------------------------- Pallas kernel (MLP) -------------------------------
def _mipnerf_mlp_kernel(x_ref, w_ref, b_ref, out_ref):
    """One tile of TILE sample points, points on the 128-lane axis."""
    xin = x_ref[...]                       # [9, T] f32
    m = xin[0:3, :]                        # means
    v = xin[3:6, :]                        # diag variances
    d = xin[6:9, :]                        # normalized view dirs

    # Integrated positional encoding: stack all levels on the sublane axis and
    # run ONE exp / ONE sin / ONE cos over the whole [3*L, T] slab.
    sm = jnp.concatenate(
        [m * (2.0 ** l) for l in range(MIN_DEG_POINT, MAX_DEG_POINT)], axis=0)
    sv = jnp.concatenate(
        [v * (4.0 ** l) for l in range(MIN_DEG_POINT, MAX_DEG_POINT)], axis=0)
    damp = jnp.exp(-0.5 * sv)
    pos_enc = jnp.concatenate(
        [damp * jnp.sin(sm), damp * jnp.cos(sm)], axis=0)       # [24, T]

    # View encoding: variance is identically zero -> plain PE, no exp/damp.
    sd = jnp.concatenate([d * (2.0 ** l) for l in range(DEG_VIEW)], axis=0)
    view_enc = jnp.concatenate([jnp.sin(sd), jnp.cos(sd)], axis=0)   # [12, T]

    # TODO(synk): reference constructs pts_linears[0] with pos_enc_dim only,
    # inconsistent with x = cat([pos_enc, view_enc]); we use the full input.
    x = jnp.concatenate([pos_enc, view_enc], axis=0)                 # [36, T]

    def dense(layer, h):
        w = w_ref[layer][:, :K_DIMS[layer]]          # [32, K] bf16 (zero padded)
        b = b_ref[layer]                             # [32, 1] f32
        return jnp.dot(w, h.astype(jnp.bfloat16),
                       preferred_element_type=jnp.float32) + b

    h = x
    for i in range(NETDEPTH):
        h = jnp.maximum(dense(i, h), 0.0)
        if i == SKIP:
            # TODO(synk): order [h, x] is a weight-layout convention; classic
            # NeRF uses [x, h] -- irrelevant for freshly initialized weights.
            h = jnp.concatenate([h, x], axis=0)                      # [68, T]

    density = dense(NETDEPTH, h)[0:1, :]             # [1, T] raw (relu later)
    features = dense(NETDEPTH + 1, h)                # [32, T]
    hv = jnp.concatenate([features, view_enc], axis=0)               # [44, T]
    hv = jnp.maximum(dense(NETDEPTH + 2, hv), 0.0)   # [32, T] (rows 16: are 0)
    rgb = jax.nn.sigmoid(dense(NETDEPTH + 3, hv)[0:3, :])            # [3, T]

    # Single lane-dense store: [4, TILE].
    out_ref[...] = jnp.concatenate([density, rgb], axis=0).astype(out_ref.dtype)


def mipnerf_mlp_apply(params, means, variances, dirs):
    """Apply the MipNeRF MLP kernel to flattened points.

    means/variances/dirs: [P, 3] float32.  Returns (density [P,1], rgb [P,3]).
    """
    w_slab, b_slab = params
    p_orig = means.shape[0]

    # One packed, transposed input: [9, P] (points on the lane axis).
    packed = jnp.concatenate(
        [means.T, variances.T, dirs.T], axis=0).astype(jnp.float32)
    pad = (-p_orig) % TILE
    if pad:
        packed = jnp.pad(packed, ((0, 0), (0, pad)))
    p_padded = packed.shape[1]

    out = pl.pallas_call(
        _mipnerf_mlp_kernel,
        out_shape=jax.ShapeDtypeStruct((4, p_padded), jnp.float32),
        grid_spec=pltpu.PrefetchScalarGridSpec(
            num_scalar_prefetch=0,
            grid=(p_padded // TILE,),
            in_specs=[
                pl.BlockSpec((9, TILE), lambda i: (0, i)),
                pl.BlockSpec((N_MATS, OUT_PAD, IN_PAD), lambda i: (0, 0, 0)),
                pl.BlockSpec((N_MATS, OUT_PAD, 1), lambda i: (0, 0, 0)),
            ],
            out_specs=pl.BlockSpec((4, TILE), lambda i: (0, i)),
        ),
        compiler_params=pltpu.CompilerParams(
            dimension_semantics=("parallel",)),   # independent tiles -> v7x 2 TCs
    )(packed, w_slab, b_slab)

    density = out[0:1, :p_orig].T          # [P, 1]
    rgb = out[1:4, :p_orig].T              # [P, 3]
    return density, rgb


# ------------------------------ parameters -----------------------------------
def init_mlp_params(key):
    """Kaiming-normal (fan_in, relu) init, zero biases, packed into padded slabs.

    Weights are stored transposed ([out, in]), zero-padded to [32, 128], and
    stacked into a single bf16 [12, 32, 128] slab; biases into [12, 32, 1] f32.
    """
    dims = []
    d_in = X_DIM
    for i in range(NETDEPTH):
        dims.append((d_in, NETWIDTH))
        d_in = NETWIDTH
        if i == SKIP:
            d_in = NETWIDTH + X_DIM
    dims += [
        (NETWIDTH, 1),                              # density_linear
        (NETWIDTH, NETWIDTH),                       # feature_linear
        (NETWIDTH + VIEW_ENC_DIM, NETWIDTH // 2),   # views_linears[0]
        (NETWIDTH // 2, 3),                         # rgb_linear
    ]
    assert len(dims) == N_MATS
    keys = jax.random.split(key, N_MATS)
    w_slab = jnp.zeros((N_MATS, OUT_PAD, IN_PAD), jnp.float32)
    b_slab = jnp.zeros((N_MATS, OUT_PAD, 1), jnp.float32)   # biases are zero
    for layer, (k, (din, dout)) in enumerate(zip(keys, dims)):
        w = jax.random.normal(k, (dout, din), jnp.float32) * math.sqrt(2.0 / din)
        w_slab = w_slab.at[layer, :dout, :din].set(w)
    return w_slab.astype(jnp.bfloat16), b_slab


# --------------------------- MipNeRF forward (glue) ---------------------------
def _run_network(params, pts, intervals, view_dirs):
    """pts [N,S,3], intervals [N,S-1], view_dirs [N,3] -> dict of [N,S,*]."""
    n, s, _ = pts.shape
    # TODO(synk): MipNeRF.forward calls the MLP with (pts, intervals, viewdirs)
    # which mismatches MipNeRFMLP's (frustums, viewdirs) signature; we build
    # per-sample Gaussian variances from intervals (axial variance (dt/3)^2).
    dt = jnp.concatenate([intervals, intervals[..., -1:]], axis=-1)      # [N,S]
    variances = jnp.broadcast_to(((dt / 3.0) ** 2)[..., None], (n, s, 3))
    vd = view_dirs / jnp.linalg.norm(view_dirs, axis=-1, keepdims=True)
    dirs = jnp.broadcast_to(vd[:, None, :], (n, s, 3))

    density, rgb = mipnerf_mlp_apply(
        params,
        pts.reshape(-1, 3).astype(jnp.float32),
        variances.reshape(-1, 3).astype(jnp.float32),
        dirs.reshape(-1, 3).astype(jnp.float32),
    )
    return {"density": density.reshape(n, s, 1), "rgb": rgb.reshape(n, s, 3)}


def _compute_weights(density, z_vals, rays_d):
    """density [N,S] (squeezed), z_vals [N,S], rays_d [N,3] -> weights [N,S]."""
    dists = z_vals[..., 1:] - z_vals[..., :-1]
    dists = jnp.concatenate(
        [dists, jnp.full_like(dists[..., :1], 1e10)], axis=-1)
    dists = dists * jnp.linalg.norm(rays_d, axis=-1, keepdims=True)
    alpha = 1.0 - jnp.exp(-jax.nn.relu(density) * dists)
    trans = jnp.cumprod(
        jnp.concatenate(
            [jnp.ones_like(alpha[..., :1]), 1.0 - alpha + 1e-10], axis=-1),
        axis=-1)[..., :-1]
    return alpha * trans


def _sample_pdf(bins, weights, num_samples, key):
    """Inverse-CDF importance sampling.  bins [N,B], weights [N,B-1]."""
    weights = weights + 1e-5
    pdf = weights / jnp.sum(weights, axis=-1, keepdims=True)
    cdf = jnp.cumsum(pdf, axis=-1)
    cdf = jnp.concatenate([jnp.zeros_like(cdf[..., :1]), cdf], axis=-1)  # [N,B]

    # TODO(synk): torch.rand is non-deterministic; we use a fixed JAX key.
    u = jax.random.uniform(key, cdf.shape[:-1] + (num_samples,), jnp.float32)

    # searchsorted(right=True) == count of cdf entries <= u
    inds = jnp.sum(cdf[:, None, :] <= u[:, :, None], axis=-1)
    below = jnp.clip(inds - 1, 0, cdf.shape[-1] - 1)
    above = jnp.clip(inds, 0, cdf.shape[-1] - 1)

    cdf_g0 = jnp.take_along_axis(cdf, below, axis=-1)
    cdf_g1 = jnp.take_along_axis(cdf, above, axis=-1)
    bins_g0 = jnp.take_along_axis(bins, below, axis=-1)
    bins_g1 = jnp.take_along_axis(bins, above, axis=-1)

    denom = cdf_g1 - cdf_g0
    denom = jnp.where(denom < 1e-5, jnp.ones_like(denom), denom)
    t = (u - cdf_g0) / denom
    return bins_g0 + t * (bins_g1 - bins_g0)


def mipnerf_forward(params_coarse, params_fine, rays_o, rays_d,
                    view_dirs=None, near=None, far=None, key=None):
    """Eval-mode MipNeRF forward pass (no perturbation of z_vals)."""
    n = rays_o.shape[0]
    if near is None:
        near = jnp.full((n,), 0.1, jnp.float32)
    if far is None:
        far = jnp.full((n,), 1000.0, jnp.float32)
    if view_dirs is None:
        view_dirs = rays_d
    if key is None:
        key = jax.random.PRNGKey(0)

    # Coarse sampling (disparity_space_sampling=True)
    t_vals = jnp.linspace(0.0, 1.0, NUM_COARSE)
    z_vals = 1.0 / (1.0 / near[:, None] * (1.0 - t_vals)
                    + 1.0 / far[:, None] * t_vals)                       # [N,Sc]

    pts = rays_o[:, None, :] + rays_d[:, None, :] * z_vals[..., None]
    intervals = z_vals[..., 1:] - z_vals[..., :-1]
    coarse = _run_network(params_coarse, pts, intervals, view_dirs)

    weights = _compute_weights(coarse["density"][..., 0], z_vals, rays_d)

    # Fine (importance) sampling
    z_mid = 0.5 * (z_vals[..., 1:] + z_vals[..., :-1])
    z_samples = _sample_pdf(z_mid, weights[..., 1:-1], NUM_FINE, key)
    z_comb = jnp.sort(jnp.concatenate([z_vals, z_samples], axis=-1), axis=-1)

    pts_f = rays_o[:, None, :] + rays_d[:, None, :] * z_comb[..., None]
    intervals_f = z_comb[..., 1:] - z_comb[..., :-1]
    fine = _run_network(params_fine, pts_f, intervals_f, view_dirs)

    return {
        "coarse": {
            "rgb": coarse["rgb"],
            "density": coarse["density"],
            "weights": weights,
            "z_vals": z_vals,
        },
        "fine": {
            "rgb": fine["rgb"],
            "density": fine["density"],
            "z_vals": z_comb,
        },
    }


# ----------------------------------- main -------------------------------------
if __name__ == "__main__":
    key = jax.random.PRNGKey(0)
    k_ro, k_rd, k_p1, k_p2, k_samp = jax.random.split(key, 5)

    N = 8
    rays_o = jax.random.normal(k_ro, (N, 3), jnp.float32) * 0.1
    rays_d = jax.random.normal(k_rd, (N, 3), jnp.float32)
    rays_d = rays_d / jnp.linalg.norm(rays_d, axis=-1, keepdims=True)
    view_dirs = rays_d
    near = jnp.full((N,), 2.0, jnp.float32)
    far = jnp.full((N,), 6.0, jnp.float32)

    params_coarse = init_mlp_params(k_p1)
    params_fine = init_mlp_params(k_p2)

    fwd = jax.jit(mipnerf_forward)
    out = fwd(params_coarse, params_fine, rays_o, rays_d,
              view_dirs, near, far, k_samp)
    jax.block_until_ready(out)

    assert out["coarse"]["rgb"].shape == (N, NUM_COARSE, 3)
    assert out["coarse"]["density"].shape == (N, NUM_COARSE, 1)
    assert out["coarse"]["weights"].shape == (N, NUM_COARSE)
    assert out["fine"]["rgb"].shape == (N, NUM_COARSE + NUM_FINE, 3)
    assert out["fine"]["density"].shape == (N, NUM_COARSE + NUM_FINE, 1)
    assert bool(jnp.all(jnp.isfinite(out["fine"]["rgb"])))
    print("KERNEL_OK")
</pallas_src>

<mosaic_0001>
module attributes {stable_mosaic.version = 11 : i64} {
  func.func @_mipnerf_mlp_kernel(%arg0: i32, %arg1: memref<9x1024xf32, #tpu.memory_space<vmem>>, %arg2: memref<12x32x128xbf16, #tpu.memory_space<vmem>>, %arg3: memref<12x32x1xf32, #tpu.memory_space<vmem>>, %arg4: memref<4x1024xf32, #tpu.memory_space<vmem>>) attributes {dimension_semantics = [#tpu.dimension_semantics<parallel>], iteration_bounds = array<i64: 1>, scalar_prefetch = 0 : i64, scratch_operands = 0 : i64, tpu.core_type = #tpu.core_type<tc>, window_params = [{transform_indices = @transform_0, window_bounds = array<i64: 9, 1024>}, {pipeline_mode = #tpu.pipeline_mode<synchronous>, transform_indices = @transform_1, window_bounds = array<i64: 12, 32, 128>}, {pipeline_mode = #tpu.pipeline_mode<synchronous>, transform_indices = @transform_2, window_bounds = array<i64: 12, 32, 1>}, {transform_indices = @transform_3, window_bounds = array<i64: 4, 1024>}]} {
    %c0 = arith.constant 0 : index
    %c0_0 = arith.constant 0 : index
    %0 = vector.load %arg1[%c0, %c0_0] : memref<9x1024xf32, #tpu.memory_space<vmem>>, vector<9x1024xf32>
    %1 = vector.extract_strided_slice %0 {offsets = [0, 0], sizes = [3, 1024], strides = [1, 1]} : vector<9x1024xf32> to vector<3x1024xf32>
    %2 = vector.extract_strided_slice %0 {offsets = [3, 0], sizes = [3, 1024], strides = [1, 1]} : vector<9x1024xf32> to vector<3x1024xf32>
    %3 = vector.extract_strided_slice %0 {offsets = [6, 0], sizes = [3, 1024], strides = [1, 1]} : vector<9x1024xf32> to vector<3x1024xf32>
    %cst = arith.constant 1.000000e+00 : f32
    %4 = vector.broadcast %cst : f32 to vector<3x1024xf32>
    %5 = arith.mulf %1, %4 : vector<3x1024xf32>
    %cst_1 = arith.constant 2.000000e+00 : f32
    %6 = vector.broadcast %cst_1 : f32 to vector<3x1024xf32>
    %7 = arith.mulf %1, %6 : vector<3x1024xf32>
    %cst_2 = arith.constant 4.000000e+00 : f32
    %8 = vector.broadcast %cst_2 : f32 to vector<3x1024xf32>
    %9 = arith.mulf %1, %8 : vector<3x1024xf32>
    %cst_3 = arith.constant 8.000000e+00 : f32
    %10 = vector.broadcast %cst_3 : f32 to vector<3x1024xf32>
    %11 = arith.mulf %1, %10 : vector<3x1024xf32>
    %12 = tpu.concatenate %5, %7, %9, %11 in 0 : vector<3x1024xf32>, vector<3x1024xf32>, vector<3x1024xf32>, vector<3x1024xf32> -> vector<12x1024xf32>
    %cst_4 = arith.constant 1.000000e+00 : f32
    %13 = vector.broadcast %cst_4 : f32 to vector<3x1024xf32>
    %14 = arith.mulf %2, %13 : vector<3x1024xf32>
    %cst_5 = arith.constant 4.000000e+00 : f32
    %15 = vector.broadcast %cst_5 : f32 to vector<3x1024xf32>
    %16 = arith.mulf %2, %15 : vector<3x1024xf32>
    %cst_6 = arith.constant 1.600000e+01 : f32
    %17 = vector.broadcast %cst_6 : f32 to vector<3x1024xf32>
    %18 = arith.mulf %2, %17 : vector<3x1024xf32>
    %cst_7 = arith.constant 6.400000e+01 : f32
    %19 = vector.broadcast %cst_7 : f32 to vector<3x1024xf32>
    %20 = arith.mulf %2, %19 : vector<3x1024xf32>
    %21 = tpu.concatenate %14, %16, %18, %20 in 0 : vector<3x1024xf32>, vector<3x1024xf32>, vector<3x1024xf32>, vector<3x1024xf32> -> vector<12x1024xf32>
    %cst_8 = arith.constant -5.000000e-01 : f32
    %22 = vector.broadcast %cst_8 : f32 to vector<12x1024xf32>
    %23 = arith.mulf %22, %21 : vector<12x1024xf32>
    %24 = math.exp %23 : vector<12x1024xf32>
    %25 = math.sin %12 : vector<12x1024xf32>
    %26 = arith.mulf %24, %25 : vector<12x1024xf32>
    %27 = math.cos %12 : vector<12x1024xf32>
    %28 = arith.mulf %24, %27 : vector<12x1024xf32>
    %29 = tpu.concatenate %26, %28 in 0 : vector<12x1024xf32>, vector<12x1024xf32> -> vector<24x1024xf32>
    %cst_9 = arith.constant 1.000000e+00 : f32
    %30 = vector.broadcast %cst_9 : f32 to vector<3x1024xf32>
    %31 = arith.mulf %3, %30 : vector<3x1024xf32>
    %cst_10 = arith.constant 2.000000e+00 : f32
    %32 = vector.broadcast %cst_10 : f32 to vector<3x1024xf32>
    %33 = arith.mulf %3, %32 : vector<3x1024xf32>
    %34 = tpu.concatenate %31, %33 in 0 : vector<3x1024xf32>, vector<3x1024xf32> -> vector<6x1024xf32>
    %35 = math.sin %34 : vector<6x1024xf32>
    %36 = math.cos %34 : vector<6x1024xf32>
    %37 = tpu.concatenate %35, %36 in 0 : vector<6x1024xf32>, vector<6x1024xf32> -> vector<12x1024xf32>
    %38 = tpu.concatenate %29, %37 in 0 : vector<24x1024xf32>, vector<12x1024xf32> -> vector<36x1024xf32>
    %c0_11 = arith.constant 0 : index
    %c0_12 = arith.constant 0 : index
    %c0_13 = arith.constant 0 : index
    %39 = vector.load %arg2[%c0_11, %c0_12, %c0_13] : memref<12x32x128xbf16, #tpu.memory_space<vmem>>, vector<1x32x128xbf16>
    %40 = vector.shape_cast %39 : vector<1x32x128xbf16> to vector<32x128xbf16>
    %41 = vector.extract_strided_slice %40 {offsets = [0, 0], sizes = [32, 36], strides = [1, 1]} : vector<32x128xbf16> to vector<32x36xbf16>
    %c0_14 = arith.constant 0 : index
    %c0_15 = arith.constant 0 : index
    %c0_16 = arith.constant 0 : index
    %42 = vector.load %arg3[%c0_14, %c0_15, %c0_16] : memref<12x32x1xf32, #tpu.memory_space<vmem>>, vector<1x32x1xf32>
    %43 = vector.shape_cast %42 : vector<1x32x1xf32> to vector<32x1xf32>
    %44 = arith.truncf %38 : vector<36x1024xf32> to vector<36x1024xbf16>
    %cst_17 = arith.constant dense<0.000000e+00> : vector<32x1024xf32>
    %45 = tpu.matmul %41, %44, %cst_17 {dimension_numbers = #tpu.dot_dimension_numbers<[1], [0], [0], [1], [0, 0, 1, 1], [], []>} : vector<32x36xbf16>, vector<36x1024xbf16>, vector<32x1024xf32> -> vector<32x1024xf32>
    %46 = vector.broadcast %43 : vector<32x1xf32> to vector<32x1024xf32>
    %47 = arith.addf %45, %46 : vector<32x1024xf32>
    %cst_18 = arith.constant 0.000000e+00 : f32
    %48 = vector.broadcast %cst_18 : f32 to vector<32x1024xf32>
    %49 = arith.maximumf %47, %48 : vector<32x1024xf32>
    %c1 = arith.constant 1 : index
    %c0_19 = arith.constant 0 : index
    %c0_20 = arith.constant 0 : index
    %50 = vector.load %arg2[%c1, %c0_19, %c0_20] : memref<12x32x128xbf16, #tpu.memory_space<vmem>>, vector<1x32x128xbf16>
    %51 = vector.shape_cast %50 : vector<1x32x128xbf16> to vector<32x128xbf16>
    %52 = vector.extract_strided_slice %51 {offsets = [0, 0], sizes = [32, 32], strides = [1, 1]} : vector<32x128xbf16> to vector<32x32xbf16>
    %c1_21 = arith.constant 1 : index
    %c0_22 = arith.constant 0 : index
    %c0_23 = arith.constant 0 : index
    %53 = vector.load %arg3[%c1_21, %c0_22, %c0_23] : memref<12x32x1xf32, #tpu.memory_space<vmem>>, vector<1x32x1xf32>
    %54 = vector.shape_cast %53 : vector<1x32x1xf32> to vector<32x1xf32>
    %55 = arith.truncf %49 : vector<32x1024xf32> to vector<32x1024xbf16>
    %cst_24 = arith.constant dense<0.000000e+00> : vector<32x1024xf32>
    %56 = tpu.matmul %52, %55, %cst_24 {dimension_numbers = #tpu.dot_dimension_numbers<[1], [0], [0], [1], [0, 0, 1, 1], [], []>} : vector<32x32xbf16>, vector<32x1024xbf16>, vector<32x1024xf32> -> vector<32x1024xf32>
    %57 = vector.broadcast %54 : vector<32x1xf32> to vector<32x1024xf32>
    %58 = arith.addf %56, %57 : vector<32x1024xf32>
    %cst_25 = arith.constant 0.000000e+00 : f32
    %59 = vector.broadcast %cst_25 : f32 to vector<32x1024xf32>
    %60 = arith.maximumf %58, %59 : vector<32x1024xf32>
    %c2 = arith.constant 2 : index
    %c0_26 = arith.constant 0 : index
    %c0_27 = arith.constant 0 : index
    %61 = vector.load %arg2[%c2, %c0_26, %c0_27] : memref<12x32x128xbf16, #tpu.memory_space<vmem>>, vector<1x32x128xbf16>
    %62 = vector.shape_cast %61 : vector<1x32x128xbf16> to vector<32x128xbf16>
    %63 = vector.extract_strided_slice %62 {offsets = [0, 0], sizes = [32, 32], strides = [1, 1]} : vector<32x128xbf16> to vector<32x32xbf16>
    %c2_28 = arith.constant 2 : index
    %c0_29 = arith.constant 0 : index
    %c0_30 = arith.constant 0 : index
    %64 = vector.load %arg3[%c2_28, %c0_29, %c0_30] : memref<12x32x1xf32, #tpu.memory_space<vmem>>, vector<1x32x1xf32>
    %65 = vector.shape_cast %64 : vector<1x32x1xf32> to vector<32x1xf32>
    %66 = arith.truncf %60 : vector<32x1024xf32> to vector<32x1024xbf16>
    %cst_31 = arith.constant dense<0.000000e+00> : vector<32x1024xf32>
    %67 = tpu.matmul %63, %66, %cst_31 {dimension_numbers = #tpu.dot_dimension_numbers<[1], [0], [0], [1], [0, 0, 1, 1], [], []>} : vector<32x32xbf16>, vector<32x1024xbf16>, vector<32x1024xf32> -> vector<32x1024xf32>
    %68 = vector.broadcast %65 : vector<32x1xf32> to vector<32x1024xf32>
    %69 = arith.addf %67, %68 : vector<32x1024xf32>
    %cst_32 = arith.constant 0.000000e+00 : f32
    %70 = vector.broadcast %cst_32 : f32 to vector<32x1024xf32>
    %71 = arith.maximumf %69, %70 : vector<32x1024xf32>
    %c3 = arith.constant 3 : index
    %c0_33 = arith.constant 0 : index
    %c0_34 = arith.constant 0 : index
    %72 = vector.load %arg2[%c3, %c0_33, %c0_34] : memref<12x32x128xbf16, #tpu.memory_space<vmem>>, vector<1x32x128xbf16>
    %73 = vector.shape_cast %72 : vector<1x32x128xbf16> to vector<32x128xbf16>
    %74 = vector.extract_strided_slice %73 {offsets = [0, 0], sizes = [32, 32], strides = [1, 1]} : vector<32x128xbf16> to vector<32x32xbf16>
    %c3_35 = arith.constant 3 : index
    %c0_36 = arith.constant 0 : index
    %c0_37 = arith.constant 0 : index
    %75 = vector.load %arg3[%c3_35, %c0_36, %c0_37] : memref<12x32x1xf32, #tpu.memory_space<vmem>>, vector<1x32x1xf32>
    %76 = vector.shape_cast %75 : vector<1x32x1xf32> to vector<32x1xf32>
    %77 = arith.truncf %71 : vector<32x1024xf32> to vector<32x1024xbf16>
    %cst_38 = arith.constant dense<0.000000e+00> : vector<32x1024xf32>
    %78 = tpu.matmul %74, %77, %cst_38 {dimension_numbers = #tpu.dot_dimension_numbers<[1], [0], [0], [1], [0, 0, 1, 1], [], []>} : vector<32x32xbf16>, vector<32x1024xbf16>, vector<32x1024xf32> -> vector<32x1024xf32>
    %79 = vector.broadcast %76 : vector<32x1xf32> to vector<32x1024xf32>
    %80 = arith.addf %78, %79 : vector<32x1024xf32>
    %cst_39 = arith.constant 0.000000e+00 : f32
    %81 = vector.broadcast %cst_39 : f32 to vector<32x1024xf32>
    %82 = arith.maximumf %80, %81 : vector<32x1024xf32>
    %c4 = arith.constant 4 : index
    %c0_40 = arith.constant 0 : index
    %c0_41 = arith.constant 0 : index
    %83 = vector.load %arg2[%c4, %c0_40, %c0_41] : memref<12x32x128xbf16, #tpu.memory_space<vmem>>, vector<1x32x128xbf16>
    %84 = vector.shape_cast %83 : vector<1x32x128xbf16> to vector<32x128xbf16>
    %85 = vector.extract_strided_slice %84 {offsets = [0, 0], sizes = [32, 32], strides = [1, 1]} : vector<32x128xbf16> to vector<32x32xbf16>
    %c4_42 = arith.constant 4 : index
    %c0_43 = arith.constant 0 : index
    %c0_44 = arith.constant 0 : index
    %86 = vector.load %arg3[%c4_42, %c0_43, %c0_44] : memref<12x32x1xf32, #tpu.memory_space<vmem>>, vector<1x32x1xf32>
    %87 = vector.shape_cast %86 : vector<1x32x1xf32> to vector<32x1xf32>
    %88 = arith.truncf %82 : vector<32x1024xf32> to vector<32x1024xbf16>
    %cst_45 = arith.constant dense<0.000000e+00> : vector<32x1024xf32>
    %89 = tpu.matmul %85, %88, %cst_45 {dimension_numbers = #tpu.dot_dimension_numbers<[1], [0], [0], [1], [0, 0, 1, 1], [], []>} : vector<32x32xbf16>, vector<32x1024xbf16>, vector<32x1024xf32> -> vector<32x1024xf32>
    %90 = vector.broadcast %87 : vector<32x1xf32> to vector<32x1024xf32>
    %91 = arith.addf %89, %90 : vector<32x1024xf32>
    %cst_46 = arith.constant 0.000000e+00 : f32
    %92 = vector.broadcast %cst_46 : f32 to vector<32x1024xf32>
    %93 = arith.maximumf %91, %92 : vector<32x1024xf32>
    %94 = tpu.concatenate %93, %38 in 0 : vector<32x1024xf32>, vector<36x1024xf32> -> vector<68x1024xf32>
    %c5 = arith.constant 5 : index
    %c0_47 = arith.constant 0 : index
    %c0_48 = arith.constant 0 : index
    %95 = vector.load %arg2[%c5, %c0_47, %c0_48] : memref<12x32x128xbf16, #tpu.memory_space<vmem>>, vector<1x32x128xbf16>
    %96 = vector.shape_cast %95 : vector<1x32x128xbf16> to vector<32x128xbf16>
    %97 = vector.extract_strided_slice %96 {offsets = [0, 0], sizes = [32, 68], strides = [1, 1]} : vector<32x128xbf16> to vector<32x68xbf16>
    %c5_49 = arith.constant 5 : index
    %c0_50 = arith.constant 0 : index
    %c0_51 = arith.constant 0 : index
    %98 = vector.load %arg3[%c5_49, %c0_50, %c0_51] : memref<12x32x1xf32, #tpu.memory_space<vmem>>, vector<1x32x1xf32>
    %99 = vector.shape_cast %98 : vector<1x32x1xf32> to vector<32x1xf32>
    %100 = arith.truncf %94 : vector<68x1024xf32> to vector<68x1024xbf16>
    %cst_52 = arith.constant dense<0.000000e+00> : vector<32x1024xf32>
    %101 = tpu.matmul %97, %100, %cst_52 {dimension_numbers = #tpu.dot_dimension_numbers<[1], [0], [0], [1], [0, 0, 1, 1], [], []>} : vector<32x68xbf16>, vector<68x1024xbf16>, vector<32x1024xf32> -> vector<32x1024xf32>
    %102 = vector.broadcast %99 : vector<32x1xf32> to vector<32x1024xf32>
    %103 = arith.addf %101, %102 : vector<32x1024xf32>
    %cst_53 = arith.constant 0.000000e+00 : f32
    %104 = vector.broadcast %cst_53 : f32 to vector<32x1024xf32>
    %105 = arith.maximumf %103, %104 : vector<32x1024xf32>
    %c6 = arith.constant 6 : index
    %c0_54 = arith.constant 0 : index
    %c0_55 = arith.constant 0 : index
    %106 = vector.load %arg2[%c6, %c0_54, %c0_55] : memref<12x32x128xbf16, #tpu.memory_space<vmem>>, vector<1x32x128xbf16>
    %107 = vector.shape_cast %106 : vector<1x32x128xbf16> to vector<32x128xbf16>
    %108 = vector.extract_strided_slice %107 {offsets = [0, 0], sizes = [32, 32], strides = [1, 1]} : vector<32x128xbf16> to vector<32x32xbf16>
    %c6_56 = arith.constant 6 : index
    %c0_57 = arith.constant 0 : index
    %c0_58 = arith.constant 0 : index
    %109 = vector.load %arg3[%c6_56, %c0_57, %c0_58] : memref<12x32x1xf32, #tpu.memory_space<vmem>>, vector<1x32x1xf32>
    %110 = vector.shape_cast %109 : vector<1x32x1xf32> to vector<32x1xf32>
    %111 = arith.truncf %105 : vector<32x1024xf32> to vector<32x1024xbf16>
    %cst_59 = arith.constant dense<0.000000e+00> : vector<32x1024xf32>
    %112 = tpu.matmul %108, %111, %cst_59 {dimension_numbers = #tpu.dot_dimension_numbers<[1], [0], [0], [1], [0, 0, 1, 1], [], []>} : vector<32x32xbf16>, vector<32x1024xbf16>, vector<32x1024xf32> -> vector<32x1024xf32>
    %113 = vector.broadcast %110 : vector<32x1xf32> to vector<32x1024xf32>
    %114 = arith.addf %112, %113 : vector<32x1024xf32>
    %cst_60 = arith.constant 0.000000e+00 : f32
    %115 = vector.broadcast %cst_60 : f32 to vector<32x1024xf32>
    %116 = arith.maximumf %114, %115 : vector<32x1024xf32>
    %c7 = arith.constant 7 : index
    %c0_61 = arith.constant 0 : index
    %c0_62 = arith.constant 0 : index
    %117 = vector.load %arg2[%c7, %c0_61, %c0_62] : memref<12x32x128xbf16, #tpu.memory_space<vmem>>, vector<1x32x128xbf16>
    %118 = vector.shape_cast %117 : vector<1x32x128xbf16> to vector<32x128xbf16>
    %119 = vector.extract_strided_slice %118 {offsets = [0, 0], sizes = [32, 32], strides = [1, 1]} : vector<32x128xbf16> to vector<32x32xbf16>
    %c7_63 = arith.constant 7 : index
    %c0_64 = arith.constant 0 : index
    %c0_65 = arith.constant 0 : index
    %120 = vector.load %arg3[%c7_63, %c0_64, %c0_65] : memref<12x32x1xf32, #tpu.memory_space<vmem>>, vector<1x32x1xf32>
    %121 = vector.shape_cast %120 : vector<1x32x1xf32> to vector<32x1xf32>
    %122 = arith.truncf %116 : vector<32x1024xf32> to vector<32x1024xbf16>
    %cst_66 = arith.constant dense<0.000000e+00> : vector<32x1024xf32>
    %123 = tpu.matmul %119, %122, %cst_66 {dimension_numbers = #tpu.dot_dimension_numbers<[1], [0], [0], [1], [0, 0, 1, 1], [], []>} : vector<32x32xbf16>, vector<32x1024xbf16>, vector<32x1024xf32> -> vector<32x1024xf32>
    %124 = vector.broadcast %121 : vector<32x1xf32> to vector<32x1024xf32>
    %125 = arith.addf %123, %124 : vector<32x1024xf32>
    %cst_67 = arith.constant 0.000000e+00 : f32
    %126 = vector.broadcast %cst_67 : f32 to vector<32x1024xf32>
    %127 = arith.maximumf %125, %126 : vector<32x1024xf32>
    %c8 = arith.constant 8 : index
    %c0_68 = arith.constant 0 : index
    %c0_69 = arith.constant 0 : index
    %128 = vector.load %arg2[%c8, %c0_68, %c0_69] : memref<12x32x128xbf16, #tpu.memory_space<vmem>>, vector<1x32x128xbf16>
    %129 = vector.shape_cast %128 : vector<1x32x128xbf16> to vector<32x128xbf16>
    %130 = vector.extract_strided_slice %129 {offsets = [0, 0], sizes = [32, 32], strides = [1, 1]} : vector<32x128xbf16> to vector<32x32xbf16>
    %c8_70 = arith.constant 8 : index
    %c0_71 = arith.constant 0 : index
    %c0_72 = arith.constant 0 : index
    %131 = vector.load %arg3[%c8_70, %c0_71, %c0_72] : memref<12x32x1xf32, #tpu.memory_space<vmem>>, vector<1x32x1xf32>
    %132 = vector.shape_cast %131 : vector<1x32x1xf32> to vector<32x1xf32>
    %133 = arith.truncf %127 : vector<32x1024xf32> to vector<32x1024xbf16>
    %cst_73 = arith.constant dense<0.000000e+00> : vector<32x1024xf32>
    %134 = tpu.matmul %130, %133, %cst_73 {dimension_numbers = #tpu.dot_dimension_numbers<[1], [0], [0], [1], [0, 0, 1, 1], [], []>} : vector<32x32xbf16>, vector<32x1024xbf16>, vector<32x1024xf32> -> vector<32x1024xf32>
    %135 = vector.broadcast %132 : vector<32x1xf32> to vector<32x1024xf32>
    %136 = arith.addf %134, %135 : vector<32x1024xf32>
    %137 = vector.extract_strided_slice %136 {offsets = [0, 0], sizes = [1, 1024], strides = [1, 1]} : vector<32x1024xf32> to vector<1x1024xf32>
    %c9 = arith.constant 9 : index
    %c0_74 = arith.constant 0 : index
    %c0_75 = arith.constant 0 : index
    %138 = vector.load %arg2[%c9, %c0_74, %c0_75] : memref<12x32x128xbf16, #tpu.memory_space<vmem>>, vector<1x32x128xbf16>
    %139 = vector.shape_cast %138 : vector<1x32x128xbf16> to vector<32x128xbf16>
    %140 = vector.extract_strided_slice %139 {offsets = [0, 0], sizes = [32, 32], strides = [1, 1]} : vector<32x128xbf16> to vector<32x32xbf16>
    %c9_76 = arith.constant 9 : index
    %c0_77 = arith.constant 0 : index
    %c0_78 = arith.constant 0 : index
    %141 = vector.load %arg3[%c9_76, %c0_77, %c0_78] : memref<12x32x1xf32, #tpu.memory_space<vmem>>, vector<1x32x1xf32>
    %142 = vector.shape_cast %141 : vector<1x32x1xf32> to vector<32x1xf32>
    %143 = arith.truncf %127 : vector<32x1024xf32> to vector<32x1024xbf16>
    %cst_79 = arith.constant dense<0.000000e+00> : vector<32x1024xf32>
    %144 = tpu.matmul %140, %143, %cst_79 {dimension_numbers = #tpu.dot_dimension_numbers<[1], [0], [0], [1], [0, 0, 1, 1], [], []>} : vector<32x32xbf16>, vector<32x1024xbf16>, vector<32x1024xf32> -> vector<32x1024xf32>
    %145 = vector.broadcast %142 : vector<32x1xf32> to vector<32x1024xf32>
    %146 = arith.addf %144, %145 : vector<32x1024xf32>
    %147 = tpu.concatenate %146, %37 in 0 : vector<32x1024xf32>, vector<12x1024xf32> -> vector<44x1024xf32>
    %c10 = arith.constant 10 : index
    %c0_80 = arith.constant 0 : index
    %c0_81 = arith.constant 0 : index
    %148 = vector.load %arg2[%c10, %c0_80, %c0_81] : memref<12x32x128xbf16, #tpu.memory_space<vmem>>, vector<1x32x128xbf16>
    %149 = vector.shape_cast %148 : vector<1x32x128xbf16> to vector<32x128xbf16>
    %150 = vector.extract_strided_slice %149 {offsets = [0, 0], sizes = [32, 44], strides = [1, 1]} : vector<32x128xbf16> to vector<32x44xbf16>
    %c10_82 = arith.constant 10 : index
    %c0_83 = arith.constant 0 : index
    %c0_84 = arith.constant 0 : index
    %151 = vector.load %arg3[%c10_82, %c0_83, %c0_84] : memref<12x32x1xf32, #tpu.memory_space<vmem>>, vector<1x32x1xf32>
    %152 = vector.shape_cast %151 : vector<1x32x1xf32> to vector<32x1xf32>
    %153 = arith.truncf %147 : vector<44x1024xf32> to vector<44x1024xbf16>
    %cst_85 = arith.constant dense<0.000000e+00> : vector<32x1024xf32>
    %154 = tpu.matmul %150, %153, %cst_85 {dimension_numbers = #tpu.dot_dimension_numbers<[1], [0], [0], [1], [0, 0, 1, 1], [], []>} : vector<32x44xbf16>, vector<44x1024xbf16>, vector<32x1024xf32> -> vector<32x1024xf32>
    %155 = vector.broadcast %152 : vector<32x1xf32> to vector<32x1024xf32>
    %156 = arith.addf %154, %155 : vector<32x1024xf32>
    %cst_86 = arith.constant 0.000000e+00 : f32
    %157 = vector.broadcast %cst_86 : f32 to vector<32x1024xf32>
    %158 = arith.maximumf %156, %157 : vector<32x1024xf32>
    %c11 = arith.constant 11 : index
    %c0_87 = arith.constant 0 : index
    %c0_88 = arith.constant 0 : index
    %159 = vector.load %arg2[%c11, %c0_87, %c0_88] : memref<12x32x128xbf16, #tpu.memory_space<vmem>>, vector<1x32x128xbf16>
    %160 = vector.shape_cast %159 : vector<1x32x128xbf16> to vector<32x128xbf16>
    %161 = vector.extract_strided_slice %160 {offsets = [0, 0], sizes = [32, 32], strides = [1, 1]} : vector<32x128xbf16> to vector<32x32xbf16>
    %c11_89 = arith.constant 11 : index
    %c0_90 = arith.constant 0 : index
    %c0_91 = arith.constant 0 : index
    %162 = vector.load %arg3[%c11_89, %c0_90, %c0_91] : memref<12x32x1xf32, #tpu.memory_space<vmem>>, vector<1x32x1xf32>
    %163 = vector.shape_cast %162 : vector<1x32x1xf32> to vector<32x1xf32>
    %164 = arith.truncf %158 : vector<32x1024xf32> to vector<32x1024xbf16>
    %cst_92 = arith.constant dense<0.000000e+00> : vector<32x1024xf32>
    %165 = tpu.matmul %161, %164, %cst_92 {dimension_numbers = #tpu.dot_dimension_numbers<[1], [0], [0], [1], [0, 0, 1, 1], [], []>} : vector<32x32xbf16>, vector<32x1024xbf16>, vector<32x1024xf32> -> vector<32x1024xf32>
    %166 = vector.broadcast %163 : vector<32x1xf32> to vector<32x1024xf32>
    %167 = arith.addf %165, %166 : vector<32x1024xf32>
    %168 = vector.extract_strided_slice %167 {offsets = [0, 0], sizes = [3, 1024], strides = [1, 1]} : vector<32x1024xf32> to vector<3x1024xf32>
    %169 = arith.negf %168 : vector<3x1024xf32>
    %170 = math.exp %169 : vector<3x1024xf32>
    %cst_93 = arith.constant 1.000000e+00 : f32
    %171 = vector.broadcast %cst_93 : f32 to vector<3x1024xf32>
    %172 = arith.addf %171, %170 : vector<3x1024xf32>
    %173 = arith.divf %171, %172 : vector<3x1024xf32>
    %174 = tpu.concatenate %137, %173 in 0 : vector<1x1024xf32>, vector<3x1024xf32> -> vector<4x1024xf32>
    %c0_94 = arith.constant 0 : index
    %c0_95 = arith.constant 0 : index
    %175 = vector.load %arg4[%c0_94, %c0_95] : memref<4x1024xf32, #tpu.memory_space<vmem>>, vector<4x1024xf32>
    tpu.vector_store %arg4[%c0_94, %c0_95], %174 {strides = array<i32>} : memref<4x1024xf32, #tpu.memory_space<vmem>>, vector<4x1024xf32>,
    return
  }
  func.func @transform_0(%arg0: i32) -> (i32, i32) {
    %c0_i32 = arith.constant 0 : i32
    %c0_i32_0 = arith.constant 0 : i32
    return %c0_i32, %arg0 : i32, i32
  }
  func.func @transform_1(%arg0: i32) -> (i32, i32, i32) {
    %c0_i32 = arith.constant 0 : i32
    %c0_i32_0 = arith.constant 0 : i32
    %c0_i32_1 = arith.constant 0 : i32
    %c0_i32_2 = arith.constant 0 : i32
    return %c0_i32, %c0_i32_0, %c0_i32_1 : i32, i32, i32
  }
  func.func @transform_2(%arg0: i32) -> (i32, i32, i32) {
    %c0_i32 = arith.constant 0 : i32
    %c0_i32_0 = arith.constant 0 : i32
    %c0_i32_1 = arith.constant 0 : i32
    %c0_i32_2 = arith.constant 0 : i32
    return %c0_i32, %c0_i32_0, %c0_i32_1 : i32, i32, i32
  }
  func.func @transform_3(%arg0: i32) -> (i32, i32) {
    %c0_i32 = arith.constant 0 : i32
    %c0_i32_0 = arith.constant 0 : i32
    return %c0_i32, %arg0 : i32, i32
  }
}

</mosaic_0001>

<bundles_post_ra>
// kernel: mipnerf_forward.2
= control target key start
LH: loop header
LB: loop body
LE: loop exit
PB: predicated region body
PF: predicated region fallthrough
CT: control target
= control target key end

     0   :  { %vm14230_vm0 = vcmask 1042432   ;;  %vm14231_vm1 = vcmask 1040384   ;;  %vm14288_vm2 = vcmask 1045504   ;;  %v14243_v41 = vmov 683565275   ;;  %s14224_s0 = inlined_call_operand.vmem [shape: f32[9,1024], index: 0, kind: input, shape index: {}]   ;;  %s14225_s1 = inlined_call_operand.vmem [shape: bf16[12,32,128], index: 1, kind: input, shape index: {}]   ;;  %s14226_s2 = inlined_call_operand.vmem [shape: f32[12,32,1], index: 2, kind: input, shape index: {}]   ;;  %s14227_s3 = inlined_call_operand.vmem [shape: f32[4,1024], index: 3, kind: output, shape index: {}]  }
   0x1   :  { %v16_v0 = vld [vmem:[%s14224_s0 + $0x8] sm:$0xff]  ;;  %v9955_v19 = vld [vmem:[%s14224_s0 + $0x18] sm:$0xff]  ;;  %v14233_v43 = vmov 2475754826   ;;  %v14245_v45 = vmov 2131351028  }
   0x2   :  { %v9934_v1 = vmul.f32 2.0, %v16_v0  ;;  %v40_v2 = vmul.f32 4.0, %v16_v0  ;;  %v48_v3 = vmul.f32 8.0, %v16_v0  ;;  %v9957_v20 = vmul.f32 16.0, %v16_v0 }
   0x3   :  { %v9959_v21 = vmul.f32 64.0, %v16_v0  ;;  %v179_v22 = vrot.slane %v16_v0, 3  ;;  %v9962_v27 = vmul.f32 2.0, %v9955_v19  ;;  %v9965_v28 = vmul.f32 4.0, %v9955_v19 }
   0x4   :  { %v64_v4 = vrot.slane %v9934_v1, 5  ;;  %v88_v5 = vrot.slane %v40_v2, 2  ;;  %v112_v6 = vrot.slane %v48_v3, 7  ;;  %v203_v30 = vrot.slane %v9957_v20, 5 }
   0x5   :  { %v227_v31 = vrot.slane %v9959_v21, 2  ;;  %v9970_v32 = vsel %vm14230_vm0, %v179_v22, %v40_v2  ;;  %v66_v38 = vrot.slane %v9962_v27, 5  ;;  %v90_v39 = vrot.slane %v9965_v28, 2 }
   0x6   :  { %v129_v7 = vsel %vm14230_vm0, %v16_v0, %v64_v4  ;;  %v9939_v8 = vsel %vm14231_vm1, %v88_v5, %v112_v6  ;;  %v14251_v47 = vmov 2102212464   ;;  %v14237_v49 = vmov 920167782  }
   0x7   :  { %v9942_v9 = vsel %vm14288_vm2, %v129_v7, %v88_v5  ;;  %v1250_v10 = vand.u32 2147483647, %v9939_v8  ;;  %v1253_v14 = vand.u32 2139095040, %v9939_v8  ;;  %v14235_v57 = vmov 1326507024  }
   0x8   :  { %v418_v11 = vand.u32 2147483647, %v9942_v9  ;;  %v421_v12 = vand.u32 2139095040, %v9942_v9  ;;  %vm420_vm15 = vcmp.lt.s32.totalorder %v9942_v9, 0 }
   0x9   :  { %v1257_v16 = vand.u32 8388607, %v1250_v10  ;;  %v1254_v18 = vshrl.u32 %v1253_v14, 23 }
   0xa   :  { %v422_v13 = vshrl.u32 %v421_v12, 23  ;;  %v425_v15 = vand.u32 8388607, %v418_v11 }
   0xb   :  { %v9221_v24 = vadd.s32 4294967169, %v1254_v18  ;;  %v1258_v26 = vor.u32 8388608, %v1257_v16 }
   0xc   :  { %v9189_v17 = vadd.s32 4294967169, %v422_v13  ;;  %v426_v25 = vor.u32 8388608, %v425_v15 }
   0xd   :  { %v1260_v29 = vadd.s32 1, %v9221_v24  ;;  %v9974_v37 = vshll.u32 %v1258_v26, 8 }
   0xe   :  { %v428_v23 = vadd.s32 1, %v9189_v17  ;;  %v9972_v36 = vshll.u32 %v426_v25, 8 }
   0xf   :  { %vm1261_vm4 = vcmp.gt.s32.totalorder %v1260_v29, 0 }
  0x10   :  { %vm429_vm3 = vcmp.gt.s32.totalorder %v428_v23, 0  ;;  %v1262_v51 = vsel %vm1261_vm4, %v1260_v29, 0  ;;  %vm10078_vm4 = vcmp.le.f32.partialorder %v418_v11, 0.7853982 }
  0x11   :  { %v430_v33 = vsel %vm429_vm3, %v428_v23, 0  ;;  %v1263_v0 = vshrl.u32 %v1262_v51, 5  ;;  %v1264_v2 = vand.u32 31, %v1262_v51 }
  0x12   :  { %v431_v34 = vshrl.u32 %v430_v33, 5  ;;  %v432_v35 = vand.u32 31, %v430_v33 }
  0x13   :  { %v1265_v14 = vsub.s32 32, %v1264_v2  ;;  %v1267_v18 = vshll.u32 %v14243_v41, %v1264_v2  ;;  %v1279_v51 = vshll.u32 %v14237_v49, %v1264_v2  ;;  %vm1282_vm9 = vcmp.lt.s32.totalorder %v1263_v0, 1 }
  0x14   :  { %v433_v40 = vsub.s32 32, %v432_v35  ;;  %v435_v42 = vshll.u32 %v14243_v41, %v432_v35  ;;  %v438_v44 = vshll.u32 %v14233_v43, %v432_v35  ;;  %v441_v46 = vshll.u32 %v14245_v45, %v432_v35 }
  0x15   :  { %v444_v48 = vshll.u32 %v14251_v47, %v432_v35  ;;  %v447_v50 = vshll.u32 %v14237_v49, %v432_v35  ;;  %vm450_vm5 = vcmp.lt.s32.totalorder %v431_v34, 1  ;;  %vm451_vm6 = vcmp.lt.s32.totalorder %v431_v34, 2 }
  0x16   :  { %v434_v52 = vshrl.u32 %v14243_v41, %v433_v40  ;;  %v436_v53 = vshrl.u32 %v14233_v43, %v433_v40  ;;  %v439_v54 = vshrl.u32 %v14245_v45, %v433_v40  ;;  %v442_v55 = vshrl.u32 %v14251_v47, %v433_v40 }
  0x17   :  { %v445_v56 = vshrl.u32 %v14237_v49, %v433_v40  ;;  %v448_v58 = vshrl.u32 %v14235_v57, %v433_v40  ;;  %vm452_vm7 = vcmp.lt.s32.totalorder %v431_v34, 3  ;;  %vm453_vm8 = vcmp.lt.s32.totalorder %v431_v34, 4 }
  0x18   :  { %v437_v59 = vor.u32 %v436_v53, %v435_v42  ;;  %v440_v60 = vor.u32 %v439_v54, %v438_v44  ;;  %v443_v61 = vor.u32 %v442_v55, %v441_v46  ;;  %v1266_v25 = vshrl.u32 %v14243_v41, %v1265_v14 }
  0x19   :  { %v446_v62 = vor.u32 %v445_v56, %v444_v48  ;;  %v449_v63 = vor.u32 %v448_v58, %v447_v50  ;;  %v1268_v40 = vshrl.u32 %v14233_v43, %v1265_v14  ;;  %v1270_v42 = vshll.u32 %v14233_v43, %v1264_v2 }
  0x1a   :  { %v454_v3 = vsel %vm450_vm5, %v434_v52, %v437_v59  ;;  %v455_v4 = vsel %vm453_vm8, %v443_v61, 2102212464  ;;  %v458_v5 = vsel %vm450_vm5, %v437_v59, %v440_v60  ;;  %v462_v6 = vsel %vm450_vm5, %v440_v60, %v443_v61 }
  0x1b   :  { %v456_v7 = vsel %vm452_vm7, %v440_v60, %v455_v4  ;;  %v459_v12 = vsel %vm453_vm8, %v446_v62, 920167782  ;;  %v463_v13 = vsel %vm453_vm8, %v449_v63, 1326507024  ;;  %v1271_v34 = vshrl.u32 %v14245_v45, %v1265_v14 }
  0x1c   :  { %v457_v15 = vsel %vm451_vm6, %v454_v3, %v456_v7  ;;  %v460_v16 = vsel %vm452_vm7, %v443_v61, %v459_v12  ;;  %v464_v17 = vsel %vm452_vm7, %v446_v62, %v463_v13  ;;  %v1273_v44 = vshll.u32 %v14245_v45, %v1264_v2 }
  0x1d   :  { %v461_v22 = vsel %vm451_vm6, %v458_v5, %v460_v16  ;;  %v465_v23 = vsel %vm451_vm6, %v462_v6, %v464_v17  ;;  %v473_v24 = vmul.u32 %v9972_v36, %v457_v15  ;;  %v1274_v46 = vshrl.u32 %v14251_v47, %v1265_v14 }
  0x1e   :  { %v10003_v26 = vmul.u32.u64.low %v9972_v36, %v465_v23  ;;  %v10004_v29 = vmul.u32.u64.high %v9972_v36, %v465_v23, %v10003_v26  ;;  %v10007_v33 = vmul.u32.u64.low %v9972_v36, %v461_v22  ;;  %v10008_v35 = vmul.u32.u64.high %v9972_v36, %v461_v22, %v10007_v33 }
  0x1f   :  { %v1276_v48 = vshll.u32 %v14251_v47, %v1264_v2  ;;  %v1277_v50 = vshrl.u32 %v14237_v49, %v1265_v14  ;;  %v1269_v52 = vor.u32 %v1268_v40, %v1267_v18  ;;  %v1272_v36 = vor.u32 %v1271_v34, %v1270_v42 }
  0x20   :  { %v1280_v53 = vshrl.u32 %v14235_v57, %v1265_v14  ;;  %vm475_vm10 = vc.u32 %v10004_v29, %v10007_v33  ;;  %v476_v54 = vadd.s32 1, %v10008_v35  ;;  %v1275_v55 = vor.u32 %v1274_v46, %v1273_v44 }
  0x21   :  { %v131_v56 = vsel %vm14230_vm0, %v9955_v19, %v66_v38  ;;  %v1278_v58 = vor.u32 %v1277_v50, %v1276_v48  ;;  %vm1283_vm11 = vcmp.lt.s32.totalorder %v1263_v0, 2  ;;  %vm1284_vm12 = vcmp.lt.s32.totalorder %v1263_v0, 3 }
  0x22   :  { %v1281_v59 = vor.u32 %v1280_v53, %v1279_v51  ;;  %v477_v60 = vsel %vm475_vm10, %v476_v54, %v10008_v35  ;;  %vm1285_vm13 = vcmp.lt.s32.totalorder %v1263_v0, 4  ;;  %v1286_v61 = vsel %vm1282_vm9, %v1266_v25, %v1269_v52 }
  0x23   :  { %v1290_v62 = vsel %vm1282_vm9, %v1269_v52, %v1272_v36  ;;  %v478_v63 = vadd.s32 %v477_v60, %v473_v24  ;;  %v1287_v2 = vsel %vm1285_vm13, %v1275_v55, 2102212464  ;;  %v1291_v3 = vsel %vm1285_vm13, %v1278_v58, 920167782 }
  0x24   :  { %v1294_v4 = vsel %vm1282_vm9, %v1272_v36, %v1275_v55  ;;  %v251_v38 = vsel %vm14288_vm2, %v9970_v32, %v203_v30  ;;  %v1288_v5 = vsel %vm1284_vm12, %v1272_v36, %v1287_v2  ;;  %v1292_v6 = vsel %vm1284_vm12, %v1275_v55, %v1291_v3 }
  0x25   :  { %v1295_v7 = vsel %vm1285_vm13, %v1281_v59, 1326507024  ;;  %v479_v12 = vadd.s32 536870912, %v478_v63  ;;  %v1293_v13 = vsel %vm1283_vm11, %v1290_v62, %v1292_v6  ;;  %v10039_v15 = vsel %vm14288_vm2, %v131_v56, %v90_v39 }
  0x26   :  { %v1296_v14 = vsel %vm1284_vm12, %v1278_v58, %v1295_v7  ;;  %v1289_v16 = vsel %vm1283_vm11, %v1286_v61, %v1288_v5  ;;  %v10044_v18 = vmul.u32.u64.low %v9974_v37, %v1293_v13  ;;  %v10045_v22 = vmul.u32.u64.high %v9974_v37, %v1293_v13, %v10044_v18 }
  0x27   :  { %v1297_v17 = vsel %vm1283_vm11, %v1294_v4, %v1296_v14  ;;  %v480_v32 = vshrl.u32 %v479_v12, 30  ;;  %v629_v25 = vand.u32 2139095040, %v10039_v15  ;;  %v259_v26 = vsel %vm14231_vm1, %v203_v30, %v227_v31 }
  0x28   :  { %v10048_v23 = vmul.u32.u64.low %v9974_v37, %v1297_v17  ;;  %v10049_v24 = vmul.u32.u64.high %v9974_v37, %v1297_v17, %v10048_v23  ;;  %v267_v35 = vmul.f32 -0.5, %v251_v38  ;;  %v1305_v40 = vmul.u32 %v9974_v37, %v1289_v16 }
  0x29   :  { %v481_v0 = vshll.u32 %v480_v32, 30  ;;  %v1308_v42 = vadd.s32 1, %v10045_v22  ;;  %v50_v34 = vmul.f32 8.0, %v9955_v19  ;;  %v630_v44 = vshrl.u32 %v629_v25, 23 }
  0x2a   :  { %v504_v48 = vsub.s32 4, %v480_v32  ;;  %vm1307_vm14 = vc.u32 %v10049_v24, %v10044_v18  ;;  %v275_v50 = vmul.f32 -0.5, %v259_v26  ;;  %v284_v51 = vmul.f32 1.442695, %v267_v35 }
  0x2b   :  { %v10060_v46 = vsub.s32 %v478_v63, %v481_v0  ;;  %v1309_v21 = vsel %vm1307_vm14, %v1308_v42, %v10045_v22  ;;  %v9197_v20 = vadd.s32 4294967169, %v630_v44  ;;  %v114_v37 = vrot.slane %v50_v34, 7 }
  0x2c   :  { %v1310_v31 = vadd.s32 %v1309_v21, %v1305_v40  ;;  %v626_v52 = vand.u32 2147483647, %v10039_v15  ;;  %v505_v54 = vsel %vm420_vm15, %v504_v48, %v480_v32  ;;  %v10071_v56 = vmul.f32 16.0, %v9955_v19 }
  0x2d   :  { %v484_v30 = vsub.s32 0, %v10060_v46  ;;  %v636_v36 = vadd.s32 1, %v9197_v20  ;;  %v10073_v58 = vmul.f32 1.442695, %v275_v50  ;;  %v181_v59 = vrot.slane %v9955_v19, 3 }
  0x2e   :  { %v1311_v55 = vadd.s32 536870912, %v1310_v31  ;;  %9734 = vpow2.f32 %v284_v51  ;;  %v10083_v62 = vmul.f32 64.0, %v9955_v19  ;;  %v507_v63 = vsel %vm10078_vm4, 0, %v505_v54 }
  0x2f   :  { %v9190_v53 = vmin.u32 %v484_v30, %v10060_v46  ;;  %vm637_vm3 = vcmp.gt.s32.totalorder %v636_v36, 0  ;;  %v633_v3 = vand.u32 8388607, %v626_v52  ;;  %vm1252_vm5 = vcmp.lt.s32.totalorder %v9939_v8, 0 }
  0x30   :  { %v1312_v2 = vshrl.u32 %v1311_v55, 30  ;;  %v638_v4 = vsel %vm637_vm3, %v636_v36, 0  ;;  %v10093_v11 = vsel %vm14231_vm1, %v90_v39, %v114_v37  ;;  %v205_v5 = vrot.slane %v10071_v56, 5 }
  0x31   :  { %v486_v61 = vclz %v9190_v53  ;;  %v640_v19 = vand.u32 31, %v638_v4  ;;  %v474_v6 = vadd.s32 %v10007_v33, %v10004_v29  ;;  %v10100_v12 = vsel %vm14230_vm0, %v181_v59, %v9965_v28 }
  0x32   :  { %v1313_v7 = vshll.u32 %v1312_v2, 30  ;;  %v1458_v13 = vand.u32 2147483647, %v10093_v11  ;;  %v10103_v14 = vadd.s32 3, %v507_v63  ;;  %v1306_v16 = vadd.s32 %v10044_v18, %v10049_v24 }
  0x33   :  { %v9191_v38 = vadd.s32 4294967294, %v486_v61  ;;  %v641_v39 = vsub.s32 32, %v640_v19  ;;  %v10108_v32 = vand.u32 3, %v507_v63  ;;  %v634_v23 = vor.u32 8388608, %v633_v3 }
  0x34   :  { %v10106_v22 = vsub.s32 %v1310_v31, %v1313_v7  ;;  %v1461_v28 = vand.u32 2139095040, %v10093_v11  ;;  %v1336_v35 = vsub.s32 4, %v1312_v2  ;;  %v643_v0 = vshll.u32 %v14243_v41, %v640_v19 }
  0x35   :  { %vm9192_vm6 = vcmp.lt.s32.totalorder %v9191_v38, 0  ;;  %v646_v18 = vshll.u32 %v14233_v43, %v640_v19  ;;  %v644_v42 = vshrl.u32 %v14233_v43, %v641_v39  ;;  %v647_v34 = vshrl.u32 %v14245_v45, %v641_v39 }
  0x36   :  { %v489_v17 = vsel %vm9192_vm6, 0, %v9191_v38  ;;  %v1316_v26 = vsub.s32 0, %v10106_v22  ;;  %v639_v48 = vshrl.u32 %v638_v4, 5  ;;  %v10122_v50 = vand.u32 8388607, %v1458_v13 }
  0x37   :  { %v490_v29 = vsub.s32 32, %v489_v17  ;;  %v491_v33 = vshll.u32 %v10060_v46, %v489_v17  ;;  %v494_v25 = vsub.s32 4294967266, %v489_v17  ;;  %v10118_v46 = vshll.u32 %v634_v23, 8 }
  0x38   :  { %v9222_v44 = vmin.u32 %v1316_v26, %v10106_v22  ;;  %v10124_v21 = vpop.eup %9734  ;;  %v649_v30 = vshll.u32 %v14245_v45, %v640_v19  ;;  %v1462_v31 = vshrl.u32 %v1461_v28, 23  ;;  %v1337_v36 = vsel %vm1252_vm5, %v1336_v35, %v1312_v2 }
  0x39   :  { %v492_v24 = vshrl.u32 %v474_v6, %v490_v29  ;;  %v495_v40 = vadd.s32 127, %v494_v25  ;;  %v642_v53 = vshrl.u32 %v14243_v41, %v641_v39  ;;  %v645_v54 = vor.u32 %v644_v42, %v643_v0 }
  0x3a   :  { %v1318_v37 = vclz %v9222_v44  ;;  %v648_v61 = vor.u32 %v647_v34, %v646_v18  ;;  %v650_v63 = vshrl.u32 %v14251_v47, %v641_v39  ;;  %v652_v4 = vshll.u32 %v14251_v47, %v640_v19 }
  0x3b   :  { %v493_v20 = vor.u32 %v492_v24, %v491_v33  ;;  %v496_v51 = vshll.u32 %v495_v40, 23  ;;  %v653_v38 = vshrl.u32 %v14237_v49, %v641_v39  ;;  %v655_v6 = vshll.u32 %v14237_v49, %v640_v19 }
  0x3c   :  { %v9223_v3 = vadd.s32 4294967294, %v1318_v37  ;;  %v651_v17 = vor.u32 %v650_v63, %v649_v30  ;;  %v656_v23 = vshrl.u32 %v14235_v57, %v641_v39  ;;  %vm658_vm7 = vcmp.lt.s32.totalorder %v639_v48, 1 }
  0x3d   :  { %v497_v55 = vor.u32 4788187, %v496_v51  ;;  %v500_v59 = vcvt.s32.f32 %v493_v20  ;;  %vm10137_vm8 = vcmp.le.f32.partialorder %v1250_v10, 0.7853982  ;;  %v654_v29 = vor.u32 %v653_v38, %v652_v4 }
  0x3e   :  { %vm9224_vm9 = vcmp.lt.s32.totalorder %v9223_v3, 0  ;;  %vm659_vm10 = vcmp.lt.s32.totalorder %v639_v48, 2  ;;  %vm660_vm11 = vcmp.lt.s32.totalorder %v639_v48, 3  ;;  %v657_v28 = vor.u32 %v656_v23, %v655_v6 }
  0x3f   :  { %v498_v7 = vand.u32 2147483647, %v497_v55  ;;  %v1321_v25 = vsel %vm9224_vm9, 0, %v9223_v3  ;;  %vm661_vm12 = vcmp.lt.s32.totalorder %v639_v48, 4  ;;  %v662_v39 = vsel %vm658_vm7, %v642_v53, %v645_v54 }
  0x40   :  { %v1322_v19 = vsub.s32 32, %v1321_v25  ;;  %v1323_v26 = vshll.u32 %v10106_v22, %v1321_v25  ;;  %v1326_v35 = vsub.s32 4294967266, %v1321_v25  ;;  %v663_v10 = vsel %vm661_vm12, %v651_v17, 2102212464 }
  0x41   :  { %v501_v33 = vmul.f32 %v500_v59, %v498_v7  ;;  %v666_v18 = vsel %vm658_vm7, %v645_v54, %v648_v61  ;;  %v667_v24 = vsel %vm661_vm12, %v654_v29, 920167782  ;;  %v664_v34 = vsel %vm660_vm11, %v648_v61, %v663_v10 }
  0x42   :  { %v1324_v40 = vshrl.u32 %v1306_v16, %v1322_v19  ;;  %v1327_v42 = vadd.s32 127, %v1326_v35  ;;  %v668_v44 = vsel %vm660_vm11, %v651_v17, %v667_v24  ;;  %v665_v22 = vsel %vm659_vm10, %v662_v39, %v664_v34 }
  0x43   :  { %v502_v0 = vxor.u32 2147483648, %v501_v33  ;;  %v669_v51 = vsel %vm659_vm10, %v666_v18, %v668_v44  ;;  %v670_v30 = vsel %vm658_vm7, %v648_v61, %v651_v17  ;;  %v671_v54 = vsel %vm661_vm12, %v657_v28, 1326507024 }
  0x44   :  { %v1325_v53 = vor.u32 %v1324_v40, %v1323_v26  ;;  %v1328_v16 = vshll.u32 %v1327_v42, 23  ;;  %v672_v55 = vsel %vm660_vm11, %v654_v29, %v671_v54  ;;  %v1339_v60 = vsel %vm10137_vm8, 0, %v1337_v36 }
  0x45   :  { %v503_v20 = vsel %vm420_vm15, %v502_v0, %v501_v33  ;;  %v10159_v59 = vmul.u32.u64.low %v10118_v46, %v669_v51  ;;  %v10160_v63 = vmul.u32.u64.high %v10118_v46, %v669_v51, %v10159_v59  ;;  %v673_v61 = vsel %vm659_vm10, %v670_v30, %v672_v55 }
  0x46   :  { %v506_v37 = vsel %vm10078_vm4, %v9942_v9, %v503_v20  ;;  %v1329_v3 = vor.u32 4788187, %v1328_v16  ;;  %v1332_v4 = vcvt.s32.f32 %v1325_v53  ;;  %v9229_v7 = vadd.s32 4294967169, %v1462_v31 }
  0x47   :  { %9736 = vcosq.f32 %v506_v37  ;;  %v10167_v38 = vmul.u32.u64.low %v10118_v46, %v673_v61  ;;  %v10168_v6 = vmul.u32.u64.high %v10118_v46, %v673_v61, %v10167_v38  ;;  %v229_v23 = vrot.slane %v10083_v62, 2 }
  0x48   :  { %9738 = vsinq.f32 %v506_v37  ;;  %v1330_v17 = vand.u32 2147483647, %v1329_v3  ;;  %v512_v29 = vand.u32 3, %v10103_v14  ;;  %v681_v33 = vmul.u32 %v10118_v46, %v665_v22  ;;  %v10190_v46 = vld [vmem:[%s14224_s0] sm:$0xff] }
  0x49   :  { %9740 = vpow2.f32 %v10073_v58  ;;  %v684_v48 = vadd.s32 1, %v10160_v63  ;;  %v1468_v25 = vadd.s32 1, %v9229_v7  ;;  %vm510_vm13 = vweird.f32 %v9942_v9 }
  0x4a   :  { %v1333_v36 = vmul.f32 %v1332_v4, %v1330_v17  ;;  %v1343_v28 = vadd.s32 3, %v1339_v60  ;;  %vm2191_vm14 = vcmp.lt.s32.totalorder %v10108_v32, 2  ;;  %v10181_v58 = vsel %vm14288_vm2, %v10100_v12, %v205_v5 }
  0x4b   :  { %vm2192_vm15 = vcmp.eq.s32.totalorder %v10108_v32, 0  ;;  %vm683_vm3 = vc.u32 %v10168_v6, %v10159_v59  ;;  %v1466_v14 = vor.u32 8388608, %v10122_v50  ;;  %vm1469_vm4 = vcmp.gt.s32.totalorder %v1468_v25, 0 }
  0x4c   :  { %v1334_v31 = vxor.u32 2147483648, %v1333_v36  ;;  %vm2195_vm6 = vcmp.eq.s32.totalorder %v10108_v32, 2  ;;  %v685_v19 = vsel %vm683_vm3, %v684_v48, %v10160_v63  ;;  %v1470_v12 = vsel %vm1469_vm4, %v1468_v25, 0 }
  0x4d   :  { %vm513_vm7 = vcmp.lt.s32.totalorder %v512_v29, 2  ;;  %vm514_vm9 = vcmp.eq.s32.totalorder %v512_v29, 0  ;;  %v686_v26 = vadd.s32 %v685_v19, %v681_v33  ;;  %v1472_v35 = vand.u32 31, %v1470_v12 }
  0x4e   :  { %v1335_v39 = vsel %vm1252_vm5, %v1334_v31, %v1333_v36  ;;  %v10196_v50 = vand.u32 3, %v1343_v28  ;;  %v10198_v0 = vand.u32 3, %v1339_v60  ;;  %v10201_v10 = vmul.f32 2.0, %v10190_v46 }
  0x4f   :  { %vm517_vm10 = vcmp.eq.s32.totalorder %v512_v29, 2  ;;  %v1338_v24 = vsel %vm10137_vm8, %v9939_v8, %v1335_v39  ;;  %v687_v40 = vadd.s32 536870912, %v686_v26  ;;  %v10206_v42 = vshll.u32 %v1466_v14, 8 }
  0x50   :  { %9742 = vcosq.f32 %v1338_v24  ;;  %v1473_v20 = vsub.s32 32, %v1472_v35  ;;  %v10209_v22 = vmul.f32 4.0, %v10190_v46  ;;  %v10214_v37 = vmul.f32 8.0, %v10190_v46 }
  0x51   :  { %v9737_v18 = vpop.eup %9736  ;;  %9744 = vsinq.f32 %v1338_v24  ;;  %v10211_v30 = vshrl.u32 %v687_v40, 30  ;;  %vm1349_vm5 = vcmp.eq.s32.totalorder %v10196_v50, 2  ;;  %vm3019_vm8 = vcmp.eq.s32.totalorder %v10198_v0, 2 }
  0x52   :  { %v9739_v34 = vpop.eup %9738  ;;  %v518_v44 = vxor.u32 2147483648, %v9737_v18  ;;  %v10222_v54 = vshrl.u32 %v1470_v12, 5  ;;  %v63_v55 = vrot.slane %v10201_v10, 5  ;;  %vm1346_vm11 = vcmp.eq.s32.totalorder %v10196_v50, 0 }
  0x53   :  { %v515_v51 = vxor.u32 2147483648, %v9739_v34  ;;  %v10216_v53 = vpop.eup %9740  ;;  %vm3016_vm12 = vcmp.eq.s32.totalorder %v10198_v0, 0  ;;  %v689_v4 = vshll.u32 %v10211_v30, 30  ;;  %v1475_v61 = vshll.u32 %v14243_v41, %v1472_v35 }
  0x54   :  { %v519_v2 = vsel %vm517_vm10, %v518_v44, %v9739_v34  ;;  %v2197_v16 = vsel %vm2195_vm6, %v518_v44, %v9739_v34  ;;  %vm1345_vm3 = vcmp.lt.s32.totalorder %v10196_v50, 2  ;;  %vm3015_vm4 = vcmp.lt.s32.totalorder %v10198_v0, 2 }
  0x55   :  { %v516_v63 = vsel %vm514_vm9, %v9737_v18, %v515_v51  ;;  %v2194_v3 = vsel %vm2192_vm15, %v9737_v18, %v515_v51  ;;  %v1476_v7 = vshrl.u32 %v14233_v43, %v1473_v20  ;;  %v1478_v17 = vshll.u32 %v14233_v43, %v1472_v35 }
  0x56   :  { %v520_v60 = vsel %vm513_vm7, %v516_v63, %v519_v2  ;;  %v2198_v38 = vsel %vm2191_vm14, %v2194_v3, %v2197_v16  ;;  %vm1342_vm15 = vweird.f32 %v9939_v8  ;;  %v10244_v48 = vsub.s32 %v686_v26, %v689_v4 }
  0x57   :  { %v521_v33 = vsel %vm510_vm13, nan, %v520_v60  ;;  %v2199_v29 = vsel %vm510_vm13, nan, %v2198_v38  ;;  %v1479_v25 = vshrl.u32 %v14245_v45, %v1473_v20  ;;  %v1481_v28 = vshll.u32 %v14245_v45, %v1472_v35 }
  0x58   :  { %v1979_v32 = vmul.f32 %v10124_v21, %v521_v33  ;;  %v10249_v36 = vmul.f32 %v10124_v21, %v2199_v29  ;;  %v1482_v14 = vshrl.u32 %v14251_v47, %v1473_v20  ;;  %v692_v31 = vsub.s32 0, %v10244_v48 }
  0x59   :  { %v1484_v19 = vshll.u32 %v14251_v47, %v1472_v35  ;;  %v1485_v9 = vshrl.u32 %v14237_v49, %v1473_v20  ;;  %v87_v12 = vrot.slane %v10209_v22, 2  ;;  %vm3674_vm13 = vcmask 1043456  }
  0x5a   :  { %v682_v26 = vadd.s32 %v10159_v59, %v10168_v6  ;;  %v1487_v39 = vshll.u32 %v14237_v49, %v1472_v35  ;;  %v1488_v21 = vshrl.u32 %v14235_v57, %v1473_v20  ;;  %v10263_v18 = vsel %vm14230_vm0, %v10190_v46, %v63_v55  ;;  %v9743_v51 = vpop.eup %9742 }
  0x5b   :  { %v9198_v24 = vmin.u32 %v692_v31, %v10244_v48  ;;  %v1474_v40 = vshrl.u32 %v14243_v41, %v1473_v20  ;;  %v1477_v34 = vor.u32 %v1476_v7, %v1475_v61  ;;  %v1480_v44 = vor.u32 %v1479_v25, %v1478_v17  ;;  %v9745_v59 = vpop.eup %9744 }
  0x5c   :  { %v14228_v2 = vrot.slane %v10249_v36, 4  ;;  %v1483_v16 = vor.u32 %v1482_v14, %v1481_v28  ;;  %v1486_v63 = vor.u32 %v1485_v9, %v1484_v19  ;;  %vm1490_vm14 = vcmp.lt.s32.totalorder %v10222_v54, 1 }
  0x5d   :  { %v1350_v6 = vxor.u32 2147483648, %v9743_v51  ;;  %v694_v35 = vclz %v9198_v24  ;;  %v1489_v3 = vor.u32 %v1488_v21, %v1487_v39  ;;  %vm1493_vm6 = vcmp.lt.s32.totalorder %v10222_v54, 4 }
  0x5e   :  { %v1347_v55 = vxor.u32 2147483648, %v9745_v59  ;;  %vm1491_vm7 = vcmp.lt.s32.totalorder %v10222_v54, 2  ;;  %vm1492_vm9 = vcmp.lt.s32.totalorder %v10222_v54, 3  ;;  %v1495_v20 = vsel %vm1493_vm6, %v1483_v16, 2102212464 }
  0x5f   :  { %v1351_v4 = vsel %vm1349_vm5, %v1350_v6, %v9745_v59  ;;  %v3021_v61 = vsel %vm3019_vm8, %v1350_v6, %v9745_v59  ;;  %v9199_v60 = vadd.s32 4294967294, %v694_v35  ;;  %v1494_v38 = vsel %vm1490_vm14, %v1474_v40, %v1477_v34 }
  0x60   :  { %v1348_v7 = vsel %vm1346_vm11, %v9743_v51, %v1347_v55  ;;  %v3018_v17 = vsel %vm3016_vm12, %v9743_v51, %v1347_v55  ;;  %v1496_v33 = vsel %vm1492_vm9, %v1480_v44, %v1495_v20  ;;  %v1498_v29 = vsel %vm1490_vm14, %v1477_v34, %v1480_v44 }
  0x61   :  { %v1352_v25 = vsel %vm1345_vm3, %v1348_v7, %v1351_v4  ;;  %v3022_v28 = vsel %vm3015_vm4, %v3018_v17, %v3021_v61  ;;  %vm9200_vm10 = vcmp.lt.s32.totalorder %v9199_v60, 0  ;;  %v1499_v14 = vsel %vm1493_vm6, %v1486_v63, 920167782 }
  0x62   :  { %v1353_v31 = vsel %vm1342_vm15, nan, %v1352_v25  ;;  %v10298_v19 = vsel %vm1342_vm15, nan, %v3022_v28  ;;  %v697_v9 = vsel %vm9200_vm10, 0, %v9199_v60  ;;  %v1500_v39 = vsel %vm1492_vm9, %v1483_v16, %v1499_v14 }
  0x63   :  { %v1987_v50 = vmul.f32 %v10216_v53, %v1353_v31  ;;  %v698_v21 = vsub.s32 32, %v697_v9  ;;  %v699_v0 = vshll.u32 %v10244_v48, %v697_v9  ;;  %v702_v24 = vsub.s32 4294967266, %v697_v9 }
  0x64   :  { %v1497_v40 = vsel %vm1491_vm7, %v1494_v38, %v1496_v33  ;;  %v1501_v34 = vsel %vm1491_vm7, %v1498_v29, %v1500_v39  ;;  %v1502_v8 = vsel %vm1490_vm14, %v1480_v44, %v1483_v16  ;;  %v1503_v51 = vsel %vm1493_vm6, %v1489_v3, 1326507024 }
  0x65   :  { %v3716_v59 = vsel %vm3674_vm13, %v1987_v50, %v14228_v2  ;;  %v700_v6 = vshrl.u32 %v682_v26, %v698_v21  ;;  %v703_v35 = vadd.s32 127, %v702_v24  ;;  %v1504_v48 = vsel %vm1492_vm9, %v1486_v63, %v1503_v51 }
  0x66   :  { %v10317_v55 = vpack.c.bf16 %v3716_v59, %v1979_v32  ;;  %v1505_v20 = vsel %vm1491_vm7, %v1502_v8, %v1504_v48  ;;  %v10322_v4 = vmul.u32.u64.low %v10206_v42, %v1501_v34  ;;  %v10323_v44 = vmul.u32.u64.high %v10206_v42, %v1501_v34, %v10322_v4 }
  0x67   :  { %v701_v16 = vor.u32 %v700_v6, %v699_v0  ;;  %v704_v3 = vshll.u32 %v703_v35, 23  ;;  %v10327_v61 = vmul.u32.u64.low %v10206_v42, %v1505_v20  ;;  %v10328_v60 = vmul.u32.u64.high %v10206_v42, %v1505_v20, %v10327_v61 }
  0x68   :  { %14293 = vst [vmem:[#allocation2_spill] sm:$0xff] %v10317_v55  ;;  %5602 = vmatprep.subr.bf16.mxu0 %v10317_v55  ;;  %v1513_v32 = vmul.u32 %v10206_v42, %v1497_v40  ;;  %v111_v54 = vrot.slane %v10214_v37, 7  ;;  %v269_v38 = vmul.f32 -0.5, %v10181_v58  ;;  %v1516_v7 = vadd.s32 1, %v10323_v44 }
  0x69   :  { %v705_v26 = vor.u32 4788187, %v704_v3  ;;  %v708_v63 = vcvt.s32.f32 %v701_v16  ;;  %v10339_v17 = vsel %vm14288_vm2, %v10263_v18, %v87_v12  ;;  %v261_v33 = vsel %vm14231_vm1, %v205_v5, %v229_v23 }
  0x6a   :  { %vm1515_vm5 = vc.u32 %v10328_v60, %v10322_v4  ;;  %v712_v58 = vsub.s32 4, %v10211_v30  ;;  %v10353_v18 = vsel %vm14231_vm1, %v87_v12, %v111_v54  ;;  %v317_v62 = vand.u32 2139095040, %v10339_v17 }
  0x6b   :  { %v706_v29 = vand.u32 2147483647, %v705_v26  ;;  %v1517_v42 = vsel %vm1515_vm5, %v1516_v7, %v10323_v44  ;;  %v277_v56 = vmul.f32 -0.5, %v261_v33  ;;  %v288_v28 = vmul.f32 1.442695, %v269_v38 }
  0x6c   :  { %v1518_v25 = vadd.s32 %v1517_v42, %v1513_v32  ;;  %vm628_vm8 = vcmp.lt.s32.totalorder %v10039_v15, 0  ;;  %v318_v14 = vshrl.u32 %v317_v62, 23  ;;  %vm627_vm11 = vcmp.le.f32.partialorder %v626_v52, 0.7853982 }
  0x6d   :  { %v709_v37 = vmul.f32 %v708_v63, %v706_v29  ;;  %v713_v31 = vsel %vm628_vm8, %v712_v58, %v10211_v30  ;;  %v314_v9 = vand.u32 2147483647, %v10339_v17  ;;  %v1149_v39 = vand.u32 2139095040, %v10353_v18 }
  0x6e   :  { %v1519_v23 = vadd.s32 536870912, %v1518_v25  ;;  %v9185_v21 = vadd.s32 4294967169, %v318_v14  ;;  %v14229_v0 = vand.u32 2147483647, %v10353_v18  ;;  %9746 = vpow2.f32 %v288_v28 }
  0x6f   :  { %v710_v5 = vxor.u32 2147483648, %v709_v37  ;;  %v304_v24 = vmul.f32 1.442695, %v277_v56  ;;  %v715_v40 = vsel %vm627_vm11, 0, %v713_v31  ;;  %v10364_v8 = vmul.f32 16.0, %v10190_v46 }
  0x70   :  { %v1520_v50 = vshrl.u32 %v1519_v23, 30  ;;  %v324_v51 = vadd.s32 1, %v9185_v21  ;;  %v178_v30 = vrot.slane %v10190_v46, 3  ;;  %v321_v59 = vand.u32 8388607, %v314_v9 }
  0x71   :  { %v711_v12 = vsel %vm628_vm8, %v710_v5, %v709_v37  ;;  %v1150_v6 = vshrl.u32 %v1149_v39, 23  ;;  %v1153_v20 = vand.u32 8388607, %v14229_v0  ;;  %9748 = vpow2.f32 %v304_v24 }
  0x72   :  { %v1521_v34 = vshll.u32 %v1520_v50, 30  ;;  %v714_v52 = vsel %vm627_vm11, %v10039_v15, %v711_v12  ;;  %v1544_v48 = vsub.s32 4, %v1520_v50  ;;  %vm325_vm12 = vcmp.gt.s32.totalorder %v324_v51, 0 }
  0x73   :  { %v719_v44 = vadd.s32 3, %v715_v40  ;;  %vm1460_vm3 = vcmp.lt.s32.totalorder %v10093_v11, 0  ;;  %v326_v16 = vsel %vm325_vm12, %v324_v51, 0  ;;  %9750 = vcosq.f32 %v714_v52 }
  0x74   :  { %v10370_v35 = vsub.s32 %v1518_v25, %v1521_v34  ;;  %v10377_v61 = vmul.f32 64.0, %v10190_v46  ;;  %v202_v26 = vrot.slane %v10364_v8, 5  ;;  %v242_v63 = vsel %vm14230_vm0, %v178_v30, %v10209_v22  ;;  %v10390_v46 = vld [vmem:[%s14224_s0 + $0x10] sm:$0xff] }
  0x75   :  { %v322_v32 = vor.u32 8388608, %v321_v59  ;;  %v328_v54 = vand.u32 31, %v326_v16  ;;  %v9217_v38 = vadd.s32 4294967169, %v1150_v6  ;;  %v1545_v33 = vsel %vm1460_vm3, %v1544_v48, %v1520_v50 }
  0x76   :  { %v1524_v3 = vsub.s32 0, %v10370_v35  ;;  %v10385_v29 = vand.u32 3, %v715_v40  ;;  %v1154_v58 = vor.u32 8388608, %v1153_v20  ;;  %9752 = vsinq.f32 %v714_v52 }
  0x77   :  { %v10392_v42 = vand.u32 3, %v719_v44  ;;  %vm10396_vm4 = vcmp.le.f32.partialorder %v1458_v13, 0.7853982  ;;  %v329_v37 = vsub.s32 32, %v328_v54  ;;  %v1514_v25 = vadd.s32 %v10322_v4, %v10328_v60 }
  0x78   :  { %v9230_v7 = vmin.u32 %v1524_v3, %v10370_v35  ;;  %v226_v56 = vrot.slane %v10377_v61, 2  ;;  %v10406_v28 = vsel %vm14288_vm2, %v242_v63, %v202_v26  ;;  %v10408_v5 = vpop.eup %9746  ;;  %v1547_v13 = vsel %vm10396_vm4, 0, %v1545_v33 }
  0x79   :  { %v10412_v23 = vshll.u32 %v322_v32, 8  ;;  %v10414_v14 = vadd.s32 1, %v9217_v38  ;;  %v10417_v31 = vmul.f32 2.0, %v10390_v46  ;;  %vm2401_vm15 = vcmp.eq.s32.totalorder %v10385_v29, 2 }
  0x7a   :  { %v1526_v62 = vclz %v9230_v7  ;;  %v331_v60 = vshll.u32 %v14243_v41, %v328_v54  ;;  %v334_v39 = vshll.u32 %v14233_v43, %v328_v54  ;;  %v10422_v12 = vshll.u32 %v1154_v58, 8 }
  0x7b   :  { %v332_v50 = vshrl.u32 %v14233_v43, %v329_v37  ;;  %v335_v21 = vshrl.u32 %v14245_v45, %v329_v37  ;;  %v340_v24 = vshll.u32 %v14251_v47, %v328_v54  ;;  %v341_v40 = vshrl.u32 %v14237_v49, %v329_v37  ;;  %v10429_v30 = vpop.eup %9748 }
  0x7c   :  { %v9231_v4 = vadd.s32 4294967294, %v1526_v62  ;;  %v1551_v34 = vadd.s32 3, %v1547_v13  ;;  %v327_v51 = vshrl.u32 %v326_v16, 5  ;;  %v337_v52 = vshll.u32 %v14245_v45, %v328_v54 }
  0x7d   :  { %vm2398_vm6 = vcmp.eq.s32.totalorder %v10385_v29, 0  ;;  %v338_v6 = vshrl.u32 %v14251_v47, %v329_v37  ;;  %v343_v48 = vshll.u32 %v14237_v49, %v328_v54  ;;  %v344_v20 = vshrl.u32 %v14235_v57, %v329_v37  ;;  %v9751_v44 = vpop.eup %9750 }
  0x7e   :  { %vm9232_vm14 = vcmp.lt.s32.totalorder %v9231_v4, 0  ;;  %v10436_v38 = vand.u32 3, %v1547_v13  ;;  %vm722_vm7 = vcmp.eq.s32.totalorder %v10392_v42, 0  ;;  %vm725_vm9 = vcmp.eq.s32.totalorder %v10392_v42, 2 }
  0x7f   :  { %v1529_v59 = vsel %vm9232_vm14, 0, %v9231_v4  ;;  %v330_v16 = vshrl.u32 %v14243_v41, %v329_v37  ;;  %v333_v7 = vor.u32 %v332_v50, %v331_v60  ;;  %v336_v33 = vor.u32 %v335_v21, %v334_v39 }
  0x80   :  { %v1530_v3 = vsub.s32 32, %v1529_v59  ;;  %v1531_v63 = vshll.u32 %v10370_v35, %v1529_v59  ;;  %v1534_v32 = vsub.s32 4294967266, %v1529_v59  ;;  %v342_v58 = vor.u32 %v341_v40, %v340_v24  ;;  %v9753_v35 = vpop.eup %9752 }
  0x81   :  { %vm2397_vm10 = vcmp.lt.s32.totalorder %v10385_v29, 2  ;;  %vm346_vm5 = vcmp.lt.s32.totalorder %v327_v51, 1  ;;  %vm1157_vm8 = vcmp.gt.s32.totalorder %v10414_v14, 0  ;;  %v726_v4 = vxor.u32 2147483648, %v9751_v44 }
  0x82   :  { %v1532_v62 = vshrl.u32 %v1514_v25, %v1530_v3  ;;  %v1535_v54 = vadd.s32 127, %v1534_v32  ;;  %v339_v13 = vor.u32 %v338_v6, %v337_v52  ;;  %v345_v59 = vor.u32 %v344_v20, %v343_v48 }
  0x83   :  { %vm347_vm11 = vcmp.lt.s32.totalorder %v327_v51, 2  ;;  %vm348_vm12 = vcmp.lt.s32.totalorder %v327_v51, 3  ;;  %vm349_vm14 = vcmp.lt.s32.totalorder %v327_v51, 4  ;;  %v350_v37 = vsel %vm346_vm5, %v330_v16, %v333_v7 }
  0x84   :  { %v1533_v2 = vor.u32 %v1532_v62, %v1531_v63  ;;  %v1536_v0 = vshll.u32 %v1535_v54, 23  ;;  %v351_v60 = vsel %vm349_vm14, %v339_v13, 2102212464  ;;  %v354_v25 = vsel %vm346_vm5, %v333_v7, %v336_v33 }
  0x85   :  { %v355_v39 = vsel %vm349_vm14, %v342_v58, 920167782  ;;  %v723_v50 = vxor.u32 2147483648, %v9753_v35  ;;  %v352_v40 = vsel %vm348_vm12, %v336_v33, %v351_v60  ;;  %v2403_v52 = vsel %vm2401_vm15, %v726_v4, %v9753_v35 }
  0x86   :  { %v1537_v21 = vor.u32 4788187, %v1536_v0  ;;  %v1540_v24 = vcvt.s32.f32 %v1533_v2  ;;  %v356_v6 = vsel %vm348_vm12, %v339_v13, %v355_v39  ;;  %v358_v48 = vsel %vm346_vm5, %v336_v33, %v339_v13 }
  0x87   :  { %v359_v20 = vsel %vm349_vm14, %v345_v59, 1326507024  ;;  %v353_v63 = vsel %vm347_vm11, %v350_v37, %v352_v40  ;;  %v357_v32 = vsel %vm347_vm11, %v354_v25, %v356_v6  ;;  %v1158_v62 = vsel %vm1157_vm8, %v10414_v14, 0 }
  0x88   :  { %v1538_v3 = vand.u32 2147483647, %v1537_v21  ;;  %v360_v16 = vsel %vm348_vm12, %v342_v58, %v359_v20  ;;  %v10455_v2 = vmul.u32.u64.low %v10412_v23, %v357_v32  ;;  %v10456_v7 = vmul.u32.u64.high %v10412_v23, %v357_v32, %v10455_v2 }
  0x89   :  { %v361_v0 = vsel %vm347_vm11, %v358_v48, %v360_v16  ;;  %vm718_vm15 = vweird.f32 %v10039_v15  ;;  %v2400_v54 = vsel %vm2398_vm6, %v9751_v44, %v723_v50  ;;  %v10469_v51 = vand.u32 3, %v1551_v34 }
  0x8a   :  { %v1541_v33 = vmul.f32 %v1540_v24, %v1538_v3  ;;  %v10466_v13 = vmul.u32.u64.low %v10412_v23, %v361_v0  ;;  %v10467_v58 = vmul.u32.u64.high %v10412_v23, %v361_v0, %v10466_v13  ;;  %v10471_v59 = vshrl.u32 %v1158_v62, 5 }
  0x8b   :  { %v1160_v37 = vand.u32 31, %v1158_v62  ;;  %v10474_v60 = vmul.f32 4.0, %v10390_v46  ;;  %vm721_vm5 = vcmp.lt.s32.totalorder %v10392_v42, 2  ;;  %v724_v14 = vsel %vm722_vm7, %v9751_v44, %v723_v50 }
  0x8c   :  { %v727_v25 = vsel %vm725_vm9, %v726_v4, %v9753_v35  ;;  %v1542_v39 = vxor.u32 2147483648, %v1541_v33  ;;  %v369_v21 = vmul.u32 %v10412_v23, %v353_v63  ;;  %v2404_v34 = vsel %vm2397_vm10, %v2400_v54, %v2403_v52 }
  0x8d   :  { %v372_v24 = vadd.s32 1, %v10456_v7  ;;  %v1161_v40 = vsub.s32 32, %v1160_v37  ;;  %v1163_v6 = vshll.u32 %v14243_v41, %v1160_v37  ;;  %vm371_vm6 = vc.u32 %v10467_v58, %v10455_v2 }
  0x8e   :  { %v1543_v48 = vsel %vm1460_vm3, %v1542_v39, %v1541_v33  ;;  %v1166_v44 = vshll.u32 %v14233_v43, %v1160_v37  ;;  %v1169_v35 = vshll.u32 %v14245_v45, %v1160_v37  ;;  %vm1178_vm7 = vcmp.lt.s32.totalorder %v10471_v59, 1 }
  0x8f   :  { %v1546_v29 = vsel %vm10396_vm4, %v10093_v11, %v1543_v48  ;;  %v373_v23 = vsel %vm371_vm6, %v372_v24, %v10456_v7  ;;  %v1164_v4 = vshrl.u32 %v14233_v43, %v1161_v40  ;;  %v1167_v52 = vshrl.u32 %v14245_v45, %v1161_v40 }
  0x90   :  { %9754 = vcosq.f32 %v1546_v29  ;;  %v374_v50 = vadd.s32 %v373_v23, %v369_v21  ;;  %v1170_v20 = vshrl.u32 %v14251_v47, %v1161_v40  ;;  %v1172_v63 = vshll.u32 %v14251_v47, %v1160_v37 }
  0x91   :  { %9756 = vsinq.f32 %v1546_v29  ;;  %v1165_v3 = vor.u32 %v1164_v4, %v1163_v6  ;;  %v1173_v32 = vshrl.u32 %v14237_v49, %v1161_v40  ;;  %v1168_v16 = vor.u32 %v1167_v52, %v1166_v44 }
  0x92   :  { %v375_v22 = vadd.s32 536870912, %v374_v50  ;;  %v1171_v0 = vor.u32 %v1170_v20, %v1169_v35  ;;  %v1175_v7 = vshll.u32 %v14237_v49, %v1160_v37  ;;  %v1176_v33 = vshrl.u32 %v14235_v57, %v1161_v40 }
  0x93   :  { %v1174_v62 = vor.u32 %v1173_v32, %v1172_v63  ;;  %vm1180_vm3 = vcmp.lt.s32.totalorder %v10471_v59, 3  ;;  %vm1181_vm4 = vcmp.lt.s32.totalorder %v10471_v59, 4  ;;  %vm3221_vm9 = vcmp.lt.s32.totalorder %v10436_v38, 2 }
  0x94   :  { %v10507_v54 = vshrl.u32 %v375_v22, 30  ;;  %v1162_v13 = vshrl.u32 %v14243_v41, %v1161_v40  ;;  %vm1179_vm10 = vcmp.lt.s32.totalorder %v10471_v59, 2  ;;  %v1186_v39 = vsel %vm1178_vm7, %v1165_v3, %v1168_v16 }
  0x95   :  { %vm1550_vm8 = vweird.f32 %v10093_v11  ;;  %v2405_v37 = vsel %vm718_vm15, nan, %v2404_v34  ;;  %vm3225_vm11 = vcmp.eq.s32.totalorder %v10436_v38, 2  ;;  %v1177_v21 = vor.u32 %v1176_v33, %v1175_v7 }
  0x96   :  { %v1187_v24 = vsel %vm1181_vm4, %v1174_v62, 920167782  ;;  %v377_v6 = vshll.u32 %v10507_v54, 30  ;;  %v1183_v40 = vsel %vm1181_vm4, %v1171_v0, 2102212464  ;;  %v1190_v44 = vsel %vm1178_vm7, %v1168_v16, %v1171_v0 }
  0x97   :  { %v1188_v48 = vsel %vm1180_vm3, %v1171_v0, %v1187_v24  ;;  %v728_v34 = vsel %vm721_vm5, %v724_v14, %v727_v25  ;;  %vm1557_vm12 = vcmp.eq.s32.totalorder %v10469_v51, 2  ;;  %v1191_v29 = vsel %vm1181_vm4, %v1177_v21, 1326507024 }
  0x98   :  { %v1189_v35 = vsel %vm1179_vm10, %v1186_v39, %v1188_v48  ;;  %v10534_v23 = vmul.f32 %v10408_v5, %v2405_v37  ;;  %v10536_v4 = vsub.s32 %v374_v50, %v377_v6  ;;  %v1182_v52 = vsel %vm1178_vm7, %v1162_v13, %v1165_v3 }
  0x99   :  { %v1192_v42 = vsel %vm1180_vm3, %v1174_v62, %v1191_v29  ;;  %v1184_v14 = vsel %vm1180_vm3, %v1168_v16, %v1183_v40  ;;  %v10547_v20 = vmul.u32.u64.low %v10422_v12, %v1189_v35  ;;  %v10548_v63 = vmul.u32.u64.high %v10422_v12, %v1189_v35, %v10547_v20 }
  0x9a   :  { %v1193_v25 = vsel %vm1179_vm10, %v1190_v44, %v1192_v42  ;;  %v9755_v32 = vpop.eup %9754  ;;  %v729_v50 = vsel %vm718_vm15, nan, %v728_v34  ;;  %v380_v3 = vsub.s32 0, %v10536_v4  ;;  %vm1553_vm14 = vcmp.lt.s32.totalorder %v10469_v51, 2 }
  0x9b   :  { %v10555_v22 = vmul.u32.u64.low %v10422_v12, %v1193_v25  ;;  %v10556_v0 = vmul.u32.u64.high %v10422_v12, %v1193_v25, %v10555_v22  ;;  %v9757_v7 = vpop.eup %9756  ;;  %vm1554_vm5 = vcmp.eq.s32.totalorder %v10469_v51, 0  ;;  %v1558_v16 = vxor.u32 2147483648, %v9755_v32 }
  0x9c   :  { %vm3222_vm6 = vcmp.eq.s32.totalorder %v10436_v38, 0  ;;  %v1555_v62 = vxor.u32 2147483648, %v9757_v7  ;;  %v9186_v33 = vmin.u32 %v380_v3, %v10536_v4  ;;  %v1185_v15 = vsel %vm1179_vm10, %v1182_v52, %v1184_v14 }
  0x9d   :  { %v65_v13 = vrot.slane %v10417_v31, 5  ;;  %v1559_v39 = vsel %vm1557_vm12, %v1558_v16, %v9757_v7  ;;  %v1981_v37 = vmul.f32 %v10408_v5, %v729_v50  ;;  %v3227_v21 = vsel %vm3225_vm11, %v1558_v16, %v9757_v7 }
  0x9e   :  { %v3678_v24 = vrot.slane %v10534_v23, 4  ;;  %v1556_v6 = vsel %vm1554_vm5, %v9755_v32, %v1555_v62  ;;  %v3224_v40 = vsel %vm3222_vm6, %v9755_v32, %v1555_v62  ;;  %v382_v48 = vclz %v9186_v33 }
  0x9f   :  { %v1204_v44 = vadd.s32 1, %v10548_v63  ;;  %v1560_v59 = vsel %vm1553_vm14, %v1556_v6, %v1559_v39  ;;  %v3228_v34 = vsel %vm3221_vm9, %v3224_v40, %v3227_v21  ;;  %v1201_v35 = vmul.u32 %v10422_v12, %v1185_v15 }
  0xa0   :  { %v89_v5 = vrot.slane %v10474_v60, 2  ;;  %v1561_v29 = vsel %vm1550_vm8, nan, %v1560_v59  ;;  %v10582_v52 = vsel %vm1550_vm8, nan, %v3228_v34  ;;  %v9187_v42 = vadd.s32 4294967294, %v382_v48 }
  0xa1   :  { %v130_v14 = vsel %vm14230_vm0, %v10390_v46, %v65_v13  ;;  %v1989_v51 = vmul.f32 %v10429_v30, %v1561_v29  ;;  %v258_v12 = vsel %vm14231_vm1, %v202_v26, %v226_v56  ;;  %v266_v38 = vmul.f32 -0.5, %v10406_v28 }
  0xa2   :  { %vm1203_vm15 = vc.u32 %v10556_v0, %v10547_v20  ;;  %v370_v11 = vadd.s32 %v10455_v2, %v10467_v58  ;;  %vm9188_vm7 = vcmp.lt.s32.totalorder %v9187_v42, 0  ;;  %v400_v25 = vsub.s32 4, %v10507_v54 }
  0xa3   :  { %v1205_v32 = vsel %vm1203_vm15, %v1204_v44, %v10548_v63  ;;  %v3718_v61 = vsel %vm3674_vm13, %v1989_v51, %v3678_v24  ;;  %v385_v8 = vsel %vm9188_vm7, 0, %v9187_v42  ;;  %v10603_v26 = vsel %vm14288_vm2, %v130_v14, %v89_v5 }
  0xa4   :  { %v1206_v50 = vadd.s32 %v1205_v32, %v1201_v35  ;;  %v10605_v56 = vpack.c.bf16 %v3718_v61, %v1981_v37  ;;  %v386_v28 = vsub.s32 32, %v385_v8  ;;  %v387_v3 = vshll.u32 %v10536_v4, %v385_v8 }
  0xa5   :  { %v390_v2 = vsub.s32 4294967266, %v385_v8  ;;  %v49_v22 = vmul.f32 8.0, %v10390_v46  ;;  %vm316_vm3 = vcmp.lt.s32.totalorder %v10339_v17, 0  ;;  %v274_v16 = vmul.f32 -0.5, %v258_v12 }
  0xa6   :  { %14296 = vst [vmem:[#allocation3_spill] sm:$0xff] %v10605_v56  ;;  %v1207_v58 = vadd.s32 536870912, %v1206_v50  ;;  %5655 = vmatprep.subr.bf16.mxu1 %v10605_v56  ;;  %v388_v63 = vshrl.u32 %v370_v11, %v386_v28  ;;  %v401_v62 = vsel %vm316_vm3, %v400_v25, %v10507_v54  ;;  %v525_v15 = vand.u32 2139095040, %v10603_v26 }
  0xa7   :  { %v391_v7 = vadd.s32 127, %v390_v2  ;;  %v282_v13 = vmul.f32 1.442695, %v266_v38  ;;  %vm10617_vm4 = vcmp.le.f32.partialorder %v314_v9, 0.7853982  ;;  %v113_v6 = vrot.slane %v49_v22, 7 }
  0xa8   :  { %v1208_v33 = vshrl.u32 %v1207_v58, 30  ;;  %v389_v4 = vor.u32 %v388_v63, %v387_v3  ;;  %v526_v40 = vshrl.u32 %v525_v15, 23  ;;  %v403_v54 = vsel %vm10617_vm4, 0, %v401_v62 }
  0xa9   :  { %v392_v39 = vshll.u32 %v391_v7, 23  ;;  %v298_v59 = vmul.f32 1.442695, %v274_v16  ;;  %v522_v35 = vand.u32 2147483647, %v10603_v26  ;;  %9758 = vpow2.f32 %v282_v13 }
  0xaa   :  { %v1209_v21 = vshll.u32 %v1208_v33, 30  ;;  %v396_v44 = vcvt.s32.f32 %v389_v4  ;;  %v9193_v29 = vadd.s32 4294967169, %v526_v40  ;;  %v14299_v9 = vand.u32 2147483647, %v10353_v18 }
  0xab   :  { %v393_v48 = vor.u32 4788187, %v392_v39  ;;  %v1232_v51 = vsub.s32 4, %v1208_v33  ;;  %v407_v12 = vadd.s32 3, %v403_v54  ;;  %v10634_v11 = vsel %vm14231_vm1, %v89_v5, %v113_v6 }
  0xac   :  { %v10623_v34 = vsub.s32 %v1206_v50, %v1209_v21  ;;  %vm10628_vm9 = vcmp.le.f32.partialorder %v14299_v9, 0.7853982  ;;  %v532_v25 = vadd.s32 1, %v9193_v29  ;;  %vm1148_vm10 = vcmp.lt.s32.totalorder %v10353_v18, 0 }
  0xad   :  { %v394_v42 = vand.u32 2147483647, %v393_v48  ;;  %v10638_v61 = vmul.f32 16.0, %v10390_v46  ;;  %v180_v8 = vrot.slane %v10390_v46, 3  ;;  %9760 = vpow2.f32 %v298_v59 }
  0xae   :  { %v1212_v38 = vsub.s32 0, %v10623_v34  ;;  %v10642_v28 = vand.u32 3, %v403_v54  ;;  %v529_v3 = vand.u32 8388607, %v522_v35  ;;  %v1233_v5 = vsel %vm1148_vm10, %v1232_v51, %v1208_v33 }
  0xaf   :  { %v397_v32 = vmul.f32 %v396_v44, %v394_v42  ;;  %vm533_vm8 = vcmp.gt.s32.totalorder %v532_v25, 0  ;;  %v1357_v58 = vand.u32 2139095040, %v10634_v11  ;;  %v10649_v22 = vand.u32 3, %v407_v12 }
  0xb0   :  { %v9218_v50 = vmin.u32 %v1212_v38, %v10623_v34  ;;  %v1202_v63 = vadd.s32 %v10547_v20, %v10556_v0  ;;  %v10654_v16 = vmul.f32 64.0, %v10390_v46  ;;  %v204_v15 = vrot.slane %v10638_v61, 5  ;;  %v9894_v61 = vld [vmem:[%s14224_s0 + $0x8] sm:$0xff] }
  0xb1   :  { %v398_v2 = vxor.u32 2147483648, %v397_v32  ;;  %v10661_v33 = vsel %vm14230_vm0, %v180_v8, %v10474_v60  ;;  %v534_v13 = vsel %vm533_vm8, %v532_v25, 0  ;;  %v10668_v20 = vsel %vm10628_vm9, 0, %v1233_v5 }
  0xb2   :  { %v1214_v7 = vclz %v9218_v50  ;;  %v536_v46 = vand.u32 31, %v534_v13  ;;  %v530_v0 = vor.u32 8388608, %v529_v3  ;;  %v1354_v21 = vand.u32 2147483647, %v10634_v11 }
  0xb3   :  { %v399_v62 = vsel %vm316_vm3, %v398_v2, %v397_v32  ;;  %v1358_v6 = vshrl.u32 %v1357_v58, 23  ;;  %v10672_v48 = vpop.eup %9758  ;;  %v535_v51 = vshrl.u32 %v534_v13, 5  ;;  %vm2089_vm12 = vcmp.eq.s32.totalorder %v10642_v28, 0 }
  0xb4   :  { %v402_v4 = vsel %vm10617_vm4, %v10339_v17, %v399_v62  ;;  %v9219_v39 = vadd.s32 4294967294, %v1214_v7  ;;  %v537_v60 = vsub.s32 32, %v536_v46  ;;  %v539_v40 = vshll.u32 %v14243_v41, %v536_v46 }
  0xb5   :  { %9762 = vcosq.f32 %v402_v4  ;;  %v542_v44 = vshll.u32 %v14233_v43, %v536_v46  ;;  %v545_v54 = vshll.u32 %v14245_v45, %v536_v46  ;;  %v548_v59 = vshll.u32 %v14251_v47, %v536_v46 }
  0xb6   :  { %9764 = vsinq.f32 %v402_v4  ;;  %vm9220_vm11 = vcmp.lt.s32.totalorder %v9219_v39, 0  ;;  %v540_v12 = vshrl.u32 %v14233_v43, %v537_v60  ;;  %v543_v38 = vshrl.u32 %v14245_v45, %v537_v60 }
  0xb7   :  { %v1217_v37 = vsel %vm9220_vm11, 0, %v9219_v39  ;;  %v546_v25 = vshrl.u32 %v14251_v47, %v537_v60  ;;  %v549_v32 = vshrl.u32 %v14237_v49, %v537_v60  ;;  %v10682_v8 = vpop.eup %9760  ;;  %v551_v2 = vshll.u32 %v14237_v49, %v536_v46 }
  0xb8   :  { %v1218_v29 = vsub.s32 32, %v1217_v37  ;;  %v1219_v42 = vshll.u32 %v10623_v34, %v1217_v37  ;;  %v1222_v9 = vsub.s32 4294967266, %v1217_v37  ;;  %v552_v5 = vshrl.u32 %v14235_v57, %v537_v60 }
  0xb9   :  { %vm2092_vm14 = vcmp.eq.s32.totalorder %v10642_v28, 2  ;;  %v541_v34 = vor.u32 %v540_v12, %v539_v40  ;;  %v544_v58 = vor.u32 %v543_v38, %v542_v44  ;;  %v547_v7 = vor.u32 %v546_v25, %v545_v54 }
  0xba   :  { %v1220_v50 = vshrl.u32 %v1202_v63, %v1218_v29  ;;  %v1223_v3 = vadd.s32 127, %v1222_v9  ;;  %v550_v62 = vor.u32 %v549_v32, %v548_v59  ;;  %v553_v39 = vor.u32 %v552_v5, %v551_v2 }
  0xbb   :  { %vm554_vm5 = vcmp.lt.s32.totalorder %v535_v51, 1  ;;  %vm413_vm6 = vcmp.eq.s32.totalorder %v10649_v22, 2  ;;  %v538_v63 = vshrl.u32 %v14243_v41, %v537_v60  ;;  %vm556_vm15 = vcmp.lt.s32.totalorder %v535_v51, 3 }
  0xbc   :  { %v1221_v13 = vor.u32 %v1220_v50, %v1219_v42  ;;  %v1224_v4 = vshll.u32 %v1223_v3, 23  ;;  %vm557_vm7 = vcmp.lt.s32.totalorder %v535_v51, 4  ;;  %v10690_v46 = vshll.u32 %v530_v0, 8 }
  0xbd   :  { %vm410_vm3 = vcmp.eq.s32.totalorder %v10649_v22, 0  ;;  %vm2088_vm4 = vcmp.lt.s32.totalorder %v10642_v28, 2  ;;  %vm555_vm8 = vcmp.lt.s32.totalorder %v535_v51, 2  ;;  %v559_v40 = vsel %vm557_vm7, %v547_v7, 2102212464 }
  0xbe   :  { %v1225_v37 = vor.u32 4788187, %v1224_v4  ;;  %v1228_v29 = vcvt.s32.f32 %v1221_v13  ;;  %v562_v54 = vsel %vm554_vm5, %v541_v34, %v544_v58  ;;  %v563_v59 = vsel %vm557_vm7, %v550_v62, 920167782 }
  0xbf   :  { %v9763_v44 = vpop.eup %9762  ;;  %v566_v42 = vsel %vm554_vm5, %v544_v58, %v547_v7  ;;  %v567_v9 = vsel %vm557_vm7, %v553_v39, 1326507024  ;;  %v1239_v0 = vadd.s32 3, %v10668_v20  ;;  %v564_v38 = vsel %vm556_vm15, %v547_v7, %v563_v59 }
  0xc0   :  { %v9765_v60 = vpop.eup %9764  ;;  %v1226_v12 = vand.u32 2147483647, %v1225_v37  ;;  %v9225_v25 = vadd.s32 4294967169, %v1358_v6  ;;  %vm409_vm11 = vcmp.lt.s32.totalorder %v10649_v22, 2  ;;  %v414_v32 = vxor.u32 2147483648, %v9763_v44 }
  0xc1   :  { %v558_v50 = vsel %vm554_vm5, %v538_v63, %v541_v34  ;;  %v560_v3 = vsel %vm556_vm15, %v544_v58, %v559_v40  ;;  %v568_v2 = vsel %vm556_vm15, %v550_v62, %v567_v9  ;;  %vm406_vm0 = vweird.f32 %v10339_v17 }
  0xc2   :  { %v411_v5 = vxor.u32 2147483648, %v9765_v60  ;;  %v1229_v13 = vmul.f32 %v1228_v29, %v1226_v12  ;;  %v565_v4 = vsel %vm555_vm8, %v562_v54, %v564_v38  ;;  %v569_v39 = vsel %vm555_vm8, %v566_v42, %v568_v2 }
  0xc3   :  { %v228_v7 = vrot.slane %v10654_v16, 2  ;;  %v10707_v6 = vmul.u32.u64.low %v10690_v46, %v569_v39  ;;  %v10708_v37 = vmul.u32.u64.high %v10690_v46, %v569_v39, %v10707_v6  ;;  %v10712_v34 = vand.u32 8388607, %v1354_v21 }
  0xc4   :  { %v1230_v58 = vxor.u32 2147483648, %v1229_v13  ;;  %v10718_v62 = vsel %vm14288_vm2, %v10661_v33, %v204_v15  ;;  %v561_v63 = vsel %vm555_vm8, %v558_v50, %v560_v3  ;;  %v1364_v29 = vadd.s32 1, %v9225_v25 }
  0xc5   :  { %v10721_v40 = vand.u32 3, %v1239_v0  ;;  %v10724_v54 = vand.u32 3, %v10668_v20  ;;  %v10727_v59 = vmul.u32.u64.low %v10690_v46, %v565_v4  ;;  %v10728_v42 = vmul.u32.u64.high %v10690_v46, %v565_v4, %v10727_v59 }
  0xc6   :  { %v1231_v9 = vsel %vm1148_vm10, %v1230_v58, %v1229_v13  ;;  %v2091_v33 = vsel %vm2089_vm12, %v9763_v44, %v411_v5  ;;  %v2094_v51 = vsel %vm2092_vm14, %v414_v32, %v9765_v60  ;;  %vm1365_vm5 = vcmp.gt.s32.totalorder %v1364_v29, 0 }
  0xc7   :  { %v1234_v20 = vsel %vm10628_vm9, %v10353_v18, %v1231_v9  ;;  %v577_v12 = vmul.u32 %v10690_v46, %v561_v63  ;;  %v1362_v0 = vor.u32 8388608, %v10712_v34  ;;  %v1366_v38 = vsel %vm1365_vm5, %v1364_v29, 0 }
  0xc8   :  { %v415_v25 = vsel %vm413_vm6, %v414_v32, %v9765_v60  ;;  %9766 = vcosq.f32 %v1234_v20  ;;  %vm579_vm10 = vc.u32 %v10708_v37, %v10727_v59  ;;  %v1368_v50 = vand.u32 31, %v1366_v38 }
  0xc9   :  { %v412_v3 = vsel %vm410_vm3, %v9763_v44, %v411_v5  ;;  %9768 = vsinq.f32 %v1234_v20  ;;  %v2095_v14 = vsel %vm2088_vm4, %v2091_v33, %v2094_v51  ;;  %v580_v46 = vadd.s32 1, %v10728_v42 }
  0xca   :  { %vm1245_vm9 = vcmp.eq.s32.totalorder %v10721_v40, 2  ;;  %vm2916_vm12 = vcmp.eq.s32.totalorder %v10724_v54, 2  ;;  %v10753_v2 = vshrl.u32 %v1366_v38, 5  ;;  %v1369_v60 = vsub.s32 32, %v1368_v50 }
  0xcb   :  { %v1371_v32 = vshll.u32 %v14243_v41, %v1368_v50  ;;  %v1374_v13 = vshll.u32 %v14233_v43, %v1368_v50  ;;  %vm1242_vm14 = vcmp.eq.s32.totalorder %v10721_v40, 0  ;;  %vm2913_vm6 = vcmp.eq.s32.totalorder %v10724_v54, 0 }
  0xcc   :  { %v581_v28 = vsel %vm579_vm10, %v580_v46, %v10728_v42  ;;  %v1377_v44 = vshll.u32 %v14245_v45, %v1368_v50  ;;  %v1380_v5 = vshll.u32 %v14251_v47, %v1368_v50  ;;  %v1383_v4 = vshll.u32 %v14237_v49, %v1368_v50 }
  0xcd   :  { %v416_v39 = vsel %vm409_vm11, %v412_v3, %v415_v25  ;;  %vm1241_vm15 = vcmp.lt.s32.totalorder %v10721_v40, 2  ;;  %vm2912_vm7 = vcmp.lt.s32.totalorder %v10724_v54, 2  ;;  %v582_v6 = vadd.s32 %v581_v28, %v577_v12 }
  0xce   :  { %v1372_v34 = vshrl.u32 %v14233_v43, %v1369_v60  ;;  %v1375_v58 = vshrl.u32 %v14245_v45, %v1369_v60  ;;  %vm1238_vm3 = vweird.f32 %v10353_v18  ;;  %v2096_v63 = vsel %vm406_vm0, nan, %v2095_v14 }
  0xcf   :  { %v1378_v29 = vshrl.u32 %v14251_v47, %v1369_v60  ;;  %v1381_v42 = vshrl.u32 %v14237_v49, %v1369_v60  ;;  %v1384_v22 = vshrl.u32 %v14235_v57, %v1369_v60  ;;  %v583_v9 = vadd.s32 536870912, %v582_v6 }
  0xd0   :  { %v1373_v33 = vor.u32 %v1372_v34, %v1371_v32  ;;  %v1376_v51 = vor.u32 %v1375_v58, %v1374_v13  ;;  %vm1386_vm4 = vcmp.lt.s32.totalorder %v10753_v2, 1  ;;  %vm1389_vm8 = vcmp.lt.s32.totalorder %v10753_v2, 4 }
  0xd1   :  { %v1379_v20 = vor.u32 %v1378_v29, %v1377_v44  ;;  %v1382_v12 = vor.u32 %v1381_v42, %v1380_v5  ;;  %v1385_v38 = vor.u32 %v1384_v22, %v1383_v4  ;;  %v10778_v25 = vmul.f32 %v10672_v48, %v2096_v63 }
  0xd2   :  { %v10780_v50 = vshrl.u32 %v583_v9, 30  ;;  %v1370_v3 = vshrl.u32 %v14243_v41, %v1369_v60  ;;  %vm1388_vm11 = vcmp.lt.s32.totalorder %v10753_v2, 3  ;;  %vm1387_vm5 = vcmp.lt.s32.totalorder %v10753_v2, 2  ;;  %v9767_v13 = vpop.eup %9766 }
  0xd3   :  { %v1395_v14 = vsel %vm1389_vm8, %v1382_v12, 920167782  ;;  %v1398_v46 = vsel %vm1386_vm4, %v1376_v51, %v1379_v20  ;;  %v1399_v32 = vsel %vm1389_vm8, %v1385_v38, 1326507024  ;;  %v417_v28 = vsel %vm406_vm0, nan, %v416_v39  ;;  %v9769_v34 = vpop.eup %9768 }
  0xd4   :  { %v585_v44 = vshll.u32 %v10780_v50, 30  ;;  %v1391_v5 = vsel %vm1389_vm8, %v1379_v20, 2102212464  ;;  %v1402_v4 = vshll.u32 %v1362_v0, 8  ;;  %v1246_v58 = vxor.u32 2147483648, %v9767_v13 }
  0xd5   :  { %v1394_v60 = vsel %vm1386_vm4, %v1373_v33, %v1376_v51  ;;  %v1396_v63 = vsel %vm1388_vm11, %v1379_v20, %v1395_v14  ;;  %v1400_v29 = vsel %vm1388_vm11, %v1382_v12, %v1399_v32  ;;  %v1243_v42 = vxor.u32 2147483648, %v9769_v34 }
  0xd6   :  { %v3675_v22 = vrot.slane %v10778_v25, 4  ;;  %v586_v17 = vsub.s32 %v582_v6, %v585_v44  ;;  %v1401_v39 = vsel %vm1387_vm5, %v1398_v46, %v1400_v29  ;;  %v1247_v0 = vsel %vm1245_vm9, %v1246_v58, %v9769_v34  ;;  %v24_v29 = vld [vmem:[%s14224_s0 + $0x48] sm:$0x1] }
  0xd7   :  { %v2918_v9 = vsel %vm2916_vm12, %v1246_v58, %v9769_v34  ;;  %v1390_v38 = vsel %vm1386_vm4, %v1370_v3, %v1373_v33  ;;  %v1392_v20 = vsel %vm1388_vm11, %v1376_v51, %v1391_v5  ;;  %v1244_v12 = vsel %vm1242_vm14, %v9767_v13, %v1243_v42 }
  0xd8   :  { %v2915_v6 = vsel %vm2913_vm6, %v9767_v13, %v1243_v42  ;;  %v588_v14 = vsub.s32 0, %v586_v17  ;;  %v1397_v46 = vsel %vm1387_vm5, %v1394_v60, %v1396_v63  ;;  %v1248_v32 = vsel %vm1241_vm15, %v1244_v12, %v1247_v0 }
  0xd9   :  { %v2919_v44 = vsel %vm2912_vm7, %v2915_v6, %v2918_v9  ;;  %v10817_v33 = vmul.u32.u64.low %v1402_v4, %v1401_v39  ;;  %v10818_v3 = vmul.u32.u64.high %v1402_v4, %v1401_v39, %v10817_v33  ;;  %v1249_v51 = vsel %vm1238_vm3, nan, %v1248_v32 }
  0xda   :  { %v1978_v5 = vmul.f32 %v10672_v48, %v417_v28  ;;  %v10825_v13 = vsel %vm1238_vm3, nan, %v2919_v44  ;;  %v9194_v34 = vmin.u32 %v588_v14, %v586_v17  ;;  %v1986_v58 = vmul.f32 %v10682_v8, %v1249_v51 }
  0xdb   :  { %v1393_v40 = vsel %vm1387_vm5, %v1390_v38, %v1392_v20  ;;  %v10830_v54 = vmul.u32.u64.low %v1402_v4, %v1397_v46  ;;  %v10831_v60 = vmul.u32.u64.high %v1402_v4, %v1397_v46, %v10830_v54  ;;  %v260_v48 = vsel %vm14231_vm1, %v204_v15, %v228_v7 }
  0xdc   :  { %v590_v63 = vclz %v9194_v34  ;;  %v3715_v18 = vsel %vm3674_vm13, %v1986_v58, %v3675_v22  ;;  %v268_v2 = vmul.f32 -0.5, %v10718_v62  ;;  %v578_v28 = vadd.s32 %v10727_v59, %v10708_v37 }
  0xdd   :  { %v10848_v42 = vpack.c.bf16 %v3715_v18, %v1978_v5  ;;  %v1409_v0 = vmul.u32 %v1402_v4, %v1393_v40  ;;  %vm1411_vm0 = vc.u32 %v10818_v3, %v10830_v54  ;;  %v608_v9 = vsub.s32 4, %v10780_v50 }
  0xde   :  { %v9195_v39 = vadd.s32 4294967294, %v590_v63  ;;  %v1412_v16 = vadd.s32 1, %v10831_v60  ;;  %v3724_v38 = vmul.f32 2.0, %v24_v29  ;;  %vm14268_vm10 = vcmask 1041408  }
  0xdf   :  { %14302 = vst [vmem:[#allocation4_spill] sm:$0xff] %v10848_v42  ;;  %5603 = vmatpush1.bf16.msra.mxu0 %v10848_v42  ;;  %v3743_v15 = vrot.slane %v9894_v61, 6  ;;  %v3744_v7 = vrot.slane %v24_v29, 6  ;;  %vm14267_vm12 = vcmask 1044480   ;;  %v3784_v59 = vrot.slane %v9934_v1, 3 }
  0xe0   :  { %vm9196_vm9 = vcmp.lt.s32.totalorder %v9195_v39, 0  ;;  %v1413_v62 = vsel %vm1411_vm0, %v1412_v16, %v10831_v60  ;;  %v3785_v4 = vrot.slane %v3724_v38, 3  ;;  %vm524_vm14 = vcmp.lt.s32.totalorder %v10603_v26, 0 }
  0xe1   :  { %v593_v37 = vsel %vm9196_vm9, 0, %v9195_v39  ;;  %v1414_v14 = vadd.s32 %v1413_v62, %v1409_v0  ;;  %v3745_v46 = vsel %vm14268_vm10, %v3743_v15, %v3744_v7  ;;  %v10865_v44 = vmul.f32 %v10429_v30, %v10582_v52  ;;  %v26_v62 = vld [vmem:[%s14224_s0 + $0x58] sm:$0x1] }
  0xe2   :  { %v594_v20 = vsub.s32 32, %v593_v37  ;;  %v595_v12 = vshll.u32 %v586_v17, %v593_v37  ;;  %v598_v6 = vsub.s32 4294967266, %v593_v37  ;;  %v3786_v32 = vsel %vm14267_vm12, %v3784_v59, %v3785_v4  ;;  %v9895_v59 = vld [vmem:[%s14224_s0 + $0x18] sm:$0xff] }
  0xe3   :  { %v1415_v5 = vadd.s32 536870912, %v1414_v14  ;;  %vm14303_vm6 = vcmask 1042432   ;;  %v609_v17 = vsel %vm524_vm14, %v608_v9, %v10780_v50  ;;  %v276_v29 = vmul.f32 -0.5, %v260_v48 }
  0xe4   :  { %v596_v33 = vshrl.u32 %v578_v28, %v594_v20  ;;  %v599_v51 = vadd.s32 127, %v598_v6  ;;  %v10868_v1 = vsel %vm14303_vm6, %v3745_v46, %v3786_v32  ;;  %v286_v30 = vmul.f32 1.442695, %v268_v2 }
  0xe5   :  { %v3928_v34 = vand.u32 2139095040, %v10868_v1  ;;  %v1416_v60 = vshrl.u32 %v1415_v5, 30  ;;  %v3925_v63 = vand.u32 2147483647, %v10868_v1  ;;  %vm10877_vm15 = vcmp.le.f32.partialorder %v522_v35, 0.7853982 }
  0xe6   :  { %v597_v58 = vor.u32 %v596_v33, %v595_v12  ;;  %v600_v40 = vshll.u32 %v599_v51, 23  ;;  %v611_v50 = vsel %vm10877_vm15, 0, %v609_v17  ;;  %v10887_v2 = vmul.f32 1.442695, %v276_v29 }
  0xe7   :  { %v3929_v18 = vshrl.u32 %v3928_v34, 23  ;;  %v1417_v0 = vshll.u32 %v1416_v60, 30  ;;  %v3932_v48 = vand.u32 8388607, %v3925_v63  ;;  %v615_v35 = vadd.s32 3, %v611_v50 }
  0xe8   :  { %v601_v28 = vor.u32 4788187, %v600_v40  ;;  %v604_v39 = vcvt.s32.f32 %v597_v58  ;;  %9770 = vpow2.f32 %v286_v30  ;;  %vm1356_vm7 = vcmp.lt.s32.totalorder %v10634_v11, 0 }
  0xe9   :  { %v9317_v9 = vadd.s32 4294967169, %v3929_v18  ;;  %v10883_v38 = vsub.s32 %v1414_v14, %v1417_v0  ;;  %v1440_v37 = vsub.s32 4, %v1416_v60  ;;  %v3749_v4 = vrot.slane %v9895_v59, 6 }
  0xea   :  { %v602_v16 = vand.u32 2147483647, %v601_v28  ;;  %v10899_v20 = vmul.f32 %v10682_v8, %v10825_v13  ;;  %v3933_v14 = vor.u32 8388608, %v3932_v48  ;;  %v3750_v46 = vrot.slane %v26_v62, 6 }
  0xeb   :  { %v3935_v61 = vadd.s32 1, %v9317_v9  ;;  %v1420_v7 = vsub.s32 0, %v10883_v38  ;;  %v10902_v32 = vand.u32 3, %v615_v35  ;;  %v10904_v33 = vand.u32 3, %v611_v50 }
  0xec   :  { %v605_v15 = vmul.f32 %v604_v39, %v602_v16  ;;  %v10908_v51 = vmul.f32 %v10216_v53, %v10298_v19  ;;  %v1410_v8 = vadd.s32 %v10830_v54, %v10818_v3  ;;  %v3726_v34 = vmul.f32 2.0, %v26_v62 }
  0xed   :  { %vm3936_vm3 = vcmp.gt.s32.totalorder %v3935_v61, 0  ;;  %v9226_v6 = vmin.u32 %v1420_v7, %v10883_v38  ;;  %v10919_v40 = vsel %vm1356_vm7, %v1440_v37, %v1416_v60  ;;  %v3790_v53 = vrot.slane %v9962_v27, 3  ;;  %v9896_v7 = vld [vmem:[%s14224_s0] sm:$0xff] }
  0xee   :  { %v606_v12 = vxor.u32 2147483648, %v605_v15  ;;  %v3937_v5 = vsel %vm3936_vm3, %v3935_v61, 0  ;;  %v10922_v30 = vshll.u32 %v3933_v14, 8  ;;  %v10925_v18 = vsel %vm14268_vm10, %v3749_v4, %v3750_v46 }
  0xef   :  { %v1422_v13 = vclz %v9226_v6  ;;  %v3939_v29 = vand.u32 31, %v3937_v5  ;;  %v10927_v3 = vshrl.u32 %v3937_v5, 5  ;;  %vm2298_vm8 = vcmp.eq.s32.totalorder %v10904_v33, 2 }
  0xf0   :  { %v607_v17 = vsel %vm524_vm14, %v606_v12, %v605_v15  ;;  %vm2295_vm11 = vcmp.eq.s32.totalorder %v10904_v33, 0  ;;  %vm10944_vm5 = vcmp.le.f32.partialorder %v1354_v21, 0.7853982  ;;  %v3791_v4 = vrot.slane %v3726_v34, 3 }
  0xf1   :  { %v610_v58 = vsel %vm10877_vm15, %v10603_v26, %v607_v17  ;;  %v9227_v19 = vadd.s32 4294967294, %v1422_v13  ;;  %v3940_v54 = vsub.s32 32, %v3939_v29  ;;  %v3942_v52 = vshll.u32 %v14243_v41, %v3939_v29 }
  0xf2   :  { %9772 = vcosq.f32 %v610_v58  ;;  %v3945_v60 = vshll.u32 %v14233_v43, %v3939_v29  ;;  %v3948_v27 = vshll.u32 %v14245_v45, %v3939_v29  ;;  %v3951_v28 = vshll.u32 %v14251_v47, %v3939_v29  ;;  %v10938_v16 = vpop.eup %9770 }
  0xf3   :  { %9774 = vsinq.f32 %v610_v58  ;;  %vm9228_vm4 = vcmp.lt.s32.totalorder %v9227_v19, 0  ;;  %v3943_v50 = vshrl.u32 %v14233_v43, %v3940_v54  ;;  %v3946_v0 = vshrl.u32 %v14245_v45, %v3940_v54 }
  0xf4   :  { %v1425_v39 = vsel %vm9228_vm4, 0, %v9227_v19  ;;  %v3954_v9 = vshll.u32 %v14237_v49, %v3939_v29  ;;  %v3949_v15 = vshrl.u32 %v14251_v47, %v3940_v54  ;;  %v3941_v37 = vshrl.u32 %v14243_v41, %v3940_v54 }
  0xf5   :  { %v1426_v48 = vsub.s32 32, %v1425_v39  ;;  %v1427_v35 = vshll.u32 %v10883_v38, %v1425_v39  ;;  %v1430_v61 = vsub.s32 4294967266, %v1425_v39  ;;  %v3952_v62 = vshrl.u32 %v14237_v49, %v3940_v54 }
  0xf6   :  { %v3955_v59 = vshrl.u32 %v14235_v57, %v3940_v54  ;;  %v3947_v14 = vor.u32 %v3946_v0, %v3945_v60  ;;  %v3950_v38 = vor.u32 %v3949_v15, %v3948_v27  ;;  %v3944_v46 = vor.u32 %v3943_v50, %v3942_v52 }
  0xf7   :  { %v1428_v12 = vshrl.u32 %v1410_v8, %v1426_v48  ;;  %v1431_v6 = vadd.s32 127, %v1430_v61  ;;  %v3953_v5 = vor.u32 %v3952_v62, %v3951_v28  ;;  %vm3957_vm0 = vcmp.lt.s32.totalorder %v10927_v3, 1 }
  0xf8   :  { %v3956_v17 = vor.u32 %v3955_v59, %v3954_v9  ;;  %vm614_vm9 = vweird.f32 %v10603_v26  ;;  %vm3959_vm14 = vcmp.lt.s32.totalorder %v10927_v3, 3  ;;  %vm3960_vm6 = vcmp.lt.s32.totalorder %v10927_v3, 4 }
  0xf9   :  { %v1429_v21 = vor.u32 %v1428_v12, %v1427_v35  ;;  %v1432_v13 = vshll.u32 %v1431_v6, 23  ;;  %vm3958_vm15 = vcmp.lt.s32.totalorder %v10927_v3, 2  ;;  %v3962_v34 = vsel %vm3960_vm6, %v3950_v38, 2102212464  ;;  %v23_v12 = vld [vmem:[%s14224_s0 + $0x40] sm:$0x1] }
  0xfa   :  { %v3966_v8 = vsel %vm3960_vm6, %v3953_v5, 920167782  ;;  %v3792_v58 = vsel %vm14267_vm12, %v3790_v53, %v3791_v4  ;;  %v3961_v52 = vsel %vm3957_vm0, %v3941_v37, %v3944_v46  ;;  %v3969_v60 = vsel %vm3957_vm0, %v3947_v14, %v3950_v38 }
  0xfb   :  { %v1433_v19 = vor.u32 4788187, %v1432_v13  ;;  %v1436_v54 = vcvt.s32.f32 %v1429_v21  ;;  %v3965_v39 = vsel %vm3957_vm0, %v3944_v46, %v3947_v14  ;;  %v3967_v50 = vsel %vm3959_vm14, %v3950_v38, %v3966_v8 }
  0xfc   :  { %v9773_v29 = vpop.eup %9772  ;;  %v3970_v0 = vsel %vm3960_vm6, %v3956_v17, 1326507024  ;;  %vm617_vm3 = vcmp.lt.s32.totalorder %v10902_v32, 2  ;;  %v3963_v48 = vsel %vm3959_vm14, %v3947_v14, %v3962_v34  ;;  %vm618_vm4 = vcmp.eq.s32.totalorder %v10902_v32, 0 }
  0xfd   :  { %v9775_v27 = vpop.eup %9774  ;;  %v622_v28 = vxor.u32 2147483648, %v9773_v29  ;;  %v1434_v9 = vand.u32 2147483647, %v1433_v19  ;;  %v3971_v35 = vsel %vm3959_vm14, %v3953_v5, %v3970_v0  ;;  %vm2294_vm1 = vcmp.lt.s32.totalorder %v10904_v33, 2 }
  0xfe   :  { %v619_v53 = vxor.u32 2147483648, %v9775_v27  ;;  %v3972_v15 = vsel %vm3958_vm15, %v3969_v60, %v3971_v35  ;;  %v1443_v62 = vsel %vm10944_vm5, 0, %v10919_v40  ;;  %v3968_v4 = vsel %vm3958_vm15, %v3965_v39, %v3967_v50 }
  0xff   :  { %v2300_v61 = vsel %vm2298_vm8, %v622_v28, %v9775_v27  ;;  %v1437_v37 = vmul.f32 %v1436_v54, %v1434_v9  ;;  %v3964_v6 = vsel %vm3958_vm15, %v3961_v52, %v3963_v48  ;;  %vm14308_vm8 = vcmask 1042432  }
 0x100   :  { %v2297_v59 = vsel %vm2295_vm11, %v9773_v29, %v619_v53  ;;  %v10989_v14 = vmul.u32.u64.low %v10922_v30, %v3972_v15  ;;  %v10990_v38 = vmul.u32.u64.high %v10922_v30, %v3972_v15, %v10989_v14  ;;  %v10994_v40 = vsel %vm14308_vm8, %v10925_v18, %v3792_v58 }
 0x101   :  { %vm621_vm11 = vcmp.eq.s32.totalorder %v10902_v32, 2  ;;  %v1438_v33 = vxor.u32 2147483648, %v1437_v37  ;;  %v2301_v46 = vsel %vm2294_vm1, %v2297_v59, %v2300_v61  ;;  %v3683_v5 = vrot.slane %v10899_v20, 4 }
 0x102   :  { %v1447_v17 = vadd.s32 3, %v1443_v62  ;;  %v10999_v21 = vmul.u32.u64.low %v10922_v30, %v3968_v4  ;;  %v11000_v13 = vmul.u32.u64.high %v10922_v30, %v3968_v4, %v10999_v21  ;;  %v3723_v3 = vmul.f32 2.0, %v23_v12 }
 0x103   :  { %v1439_v34 = vsel %vm1356_vm7, %v1438_v33, %v1437_v37  ;;  %v3980_v8 = vmul.u32 %v10922_v30, %v3964_v6  ;;  %v4133_v18 = vand.u32 2147483647, %v10994_v40  ;;  %v4136_v58 = vand.u32 2139095040, %v10994_v40  ;;  %v11046_v33 = vld [vmem:[%s14224_s0 + $0x50] sm:$0x1] }
 0x104   :  { %v620_v19 = vsel %vm618_vm4, %v9773_v29, %v619_v53  ;;  %v623_v54 = vsel %vm621_vm11, %v622_v28, %v9775_v27  ;;  %v1442_v20 = vsel %vm10944_vm5, %v10634_v11, %v1439_v34  ;;  %v2302_v52 = vsel %vm614_vm9, nan, %v2301_v46 }
 0x105   :  { %9776 = vcosq.f32 %v1442_v20  ;;  %vm3982_vm1 = vc.u32 %v10990_v38, %v10999_v21  ;;  %v4137_v60 = vshrl.u32 %v4136_v58, 23  ;;  %v11018_v30 = vsel %vm3674_vm13, %v3675_v22, %v3683_v5 }
 0x106   :  { %9778 = vsinq.f32 %v1442_v20  ;;  %v3983_v29 = vadd.s32 1, %v11000_v13  ;;  %v3740_v27 = vrot.slane %v9896_v7, 6  ;;  %v3741_v28 = vrot.slane %v23_v12, 6 }
 0x107   :  { %v9325_v39 = vadd.s32 4294967169, %v4137_v60  ;;  %v4140_v50 = vand.u32 8388607, %v4133_v18  ;;  %v3781_v0 = vrot.slane %v10201_v10, 3  ;;  %v3782_v53 = vrot.slane %v3723_v3, 3 }
 0x108   :  { %v624_v25 = vsel %vm617_vm3, %v620_v19, %v623_v54  ;;  %v3117_v22 = vand.u32 3, %v1443_v62  ;;  %v3984_v9 = vsel %vm3982_vm1, %v3983_v29, %v11000_v13  ;;  %9780 = vpow2.f32 %v10887_v2  ;;  %vm14309_vm3 = vmmov %vm14308_vm8 }
 0x109   :  { %v1448_v48 = vand.u32 3, %v1447_v17  ;;  %v3985_v35 = vadd.s32 %v3984_v9, %v3980_v8  ;;  %v4143_v61 = vadd.s32 1, %v9325_v39  ;;  %vm1446_vm7 = vweird.f32 %v10634_v11 }
 0x10a   :  { %v11033_v15 = vmul.f32 %v10938_v16, %v2302_v52  ;;  %v3685_v37 = vrot.slane %v10908_v51, 4  ;;  %v3742_v10 = vsel %vm14268_vm10, %v3740_v27, %v3741_v28  ;;  %v3783_v32 = vsel %vm14267_vm12, %v3781_v0, %v3782_v53 }
 0x10b   :  { %v625_v62 = vsel %vm614_vm9, nan, %v624_v25  ;;  %v3986_v59 = vadd.s32 536870912, %v3985_v35  ;;  %v4141_v4 = vor.u32 8388608, %v4140_v50  ;;  %vm4144_vm5 = vcmp.gt.s32.totalorder %v4143_v61, 0 }
 0x10c   :  { %vm3118_vm0 = vcmp.lt.s32.totalorder %v3117_v22, 2  ;;  %vm3119_vm14 = vcmp.eq.s32.totalorder %v3117_v22, 0  ;;  %vm3122_vm6 = vcmp.eq.s32.totalorder %v3117_v22, 2  ;;  %v4145_v2 = vsel %vm4144_vm5, %v4143_v61, 0 }
 0x10d   :  { %vm1449_vm15 = vcmp.lt.s32.totalorder %v1448_v48, 2  ;;  %v3987_v12 = vshrl.u32 %v3986_v59, 30  ;;  %v4147_v6 = vand.u32 31, %v4145_v2  ;;  %v11041_v14 = vsel %vm14309_vm3, %v3742_v10, %v3783_v32 }
 0x10e   :  { %vm1450_vm4 = vcmp.eq.s32.totalorder %v1448_v48, 0  ;;  %vm1453_vm9 = vcmp.eq.s32.totalorder %v1448_v48, 2  ;;  %v1980_v26 = vmul.f32 %v10938_v16, %v625_v62  ;;  %v3677_v46 = vrot.slane %v11033_v15, 4  ;;  %v11063_v16 = vld [vmem:[%s14224_s0 + $0x10] sm:$0xff] }
 0x10f   :  { %vm3927_vm8 = vcmp.lt.s32.totalorder %v10868_v1, 0  ;;  %v9777_v5 = vpop.eup %9776  ;;  %v11052_v17 = vadd.s32 %v10999_v21, %v10990_v38  ;;  %v3988_v13 = vshll.u32 %v3987_v12, 30  ;;  %v4148_v3 = vsub.s32 32, %v4147_v6 }
 0x110   :  { %v11054_v34 = vshll.u32 %v4141_v4, 8  ;;  %v9779_v8 = vpop.eup %9778  ;;  %v1454_v58 = vxor.u32 2147483648, %v9777_v5  ;;  %v3824_v19 = vand.u32 2139095040, %v11041_v14  ;;  %v11058_v54 = vmul.f32 2.0, %v11046_v33 }
 0x111   :  { %v3746_v20 = vrot.slane %v11063_v16, 6  ;;  %v1451_v38 = vxor.u32 2147483648, %v9779_v8  ;;  %v11066_v21 = vsub.s32 %v3985_v35, %v3988_v13  ;;  %v3821_v52 = vand.u32 2147483647, %v11041_v14 }
 0x112   :  { %v3747_v60 = vrot.slane %v11046_v33, 6  ;;  %v1455_v29 = vsel %vm1453_vm9, %v1454_v58, %v9779_v8  ;;  %v3124_v7 = vsel %vm3122_vm6, %v1454_v58, %v9779_v8  ;;  %v4011_v27 = vsub.s32 4, %v3987_v12  ;;  %v11073_v39 = vpop.eup %9780 }
 0x113   :  { %v4150_v28 = vshll.u32 %v14243_v41, %v4147_v6  ;;  %v1452_v50 = vsel %vm1450_vm4, %v9777_v5, %v1451_v38  ;;  %v3121_v0 = vsel %vm3119_vm14, %v9777_v5, %v1451_v38  ;;  %v3991_v53 = vsub.s32 0, %v11066_v21 }
 0x114   :  { %v4151_v25 = vshrl.u32 %v14233_v43, %v4148_v3  ;;  %v1456_v9 = vsel %vm1449_vm15, %v1452_v50, %v1455_v29  ;;  %v3125_v35 = vsel %vm3118_vm0, %v3121_v0, %v3124_v7  ;;  %v4146_v61 = vshrl.u32 %v4145_v2, 5 }
 0x115   :  { %v3825_v10 = vshrl.u32 %v3824_v19, 23  ;;  %v1457_v32 = vsel %vm1446_vm7, nan, %v1456_v9  ;;  %v11085_v62 = vsel %vm1446_vm7, nan, %v3125_v35  ;;  %v9318_v59 = vmin.u32 %v3991_v53, %v11066_v21 }
 0x116   :  { %v11090_v4 = vand.u32 8388607, %v3821_v52  ;;  %v1988_v48 = vmul.f32 %v11073_v39, %v1457_v32  ;;  %v4153_v22 = vshll.u32 %v14233_v43, %v4147_v6  ;;  %v4156_v2 = vshll.u32 %v14245_v45, %v4147_v6 }
 0x117   :  { %v4159_v5 = vshll.u32 %v14251_v47, %v4147_v6  ;;  %vm11098_vm11 = vcmp.le.f32.partialorder %v3925_v63, 0.7853982  ;;  %v3993_v13 = vclz %v9318_v59  ;;  %v4012_v8 = vsel %vm3927_vm8, %v4011_v27, %v3987_v12 }
 0x118   :  { %v4149_v58 = vshrl.u32 %v14243_v41, %v4148_v3  ;;  %v4152_v19 = vor.u32 %v4151_v25, %v4150_v28  ;;  %v3717_v38 = vsel %vm3674_vm13, %v1988_v48, %v3677_v46  ;;  %v4154_v29 = vshrl.u32 %v14245_v45, %v4148_v3 }
 0x119   :  { %v4157_v7 = vshrl.u32 %v14251_v47, %v4148_v3  ;;  %v4160_v63 = vshrl.u32 %v14237_v49, %v4148_v3  ;;  %v11111_v50 = vpack.c.bf16 %v3717_v38, %v1980_v26  ;;  %v9319_v0 = vadd.s32 4294967294, %v3993_v13 }
 0x11a   :  { %v4162_v53 = vshll.u32 %v14237_v49, %v4147_v6  ;;  %v4163_v12 = vshrl.u32 %v14235_v57, %v4148_v3  ;;  %v4155_v27 = vor.u32 %v4154_v29, %v4153_v22  ;;  %vm4165_vm1 = vcmp.lt.s32.totalorder %v4146_v61, 1 }
 0x11b   :  { %14312 = vst [vmem:[#allocation5_spill] sm:$0xff] %v11111_v50  ;;  %v4158_v9 = vor.u32 %v4157_v7, %v4156_v2  ;;  %v4161_v28 = vor.u32 %v4160_v63, %v4159_v5  ;;  %5656 = vmatpush1.bf16.msra.mxu1 %v11111_v50  ;;  %vm9320_vm7 = vcmp.lt.s32.totalorder %v9319_v0, 0  ;;  %vm4166_vm5 = vcmp.lt.s32.totalorder %v4146_v61, 2 }
 0x11c   :  { %v4164_v25 = vor.u32 %v4163_v12, %v4162_v53  ;;  %vm4167_vm0 = vcmp.lt.s32.totalorder %v4146_v61, 3  ;;  %v3996_v35 = vsel %vm9320_vm7, 0, %v9319_v0  ;;  %vm4168_vm14 = vcmp.lt.s32.totalorder %v4146_v61, 4  ;;  %v5513_v61 = vld [vmem:[%s14226_s2] sm:$0xff] }
 0x11d   :  { %v4169_v26 = vsel %vm4165_vm1, %v4149_v58, %v4152_v19  ;;  %v4173_v32 = vsel %vm4165_vm1, %v4152_v19, %v4155_v27  ;;  %v3997_v59 = vsub.s32 32, %v3996_v35  ;;  %v3998_v6 = vshll.u32 %v11066_v21, %v3996_v35 }
 0x11e   :  { %v4001_v3 = vsub.s32 4294967266, %v3996_v35  ;;  %v4170_v48 = vsel %vm4168_vm14, %v4158_v9, 2102212464  ;;  %v4174_v2 = vsel %vm4168_vm14, %v4161_v28, 920167782  ;;  %v4177_v5 = vsel %vm4165_vm1, %v4155_v27, %v4158_v9 }
 0x11f   :  { %v4171_v22 = vsel %vm4167_vm0, %v4155_v27, %v4170_v48  ;;  %v4178_v13 = vsel %vm4168_vm14, %v4164_v25, 1326507024  ;;  %v3999_v38 = vshrl.u32 %v11052_v17, %v3997_v59  ;;  %v4175_v7 = vsel %vm4167_vm0, %v4158_v9, %v4174_v2 }
 0x120   :  { %v4002_v29 = vadd.s32 127, %v4001_v3  ;;  %v3787_v58 = vrot.slane %v10417_v31, 3  ;;  %v4014_v19 = vsel %vm11098_vm11, 0, %v4012_v8  ;;  %v4176_v21 = vsel %vm4166_vm5, %v4173_v32, %v4175_v7 }
 0x121   :  { %v4179_v63 = vsel %vm4167_vm0, %v4161_v28, %v4178_v13  ;;  %v9313_v0 = vadd.s32 4294967169, %v3825_v10  ;;  %v4000_v53 = vor.u32 %v3999_v38, %v3998_v6  ;;  %v4172_v27 = vsel %vm4166_vm5, %v4169_v26, %v4171_v22 }
 0x122   :  { %v4003_v12 = vshll.u32 %v4002_v29, 23  ;;  %v4180_v25 = vsel %vm4166_vm5, %v4177_v5, %v4179_v63  ;;  %v11135_v31 = vmul.u32.u64.low %v11054_v34, %v4176_v21  ;;  %v11136_v9 = vmul.u32.u64.high %v11054_v34, %v4176_v21, %v11135_v31 }
 0x123   :  { %v11131_v17 = vmul.u32.u64.low %v11054_v34, %v4180_v25  ;;  %v11132_v35 = vmul.u32.u64.high %v11054_v34, %v4180_v25, %v11131_v17  ;;  %v4007_v32 = vcvt.s32.f32 %v4000_v53  ;;  %v4018_v59 = vadd.s32 3, %v4014_v19 }
 0x124   :  { %v4004_v8 = vor.u32 4788187, %v4003_v12  ;;  %v3831_v28 = vadd.s32 1, %v9313_v0  ;;  %v11141_v10 = vmul.f32 %v11073_v39, %v11085_v62  ;;  %v4188_v6 = vmul.u32 %v11054_v34, %v4172_v27 }
 0x125   :  { %v3788_v3 = vrot.slane %v11058_v54, 3  ;;  %v14239_v48 = vmov 0   ;;  %vm4190_vm15 = vc.u32 %v11132_v35, %v11135_v31  ;;  %v4191_v39 = vadd.s32 1, %v11136_v9 }
 0x126   :  { %v4005_v26 = vand.u32 2147483647, %v4004_v8  ;;  %vm3832_vm6 = vcmp.gt.s32.totalorder %v3831_v28, 0  ;;  %5634 = vmatprep.mubr.bf16.mxu0 %v14239_v48  ;;  %5687 = vmatprep.mubr.bf16.mxu1 %v14239_v48  ;;  %v11155_v34 = vand.u32 3, %v4014_v19  ;;  %v3748_v54 = vsel %vm14268_vm10, %v3746_v20, %v3747_v60 }
 0x127   :  { %v3833_v62 = vsel %vm3832_vm6, %v3831_v28, 0  ;;  %9708 = vset.pattern.permute.xlu0 %v14239_v48  ;;  %9709 = vset.pattern.permute.xlu1 %v14239_v48  ;;  %v11162_v5 = vand.u32 3, %v4018_v59  ;;  %v4192_v13 = vsel %vm4190_vm15, %v4191_v39, %v11136_v9  ;;  %v3829_v38 = vor.u32 8388608, %v11090_v4 }
 0x128   :  { %v4008_v22 = vmul.f32 %v4007_v32, %v4005_v26  ;;  %v3835_v2 = vand.u32 31, %v3833_v62  ;;  %5543 = vperm.xlu0 %9708, %v5513_v61   ;;  %v11166_v29 = vshrl.u32 %v3833_v62, 5  ;;  %v4193_v21 = vadd.s32 %v4192_v13, %v4188_v6 }
 0x129   :  { %v3789_v63 = vsel %vm14267_vm12, %v3787_v58, %v3788_v3  ;;  %v3687_v32 = vrot.slane %v11141_v10, 4  ;;  %vm4017_vm1 = vweird.f32 %v10868_v1  ;;  %vm4851_vm5 = vcmp.eq.s32.totalorder %v11155_v34, 0 }
 0x12a   :  { %v4009_v7 = vxor.u32 2147483648, %v4008_v22  ;;  %v3836_v19 = vsub.s32 32, %v3835_v2  ;;  %v3838_v33 = vshll.u32 %v14243_v41, %v3835_v2  ;;  %v3841_v16 = vshll.u32 %v14233_v43, %v3835_v2 }
 0x12b   :  { %v3844_v20 = vshll.u32 %v14245_v45, %v3835_v2  ;;  %v3847_v60 = vshll.u32 %v14251_v47, %v3835_v2  ;;  %v4194_v53 = vadd.s32 536870912, %v4193_v21  ;;  %v3850_v12 = vshll.u32 %v14237_v49, %v3835_v2 }
 0x12c   :  { %v4010_v0 = vsel %vm3927_vm8, %v4009_v7, %v4008_v22  ;;  %v3839_v4 = vshrl.u32 %v14233_v43, %v3836_v19  ;;  %v3842_v27 = vshrl.u32 %v14245_v45, %v3836_v19  ;;  %v3845_v25 = vshrl.u32 %v14251_v47, %v3836_v19 }
 0x12d   :  { %v4013_v58 = vsel %vm11098_vm11, %v10868_v1, %v4010_v0  ;;  %v3848_v17 = vshrl.u32 %v14237_v49, %v3836_v19  ;;  %v11183_v9 = vshrl.u32 %v4194_v53, 30  ;;  %v3851_v8 = vshrl.u32 %v14235_v57, %v3836_v19 }
 0x12e   :  { %9782 = vcosq.f32 %v4013_v58  ;;  %v3837_v59 = vshrl.u32 %v14243_v41, %v3836_v19  ;;  %v11189_v11 = vsel %vm14309_vm3, %v3748_v54, %v3789_v63  ;;  %v3840_v26 = vor.u32 %v3839_v4, %v3838_v33 }
 0x12f   :  { %9784 = vsinq.f32 %v4013_v58  ;;  %v3849_v28 = vor.u32 %v3848_v17, %v3847_v60  ;;  %v4196_v61 = vshll.u32 %v11183_v9, 30  ;;  %v3843_v6 = vor.u32 %v3842_v27, %v3841_v16 }
 0x130   :  { %v3846_v3 = vor.u32 %v3845_v25, %v3844_v20  ;;  %v3852_v39 = vor.u32 %v3851_v8, %v3850_v12  ;;  %vm3853_vm4 = vcmp.lt.s32.totalorder %v11166_v29, 1  ;;  %vm3855_vm9 = vcmp.lt.s32.totalorder %v11166_v29, 3 }
 0x131   :  { %vm3856_vm8 = vcmp.lt.s32.totalorder %v11166_v29, 4  ;;  %vm4850_vm11 = vcmp.lt.s32.totalorder %v11155_v34, 2  ;;  %v11196_v10 = vsub.s32 %v4193_v21, %v4196_v61  ;;  %v3869_v2 = vshll.u32 %v3829_v38, 8 }
 0x132   :  { %v3858_v62 = vsel %vm3856_vm8, %v3846_v3, 2102212464  ;;  %v3862_v22 = vsel %vm3856_vm8, %v3849_v28, 920167782  ;;  %v4032_v54 = vand.u32 2139095040, %v11189_v11  ;;  %vm3854_vm7 = vcmp.lt.s32.totalorder %v11166_v29, 2 }
 0x133   :  { %v4199_v13 = vsub.s32 0, %v11196_v10  ;;  %v3857_v7 = vsel %vm3853_vm4, %v3837_v59, %v3840_v26  ;;  %v3861_v19 = vsel %vm3853_vm4, %v3840_v26, %v3843_v6  ;;  %v3859_v21 = vsel %vm3855_vm9, %v3843_v6, %v3858_v62 }
 0x134   :  { %v3863_v63 = vsel %vm3855_vm9, %v3846_v3, %v3862_v22  ;;  %v3866_v33 = vsel %vm3856_vm8, %v3852_v39, 1326507024  ;;  %v11213_v38 = vsel %vm3674_vm13, %v3677_v46, %v3687_v32  ;;  %vm4854_vm0 = vcmp.eq.s32.totalorder %v11155_v34, 2 }
 0x135   :  { %v9326_v16 = vmin.u32 %v4199_v13, %v11196_v10  ;;  %v3865_v20 = vsel %vm3853_vm4, %v3843_v6, %v3846_v3  ;;  %vm4020_vm14 = vcmp.lt.s32.totalorder %v11162_v5, 2  ;;  %vm4021_vm6 = vcmp.eq.s32.totalorder %v11162_v5, 0 }
 0x136   :  { %v3864_v60 = vsel %vm3854_vm7, %v3861_v19, %v3863_v63  ;;  %v3867_v15 = vsel %vm3855_vm9, %v3849_v28, %v3866_v33  ;;  %vm4024_vm15 = vcmp.eq.s32.totalorder %v11162_v5, 2  ;;  %v3860_v53 = vsel %vm3854_vm7, %v3857_v7, %v3859_v21 }
 0x137   :  { %v4201_v0 = vclz %v9326_v16  ;;  %v4033_v4 = vshrl.u32 %v4032_v54, 23  ;;  %v3868_v27 = vsel %vm3854_vm7, %v3865_v20, %v3867_v15  ;;  %v4189_v6 = vadd.s32 %v11135_v31, %v11132_v35 }
 0x138   :  { %v9783_v46 = vpop.eup %9782  ;;  %v11231_v25 = vmul.u32.u64.low %v3869_v2, %v3864_v60  ;;  %v11232_v17 = vmul.u32.u64.high %v3869_v2, %v3864_v60, %v11231_v25  ;;  %v11235_v59 = vmul.u32.u64.low %v3869_v2, %v3868_v27  ;;  %v11236_v28 = vmul.u32.u64.high %v3869_v2, %v3868_v27, %v11235_v59 }
 0x139   :  { %v9785_v12 = vpop.eup %9784  ;;  %v4025_v58 = vxor.u32 2147483648, %v9783_v46  ;;  %v9327_v32 = vadd.s32 4294967294, %v4201_v0  ;;  %v3876_v3 = vmul.u32 %v3869_v2, %v3860_v53  ;;  %v9321_v62 = vadd.s32 4294967169, %v4033_v4 }
 0x13a   :  { %v4022_v8 = vxor.u32 2147483648, %v9785_v12  ;;  %v3879_v7 = vadd.s32 1, %v11232_v17  ;;  %v14313_v5 = vrot.slane %v10249_v36, 4  ;;  %vm3878_vm4 = vc.u32 %v11236_v28, %v11231_v25 }
 0x13b   :  { %v4026_v61 = vsel %vm4024_vm15, %v4025_v58, %v9785_v12  ;;  %v4856_v26 = vsel %vm4854_vm0, %v4025_v58, %v9785_v12  ;;  %vm9328_vm3 = vcmp.lt.s32.totalorder %v9327_v32, 0  ;;  %v4219_v16 = vsub.s32 4, %v11183_v9  ;;  %v11281_v12 = vld [vmem:[%s14224_s0 + $0x28] sm:$0xff] }
 0x13c   :  { %v4023_v29 = vsel %vm4021_vm6, %v9783_v46, %v4022_v8  ;;  %v4853_v39 = vsel %vm4851_vm5, %v9783_v46, %v4022_v8  ;;  %v4204_v13 = vsel %vm9328_vm3, 0, %v9327_v32  ;;  %v3686_v21 = vsel %vm3674_vm13, %v14313_v5, %v3685_v37 }
 0x13d   :  { %v4027_v22 = vsel %vm4020_vm14, %v4023_v29, %v4026_v61  ;;  %v4857_v54 = vsel %vm4850_vm11, %v4853_v39, %v4856_v26  ;;  %v4205_v2 = vsub.s32 32, %v4204_v13  ;;  %v4206_v19 = vshll.u32 %v11196_v10, %v4204_v13 }
 0x13e   :  { %v4028_v35 = vsel %vm4017_vm1, nan, %v4027_v22  ;;  %v4858_v31 = vsel %vm4017_vm1, nan, %v4857_v54  ;;  %v4209_v63 = vsub.s32 4294967266, %v4204_v13  ;;  %v3880_v1 = vsel %vm3878_vm4, %v3879_v7, %v11232_v17 }
 0x13f   :  { %v11261_v34 = vrot.slane %v4858_v31, 2  ;;  %v4207_v33 = vshrl.u32 %v4189_v6, %v4205_v2  ;;  %v4039_v20 = vadd.s32 1, %v9321_v62  ;;  %vm4135_vm9 = vcmp.lt.s32.totalorder %v10994_v40, 0 }
 0x140   :  { %v4210_v36 = vadd.s32 127, %v4209_v63  ;;  %v3881_v51 = vadd.s32 %v3880_v1, %v3876_v3  ;;  %v4029_v53 = vand.u32 2147483647, %v11189_v11  ;;  %v4220_v58 = vsel %vm4135_vm9, %v4219_v16, %v11183_v9 }
 0x141   :  { %14314 = vst [vmem:[#allocation6_spill] sm:$0xff] %v11261_v34  ;;  %v11269_v10 = vsel %vm14288_vm2, %v4028_v35, %v11261_v34  ;;  %v4208_v15 = vor.u32 %v4207_v33, %v4206_v19  ;;  %vm4040_vm8 = vcmp.gt.s32.totalorder %v4039_v20, 0  ;;  %v3689_v17 = vrot.slane %v10865_v44, 4 }
 0x142   :  { %14315 = vst [vmem:[#allocation7_spill] sm:$0xff] %v11269_v10  ;;  %v11273_v37 = vpack.c.bf16 %v11269_v10, %v3686_v21  ;;  %v4211_v46 = vshll.u32 %v4210_v36, 23  ;;  %v3882_v0 = vadd.s32 536870912, %v3881_v51  ;;  %v4041_v4 = vsel %vm4040_vm8, %v4039_v20, 0 }
 0x143   :  { %v4043_v27 = vand.u32 31, %v4041_v4  ;;  %v4215_v32 = vcvt.s32.f32 %v4208_v15  ;;  %vm11292_vm11 = vcmp.le.f32.partialorder %v4133_v18, 0.7853982  ;;  %v11297_v6 = vmul.f32 2.0, %v11281_v12 }
 0x144   :  { %14316 = vst [vmem:[#allocation8_spill] sm:$0xff] %v11273_v37  ;;  %5604 = vmatprep.subr.bf16.mxu0 %v11273_v37  ;;  %v4212_v8 = vor.u32 4788187, %v4211_v46  ;;  %v11288_v59 = vshrl.u32 %v3882_v0, 30  ;;  %v11300_v3 = vmul.f32 4.0, %v11281_v12  ;;  %v4222_v29 = vsel %vm11292_vm11, 0, %v4220_v58 }
 0x145   :  { %v4044_v26 = vsub.s32 32, %v4043_v27  ;;  %v4036_v62 = vand.u32 8388607, %v4029_v53  ;;  %v4046_v18 = vshll.u32 %v14243_v41, %v4043_v27  ;;  %v4049_v54 = vshll.u32 %v14233_v43, %v4043_v27 }
 0x146   :  { %v4213_v9 = vand.u32 2147483647, %v4212_v8  ;;  %v3884_v39 = vshll.u32 %v11288_v59, 30  ;;  %v4052_v13 = vshll.u32 %v14245_v45, %v4043_v27  ;;  %v4226_v19 = vadd.s32 3, %v4222_v29 }
 0x147   :  { %v4047_v22 = vshrl.u32 %v14233_v43, %v4044_v26  ;;  %v4050_v31 = vshrl.u32 %v14245_v45, %v4044_v26  ;;  %v4053_v2 = vshrl.u32 %v14251_v47, %v4044_v26  ;;  %v4042_v5 = vshrl.u32 %v4041_v4, 5 }
 0x148   :  { %v4216_v7 = vmul.f32 %v4215_v32, %v4213_v9  ;;  %v11311_v35 = vsub.s32 %v3881_v51, %v3884_v39  ;;  %v4055_v21 = vshll.u32 %v14251_v47, %v4043_v27  ;;  %v4056_v63 = vshrl.u32 %v14237_v49, %v4044_v26 }
 0x149   :  { %v11317_v16 = vand.u32 3, %v4222_v29  ;;  %v4037_v20 = vor.u32 8388608, %v4036_v62  ;;  %v4045_v36 = vshrl.u32 %v14243_v41, %v4044_v26  ;;  %v4048_v51 = vor.u32 %v4047_v22, %v4046_v18 }
 0x14a   :  { %v4217_v33 = vxor.u32 2147483648, %v4216_v7  ;;  %v3887_v1 = vsub.s32 0, %v11311_v35  ;;  %v4058_v15 = vshll.u32 %v14237_v49, %v4043_v27  ;;  %v4059_v46 = vshrl.u32 %v14235_v57, %v4044_v26 }
 0x14b   :  { %v4051_v58 = vor.u32 %v4050_v31, %v4049_v54  ;;  %v4054_v8 = vor.u32 %v4053_v2, %v4052_v13  ;;  %v4057_v9 = vor.u32 %v4056_v63, %v4055_v21  ;;  %vm4061_vm1 = vcmp.lt.s32.totalorder %v4042_v5, 1 }
 0x14c   :  { %v4218_v0 = vsel %vm4135_vm9, %v4217_v33, %v4216_v7  ;;  %v9314_v4 = vmin.u32 %v3887_v1, %v11311_v35  ;;  %v4060_v29 = vor.u32 %v4059_v46, %v4058_v15  ;;  %v11329_v39 = vand.u32 3, %v4226_v19 }
 0x14d   :  { %v4221_v32 = vsel %vm11292_vm11, %v10994_v40, %v4218_v0  ;;  %v3877_v27 = vadd.s32 %v11231_v25, %v11236_v28  ;;  %vm4062_vm7 = vcmp.lt.s32.totalorder %v4042_v5, 2  ;;  %vm4063_vm5 = vcmp.lt.s32.totalorder %v4042_v5, 3 }
 0x14e   :  { %9786 = vcosq.f32 %v4221_v32  ;;  %v3889_v26 = vclz %v9314_v4  ;;  %v4077_v62 = vshll.u32 %v4037_v20, 8  ;;  %vm3823_vm0 = vcmp.lt.s32.totalorder %v11041_v14, 0 }
 0x14f   :  { %9788 = vsinq.f32 %v4221_v32  ;;  %vm4064_vm14 = vcmp.lt.s32.totalorder %v4042_v5, 4  ;;  %v4065_v61 = vsel %vm4061_vm1, %v4045_v36, %v4048_v51  ;;  %v4069_v22 = vsel %vm4061_vm1, %v4048_v51, %v4051_v58 }
 0x150   :  { %v9315_v18 = vadd.s32 4294967294, %v3889_v26  ;;  %v4066_v54 = vsel %vm4064_vm14, %v4054_v8, 2102212464  ;;  %v4070_v13 = vsel %vm4064_vm14, %v4057_v9, 920167782  ;;  %v4073_v7 = vsel %vm4061_vm1, %v4051_v58, %v4054_v8 }
 0x151   :  { %v4074_v31 = vsel %vm4064_vm14, %v4060_v29, 1326507024  ;;  %vm5056_vm6 = vcmp.lt.s32.totalorder %v11317_v16, 2  ;;  %v4067_v25 = vsel %vm4063_vm5, %v4051_v58, %v4066_v54  ;;  %v4071_v28 = vsel %vm4063_vm5, %v4054_v8, %v4070_v13 }
 0x152   :  { %vm9316_vm15 = vcmp.lt.s32.totalorder %v9315_v18, 0  ;;  %v4075_v2 = vsel %vm4063_vm5, %v4057_v9, %v4074_v31  ;;  %vm4225_vm3 = vweird.f32 %v10994_v40  ;;  %v3907_v21 = vsub.s32 4, %v11288_v59 }
 0x153   :  { %v3892_v19 = vsel %vm9316_vm15, 0, %v9315_v18  ;;  %v4072_v63 = vsel %vm4062_vm7, %v4069_v22, %v4071_v28  ;;  %v4076_v33 = vsel %vm4062_vm7, %v4073_v7, %v4075_v2  ;;  %vm11344_vm4 = vcmp.le.f32.partialorder %v3821_v52, 0.7853982 }
 0x154   :  { %v3893_v20 = vsub.s32 32, %v3892_v19  ;;  %v3894_v36 = vshll.u32 %v11311_v35, %v3892_v19  ;;  %v3897_v51 = vsub.s32 4294967266, %v3892_v19  ;;  %v4068_v15 = vsel %vm4062_vm7, %v4065_v61, %v4067_v25 }
 0x155   :  { %v11350_v46 = vmul.u32.u64.low %v4077_v62, %v4076_v33  ;;  %v11351_v0 = vmul.u32.u64.high %v4077_v62, %v4076_v33, %v11350_v46  ;;  %v11353_v4 = vmul.u32.u64.low %v4077_v62, %v4072_v63  ;;  %v11354_v58 = vmul.u32.u64.high %v4077_v62, %v4072_v63, %v11353_v4 }
 0x156   :  { %vm5057_vm9 = vcmp.eq.s32.totalorder %v11317_v16, 0  ;;  %v3895_v8 = vshrl.u32 %v3877_v27, %v3893_v20  ;;  %v3898_v52 = vadd.s32 127, %v3897_v51  ;;  %v68_v32 = vrot.slane %v11297_v6, 5 }
 0x157   :  { %vm4228_vm8 = vcmp.lt.s32.totalorder %v11329_v39, 2  ;;  %vm4229_vm11 = vcmp.eq.s32.totalorder %v11329_v39, 0  ;;  %vm4232_vm1 = vcmp.eq.s32.totalorder %v11329_v39, 2  ;;  %vm5060_vm7 = vcmp.eq.s32.totalorder %v11317_v16, 2 }
 0x158   :  { %v9787_v35 = vpop.eup %9786  ;;  %v3896_v5 = vor.u32 %v3895_v8, %v3894_v36  ;;  %v3899_v9 = vshll.u32 %v3898_v52, 23  ;;  %v4084_v29 = vmul.u32 %v4077_v62, %v4068_v15  ;;  %v92_v26 = vrot.slane %v11300_v3, 2 }
 0x159   :  { %v9789_v18 = vpop.eup %9788  ;;  %v4233_v61 = vxor.u32 2147483648, %v9787_v35  ;;  %v3908_v27 = vsel %vm3823_vm0, %v3907_v21, %v11288_v59  ;;  %vm4086_vm5 = vc.u32 %v11351_v0, %v11353_v4  ;;  %v4087_v22 = vadd.s32 1, %v11354_v58 }
 0x15a   :  { %v4230_v54 = vxor.u32 2147483648, %v9789_v18  ;;  %v3900_v13 = vor.u32 4788187, %v3899_v9  ;;  %v3903_v7 = vcvt.s32.f32 %v3896_v5  ;;  %vm14321_vm14 = vcmask 1042432  }
 0x15b   :  { %v133_v31 = vsel %vm14321_vm14, %v11281_v12, %v68_v32  ;;  %v4234_v62 = vsel %vm4232_vm1, %v4233_v61, %v9789_v18  ;;  %v5062_v25 = vsel %vm5060_vm7, %v4233_v61, %v9789_v18  ;;  %v4088_v28 = vsel %vm4086_vm5, %v4087_v22, %v11354_v58 }
 0x15c   :  { %v52_v59 = vmul.f32 8.0, %v11281_v12  ;;  %v4231_v2 = vsel %vm4229_vm11, %v9787_v35, %v4230_v54  ;;  %v5059_v19 = vsel %vm5057_vm9, %v9787_v35, %v4230_v54  ;;  %v3901_v21 = vand.u32 2147483647, %v3900_v13 }
 0x15d   :  { %v4089_v63 = vadd.s32 %v4088_v28, %v4084_v29  ;;  %v4235_v33 = vsel %vm4228_vm8, %v4231_v2, %v4234_v62  ;;  %v5063_v20 = vsel %vm5056_vm6, %v5059_v19, %v5062_v25  ;;  %v3910_v36 = vsel %vm11344_vm4, 0, %v3908_v27 }
 0x15e   :  { %v11389_v51 = vsel %vm14288_vm2, %v133_v31, %v92_v26  ;;  %v4236_v15 = vsel %vm4225_vm3, nan, %v4235_v33  ;;  %v5064_v46 = vsel %vm4225_vm3, nan, %v5063_v20  ;;  %v3904_v58 = vmul.f32 %v3903_v7, %v3901_v21 }
 0x15f   :  { %v4090_v8 = vadd.s32 536870912, %v4089_v63  ;;  %v3690_v16 = vsel %vm3674_vm13, %v3678_v24, %v3689_v17  ;;  %v11400_v39 = vrot.slane %v5064_v46, 2  ;;  %v837_v35 = vand.u32 2139095040, %v11389_v51 }
 0x160   :  { %v3905_v52 = vxor.u32 2147483648, %v3904_v58  ;;  %v3914_v40 = vadd.s32 3, %v3910_v36  ;;  %v116_v9 = vrot.slane %v52_v59, 7  ;;  %v14232_v29 = vand.u32 2147483647, %v11389_v51 }
 0x161   :  { %14322 = vst [vmem:[#allocation9_spill] sm:$0xff] %v11400_v39  ;;  %v4091_v32 = vshrl.u32 %v4090_v8, 30  ;;  %v11405_v5 = vsel %vm14288_vm2, %v4236_v15, %v11400_v39  ;;  %v11419_v61 = vand.u32 3, %v3910_v36  ;;  %v838_v22 = vshrl.u32 %v837_v35, 23 }
 0x162   :  { %14323 = vst [vmem:[#allocation10_spill] sm:$0xff] %v11405_v5  ;;  %v11409_v44 = vpack.c.bf16 %v11405_v5, %v3690_v16  ;;  %v3906_v24 = vsel %vm3823_vm0, %v3905_v52, %v3904_v58  ;;  %v3915_v54 = vand.u32 3, %v3914_v40  ;;  %vm14325_vm6 = vcmask 1040384  }
 0x163   :  { %v4092_v17 = vshll.u32 %v4091_v32, 30  ;;  %v3909_v18 = vsel %vm11344_vm4, %v11041_v14, %v3906_v24  ;;  %v11424_v13 = vsel %vm14325_vm6, %v92_v26, %v116_v9  ;;  %v841_v7 = vand.u32 8388607, %v14232_v29 }
 0x164   :  { %14324 = vst [vmem:[#allocation11_spill] sm:$0xff] %v11409_v44  ;;  %5657 = vmatprep.subr.bf16.mxu1 %v11409_v44  ;;  %9790 = vcosq.f32 %v3909_v18  ;;  %v4115_v1 = vsub.s32 4, %v4091_v32  ;;  %v9205_v62 = vadd.s32 4294967169, %v838_v22  ;;  %vm11431_vm0 = vcmp.le.f32.partialorder %v4029_v53, 0.7853982 }
 0x165   :  { %v11421_v27 = vsub.s32 %v4089_v63, %v4092_v17  ;;  %9792 = vsinq.f32 %v3909_v18  ;;  %vm4031_vm15 = vcmp.lt.s32.totalorder %v11189_v11, 0  ;;  %v11438_v28 = vpack.c.bf16 %v11261_v34, %v11261_v34 }
 0x166   :  { %vm4747_vm3 = vcmp.lt.s32.totalorder %v11419_v61, 2  ;;  %v844_v59 = vadd.s32 1, %v9205_v62  ;;  %v1669_v2 = vand.u32 2139095040, %v11424_v13  ;;  %vm3913_vm4 = vweird.f32 %v11041_v14 }
 0x167   :  { %v4095_v31 = vsub.s32 0, %v11421_v27  ;;  %14328 = vst [vmem:[#allocation12_spill] sm:$0xff] %v11438_v28  ;;  %vm3916_vm9 = vcmp.lt.s32.totalorder %v3915_v54, 2  ;;  %vm4748_vm8 = vcmp.eq.s32.totalorder %v11419_v61, 0  ;;  %vm4751_vm11 = vcmp.eq.s32.totalorder %v11419_v61, 2 }
 0x168   :  { %v842_v53 = vor.u32 8388608, %v841_v7  ;;  %v4116_v21 = vsel %vm4031_vm15, %v4115_v1, %v4091_v32  ;;  %vm845_vm1 = vcmp.gt.s32.totalorder %v844_v59, 0  ;;  %v1670_v63 = vshrl.u32 %v1669_v2, 23 }
 0x169   :  { %v9322_v26 = vmin.u32 %v4095_v31, %v11421_v27  ;;  %vm3917_vm7 = vcmp.eq.s32.totalorder %v3915_v54, 0  ;;  %vm3920_vm5 = vcmp.eq.s32.totalorder %v3915_v54, 2  ;;  %v11449_v33 = vmul.f32 16.0, %v11281_v12 }
 0x16a   :  { %v846_v20 = vsel %vm845_vm1, %v844_v59, 0  ;;  %v4085_v36 = vadd.s32 %v11353_v4, %v11351_v0  ;;  %v1666_v58 = vand.u32 2147483647, %v11424_v13  ;;  %v11456_v8 = vsel %vm11431_vm0, 0, %v4116_v21 }
 0x16b   :  { %v4097_v19 = vclz %v9322_v26  ;;  %v848_v46 = vand.u32 31, %v846_v20  ;;  %v11458_v16 = vshrl.u32 %v846_v20, 5  ;;  %v11460_v52 = vshll.u32 %v842_v53, 8 }
 0x16c   :  { %v11462_v32 = vadd.s32 4294967169, %v1670_v63  ;;  %vm14286_vm6 = vcmask 293888   ;;  %v183_v25 = vrot.slane %v11281_v12, 3  ;;  %v14349_v5 = vmov 1326507024  }
 0x16d   :  { %v9323_v15 = vadd.s32 4294967294, %v4097_v19  ;;  %v849_v40 = vsub.s32 32, %v848_v46  ;;  %v851_v9 = vshll.u32 %v14243_v41, %v848_v46  ;;  %v854_v0 = vshll.u32 %v14233_v43, %v848_v46 }
 0x16e   :  { %v9791_v35 = vpop.eup %9790  ;;  %v857_v18 = vshll.u32 %v14245_v45, %v848_v46  ;;  %v860_v22 = vshll.u32 %v14251_v47, %v848_v46 }
 0x16f   :  { %vm9324_vm14 = vcmp.lt.s32.totalorder %v9323_v15, 0  ;;  %v9793_v4 = vpop.eup %9792  ;;  %v3921_v24 = vxor.u32 2147483648, %v9791_v35  ;;  %v850_v2 = vshrl.u32 %v14243_v41, %v849_v40  ;;  %v852_v53 = vshrl.u32 %v14233_v43, %v849_v40 }
 0x170   :  { %v4100_v17 = vsel %vm9324_vm14, 0, %v9323_v15  ;;  %v3918_v7 = vxor.u32 2147483648, %v9793_v4  ;;  %v855_v23 = vshrl.u32 %v14245_v45, %v849_v40  ;;  %v858_v54 = vshrl.u32 %v14251_v47, %v849_v40 }
 0x171   :  { %v4101_v31 = vsub.s32 32, %v4100_v17  ;;  %v4102_v1 = vshll.u32 %v11421_v27, %v4100_v17  ;;  %v4105_v62 = vsub.s32 4294967266, %v4100_v17  ;;  %v3922_v26 = vsel %vm3920_vm5, %v3921_v24, %v9793_v4 }
 0x172   :  { %v4753_v59 = vsel %vm4751_vm11, %v3921_v24, %v9793_v4  ;;  %v3919_v19 = vsel %vm3917_vm7, %v9791_v35, %v3918_v7  ;;  %v4750_v21 = vsel %vm4748_vm8, %v9791_v35, %v3918_v7  ;;  %v853_v17 = vor.u32 %v852_v53, %v851_v9 }
 0x173   :  { %v4103_v63 = vshrl.u32 %v4085_v36, %v4101_v31  ;;  %v4106_v20 = vadd.s32 127, %v4105_v62  ;;  %v3923_v15 = vsel %vm3916_vm9, %v3919_v19, %v3922_v26  ;;  %v4754_v27 = vsel %vm4747_vm3, %v4750_v21, %v4753_v59 }
 0x174   :  { %v3924_v4 = vsel %vm3913_vm4, nan, %v3923_v15  ;;  %v4755_v24 = vsel %vm3913_vm4, nan, %v4754_v27  ;;  %v856_v36 = vor.u32 %v855_v23, %v854_v0  ;;  %v861_v35 = vshrl.u32 %v14237_v49, %v849_v40 }
 0x175   :  { %v4104_v60 = vor.u32 %v4103_v63, %v4102_v1  ;;  %v4107_v29 = vshll.u32 %v4106_v20, 23  ;;  %v11485_v43 = vrot.slane %v4755_v24, 2  ;;  %v863_v9 = vshll.u32 %v14237_v49, %v848_v46 }
 0x176   :  { %v864_v31 = vshrl.u32 %v14235_v57, %v849_v40  ;;  %v859_v62 = vor.u32 %v858_v54, %v857_v18  ;;  %v862_v23 = vor.u32 %v861_v35, %v860_v22  ;;  %vm866_vm3 = vcmp.lt.s32.totalorder %v11458_v16, 1 }
 0x177   :  { %14329 = vst [vmem:[#allocation13_spill] sm:$0xff] %v11485_v43  ;;  %v4108_v61 = vor.u32 4788187, %v4107_v29  ;;  %v4111_v7 = vcvt.s32.f32 %v4104_v60  ;;  %v11493_v14 = vsel %vm14288_vm2, %v3924_v4, %v11485_v43  ;;  %v5533_v1 = vpack.c.bf16 %v11485_v43, %v11485_v43 }
 0x178   :  { %14330 = vst [vmem:[#allocation14_spill] sm:$0xff] %v11493_v14  ;;  %v11499_v0 = vpack.c.bf16 %v11493_v14, %v11018_v30  ;;  %v865_v60 = vor.u32 %v864_v31, %v863_v9  ;;  %vm867_vm4 = vcmp.lt.s32.totalorder %v11458_v16, 2  ;;  %vm868_vm9 = vcmp.lt.s32.totalorder %v11458_v16, 3 }
 0x179   :  { %v4109_v29 = vand.u32 2147483647, %v4108_v61  ;;  %v11503_v46 = vsel %vm14268_vm10, %v5533_v1, 0  ;;  %vm869_vm8 = vcmp.lt.s32.totalorder %v11458_v16, 4  ;;  %v870_v18 = vsel %vm866_vm3, %v850_v2, %v853_v17  ;;  %v11518_v2 = vld [vmem:[%s14225_s1] sm:$0xff]  }
 0x17a   :  { %14331 = vst [vmem:[#allocation15_spill] sm:$0xff] %v11499_v0  ;;  %14332 = vst [vmem:[#allocation16_spill] sm:$0xff] %v11503_v46  ;;  %5605 = vmatpush1.bf16.msra.mxu0 %v11499_v0  ;;  %v871_v22 = vsel %vm869_vm8, %v859_v62, 2102212464  ;;  %v874_v30 = vsel %vm866_vm3, %v853_v17, %v856_v36  ;;  %v875_v59 = vsel %vm869_vm8, %v862_v23, 920167782  ;;  %v878_v53 = vsel %vm866_vm3, %v856_v36, %v859_v62 }
 0x17b   :  { %v4112_v40 = vmul.f32 %v4111_v7, %v4109_v29  ;;  %9379 = vmatprep.subr.msk.bf16.mxu0 %vm14268_vm10, %v11438_v28  ;;  %v872_v26 = vsel %vm868_vm9, %v856_v36, %v871_v22  ;;  %v879_v19 = vsel %vm869_vm8, %v865_v60, 1326507024  ;;  %v4122_v63 = vadd.s32 3, %v11456_v8 }
 0x17c   :  { %v876_v20 = vsel %vm868_vm9, %v859_v62, %v875_v59  ;;  %v880_v15 = vsel %vm868_vm9, %v862_v23, %v879_v19  ;;  %v11513_v27 = vand.u32 3, %v11456_v8  ;;  %v1676_v24 = vadd.s32 1, %v11462_v32 }
 0x17d   :  { %v4113_v21 = vxor.u32 2147483648, %v4112_v40  ;;  %v877_v17 = vsel %vm867_vm4, %v874_v30, %v876_v20  ;;  %v881_v4 = vsel %vm867_vm4, %v878_v53, %v880_v15  ;;  %v873_v8 = vsel %vm867_vm4, %v870_v18, %v872_v26 }
 0x17e   :  { %5607 = vmatpush1.bf16.msra.mxu0 %v11503_v46  ;;  %v11531_v54 = vmul.u32.u64.low %v11460_v52, %v881_v4  ;;  %v11532_v35 = vmul.u32.u64.high %v11460_v52, %v881_v4, %v11531_v54  ;;  %v11538_v7 = vmul.u32.u64.low %v11460_v52, %v877_v17  ;;  %v11539_v9 = vmul.u32.u64.high %v11460_v52, %v877_v17, %v11538_v7 }
 0x17f   :  { %v4114_v36 = vsel %vm4031_vm15, %v4113_v21, %v4112_v40  ;;  %vm1677_vm11 = vcmp.gt.s32.totalorder %v1676_v24, 0  ;;  %v11542_v32 = vand.u32 3, %v4122_v63  ;;  %v11545_v16 = vmul.f32 64.0, %v11281_v12 }
 0x180   :  { %v4117_v61 = vsel %vm11431_vm0, %v11189_v11, %v4114_v36  ;;  %v1678_v31 = vsel %vm1677_vm11, %v1676_v24, 0  ;;  %v1673_v1 = vand.u32 8388607, %v1666_v58  ;;  %vm4957_vm0 = vcmp.eq.s32.totalorder %v11513_v27, 2  ;;  %v11579_v24 = vld [vmem:[%s14224_s0 + $0x38] sm:$0xff] }
 0x181   :  { %9794 = vcosq.f32 %v4117_v61  ;;  %9380 = vmatmul.mubr.msk.bf16.vlgmr.msra.gmra.mrb[0].mxu0 %vm14286_vm6, %v11518_v2  ;;  %v1680_v62 = vand.u32 31, %v1678_v31  ;;  %v889_v23 = vmul.u32 %v11460_v52, %v873_v8  ;;  %vm891_vm15 = vc.u32 %v11532_v35, %v11538_v7 }
 0x182   :  { %9796 = vsinq.f32 %v4117_v61  ;;  %v11556_v29 = vshrl.u32 %v1678_v31, 5  ;;  %5644 = vmatprep.mubr.bf16.mxu0 %v14239_v48  ;;  %vm4954_vm1 = vcmp.eq.s32.totalorder %v11513_v27, 0  ;;  %v892_v60 = vadd.s32 1, %v11539_v9 }
 0x183   :  { %v1681_v40 = vsub.s32 32, %v1680_v62  ;;  %v1683_v18 = vshll.u32 %v14243_v41, %v1680_v62  ;;  %v14333_v22 = vmov 2475754826   ;;  %vm4124_vm7 = vcmp.lt.s32.totalorder %v11542_v32, 2 }
 0x184   :  { %v1686_v30 = vshll.u32 %v14333_v22, %v1680_v62  ;;  %vm4125_vm5 = vcmp.eq.s32.totalorder %v11542_v32, 0  ;;  %vm4953_vm14 = vcmp.lt.s32.totalorder %v11513_v27, 2  ;;  %v1689_v52 = vshll.u32 %v14245_v45, %v1680_v62 }
 0x185   :  { %v1692_v26 = vshll.u32 %v14251_v47, %v1680_v62  ;;  %v1695_v59 = vshll.u32 %v14237_v49, %v1680_v62  ;;  %vm4121_vm3 = vweird.f32 %v11189_v11  ;;  %v893_v53 = vsel %vm891_vm15, %v892_v60, %v11539_v9 }
 0x186   :  { %v1674_v19 = vor.u32 8388608, %v1673_v1  ;;  %v1684_v21 = vshrl.u32 %v14333_v22, %v1681_v40  ;;  %v1687_v63 = vshrl.u32 %v14245_v45, %v1681_v40  ;;  %v894_v20 = vadd.s32 %v893_v53, %v889_v23 }
 0x187   :  { %v1690_v15 = vshrl.u32 %v14251_v47, %v1681_v40  ;;  %v1693_v17 = vshrl.u32 %v14237_v49, %v1681_v40  ;;  %v1696_v4 = vshrl.u32 %v14235_v57, %v1681_v40  ;;  %vm4128_vm4 = vcmp.eq.s32.totalorder %v11542_v32, 2 }
 0x188   :  { %v1685_v36 = vor.u32 %v1684_v21, %v1683_v18  ;;  %v1688_v8 = vor.u32 %v1687_v63, %v1686_v30  ;;  %vm1698_vm9 = vcmp.lt.s32.totalorder %v11556_v29, 1  ;;  %v895_v54 = vadd.s32 536870912, %v894_v20 }
 0x189   :  { %v1691_v61 = vor.u32 %v1690_v15, %v1689_v52  ;;  %v1694_v9 = vor.u32 %v1693_v17, %v1692_v26  ;;  %v1697_v31 = vor.u32 %v1696_v4, %v1695_v59  ;;  %v1682_v1 = vshrl.u32 %v14243_v41, %v1681_v40 }
 0x18a   :  { %vm1700_vm8 = vcmp.lt.s32.totalorder %v11556_v29, 3  ;;  %vm1701_vm11 = vcmp.lt.s32.totalorder %v11556_v29, 4  ;;  %v11587_v62 = vmul.f32 2.0, %v11579_v24  ;;  %v11589_v60 = vshrl.u32 %v895_v54, 30 }
 0x18b   :  { %v9795_v23 = vpop.eup %9794  ;;  %vm1699_vm15 = vcmp.lt.s32.totalorder %v11556_v29, 2  ;;  %v1707_v18 = vsel %vm1701_vm11, %v1694_v9, 920167782  ;;  %v1714_v30 = vshll.u32 %v1674_v19, 8  ;;  %v1703_v26 = vsel %vm1701_vm11, %v1691_v61, 2102212464 }
 0x18c   :  { %v9797_v53 = vpop.eup %9796  ;;  %v4129_v52 = vxor.u32 2147483648, %v9795_v23  ;;  %v1706_v40 = vsel %vm1698_vm9, %v1685_v36, %v1688_v8  ;;  %v1711_v59 = vsel %vm1701_vm11, %v1697_v31, 1326507024  ;;  %v897_v63 = vshll.u32 %v11589_v60, 30 }
 0x18d   :  { %v4126_v21 = vxor.u32 2147483648, %v9797_v53  ;;  %v1708_v15 = vsel %vm1700_vm8, %v1691_v61, %v1707_v18  ;;  %v1710_v17 = vsel %vm1698_vm9, %v1688_v8, %v1691_v61  ;;  %v1702_v54 = vsel %vm1698_vm9, %v1682_v1, %v1685_v36 }
 0x18e   :  { %v4130_v4 = vsel %vm4128_vm4, %v4129_v52, %v9797_v53  ;;  %v4959_v19 = vsel %vm4957_vm0, %v4129_v52, %v9797_v53  ;;  %v1712_v31 = vsel %vm1700_vm8, %v1694_v9, %v1711_v59  ;;  %v11611_v49 = vsub.s32 %v894_v20, %v897_v63 }
 0x18f   :  { %v4127_v57 = vsel %vm4125_vm5, %v9795_v23, %v4126_v21  ;;  %v4956_v18 = vsel %vm4954_vm1, %v9795_v23, %v4126_v21  ;;  %v1704_v61 = vsel %vm1700_vm8, %v1688_v8, %v1703_v26  ;;  %v1709_v9 = vsel %vm1699_vm15, %v1706_v40, %v1708_v15 }
 0x190   :  { %v4131_v53 = vsel %vm4124_vm7, %v4127_v57, %v4130_v4  ;;  %v4960_v36 = vsel %vm4953_vm14, %v4956_v18, %v4959_v19  ;;  %v1713_v1 = vsel %vm1699_vm15, %v1710_v17, %v1712_v31  ;;  %v231_v8 = vrot.slane %v11545_v16, 2 }
 0x191   :  { %v4132_v23 = vsel %vm4121_vm3, nan, %v4131_v53  ;;  %v4961_v20 = vsel %vm4121_vm3, nan, %v4960_v36  ;;  %v900_v32 = vsub.s32 0, %v11611_v49  ;;  %v11635_v26 = vmul.f32 4.0, %v11579_v24 }
 0x192   :  { %v11629_v57 = vrot.slane %v4961_v20, 2  ;;  %v11631_v27 = vmul.u32.u64.low %v1714_v30, %v1713_v1  ;;  %v11632_v52 = vmul.u32.u64.high %v1714_v30, %v1713_v1, %v11631_v27  ;;  %v1705_v59 = vsel %vm1699_vm15, %v1702_v54, %v1704_v61 }
 0x193   :  { %v9206_v40 = vmin.u32 %v900_v32, %v11611_v49  ;;  %v11640_v21 = vmul.u32.u64.low %v1714_v30, %v1709_v9  ;;  %v11641_v11 = vmul.u32.u64.high %v1714_v30, %v1709_v9, %v11640_v21  ;;  %v11650_v63 = vpack.c.bf16 %v11400_v39, %v11400_v39 }
 0x194   :  { %14334 = vst [vmem:[#allocation17_spill] sm:$0xff] %v11629_v57  ;;  %v11646_v16 = vsel %vm14288_vm2, %v4132_v23, %v11629_v57  ;;  %v5535_v15 = vpack.c.bf16 %v11629_v57, %v11629_v57  ;;  %v70_v17 = vrot.slane %v11587_v62, 5  ;;  %v207_v19 = vrot.slane %v11449_v33, 5 }
 0x195   :  { %14335 = vst [vmem:[#allocation18_spill] sm:$0xff] %v11646_v16  ;;  %14336 = vst [vmem:[#allocation19_spill] sm:$0xff] %v11650_v63  ;;  %v11657_v29 = vpack.c.bf16 %v11646_v16, %v11213_v38  ;;  %v902_v4 = vclz %v9206_v40  ;;  %v1721_v54 = vmul.u32 %v1714_v30, %v1705_v59  ;;  %vm1723_vm0 = vc.u32 %v11632_v52, %v11640_v21 }
 0x196   :  { %vm14338_vm1 = vcmask 1042432   ;;  %v1724_v61 = vadd.s32 1, %v11641_v11  ;;  %v94_v38 = vrot.slane %v11635_v26, 2  ;;  %v11672_v33 = vsel %vm14268_vm10, %v5535_v15, 0 }
 0x197   :  { %14337 = vst [vmem:[#allocation20_spill] sm:$0xff] %v11657_v29  ;;  %5658 = vmatpush1.bf16.msra.mxu1 %v11657_v29  ;;  %v247_v31 = vsel %vm14338_vm1, %v183_v25, %v11300_v3  ;;  %v9207_v18 = vadd.s32 4294967294, %v902_v4  ;;  %14339 = vst [vmem:[#allocation21_spill] sm:$0xff] %v11672_v33  ;;  %vm14340_vm7 = vcmask 1040384   ;;  %v890_v12 = vadd.s32 %v11538_v7, %v11532_v35 }
 0x198   :  { %9382 = vmatprep.subr.msk.bf16.mxu1 %vm14268_vm10, %v11650_v63  ;;  %v263_v30 = vsel %vm14340_vm7, %v207_v19, %v231_v8  ;;  %vm14341_vm5 = vmmov %vm14338_vm1  ;;  %v920_v3 = vsub.s32 4, %v11589_v60  ;;  %v1725_v25 = vsel %vm1723_vm0, %v1724_v61, %v11641_v11  ;;  %v255_v36 = vsel %vm14288_vm2, %v247_v31, %v207_v19 }
 0x199   :  { %v135_v53 = vsel %vm14341_vm5, %v11579_v24, %v70_v17  ;;  %vm9208_vm14 = vcmp.lt.s32.totalorder %v9207_v18, 0  ;;  %v1726_v1 = vadd.s32 %v1725_v25, %v1721_v54  ;;  %v54_v23 = vmul.f32 8.0, %v11579_v24  ;;  %vm14345_vm9 = vmmov %vm14340_vm7 }
 0x19a   :  { %v905_v9 = vsel %vm9208_vm14, 0, %v9207_v18  ;;  %v11686_v27 = vsel %vm14288_vm2, %v135_v53, %v94_v38  ;;  %v279_v35 = vmul.f32 -0.5, %v263_v30  ;;  %vm836_vm3 = vcmp.lt.s32.totalorder %v11389_v51, 0 }
 0x19b   :  { %5660 = vmatpush1.bf16.msra.mxu1 %v11672_v33  ;;  %v906_v20 = vsub.s32 32, %v905_v9  ;;  %v907_v8 = vshll.u32 %v11611_v49, %v905_v9  ;;  %v910_v32 = vsub.s32 4294967266, %v905_v9  ;;  %v1727_v7 = vadd.s32 536870912, %v1726_v1 }
 0x19c   :  { %v921_v11 = vsel %vm836_vm3, %v920_v3, %v11589_v60  ;;  %v14242_v15 = vand.u32 2147483647, %v11686_v27  ;;  %v271_v49 = vmul.f32 -0.5, %v255_v36  ;;  %v118_v4 = vrot.slane %v54_v23, 7 }
 0x19d   :  { %v908_v40 = vshrl.u32 %v890_v12, %v906_v20  ;;  %v911_v59 = vadd.s32 127, %v910_v32  ;;  %v1728_v17 = vshrl.u32 %v1727_v7, 30  ;;  %v1045_v19 = vand.u32 2139095040, %v11686_v27 }
 0x19e   :  { %9383 = vmatmul.mubr.msk.bf16.vlgmr.msra.gmra.mrb[0].mxu1 %vm14286_vm6, %v11518_v2  ;;  %v14342_v54 = vand.u32 2147483647, %v11389_v51  ;;  %v308_v60 = vmul.f32 1.442695, %v279_v35  ;;  %v1049_v25 = vand.u32 8388607, %v14242_v15  ;;  %v11710_v23 = vsel %vm14345_vm9, %v94_v38, %v118_v4 }
 0x19f   :  { %v909_v18 = vor.u32 %v908_v40, %v907_v8  ;;  %v912_v61 = vshll.u32 %v911_v59, 23  ;;  %5697 = vmatprep.mubr.bf16.mxu1 %v14239_v48  ;;  %v1729_v2 = vshll.u32 %v1728_v17, 30  ;;  %v1046_v53 = vshrl.u32 %v1045_v19, 23 }
 0x1a0   :  { %vm11698_vm4 = vcmp.le.f32.partialorder %v14342_v54, 0.7853982  ;;  %v292_v36 = vmul.f32 1.442695, %v271_v49  ;;  %9798 = vpow2.f32 %v308_v60  ;;  %v1752_v7 = vsub.s32 4, %v1728_v17 }
 0x1a1   :  { %v923_v30 = vsel %vm11698_vm4, 0, %v921_v11  ;;  %v913_v12 = vor.u32 4788187, %v912_v61  ;;  %v916_v3 = vcvt.s32.f32 %v909_v18  ;;  %v11707_v9 = vsub.s32 %v1726_v1, %v1729_v2 }
 0x1a2   :  { %v9213_v20 = vadd.s32 4294967169, %v1046_v53  ;;  %v927_v32 = vadd.s32 3, %v923_v30  ;;  %v1050_v11 = vor.u32 8388608, %v1049_v25  ;;  %v14241_v19 = vand.u32 2147483647, %v11710_v23 }
 0x1a3   :  { %v914_v8 = vand.u32 2147483647, %v913_v12  ;;  %v1732_v35 = vsub.s32 0, %v11707_v9  ;;  %v1877_v54 = vand.u32 2139095040, %v11710_v23  ;;  %9800 = vpow2.f32 %v292_v36 }
 0x1a4   :  { %v1052_v40 = vadd.s32 1, %v9213_v20  ;;  %vm1668_vm8 = vcmp.lt.s32.totalorder %v11424_v13, 0  ;;  %v11717_v49 = vand.u32 3, %v927_v32  ;;  %v1722_v61 = vadd.s32 %v11640_v21, %v11632_v52 }
 0x1a5   :  { %v917_v59 = vmul.f32 %v916_v3, %v914_v8  ;;  %v9238_v38 = vmin.u32 %v1732_v35, %v11707_v9  ;;  %v1878_v18 = vshrl.u32 %v1877_v54, 23  ;;  %v1753_v2 = vsel %vm1668_vm8, %v1752_v7, %v1728_v17 }
 0x1a6   :  { %vm1053_vm11 = vcmp.gt.s32.totalorder %v1052_v40, 0  ;;  %v11723_v53 = vand.u32 3, %v923_v30  ;;  %v11727_v25 = vshll.u32 %v1050_v11, 8  ;;  %v11731_v36 = vand.u32 8388607, %v14241_v19 }
 0x1a7   :  { %v918_v1 = vxor.u32 2147483648, %v917_v59  ;;  %v1054_v4 = vsel %vm1053_vm11, %v1052_v40, 0  ;;  %v1734_v60 = vclz %v9238_v38  ;;  %v11738_v17 = vadd.s32 4294967169, %v1878_v18 }
 0x1a8   :  { %v1056_v3 = vand.u32 31, %v1054_v4  ;;  %v11736_v20 = vshrl.u32 %v1054_v4, 5  ;;  %vm11744_vm15 = vcmp.le.f32.partialorder %v1666_v58, 0.7853982  ;;  %vm2604_vm1 = vcmp.eq.s32.totalorder %v11723_v53, 0 }
 0x1a9   :  { %v919_v12 = vsel %vm836_vm3, %v918_v1, %v917_v59  ;;  %v9239_v21 = vadd.s32 4294967294, %v1734_v60  ;;  %vm2607_vm7 = vcmp.eq.s32.totalorder %v11723_v53, 2  ;;  %vm933_vm5 = vcmp.eq.s32.totalorder %v11717_v49, 2 }
 0x1aa   :  { %v922_v52 = vsel %vm11698_vm4, %v11389_v51, %v919_v12  ;;  %v1057_v30 = vsub.s32 32, %v1056_v3  ;;  %v1059_v8 = vshll.u32 %v14243_v41, %v1056_v3  ;;  %v1062_v32 = vshll.u32 %v14333_v22, %v1056_v3  ;;  %v11753_v38 = vpop.eup %9798 }
 0x1ab   :  { %9802 = vcosq.f32 %v922_v52  ;;  %vm9240_vm0 = vcmp.lt.s32.totalorder %v9239_v21, 0  ;;  %v1065_v31 = vshll.u32 %v14245_v45, %v1056_v3  ;;  %v1068_v7 = vshll.u32 %v14251_v47, %v1056_v3 }
 0x1ac   :  { %9804 = vsinq.f32 %v922_v52  ;;  %v1737_v40 = vsel %vm9240_vm0, 0, %v9239_v21  ;;  %v1058_v59 = vshrl.u32 %v14243_v41, %v1057_v30  ;;  %v1060_v11 = vshrl.u32 %v14333_v22, %v1057_v30 }
 0x1ad   :  { %v1063_v54 = vshrl.u32 %v14245_v45, %v1057_v30  ;;  %v1738_v1 = vsub.s32 32, %v1737_v40  ;;  %v1739_v58 = vshll.u32 %v11707_v9, %v1737_v40  ;;  %v1742_v4 = vsub.s32 4294967266, %v1737_v40  ;;  %v11759_v19 = vpop.eup %9800 }
 0x1ae   :  { %v1066_v18 = vshrl.u32 %v14251_v47, %v1057_v30  ;;  %v1061_v60 = vor.u32 %v1060_v11, %v1059_v8  ;;  %v14348_v52 = vmov 920167782   ;;  %v1072_v9 = vshrl.u32 %v14349_v5, %v1057_v30 }
 0x1af   :  { %v1064_v12 = vor.u32 %v1063_v54, %v1062_v32  ;;  %v1069_v48 = vshrl.u32 %v14348_v52, %v1057_v30  ;;  %v1071_v21 = vshll.u32 %v14348_v52, %v1056_v3  ;;  %v1740_v15 = vshrl.u32 %v1722_v61, %v1738_v1 }
 0x1b0   :  { %v1743_v41 = vadd.s32 127, %v1742_v4  ;;  %v1067_v45 = vor.u32 %v1066_v18, %v1065_v31  ;;  %vm1074_vm14 = vcmp.lt.s32.totalorder %v11736_v20, 1  ;;  %vm1075_vm3 = vcmp.lt.s32.totalorder %v11736_v20, 2 }
 0x1b1   :  { %v1070_v40 = vor.u32 %v1069_v48, %v1068_v7  ;;  %vm1076_vm4 = vcmp.lt.s32.totalorder %v11736_v20, 3  ;;  %v1741_v3 = vor.u32 %v1740_v15, %v1739_v58  ;;  %v1073_v61 = vor.u32 %v1072_v9, %v1071_v21 }
 0x1b2   :  { %v1744_v8 = vshll.u32 %v1743_v41, 23  ;;  %vm1077_vm9 = vcmp.lt.s32.totalorder %v11736_v20, 4  ;;  %vm930_vm11 = vcmp.eq.s32.totalorder %v11717_v49, 0  ;;  %vm2603_vm0 = vcmp.lt.s32.totalorder %v11723_v53, 2 }
 0x1b3   :  { %v1078_v30 = vsel %vm1074_vm14, %v1058_v59, %v1061_v60  ;;  %v1079_v32 = vsel %vm1077_vm9, %v1067_v45, 2102212464  ;;  %v1082_v48 = vsel %vm1074_vm14, %v1061_v60, %v1064_v12  ;;  %v1083_v31 = vsel %vm1077_vm9, %v1070_v40, 920167782 }
 0x1b4   :  { %v1745_v7 = vor.u32 4788187, %v1744_v8  ;;  %v1748_v11 = vcvt.s32.f32 %v1741_v3  ;;  %v1080_v41 = vsel %vm1076_vm4, %v1064_v12, %v1079_v32  ;;  %v1084_v15 = vsel %vm1076_vm4, %v1067_v45, %v1083_v31 }
 0x1b5   :  { %v9803_v54 = vpop.eup %9802  ;;  %v11781_v1 = vsel %vm11744_vm15, 0, %v1753_v2  ;;  %v1085_v59 = vsel %vm1075_vm3, %v1082_v48, %v1084_v15  ;;  %v1086_v58 = vsel %vm1074_vm14, %v1064_v12, %v1067_v45  ;;  %v1087_v4 = vsel %vm1077_vm9, %v1073_v61, 1326507024 }
 0x1b6   :  { %v9805_v18 = vpop.eup %9804  ;;  %v934_v60 = vxor.u32 2147483648, %v9803_v54  ;;  %v1746_v21 = vand.u32 2147483647, %v1745_v7  ;;  %v1081_v9 = vsel %vm1075_vm3, %v1078_v30, %v1080_v41  ;;  %v1088_v3 = vsel %vm1076_vm4, %v1070_v40, %v1087_v4 }
 0x1b7   :  { %v931_v8 = vxor.u32 2147483648, %v9805_v18  ;;  %v1089_v2 = vsel %vm1075_vm3, %v1086_v58, %v1088_v3  ;;  %v11794_v32 = vmul.u32.u64.low %v11727_v25, %v1085_v59  ;;  %v11795_v48 = vmul.u32.u64.high %v11727_v25, %v1085_v59, %v11794_v32 }
 0x1b8   :  { %v1749_v45 = vmul.f32 %v1748_v11, %v1746_v21  ;;  %v1759_v12 = vadd.s32 3, %v11781_v1  ;;  %v1882_v61 = vor.u32 8388608, %v11731_v36  ;;  %v1884_v31 = vadd.s32 1, %v11738_v17 }
 0x1b9   :  { %v11802_v30 = vmul.f32 16.0, %v11579_v24  ;;  %v11805_v40 = vmul.f32 64.0, %v11579_v24  ;;  %v11808_v20 = vmul.u32.u64.low %v11727_v25, %v1089_v2  ;;  %v11809_v7 = vmul.u32.u64.high %v11727_v25, %v1089_v2, %v11808_v20 }
 0x1ba   :  { %vm926_vm14 = vweird.f32 %v11389_v51  ;;  %v1750_v41 = vxor.u32 2147483648, %v1749_v45  ;;  %v1097_v15 = vmul.u32 %v11727_v25, %v1081_v9  ;;  %vm1885_vm3 = vcmp.gt.s32.totalorder %v1884_v31, 0 }
 0x1bb   :  { %v2606_v36 = vsel %vm2604_vm1, %v9803_v54, %v931_v8  ;;  %v2609_v17 = vsel %vm2607_vm7, %v934_v60, %v9805_v18  ;;  %v1100_v59 = vadd.s32 1, %v11795_v48  ;;  %v1886_v58 = vsel %vm1885_vm3, %v1884_v31, 0 }
 0x1bc   :  { %vm929_vm4 = vcmp.lt.s32.totalorder %v11717_v49, 2  ;;  %v935_v4 = vsel %vm933_vm5, %v934_v60, %v9805_v18  ;;  %v1751_v21 = vsel %vm1668_vm8, %v1750_v41, %v1749_v45  ;;  %v11824_v3 = vand.u32 3, %v1759_v12 }
 0x1bd   :  { %v11826_v25 = vshll.u32 %v1882_v61, 8  ;;  %v1754_v9 = vsel %vm11744_vm15, %v11424_v13, %v1751_v21  ;;  %vm1099_vm1 = vc.u32 %v11809_v7, %v11794_v32  ;;  %v11833_v2 = vshrl.u32 %v1886_v58, 5 }
 0x1be   :  { %v1888_v31 = vand.u32 31, %v1886_v58  ;;  %v932_v18 = vsel %vm930_vm11, %v9803_v54, %v931_v8  ;;  %9806 = vcosq.f32 %v1754_v9  ;;  %v2610_v60 = vsel %vm2603_vm0, %v2606_v36, %v2609_v17 }
 0x1bf   :  { %v1101_v45 = vsel %vm1099_vm1, %v1100_v59, %v11795_v48  ;;  %9808 = vsinq.f32 %v1754_v9  ;;  %v14350_v35 = vmov 683565275   ;;  %v14351_v21 = vmov 2131351028  }
 0x1c0   :  { %v1102_v12 = vadd.s32 %v1101_v45, %v1097_v15  ;;  %v1889_v61 = vsub.s32 32, %v1888_v31  ;;  %v1891_v20 = vshll.u32 %v14350_v35, %v1888_v31  ;;  %v1894_v41 = vshll.u32 %v14333_v22, %v1888_v31 }
 0x1c1   :  { %v1897_v11 = vshll.u32 %v14351_v21, %v1888_v31  ;;  %v1900_v58 = vshll.u32 %v14251_v47, %v1888_v31  ;;  %v1903_v39 = vshll.u32 %v14348_v52, %v1888_v31  ;;  %vm1762_vm8 = vcmp.eq.s32.totalorder %v11824_v3, 0 }
 0x1c2   :  { %v1103_v54 = vadd.s32 536870912, %v1102_v12  ;;  %v1892_v53 = vshrl.u32 %v14333_v22, %v1889_v61  ;;  %v1895_v8 = vshrl.u32 %v14351_v21, %v1889_v61  ;;  %vm1906_vm15 = vcmp.lt.s32.totalorder %v11833_v2, 1 }
 0x1c3   :  { %v1890_v48 = vshrl.u32 %v14350_v35, %v1889_v61  ;;  %v1898_v15 = vshrl.u32 %v14251_v47, %v1889_v61  ;;  %v1901_v36 = vshrl.u32 %v14348_v52, %v1889_v61  ;;  %v1904_v17 = vshrl.u32 %v14349_v5, %v1889_v61 }
 0x1c4   :  { %vm14266_vm7 = vweird.f32 %v11424_v13  ;;  %v11854_v59 = vshrl.u32 %v1103_v54, 30  ;;  %v1893_v9 = vor.u32 %v1892_v53, %v1891_v20  ;;  %v1896_v31 = vor.u32 %v1895_v8, %v1894_v41 }
 0x1c5   :  { %vm1908_vm5 = vcmp.lt.s32.totalorder %v11833_v2, 3  ;;  %v1899_v45 = vor.u32 %v1898_v15, %v1897_v11  ;;  %v1902_v57 = vor.u32 %v1901_v36, %v1900_v58  ;;  %v1905_v16 = vor.u32 %v1904_v17, %v1903_v39 }
 0x1c6   :  { %vm1909_vm9 = vcmp.lt.s32.totalorder %v11833_v2, 4  ;;  %v2611_v47 = vsel %vm926_vm14, nan, %v2610_v60  ;;  %v1105_v10 = vshll.u32 %v11854_v59, 30  ;;  %vm1907_vm11 = vcmp.lt.s32.totalorder %v11833_v2, 2 }
 0x1c7   :  { %v1914_v61 = vsel %vm1906_vm15, %v1893_v9, %v1896_v31  ;;  %v1911_v54 = vsel %vm1909_vm9, %v1899_v45, 2102212464  ;;  %v1915_v20 = vsel %vm1909_vm9, %v1902_v57, 920167782  ;;  %v1918_v41 = vsel %vm1906_vm15, %v1896_v31, %v1899_v45 }
 0x1c8   :  { %v1919_v11 = vsel %vm1909_vm9, %v1905_v16, 1326507024  ;;  %v936_v39 = vsel %vm929_vm4, %v932_v18, %v935_v4  ;;  %vm1765_vm0 = vcmp.eq.s32.totalorder %v11824_v3, 2  ;;  %v11869_v58 = vsub.s32 %v1102_v12, %v1105_v10  ;;  %v11873_v53 = vpop.eup %9806  ;;  %v11887_v10 = vld [vmem:[%s14224_s0 + $0x20] sm:$0xff] }
 0x1c9   :  { %v1916_v60 = vsel %vm1908_vm5, %v1899_v45, %v1915_v20  ;;  %v11876_v8 = vmul.f32 %v11759_v19, %v2611_v47  ;;  %v1910_v15 = vsel %vm1906_vm15, %v1890_v48, %v1893_v9  ;;  %v1912_v16 = vsel %vm1908_vm5, %v1896_v31, %v1911_v54  ;;  %v11889_v4 = vpop.eup %9808 }
 0x1ca   :  { %v1920_v49 = vsel %vm1908_vm5, %v1902_v57, %v1919_v11  ;;  %v14255_v18 = vxor.u32 2147483648, %v11873_v53  ;;  %v1108_v47 = vsub.s32 0, %v11869_v58  ;;  %v1917_v12 = vsel %vm1907_vm11, %v1914_v61, %v1916_v60 }
 0x1cb   :  { %v1921_v48 = vsel %vm1907_vm11, %v1918_v41, %v1920_v49  ;;  %vm1761_vm3 = vcmp.lt.s32.totalorder %v11824_v3, 2  ;;  %v14256_v57 = vxor.u32 2147483648, %v11889_v4  ;;  %v937_v9 = vsel %vm926_vm14, nan, %v936_v39 }
 0x1cc   :  { %v11900_v36 = vmul.u32.u64.low %v11826_v25, %v1921_v48  ;;  %v11901_v17 = vmul.u32.u64.high %v11826_v25, %v1921_v48, %v11900_v36  ;;  %v1767_v31 = vsel %vm1765_vm0, %v14255_v18, %v11889_v4  ;;  %v9214_v45 = vmin.u32 %v1108_v47, %v11869_v58 }
 0x1cd   :  { %v11912_v61 = vmul.f32 2.0, %v11887_v10  ;;  %v1764_v54 = vsel %vm1762_vm8, %v11873_v53, %v14256_v57  ;;  %v1913_v51 = vsel %vm1907_vm11, %v1910_v15, %v1912_v16  ;;  %v14254_v39 = vrot.slane %v11876_v8, 4 }
 0x1ce   :  { %v11922_v20 = vmul.u32.u64.low %v11826_v25, %v1917_v12  ;;  %v11923_v41 = vmul.u32.u64.high %v11826_v25, %v1917_v12, %v11922_v20  ;;  %v1768_v11 = vsel %vm1761_vm3, %v1764_v54, %v1767_v31  ;;  %v1110_v60 = vclz %v9214_v45 }
 0x1cf   :  { %v11928_v49 = vmul.f32 4.0, %v11887_v10  ;;  %v1769_v47 = vsel %vm14266_vm7, nan, %v1768_v11  ;;  %v1983_v3 = vmul.f32 %v11759_v19, %v937_v9  ;;  %v209_v2 = vrot.slane %v11802_v30, 5 }
 0x1d0   :  { %v1991_v15 = vmul.f32 %v11753_v38, %v1769_v47  ;;  %v9215_v16 = vadd.s32 4294967294, %v1110_v60  ;;  %v1929_v12 = vmul.u32 %v11826_v25, %v1913_v51  ;;  %vm1931_vm14 = vc.u32 %v11901_v17, %v11922_v20 }
 0x1d1   :  { %v233_v48 = vrot.slane %v11805_v40, 2  ;;  %v14352_v36 = vrot.slane %v11579_v24, 3  ;;  %vm14353_vm4 = vcmask 1042432   ;;  %v1932_v45 = vadd.s32 1, %v11923_v41 }
 0x1d2   :  { %v67_v19 = vrot.slane %v11912_v61, 5  ;;  %v3720_v30 = vsel %vm3674_vm13, %v1991_v15, %v14254_v39  ;;  %v1098_v25 = vadd.s32 %v11794_v32, %v11809_v7  ;;  %vm9216_vm1 = vcmp.lt.s32.totalorder %v9215_v16, 0  ;;  %vm14355_vm8 = vmmov %vm14353_vm4 }
 0x1d3   :  { %v249_v31 = vsel %vm14353_vm4, %v14352_v36, %v11635_v26  ;;  %v91_v9 = vrot.slane %v11928_v49, 2  ;;  %v11951_v40 = vpack.c.bf16 %v3720_v30, %v1983_v3  ;;  %v1113_v54 = vsel %vm9216_vm1, 0, %v9215_v16 }
 0x1d4   :  { %v1933_v24 = vsel %vm1931_vm14, %v1932_v45, %v11923_v41  ;;  %v132_v26 = vsel %vm14355_vm8, %v11887_v10, %v67_v19  ;;  %v1114_v51 = vsub.s32 32, %v1113_v54  ;;  %v1115_v11 = vshll.u32 %v11869_v58, %v1113_v54 }
 0x1d5   :  { %14354 = vst [vmem:[#allocation22_spill] sm:$0xff] %v11951_v40  ;;  %v1118_v60 = vsub.s32 4294967266, %v1113_v54  ;;  %v1934_v47 = vadd.s32 %v1933_v24, %v1929_v12  ;;  %5708 = vmatprep.subr.bf16.mxu0 %v11951_v40  ;;  %v257_v32 = vsel %vm14288_vm2, %v249_v31, %v209_v2  ;;  %vm14356_vm15 = vcmask 1040384  }
 0x1d6   :  { %v265_v7 = vsel %vm14356_vm15, %v209_v2, %v233_v48  ;;  %v1128_v3 = vsub.s32 4, %v11854_v59  ;;  %v1116_v15 = vshrl.u32 %v1098_v25, %v1114_v51  ;;  %v11962_v41 = vsel %vm14288_vm2, %v132_v26, %v91_v9  ;;  %vm14363_vm14 = vmmov %vm14356_vm15 }
 0x1d7   :  { %v1119_v16 = vadd.s32 127, %v1118_v60  ;;  %v1935_v36 = vadd.s32 536870912, %v1934_v47  ;;  %vm1044_vm5 = vcmp.lt.s32.totalorder %v11686_v27, 0  ;;  %v273_v45 = vmul.f32 -0.5, %v257_v32 }
 0x1d8   :  { %v1117_v58 = vor.u32 %v1116_v15, %v1115_v11  ;;  %v281_v30 = vmul.f32 -0.5, %v265_v7  ;;  %v1129_v31 = vsel %vm1044_vm5, %v1128_v3, %v11854_v59  ;;  %v733_v2 = vand.u32 2139095040, %v11962_v41 }
 0x1d9   :  { %v1120_v19 = vshll.u32 %v1119_v16, 23  ;;  %v1936_v12 = vshrl.u32 %v1935_v36, 30  ;;  %v51_v24 = vmul.f32 8.0, %v11887_v10  ;;  %v14357_v26 = vand.u32 2147483647, %v11686_v27 }
 0x1da   :  { %v1124_v25 = vcvt.s32.f32 %v1117_v58  ;;  %v734_v60 = vshrl.u32 %v733_v2, 23  ;;  %v296_v32 = vmul.f32 1.442695, %v273_v45  ;;  %v312_v15 = vmul.f32 1.442695, %v281_v30 }
 0x1db   :  { %v1121_v48 = vor.u32 4788187, %v1120_v19  ;;  %v1937_v54 = vshll.u32 %v1936_v12, 30  ;;  %vm11972_vm9 = vcmp.le.f32.partialorder %v14357_v26, 0.7853982  ;;  %v1960_v11 = vsub.s32 4, %v1936_v12 }
 0x1dc   :  { %v1131_v59 = vsel %vm11972_vm9, 0, %v1129_v31  ;;  %v14257_v16 = vand.u32 2147483647, %v11962_v41  ;;  %v9201_v36 = vadd.s32 4294967169, %v734_v60  ;;  %vm1876_vm11 = vcmp.lt.s32.totalorder %v11710_v23, 0 }
 0x1dd   :  { %v1122_v7 = vand.u32 2147483647, %v1121_v48  ;;  %v11978_v3 = vsub.s32 %v1934_v47, %v1937_v54  ;;  %v115_v26 = vrot.slane %v51_v24, 7  ;;  %v1135_v39 = vadd.s32 3, %v1131_v59 }
 0x1de   :  { %v1961_v45 = vsel %vm1876_vm11, %v1960_v11, %v1936_v12  ;;  %v740_v2 = vadd.s32 1, %v9201_v36  ;;  %9810 = vpow2.f32 %v296_v32  ;;  %v14360_v30 = vand.u32 2147483647, %v11710_v23 }
 0x1df   :  { %v1125_v58 = vmul.f32 %v1124_v25, %v1122_v7  ;;  %v1940_v19 = vsub.s32 0, %v11978_v3  ;;  %9812 = vpow2.f32 %v312_v15  ;;  %v11994_v25 = vand.u32 8388607, %v14257_v16 }
 0x1e0   :  { %vm11988_vm0 = vcmp.le.f32.partialorder %v14360_v30, 0.7853982  ;;  %vm741_vm3 = vcmp.gt.s32.totalorder %v740_v2, 0  ;;  %v12003_v11 = vsel %vm14363_vm14, %v91_v9, %v115_v26  ;;  %v12008_v32 = vand.u32 3, %v1135_v39 }
 0x1e1   :  { %v1126_v48 = vxor.u32 2147483648, %v1125_v58  ;;  %v9246_v47 = vmin.u32 %v1940_v19, %v11978_v3  ;;  %v12000_v24 = vsel %vm11988_vm0, 0, %v1961_v45  ;;  %v12010_v7 = vand.u32 3, %v1131_v59 }
 0x1e2   :  { %v742_v15 = vsel %vm741_vm3, %v740_v2, 0  ;;  %v1930_v36 = vadd.s32 %v11922_v20, %v11901_v17  ;;  %v1967_v45 = vadd.s32 3, %v12000_v24  ;;  %v738_v9 = vor.u32 8388608, %v11994_v25 }
 0x1e3   :  { %v1127_v12 = vsel %vm1044_vm5, %v1126_v48, %v1125_v58  ;;  %v1942_v54 = vclz %v9246_v47  ;;  %v744_v19 = vand.u32 31, %v742_v15  ;;  %v1565_v26 = vand.u32 2139095040, %v12003_v11 }
 0x1e4   :  { %v1130_v60 = vsel %vm11972_vm9, %v11686_v27, %v1127_v12  ;;  %v12017_v51 = vshrl.u32 %v742_v15, 5  ;;  %v14364_v20 = vmov 2102212464   ;;  %vm1141_vm1 = vcmp.eq.s32.totalorder %v12008_v32, 2 }
 0x1e5   :  { %9814 = vcosq.f32 %v1130_v60  ;;  %v9247_v58 = vadd.s32 4294967294, %v1942_v54  ;;  %v745_v39 = vsub.s32 32, %v744_v19  ;;  %v747_v59 = vshll.u32 %v14350_v35, %v744_v19 }
 0x1e6   :  { %9816 = vsinq.f32 %v1130_v60  ;;  %v750_v48 = vshll.u32 %v14333_v22, %v744_v19  ;;  %v753_v17 = vshll.u32 %v14351_v21, %v744_v19  ;;  %v756_v47 = vshll.u32 %v14364_v20, %v744_v19 }
 0x1e7   :  { %vm9248_vm4 = vcmp.lt.s32.totalorder %v9247_v58, 0  ;;  %v759_v25 = vshll.u32 %v14348_v52, %v744_v19  ;;  %vm2813_vm8 = vcmp.eq.s32.totalorder %v12010_v7, 2  ;;  %v748_v60 = vshrl.u32 %v14333_v22, %v745_v39 }
 0x1e8   :  { %v1945_v2 = vsel %vm9248_vm4, 0, %v9247_v58  ;;  %v751_v15 = vshrl.u32 %v14351_v21, %v745_v39  ;;  %v754_v58 = vshrl.u32 %v14364_v20, %v745_v39  ;;  %v757_v18 = vshrl.u32 %v14348_v52, %v745_v39  ;;  %v12031_v57 = vpop.eup %9810 }
 0x1e9   :  { %v1946_v30 = vsub.s32 32, %v1945_v2  ;;  %v1947_v12 = vshll.u32 %v11978_v3, %v1945_v2  ;;  %v1950_v54 = vsub.s32 4294967266, %v1945_v2  ;;  %vm1138_vm15 = vcmp.eq.s32.totalorder %v12008_v32, 0  ;;  %v12036_v34 = vpop.eup %9812 }
 0x1ea   :  { %v760_v19 = vshrl.u32 %v14349_v5, %v745_v39  ;;  %v749_v43 = vor.u32 %v748_v60, %v747_v59  ;;  %v752_v14 = vor.u32 %v751_v15, %v750_v48  ;;  %v758_v40 = vor.u32 %v757_v18, %v756_v47 }
 0x1eb   :  { %v1948_v3 = vshrl.u32 %v1930_v36, %v1946_v30  ;;  %v1951_v2 = vadd.s32 127, %v1950_v54  ;;  %v1566_v33 = vshrl.u32 %v1565_v26, 23  ;;  %v755_v28 = vor.u32 %v754_v58, %v753_v17 }
 0x1ec   :  { %vm762_vm5 = vcmp.lt.s32.totalorder %v12017_v51, 1  ;;  %vm1137_vm9 = vcmp.lt.s32.totalorder %v12008_v32, 2  ;;  %v746_v36 = vshrl.u32 %v14350_v35, %v745_v39  ;;  %v761_v30 = vor.u32 %v760_v19, %v759_v25 }
 0x1ed   :  { %v1949_v46 = vor.u32 %v1948_v3, %v1947_v12  ;;  %v1952_v63 = vshll.u32 %v1951_v2, 23  ;;  %vm764_vm3 = vcmp.lt.s32.totalorder %v12017_v51, 3  ;;  %vm765_vm14 = vcmp.lt.s32.totalorder %v12017_v51, 4 }
 0x1ee   :  { %vm2809_vm4 = vcmp.lt.s32.totalorder %v12010_v7, 2  ;;  %v767_v18 = vsel %vm765_vm14, %v755_v28, 2102212464  ;;  %v771_v26 = vsel %vm765_vm14, %v758_v40, 920167782  ;;  %vm763_vm7 = vcmp.lt.s32.totalorder %v12017_v51, 2 }
 0x1ef   :  { %v9815_v54 = vpop.eup %9814  ;;  %v1953_v16 = vor.u32 4788187, %v1952_v63  ;;  %v1956_v59 = vcvt.s32.f32 %v1949_v46  ;;  %v770_v39 = vsel %vm762_vm5, %v749_v43, %v752_v14  ;;  %v778_v17 = vshll.u32 %v738_v9, 8 }
 0x1f0   :  { %v9817_v48 = vpop.eup %9816  ;;  %v9233_v47 = vadd.s32 4294967169, %v1566_v33  ;;  %v1142_v12 = vxor.u32 2147483648, %v9815_v54  ;;  %v772_v46 = vsel %vm764_vm3, %v755_v28, %v771_v26  ;;  %v774_v63 = vsel %vm762_vm5, %v752_v14, %v755_v28 }
 0x1f1   :  { %v1954_v25 = vand.u32 2147483647, %v1953_v16  ;;  %vm1134_vm12 = vweird.f32 %v11686_v27  ;;  %v1139_v60 = vxor.u32 2147483648, %v9817_v48  ;;  %v766_v15 = vsel %vm762_vm5, %v746_v36, %v749_v43 }
 0x1f2   :  { %v768_v58 = vsel %vm764_vm3, %v752_v14, %v767_v18  ;;  %v775_v33 = vsel %vm765_vm14, %v761_v30, 1326507024  ;;  %v12062_v16 = vand.u32 3, %v1967_v45  ;;  %vm2810_vm10 = vcmp.eq.s32.totalorder %v12010_v7, 0 }
 0x1f3   :  { %v1957_v9 = vmul.f32 %v1956_v59, %v1954_v25  ;;  %v776_v28 = vsel %vm764_vm3, %v758_v40, %v775_v33  ;;  %v773_v3 = vsel %vm763_vm7, %v770_v39, %v772_v46  ;;  %v14365_v2 = vand.u32 2147483647, %v12003_v11 }
 0x1f4   :  { %v777_v43 = vsel %vm763_vm7, %v774_v63, %v776_v28  ;;  %v1572_v19 = vadd.s32 1, %v9233_v47  ;;  %v1143_v36 = vsel %vm1141_vm1, %v1142_v12, %v9817_v48  ;;  %v2815_v30 = vsel %vm2813_vm8, %v1142_v12, %v9817_v48 }
 0x1f5   :  { %v1569_v14 = vand.u32 8388607, %v14365_v2  ;;  %v1958_v45 = vxor.u32 2147483648, %v1957_v9  ;;  %v769_v40 = vsel %vm763_vm7, %v766_v15, %v768_v58  ;;  %v1140_v59 = vsel %vm1138_vm15, %v9815_v54, %v1139_v60 }
 0x1f6   :  { %v2812_v18 = vsel %vm2810_vm10, %v9815_v54, %v1139_v60  ;;  %v12081_v26 = vmul.u32.u64.low %v778_v17, %v777_v43  ;;  %v12082_v39 = vmul.u32.u64.high %v778_v17, %v777_v43, %v12081_v26  ;;  %vm1573_vm1 = vcmp.gt.s32.totalorder %v1572_v19, 0 }
 0x1f7   :  { %v1959_v47 = vsel %vm1876_vm11, %v1958_v45, %v1957_v9  ;;  %v12086_v25 = vmul.u32.u64.low %v778_v17, %v773_v3  ;;  %v12087_v46 = vmul.u32.u64.high %v778_v17, %v773_v3, %v12086_v25  ;;  %v12094_v48 = vmul.f32 16.0, %v11887_v10 }
 0x1f8   :  { %v1962_v51 = vsel %vm11988_vm0, %v11710_v23, %v1959_v47  ;;  %v1570_v12 = vor.u32 8388608, %v1569_v14  ;;  %v1574_v54 = vsel %vm1573_vm1, %v1572_v19, 0  ;;  %v1144_v63 = vsel %vm1137_vm9, %v1140_v59, %v1143_v36 }
 0x1f9   :  { %9818 = vcosq.f32 %v1962_v51  ;;  %v785_v60 = vmul.u32 %v778_v17, %v769_v40  ;;  %v1576_v15 = vand.u32 31, %v1574_v54  ;;  %v2816_v58 = vsel %vm2809_vm4, %v2812_v18, %v2815_v30 }
 0x1fa   :  { %9820 = vsinq.f32 %v1962_v51  ;;  %vm787_vm10 = vc.u32 %v12082_v39, %v12086_v25  ;;  %v12102_v31 = vshrl.u32 %v1574_v54, 5  ;;  %vm1973_vm7 = vcmp.eq.s32.totalorder %v12062_v16, 2 }
 0x1fb   :  { %v788_v33 = vadd.s32 1, %v12087_v46  ;;  %v1577_v9 = vsub.s32 32, %v1576_v15  ;;  %v1579_v32 = vshll.u32 %v14350_v35, %v1576_v15  ;;  %v1582_v28 = vshll.u32 %v14333_v22, %v1576_v15 }
 0x1fc   :  { %v1145_v17 = vsel %vm1134_vm12, nan, %v1144_v63  ;;  %vm1970_vm11 = vcmp.eq.s32.totalorder %v12062_v16, 0  ;;  %v1585_v7 = vshll.u32 %v14351_v21, %v1576_v15  ;;  %v1588_v3 = vshll.u32 %v14364_v20, %v1576_v15 }
 0x1fd   :  { %v1591_v43 = vshll.u32 %v14348_v52, %v1576_v15  ;;  %vm1969_vm0 = vcmp.lt.s32.totalorder %v12062_v16, 2  ;;  %v2817_v2 = vsel %vm1134_vm12, nan, %v2816_v58  ;;  %v789_v14 = vsel %vm787_vm10, %v788_v33, %v12087_v46  ;;  %v12134_v15 = vld [vmem:[%s14224_s0 + $0x30] sm:$0xff] }
 0x1fe   :  { %v1580_v19 = vshrl.u32 %v14333_v22, %v1577_v9  ;;  %v1583_v36 = vshrl.u32 %v14351_v21, %v1577_v9  ;;  %vm14287_vm8 = vweird.f32 %v11710_v23  ;;  %v790_v45 = vadd.s32 %v789_v14, %v785_v60 }
 0x1ff   :  { %v1586_v30 = vshrl.u32 %v14364_v20, %v1577_v9  ;;  %v1589_v40 = vshrl.u32 %v14348_v52, %v1577_v9  ;;  %v1592_v59 = vshrl.u32 %v14349_v5, %v1577_v9  ;;  %vm1594_vm15 = vcmp.lt.s32.totalorder %v12102_v31, 1 }
 0x200   :  { %v1581_v18 = vor.u32 %v1580_v19, %v1579_v32  ;;  %v1584_v26 = vor.u32 %v1583_v36, %v1582_v28  ;;  %vm1596_vm12 = vcmp.lt.s32.totalorder %v12102_v31, 3  ;;  %v791_v27 = vadd.s32 536870912, %v790_v45 }
 0x201   :  { %v1587_v47 = vor.u32 %v1586_v30, %v1585_v7  ;;  %v1590_v46 = vor.u32 %v1589_v40, %v1588_v3  ;;  %v1593_v51 = vor.u32 %v1592_v59, %v1591_v43  ;;  %v1985_v54 = vmul.f32 %v12031_v57, %v1145_v17 }
 0x202   :  { %v1578_v63 = vshrl.u32 %v14350_v35, %v1577_v9  ;;  %vm1597_vm5 = vcmp.lt.s32.totalorder %v12102_v31, 4  ;;  %v12129_v60 = vshll.u32 %v1570_v12, 8  ;;  %v12136_v58 = vshrl.u32 %v791_v27, 30 }
 0x203   :  { %vm1595_vm9 = vcmp.lt.s32.totalorder %v12102_v31, 2  ;;  %v1599_v33 = vsel %vm1597_vm5, %v1587_v47, 2102212464  ;;  %v1603_v32 = vsel %vm1597_vm5, %v1590_v46, 920167782  ;;  %v12139_v28 = vpop.eup %9818  ;;  %v1602_v9 = vsel %vm1594_vm15, %v1581_v18, %v1584_v26 }
 0x204   :  { %v1604_v12 = vsel %vm1596_vm12, %v1587_v47, %v1603_v32  ;;  %v1606_v17 = vsel %vm1594_vm15, %v1584_v26, %v1587_v47  ;;  %v1607_v7 = vsel %vm1597_vm5, %v1593_v51, 1326507024  ;;  %v12147_v3 = vpop.eup %9820  ;;  %v14269_v43 = vxor.u32 2147483648, %v12139_v28 }
 0x205   :  { %v12151_v14 = vmul.f32 %v12031_v57, %v2817_v2  ;;  %v793_v19 = vshll.u32 %v12136_v58, 30  ;;  %v12155_v36 = vmul.f32 2.0, %v12134_v15  ;;  %v14271_v30 = vxor.u32 2147483648, %v12147_v3  ;;  %v5514_v57 = vld [vmem:[%s14226_s2 + $0x8] sm:$0xff] }
 0x206   :  { %v1598_v40 = vsel %vm1594_vm15, %v1578_v63, %v1581_v18  ;;  %v1600_v59 = vsel %vm1596_vm12, %v1584_v26, %v1599_v33  ;;  %v1608_v27 = vsel %vm1596_vm12, %v1590_v46, %v1607_v7  ;;  %v9711_v2 = vld [vmem:[%s14225_s1 + $0x8] sm:$0xff]   ;;  %v1975_v18 = vsel %vm1973_vm7, %v14269_v43, %v12147_v3  ;;  %5548 = vperm.xlu0 %9708, %v5514_v57  }
 0x207   :  { %v12175_v47 = vsub.s32 %v790_v45, %v793_v19  ;;  %v1605_v26 = vsel %vm1595_vm9, %v1602_v9, %v1604_v12  ;;  %v1609_v46 = vsel %vm1595_vm9, %v1606_v17, %v1608_v27  ;;  %v1972_v51 = vsel %vm1970_vm11, %v12139_v28, %v14271_v30  ;;  %9381 = vmatmul.mubr.msk.bf16.gmra.mrb[4].mxu0 %vm14286_vm6, %v9711_v2 }
 0x208   :  { %v12187_v63 = vmul.u32.u64.low %v12129_v60, %v1609_v46  ;;  %v12188_v33 = vmul.u32.u64.high %v12129_v60, %v1609_v46, %v12187_v63  ;;  %v12191_v45 = vmul.f32 4.0, %v12134_v15  ;;  %9384 = vmatmul.mubr.msk.bf16.gmra.mrb[4].mxu1 %vm14286_vm6, %v9711_v2  ;;  %v1976_v32 = vsel %vm1969_vm0, %v1972_v51, %v1975_v18 }
 0x209   :  { %v14270_v9 = vrot.slane %v12151_v14, 4  ;;  %v796_v12 = vsub.s32 0, %v12175_v47  ;;  %v69_v17 = vrot.slane %v12155_v36, 5  ;;  %v14366_v7 = vmov 0  }
 0x20a   :  { %5740 = vmatprep.mubr.bf16.mxu0 %v14366_v7  ;;  %5793 = vmatprep.mubr.bf16.mxu1 %v14366_v7  ;;  %v1977_v19 = vsel %vm14287_vm8, nan, %v1976_v32  ;;  %v1601_v27 = vsel %vm1595_vm9, %v1598_v40, %v1600_v59  ;;  %v12207_v57 = vmul.u32.u64.low %v12129_v60, %v1605_v26  ;;  %v12208_v16 = vmul.u32.u64.high %v12129_v60, %v1605_v26, %v12207_v57 }
 0x20b   :  { %v1993_v2 = vmul.f32 %v12036_v34, %v1977_v19  ;;  %v182_v18 = vrot.slane %v11887_v10, 3  ;;  %v9202_v46 = vmin.u32 %v796_v12, %v12175_v47  ;;  %v166_v51 = vmul.f32 64.0, %v11887_v10 }
 0x20c   :  { %v93_v63 = vrot.slane %v12191_v45, 2  ;;  %v1617_v59 = vmul.u32 %v12129_v60, %v1601_v27  ;;  %vm1619_vm3 = vc.u32 %v12188_v33, %v12207_v57  ;;  %v206_v32 = vrot.slane %v12094_v48, 5 }
 0x20d   :  { %v3722_v31 = vsel %vm3674_vm13, %v1993_v2, %v14270_v9  ;;  %v798_v40 = vclz %v9202_v46  ;;  %v1620_v12 = vadd.s32 1, %v12208_v16  ;;  %vm14368_vm14 = vcmask 1042432  }
 0x20e   :  { %v12222_v26 = vpack.c.bf16 %v3722_v31, %v1985_v54  ;;  %v134_v10 = vsel %vm14368_vm14, %v12134_v15, %v69_v17  ;;  %vm14369_vm4 = vmmov %vm14368_vm14  ;;  %v230_v2 = vrot.slane %v166_v51, 2  ;;  %v786_v60 = vadd.s32 %v12086_v25, %v12082_v39 }
 0x20f   :  { %v246_v19 = vsel %vm14369_vm4, %v182_v18, %v11928_v49  ;;  %v9203_v43 = vadd.s32 4294967294, %v798_v40  ;;  %v816_v54 = vsub.s32 4, %v12136_v58  ;;  %v1621_v27 = vsel %vm1619_vm3, %v1620_v12, %v12208_v16 }
 0x210   :  { %14367 = vst [vmem:[#allocation23_spill] sm:$0xff] %v12222_v26  ;;  %5761 = vmatprep.subr.bf16.mxu1 %v12222_v26  ;;  %v1622_v48 = vadd.s32 %v1621_v27, %v1617_v59  ;;  %v53_v46 = vmul.f32 8.0, %v12134_v15  ;;  %v12237_v17 = vsel %vm14288_vm2, %v134_v10, %v93_v63  ;;  %v254_v49 = vsel %vm14288_vm2, %v246_v19, %v206_v32 }
 0x211   :  { %vm9204_vm1 = vcmp.lt.s32.totalorder %v9203_v43, 0  ;;  %vm732_vm10 = vcmp.lt.s32.totalorder %v11962_v41, 0  ;;  %vm14370_vm7 = vcmask 1040384   ;;  %v941_v12 = vand.u32 2139095040, %v12237_v17 }
 0x212   :  { %v801_v18 = vsel %vm9204_vm1, 0, %v9203_v43  ;;  %v1623_v40 = vadd.s32 536870912, %v1622_v48  ;;  %v262_v16 = vsel %vm14370_vm7, %v206_v32, %v230_v2  ;;  %v817_v59 = vsel %vm732_vm10, %v816_v54, %v12136_v58  ;;  %vm14375_vm0 = vmmov %vm14370_vm7 }
 0x213   :  { %v802_v31 = vsub.s32 32, %v801_v18  ;;  %v803_v39 = vshll.u32 %v12175_v47, %v801_v18  ;;  %v806_v25 = vsub.s32 4294967266, %v801_v18  ;;  %v117_v9 = vrot.slane %v53_v46, 7 }
 0x214   :  { %v1624_v27 = vshrl.u32 %v1623_v40, 30  ;;  %v270_v43 = vmul.f32 -0.5, %v254_v49  ;;  %v14371_v30 = vand.u32 2147483647, %v11962_v41  ;;  %v942_v47 = vshrl.u32 %v941_v12, 23 }
 0x215   :  { %v804_v10 = vshrl.u32 %v786_v60, %v802_v31  ;;  %v807_v19 = vadd.s32 127, %v806_v25  ;;  %v14374_v32 = vand.u32 2147483647, %v12237_v17  ;;  %v12263_v40 = vmul.f32 -0.5, %v262_v16 }
 0x216   :  { %vm12250_vm11 = vcmp.le.f32.partialorder %v14371_v30, 0.7853982  ;;  %v1625_v60 = vshll.u32 %v1624_v27, 30  ;;  %v1648_v54 = vsub.s32 4, %v1624_v27  ;;  %v9209_v31 = vadd.s32 4294967169, %v942_v47 }
 0x217   :  { %v945_v2 = vand.u32 8388607, %v14374_v32  ;;  %v805_v18 = vor.u32 %v804_v10, %v803_v39  ;;  %v808_v26 = vshll.u32 %v807_v19, 23  ;;  %v819_v58 = vsel %vm12250_vm11, 0, %v817_v59 }
 0x218   :  { %v12258_v25 = vsub.s32 %v1622_v48, %v1625_v60  ;;  %v12261_v30 = vsel %vm14375_vm0, %v93_v63, %v117_v9  ;;  %v823_v12 = vadd.s32 3, %v819_v58  ;;  %v948_v32 = vadd.s32 1, %v9209_v31 }
 0x219   :  { %v809_v46 = vor.u32 4788187, %v808_v26  ;;  %v812_v49 = vcvt.s32.f32 %v805_v18  ;;  %v946_v29 = vor.u32 8388608, %v945_v2  ;;  %v12265_v39 = vmul.f32 1.442695, %v270_v43 }
 0x21a   :  { %vm1564_vm15 = vcmp.lt.s32.totalorder %v12003_v11, 0  ;;  %v1628_v59 = vsub.s32 0, %v12258_v25  ;;  %v14376_v26 = vand.u32 2147483647, %v12003_v11  ;;  %vm949_vm5 = vcmp.gt.s32.totalorder %v948_v32, 0 }
 0x21b   :  { %v810_v10 = vand.u32 2147483647, %v809_v46  ;;  %v1649_v9 = vsel %vm1564_vm15, %v1648_v54, %v1624_v27  ;;  %v1773_v63 = vand.u32 2139095040, %v12261_v30  ;;  %v12279_v43 = vand.u32 3, %v819_v58 }
 0x21c   :  { %vm12271_vm12 = vcmp.le.f32.partialorder %v14376_v26, 0.7853982  ;;  %v9234_v19 = vmin.u32 %v1628_v59, %v12258_v25  ;;  %v950_v47 = vsel %vm949_vm5, %v948_v32, 0  ;;  %v12281_v2 = vand.u32 3, %v823_v12 }
 0x21d   :  { %v813_v16 = vmul.f32 %v812_v49, %v810_v10  ;;  %v1618_v18 = vadd.s32 %v12207_v57, %v12188_v33  ;;  %v952_v60 = vand.u32 31, %v950_v47  ;;  %v12285_v31 = vshll.u32 %v946_v29, 8 }
 0x21e   :  { %v1630_v26 = vclz %v9234_v19  ;;  %v12289_v27 = vsel %vm12271_vm12, 0, %v1649_v9  ;;  %v951_v54 = vshrl.u32 %v950_v47, 5  ;;  %v1774_v12 = vshrl.u32 %v1773_v63, 23 }
 0x21f   :  { %v814_v46 = vxor.u32 2147483648, %v813_v16  ;;  %v953_v49 = vsub.s32 32, %v952_v60  ;;  %v955_v58 = vshll.u32 %v14350_v35, %v952_v60  ;;  %v958_v32 = vshll.u32 %v14333_v22, %v952_v60 }
 0x220   :  { %v9235_v33 = vadd.s32 4294967294, %v1630_v26  ;;  %v961_v29 = vshll.u32 %v14351_v21, %v952_v60  ;;  %v964_v57 = vshll.u32 %v14364_v20, %v952_v60  ;;  %v967_v42 = vshll.u32 %v14348_v52, %v952_v60 }
 0x221   :  { %v815_v10 = vsel %vm732_vm10, %v814_v46, %v813_v16  ;;  %v954_v9 = vshrl.u32 %v14350_v35, %v953_v49  ;;  %v956_v19 = vshrl.u32 %v14333_v22, %v953_v49  ;;  %v959_v47 = vshrl.u32 %v14351_v21, %v953_v49 }
 0x222   :  { %v818_v59 = vsel %vm12250_vm11, %v11962_v41, %v815_v10  ;;  %vm9236_vm9 = vcmp.lt.s32.totalorder %v9235_v33, 0  ;;  %v962_v63 = vshrl.u32 %v14364_v20, %v953_v49  ;;  %v965_v16 = vshrl.u32 %v14348_v52, %v953_v49 }
 0x223   :  { %9822 = vcosq.f32 %v818_v59  ;;  %v1633_v46 = vsel %vm9236_vm9, 0, %v9235_v33  ;;  %v957_v26 = vor.u32 %v956_v19, %v955_v58  ;;  %v960_v0 = vor.u32 %v959_v47, %v958_v32 }
 0x224   :  { %9824 = vsinq.f32 %v818_v59  ;;  %v1634_v44 = vsub.s32 32, %v1633_v46  ;;  %v1635_v51 = vshll.u32 %v12258_v25, %v1633_v46  ;;  %v1638_v10 = vsub.s32 4294967266, %v1633_v46 }
 0x225   :  { %v963_v37 = vor.u32 %v962_v63, %v961_v29  ;;  %v966_v50 = vor.u32 %v965_v16, %v964_v57  ;;  %v968_v56 = vshrl.u32 %v14349_v5, %v953_v49  ;;  %vm970_vm3 = vcmp.lt.s32.totalorder %v951_v54, 1 }
 0x226   :  { %v1636_v55 = vshrl.u32 %v1618_v18, %v1634_v44  ;;  %v1639_v7 = vadd.s32 127, %v1638_v10  ;;  %vm2501_vm14 = vcmp.eq.s32.totalorder %v12279_v43, 0  ;;  %vm971_vm4 = vcmp.lt.s32.totalorder %v951_v54, 2 }
 0x227   :  { %vm972_vm1 = vcmp.lt.s32.totalorder %v951_v54, 3  ;;  %v969_v33 = vor.u32 %v968_v56, %v967_v42  ;;  %vm973_vm10 = vcmp.lt.s32.totalorder %v951_v54, 4  ;;  %v974_v58 = vsel %vm970_vm3, %v954_v9, %v957_v26 }
 0x228   :  { %v978_v25 = vsel %vm970_vm3, %v957_v26, %v960_v0  ;;  %v1637_v32 = vor.u32 %v1636_v55, %v1635_v51  ;;  %v1640_v29 = vshll.u32 %v1639_v7, 23  ;;  %v975_v57 = vsel %vm973_vm10, %v963_v37, 2102212464 }
 0x229   :  { %v979_v59 = vsel %vm973_vm10, %v966_v50, 920167782  ;;  %v976_v60 = vsel %vm972_vm1, %v960_v0, %v975_v57  ;;  %v982_v44 = vsel %vm970_vm3, %v960_v0, %v963_v37  ;;  %v983_v18 = vsel %vm973_vm10, %v969_v33, 1326507024 }
 0x22a   :  { %v980_v49 = vsel %vm972_vm1, %v963_v37, %v979_v59  ;;  %v1641_v19 = vor.u32 4788187, %v1640_v29  ;;  %v1644_v47 = vcvt.s32.f32 %v1637_v32  ;;  %v1770_v42 = vand.u32 2147483647, %v12261_v30 }
 0x22b   :  { %v981_v56 = vsel %vm971_vm4, %v978_v25, %v980_v49  ;;  %vm2504_vm7 = vcmp.eq.s32.totalorder %v12279_v43, 2  ;;  %v984_v55 = vsel %vm972_vm1, %v966_v50, %v983_v18  ;;  %vm822_vm11 = vweird.f32 %v11962_v41 }
 0x22c   :  { %v12319_v7 = vmul.u32.u64.low %v12285_v31, %v981_v56  ;;  %v12320_v9 = vmul.u32.u64.high %v12285_v31, %v981_v56, %v12319_v7  ;;  %v1642_v16 = vand.u32 2147483647, %v1641_v19  ;;  %v977_v37 = vsel %vm971_vm4, %v974_v58, %v976_v60 }
 0x22d   :  { %v9823_v63 = vpop.eup %9822  ;;  %v985_v0 = vsel %vm971_vm4, %v982_v44, %v984_v55  ;;  %v9241_v46 = vadd.s32 4294967169, %v1774_v12  ;;  %v1655_v10 = vadd.s32 3, %v12289_v27  ;;  %v1777_v29 = vand.u32 8388607, %v1770_v42 }
 0x22e   :  { %v9825_v26 = vpop.eup %9824  ;;  %v830_v51 = vxor.u32 2147483648, %v9823_v63  ;;  %v12327_v33 = vmul.u32.u64.low %v12285_v31, %v985_v0  ;;  %v12328_v50 = vmul.u32.u64.high %v12285_v31, %v985_v0, %v12327_v33  ;;  %v1645_v32 = vmul.f32 %v1644_v47, %v1642_v16 }
 0x22f   :  { %v827_v25 = vxor.u32 2147483648, %v9825_v26  ;;  %v1780_v57 = vadd.s32 1, %v9241_v46  ;;  %9826 = vpow2.f32 %v12265_v39  ;;  %v306_v54 = vmul.f32 1.442695, %v12263_v40 }
 0x230   :  { %v993_v12 = vmul.u32 %v12285_v31, %v977_v37  ;;  %v996_v58 = vadd.s32 1, %v12320_v9  ;;  %vm826_vm0 = vcmp.eq.s32.totalorder %v12281_v2, 0  ;;  %vm829_vm5 = vcmp.eq.s32.totalorder %v12281_v2, 2 }
 0x231   :  { %v1646_v59 = vxor.u32 2147483648, %v1645_v32  ;;  %vm2500_vm9 = vcmp.lt.s32.totalorder %v12279_v43, 2  ;;  %v2503_v60 = vsel %vm2501_vm14, %v9823_v63, %v827_v25  ;;  %v2506_v49 = vsel %vm2504_vm7, %v830_v51, %v9825_v26 }
 0x232   :  { %vm995_vm3 = vc.u32 %v12328_v50, %v12319_v7  ;;  %vm1781_vm4 = vcmp.gt.s32.totalorder %v1780_v57, 0  ;;  %v12346_v39 = vand.u32 3, %v1655_v10  ;;  %v1778_v44 = vor.u32 8388608, %v1777_v29 }
 0x233   :  { %v1647_v40 = vsel %vm1564_vm15, %v1646_v59, %v1645_v32  ;;  %v997_v31 = vsel %vm995_vm3, %v996_v58, %v12320_v9  ;;  %vm825_vm1 = vcmp.lt.s32.totalorder %v12281_v2, 2  ;;  %v831_v18 = vsel %vm829_vm5, %v830_v51, %v9825_v26 }
 0x234   :  { %v1650_v19 = vsel %vm12271_vm12, %v12003_v11, %v1647_v40  ;;  %v998_v43 = vadd.s32 %v997_v31, %v993_v12  ;;  %v828_v47 = vsel %vm826_vm0, %v9823_v63, %v827_v25  ;;  %v2507_v56 = vsel %vm2500_vm9, %v2503_v60, %v2506_v49 }
 0x235   :  { %9828 = vcosq.f32 %v1650_v19  ;;  %v1782_v55 = vsel %vm1781_vm4, %v1780_v57, 0  ;;  %vm1661_vm15 = vcmp.eq.s32.totalorder %v12346_v39, 2  ;;  %v12356_v37 = vshll.u32 %v1778_v44, 8 }
 0x236   :  { %9830 = vsinq.f32 %v1650_v19  ;;  %v999_v16 = vadd.s32 536870912, %v998_v43  ;;  %v1784_v9 = vand.u32 31, %v1782_v55  ;;  %v832_v0 = vsel %vm825_vm1, %v828_v47, %v831_v18 }
 0x237   :  { %9832 = vpow2.f32 %v306_v54  ;;  %vm1658_vm14 = vcmp.eq.s32.totalorder %v12346_v39, 0  ;;  %v2508_v48 = vsel %vm822_vm11, nan, %v2507_v56  ;;  %v12362_v2 = vadd.s32 %v12319_v7, %v12328_v50 }
 0x238   :  { %v12364_v63 = vshrl.u32 %v999_v16, 30  ;;  %vm1657_vm12 = vcmp.lt.s32.totalorder %v12346_v39, 2  ;;  %v1783_v46 = vshrl.u32 %v1782_v55, 5  ;;  %v1785_v26 = vsub.s32 32, %v1784_v9 }
 0x239   :  { %v1787_v51 = vshll.u32 %v14350_v35, %v1784_v9  ;;  %v1790_v10 = vshll.u32 %v14333_v22, %v1784_v9  ;;  %v9827_v33 = vpop.eup %9826  ;;  %vm1654_vm10 = vweird.f32 %v12003_v11  ;;  %v1793_v32 = vshll.u32 %v14351_v21, %v1784_v9 }
 0x23a   :  { %v1001_v25 = vshll.u32 %v12364_v63, 30  ;;  %v1796_v7 = vshll.u32 %v14364_v20, %v1784_v9  ;;  %v1799_v50 = vshll.u32 %v14348_v52, %v1784_v9  ;;  %v1786_v29 = vshrl.u32 %v14350_v35, %v1785_v26 }
 0x23b   :  { %v1788_v57 = vshrl.u32 %v14333_v22, %v1785_v26  ;;  %v1791_v54 = vshrl.u32 %v14351_v21, %v1785_v26  ;;  %v1794_v12 = vshrl.u32 %v14364_v20, %v1785_v26  ;;  %v833_v58 = vsel %vm822_vm11, nan, %v832_v0 }
 0x23c   :  { %v12380_v59 = vsub.s32 %v998_v43, %v1001_v25  ;;  %v1797_v60 = vshrl.u32 %v14348_v52, %v1785_v26  ;;  %v1800_v49 = vshrl.u32 %v14349_v5, %v1785_v26  ;;  %v12384_v40 = vmul.f32 %v9827_v33, %v2508_v48 }
 0x23d   :  { %v1789_v31 = vor.u32 %v1788_v57, %v1787_v51  ;;  %v1792_v44 = vor.u32 %v1791_v54, %v1790_v10  ;;  %vm1802_vm7 = vcmp.lt.s32.totalorder %v1783_v46, 1  ;;  %v1795_v19 = vor.u32 %v1794_v12, %v1793_v32 }
 0x23e   :  { %v1004_v18 = vsub.s32 0, %v12380_v59  ;;  %v1798_v47 = vor.u32 %v1797_v60, %v1796_v7  ;;  %v1801_v56 = vor.u32 %v1800_v49, %v1799_v50  ;;  %vm1803_vm0 = vcmp.lt.s32.totalorder %v1783_v46, 2 }
 0x23f   :  { %v12387_v55 = vpop.eup %9828  ;;  %vm1804_vm11 = vcmp.lt.s32.totalorder %v1783_v46, 3  ;;  %vm1805_vm5 = vcmp.lt.s32.totalorder %v1783_v46, 4  ;;  %v1806_v41 = vsel %vm1802_vm7, %v1786_v29, %v1789_v31  ;;  %v1810_v48 = vsel %vm1802_vm7, %v1789_v31, %v1792_v44 }
 0x240   :  { %v12390_v43 = vpop.eup %9830  ;;  %v14284_v16 = vxor.u32 2147483648, %v12387_v55  ;;  %v9210_v9 = vmin.u32 %v1004_v18, %v12380_v59  ;;  %v1807_v0 = vsel %vm1805_vm5, %v1795_v19, 2102212464  ;;  %v1811_v25 = vsel %vm1805_vm5, %v1798_v47, 920167782 }
 0x241   :  { %v12395_v26 = vpop.eup %9832  ;;  %v14285_v51 = vxor.u32 2147483648, %v12390_v43  ;;  %v1808_v10 = vsel %vm1804_vm11, %v1792_v44, %v1807_v0  ;;  %v1815_v32 = vsel %vm1805_vm5, %v1801_v56, 1326507024  ;;  %v1982_v50 = vmul.f32 %v9827_v33, %v833_v58 }
 0x242   :  { %v1663_v7 = vsel %vm1661_vm15, %v14284_v16, %v12390_v43  ;;  %v1006_v29 = vclz %v9210_v9  ;;  %v1814_v57 = vsel %vm1802_vm7, %v1792_v44, %v1795_v19  ;;  %v14282_v12 = vrot.slane %v12384_v40, 4 }
 0x243   :  { %v1660_v54 = vsel %vm1658_vm14, %v12387_v55, %v14285_v51  ;;  %v1809_v60 = vsel %vm1803_vm0, %v1806_v41, %v1808_v10  ;;  %v1812_v49 = vsel %vm1804_vm11, %v1795_v19, %v1811_v25  ;;  %v1816_v58 = vsel %vm1804_vm11, %v1798_v47, %v1815_v32  ;;  %v28_v47 = vld [vmem:[%s14224_s0 + $0x68] sm:$0x1] }
 0x244   :  { %v1664_v31 = vsel %vm1657_vm12, %v1660_v54, %v1663_v7  ;;  %v9211_v18 = vadd.s32 4294967294, %v1006_v29  ;;  %v1813_v33 = vsel %vm1803_vm0, %v1810_v48, %v1812_v49  ;;  %v1817_v56 = vsel %vm1803_vm0, %v1814_v57, %v1816_v58 }
 0x245   :  { %v1665_v44 = vsel %vm1654_vm10, nan, %v1664_v31  ;;  %v12421_v9 = vmul.u32.u64.low %v12356_v37, %v1813_v33  ;;  %v12422_v0 = vmul.u32.u64.high %v12356_v37, %v1813_v33, %v12421_v9  ;;  %v160_v48 = vmul.f32 16.0, %v12134_v15 }
 0x246   :  { %v1990_v19 = vmul.f32 %v12395_v26, %v1665_v44  ;;  %vm9212_vm9 = vcmp.lt.s32.totalorder %v9211_v18, 0  ;;  %v12427_v39 = vmul.u32.u64.low %v12356_v37, %v1817_v56  ;;  %v12428_v41 = vmul.u32.u64.high %v12356_v37, %v1817_v56, %v12427_v39 }
 0x247   :  { %v184_v46 = vrot.slane %v12134_v15, 3  ;;  %v1009_v10 = vsel %vm9212_vm9, 0, %v9211_v18  ;;  %v1825_v25 = vmul.u32 %v12356_v37, %v1809_v60  ;;  %v168_v49 = vmul.f32 64.0, %v12134_v15  ;;  %v9898_v15 = vld [vmem:[%s14224_s0 + $0x28] sm:$0xff] }
 0x248   :  { %v3719_v32 = vsel %vm3674_vm13, %v1990_v19, %v14282_v12  ;;  %v1010_v7 = vsub.s32 32, %v1009_v10  ;;  %v1011_v29 = vshll.u32 %v12380_v59, %v1009_v10  ;;  %v1014_v57 = vsub.s32 4294967266, %v1009_v10 }
 0x249   :  { %v12440_v54 = vpack.c.bf16 %v3719_v32, %v1982_v50  ;;  %v1828_v31 = vadd.s32 1, %v12422_v0  ;;  %v3728_v33 = vmul.f32 2.0, %v28_v47  ;;  %vm1827_vm3 = vc.u32 %v12428_v41, %v12421_v9 }
 0x24a   :  { %v1012_v58 = vshrl.u32 %v12362_v2, %v1010_v7  ;;  %v1015_v18 = vadd.s32 127, %v1014_v57  ;;  %v208_v37 = vrot.slane %v160_v48, 5  ;;  %vm14379_vm4 = vcmask 1042432  }
 0x24b   :  { %5709 = vmatpush1.bf16.msra.mxu0 %v12440_v54  ;;  %v248_v59 = vsel %vm14379_vm4, %v184_v46, %v12191_v45  ;;  %v1829_v50 = vsel %vm1827_vm3, %v1828_v31, %v12422_v0  ;;  %v3755_v60 = vrot.slane %v9898_v15, 6  ;;  %v3426_v19 = vand.u32 3, %v11781_v1  ;;  %vm14382_vm7 = vmmov %vm14379_vm4 }
 0x24c   :  { %v1013_v44 = vor.u32 %v1012_v58, %v1011_v29  ;;  %v1016_v56 = vshll.u32 %v1015_v18, 23  ;;  %v1830_v2 = vadd.s32 %v1829_v50, %v1825_v25  ;;  %v232_v39 = vrot.slane %v168_v49, 2 }
 0x24d   :  { %v3756_v10 = vrot.slane %v28_v47, 6  ;;  %v3796_v32 = vrot.slane %v11297_v6, 3  ;;  %v3797_v48 = vrot.slane %v3728_v33, 3  ;;  %vm940_vm1 = vcmp.lt.s32.totalorder %v12237_v17, 0 }
 0x24e   :  { %v1017_v45 = vor.u32 4788187, %v1016_v56  ;;  %v1020_v46 = vcvt.s32.f32 %v1013_v44  ;;  %v1831_v0 = vadd.s32 536870912, %v1830_v2  ;;  %v256_v7 = vsel %vm14288_vm2, %v248_v59, %v208_v37 }
 0x24f   :  { %v1024_v57 = vsub.s32 4, %v12364_v63  ;;  %vm14380_vm15 = vcmask 1041408   ;;  %vm14381_vm14 = vcmask 1044480   ;;  %vm3428_vm12 = vcmp.eq.s32.totalorder %v3426_v19, 0 }
 0x250   :  { %v3757_v29 = vsel %vm14380_vm15, %v3755_v60, %v3756_v10  ;;  %v3798_v25 = vsel %vm14381_vm14, %v3796_v32, %v3797_v48  ;;  %v1018_v31 = vand.u32 2147483647, %v1017_v45  ;;  %v1832_v1 = vshrl.u32 %v1831_v0, 30 }
 0x251   :  { %v12462_v47 = vsel %vm14382_vm7, %v3757_v29, %v3798_v25  ;;  %vm14383_vm0 = vcmask 1040384   ;;  %v14384_v49 = vand.u32 2147483647, %v12237_v17  ;;  %vm3431_vm5 = vcmp.eq.s32.totalorder %v3426_v19, 2 }
 0x252   :  { %v264_v6 = vsel %vm14383_vm0, %v208_v37, %v232_v39  ;;  %v4344_v58 = vand.u32 2139095040, %v12462_v47  ;;  %v272_v18 = vmul.f32 -0.5, %v256_v7  ;;  %v1021_v59 = vmul.f32 %v1020_v46, %v1018_v31 }
 0x253   :  { %vm12467_vm11 = vcmp.le.f32.partialorder %v14384_v49, 0.7853982  ;;  %v1833_v50 = vshll.u32 %v1832_v1, 30  ;;  %vm3427_vm9 = vcmp.lt.s32.totalorder %v3426_v19, 2  ;;  %v1025_v15 = vsel %vm940_vm1, %v1024_v57, %v12364_v63 }
 0x254   :  { %v14387_v60 = vxor.u32 2147483648, %v11889_v4  ;;  %v14283_v44 = vand.u32 2147483647, %v12462_v47  ;;  %v4345_v56 = vshrl.u32 %v4344_v58, 23  ;;  %v1022_v39 = vxor.u32 2147483648, %v1021_v59 }
 0x255   :  { %v12479_v10 = vsub.s32 %v1830_v2, %v1833_v50  ;;  %v1856_v32 = vsub.s32 4, %v1832_v1  ;;  %v14388_v48 = vxor.u32 2147483648, %v11873_v53  ;;  %v280_v46 = vmul.f32 -0.5, %v264_v6 }
 0x256   :  { %v3430_v37 = vsel %vm3428_vm12, %v11873_v53, %v14387_v60  ;;  %v9333_v0 = vadd.s32 4294967169, %v4345_v56  ;;  %v1023_v63 = vsel %vm940_vm1, %v1022_v39, %v1021_v59  ;;  %v1027_v7 = vsel %vm12467_vm11, 0, %v1025_v15  ;;  %v12514_v15 = vld [vmem:[%s14224_s0 + $0x78] sm:$0x1] }
 0x257   :  { %v3433_v45 = vsel %vm3431_vm5, %v14388_v48, %v11889_v4  ;;  %vm1772_vm3 = vcmp.lt.s32.totalorder %v12261_v30, 0  ;;  %v1836_v57 = vsub.s32 0, %v12479_v10  ;;  %v1026_v2 = vsel %vm12467_vm11, %v12237_v17, %v1023_v63 }
 0x258   :  { %v3434_v29 = vsel %vm3427_vm9, %v3430_v37, %v3433_v45  ;;  %v4348_v53 = vand.u32 8388607, %v14283_v44  ;;  %v4351_v4 = vadd.s32 1, %v9333_v0  ;;  %v294_v25 = vmul.f32 1.442695, %v272_v18 }
 0x259   :  { %v9242_v31 = vmin.u32 %v1836_v57, %v12479_v10  ;;  %v1857_v6 = vsel %vm1772_vm3, %v1856_v32, %v1832_v1  ;;  %v310_v49 = vmul.f32 1.442695, %v280_v46  ;;  %9834 = vcosq.f32 %v1026_v2 }
 0x25a   :  { %v1031_v58 = vadd.s32 3, %v1027_v7  ;;  %vm4352_vm4 = vcmp.gt.s32.totalorder %v4351_v4, 0  ;;  %9836 = vsinq.f32 %v1026_v2  ;;  %vm12501_vm1 = vcmp.le.f32.partialorder %v1770_v42, 0.7853982 }
 0x25b   :  { %v1838_v33 = vclz %v9242_v31  ;;  %vm14391_vm15 = vweird.f32 %v11424_v13  ;;  %v12509_v59 = vsel %vm12501_vm1, 0, %v1857_v6  ;;  %v4349_v1 = vor.u32 8388608, %v4348_v53 }
 0x25c   :  { %v3435_v18 = vsel %vm14391_vm15, nan, %v3434_v29  ;;  %v4353_v50 = vsel %vm4352_vm4, %v4351_v4, 0  ;;  %9838 = vpow2.f32 %v294_v25  ;;  %v12516_v60 = vand.u32 3, %v1027_v7 }
 0x25d   :  { %v9243_v42 = vadd.s32 4294967294, %v1838_v33  ;;  %v4355_v37 = vand.u32 31, %v4353_v50  ;;  %9840 = vpow2.f32 %v310_v49  ;;  %v12518_v56 = vand.u32 3, %v1031_v58 }
 0x25e   :  { %v1826_v13 = vadd.s32 %v12421_v9, %v12428_v41  ;;  %v12523_v39 = vmul.f32 %v11753_v38, %v3435_v18  ;;  %v12526_v32 = vadd.s32 3, %v12509_v59  ;;  %v12529_v45 = vmul.f32 2.0, %v12514_v15  ;;  %v9899_v18 = vld [vmem:[%s14224_s0 + $0x38] sm:$0xff] }
 0x25f   :  { %vm9244_vm14 = vcmp.lt.s32.totalorder %v9243_v42, 0  ;;  %v4356_v48 = vsub.s32 32, %v4355_v37  ;;  %v12531_v0 = vshrl.u32 %v4353_v50, 5  ;;  %v4358_v63 = vshll.u32 %v14350_v35, %v4355_v37 }
 0x260   :  { %v1841_v46 = vsel %vm9244_vm14, 0, %v9243_v42  ;;  %v12534_v7 = vshll.u32 %v4349_v1, 8  ;;  %vm2707_vm12 = vcmp.eq.s32.totalorder %v12516_v60, 0  ;;  %vm2710_vm7 = vcmp.eq.s32.totalorder %v12516_v60, 2 }
 0x261   :  { %v1842_v57 = vsub.s32 32, %v1841_v46  ;;  %v1843_v9 = vshll.u32 %v12479_v10, %v1841_v46  ;;  %v1846_v38 = vsub.s32 4294967266, %v1841_v46  ;;  %v4361_v41 = vshll.u32 %v14333_v22, %v4355_v37 }
 0x262   :  { %v4359_v2 = vshrl.u32 %v14333_v22, %v4356_v48  ;;  %v4362_v29 = vshrl.u32 %v14351_v21, %v4356_v48  ;;  %v4364_v53 = vshll.u32 %v14351_v21, %v4355_v37  ;;  %v4367_v4 = vshll.u32 %v14364_v20, %v4355_v37 }
 0x263   :  { %v1844_v25 = vshrl.u32 %v1826_v13, %v1842_v57  ;;  %v1847_v31 = vadd.s32 127, %v1846_v38  ;;  %v4365_v6 = vshrl.u32 %v14364_v20, %v4356_v48  ;;  %v4368_v10 = vshrl.u32 %v14348_v52, %v4356_v48  ;;  %v12546_v49 = vpop.eup %9834 }
 0x264   :  { %v4370_v58 = vshll.u32 %v14348_v52, %v4355_v37  ;;  %v4371_v33 = vshrl.u32 %v14349_v5, %v4356_v48  ;;  %v3761_v1 = vrot.slane %v9899_v18, 6  ;;  %v3762_v50 = vrot.slane %v12514_v15, 6  ;;  %v9837_v42 = vpop.eup %9836 }
 0x265   :  { %vm1037_vm0 = vcmp.eq.s32.totalorder %v12518_v56, 2  ;;  %v1845_v13 = vor.u32 %v1844_v25, %v1843_v9  ;;  %v1848_v46 = vshll.u32 %v1847_v31, 23  ;;  %v3802_v57 = vrot.slane %v11587_v62, 3 }
 0x266   :  { %v3803_v38 = vrot.slane %v12529_v45, 3  ;;  %vm1034_vm11 = vcmp.eq.s32.totalorder %v12518_v56, 0  ;;  %v4357_v37 = vshrl.u32 %v14350_v35, %v4356_v48  ;;  %v4360_v12 = vor.u32 %v4359_v2, %v4358_v63  ;;  %v12560_v18 = vpop.eup %9838 }
 0x267   :  { %v4363_v44 = vor.u32 %v4362_v29, %v4361_v41  ;;  %vm4373_vm5 = vcmp.lt.s32.totalorder %v12531_v0, 1  ;;  %v1849_v15 = vor.u32 4788187, %v1848_v46  ;;  %v1852_v16 = vcvt.s32.f32 %v1845_v13  ;;  %v12563_v31 = vpop.eup %9840 }
 0x268   :  { %vm2706_vm9 = vcmp.lt.s32.totalorder %v12516_v60, 2  ;;  %v4366_v9 = vor.u32 %v4365_v6, %v4364_v53  ;;  %v4369_v25 = vor.u32 %v4368_v10, %v4367_v4  ;;  %v1035_v62 = vxor.u32 2147483648, %v9837_v42 }
 0x269   :  { %v1038_v45 = vxor.u32 2147483648, %v12546_v49  ;;  %v4372_v51 = vor.u32 %v4371_v33, %v4370_v58  ;;  %vm4376_vm4 = vcmp.lt.s32.totalorder %v12531_v0, 4  ;;  %vm1033_vm15 = vcmp.lt.s32.totalorder %v12518_v56, 2  ;;  %v9900_v56 = vld [vmem:[%s14224_s0 + $0x20] sm:$0xff] }
 0x26a   :  { %v1850_v48 = vand.u32 2147483647, %v1849_v15  ;;  %vm4375_vm14 = vcmp.lt.s32.totalorder %v12531_v0, 3  ;;  %vm14392_vm6 = vcmask 1041408   ;;  %v3323_v41 = vand.u32 3, %v12289_v27 }
 0x26b   :  { %v3763_v63 = vsel %vm14392_vm6, %v3761_v1, %v3762_v50  ;;  %vm1030_vm8 = vweird.f32 %v12237_v17  ;;  %vm4374_vm2 = vcmp.lt.s32.totalorder %v12531_v0, 2  ;;  %v4377_v2 = vsel %vm4373_vm5, %v4357_v37, %v4360_v12 }
 0x26c   :  { %v4378_v29 = vsel %vm4376_vm4, %v4366_v9, 2102212464  ;;  %v4381_v53 = vsel %vm4373_vm5, %v4360_v12, %v4363_v44  ;;  %v1853_v4 = vmul.f32 %v1852_v16, %v1850_v48  ;;  %v4382_v27 = vsel %vm4376_vm4, %v4369_v25, 920167782 }
 0x26d   :  { %v4379_v6 = vsel %vm4375_vm14, %v4363_v44, %v4378_v29  ;;  %v4385_v10 = vsel %vm4373_vm5, %v4363_v44, %v4366_v9  ;;  %v2709_v58 = vsel %vm2707_vm12, %v12546_v49, %v1035_v62  ;;  %v2712_v33 = vsel %vm2710_vm7, %v1038_v45, %v9837_v42 }
 0x26e   :  { %v4383_v12 = vsel %vm4375_vm14, %v4366_v9, %v4382_v27  ;;  %v4386_v16 = vsel %vm4376_vm4, %v4372_v51, 1326507024  ;;  %v1854_v1 = vxor.u32 2147483648, %v1853_v4  ;;  %v4380_v50 = vsel %vm4374_vm2, %v4377_v2, %v4379_v6 }
 0x26f   :  { %v4384_v44 = vsel %vm4374_vm2, %v4381_v53, %v4383_v12  ;;  %v4387_v13 = vsel %vm4375_vm14, %v4369_v25, %v4386_v16  ;;  %vm14393_vm6 = vcmask 1044480   ;;  %vm14394_vm12 = vcmask 1042432  }
 0x270   :  { %v4388_v46 = vsel %vm4374_vm2, %v4385_v10, %v4387_v13  ;;  %v12603_v37 = vmul.u32.u64.low %v12534_v7, %v4384_v44  ;;  %v12604_v15 = vmul.u32.u64.high %v12534_v7, %v4384_v44, %v12603_v37  ;;  %v3804_v51 = vsel %vm14393_vm6, %v3802_v57, %v3803_v38  ;;  %v27_v38 = vld [vmem:[%s14224_s0 + $0x60] sm:$0x1] }
 0x271   :  { %v1855_v9 = vsel %vm1772_vm3, %v1854_v1, %v1853_v4  ;;  %v12611_v48 = vmul.u32.u64.low %v12534_v7, %v4388_v46  ;;  %v12612_v2 = vmul.u32.u64.high %v12534_v7, %v4388_v46, %v12611_v48  ;;  %v12615_v29 = vsel %vm14394_vm12, %v3763_v63, %v3804_v51 }
 0x272   :  { %v1039_v0 = vsel %vm1037_vm0, %v1038_v45, %v9837_v42  ;;  %v1858_v25 = vsel %vm12501_vm1, %v12261_v30, %v1855_v9  ;;  %v12623_v53 = vand.u32 3, %v12526_v32  ;;  %v4552_v57 = vand.u32 2139095040, %v12615_v29 }
 0x273   :  { %v1036_v63 = vsel %vm1034_vm11, %v12546_v49, %v1035_v62  ;;  %9842 = vcosq.f32 %v1858_v25  ;;  %v4396_v42 = vmul.u32 %v12534_v7, %v4380_v50  ;;  %vm3325_vm2 = vcmp.eq.s32.totalorder %v3323_v41, 0 }
 0x274   :  { %9844 = vsinq.f32 %v1858_v25  ;;  %v2713_v19 = vsel %vm2706_vm9, %v2709_v58, %v2712_v33  ;;  %v4399_v32 = vadd.s32 1, %v12604_v15  ;;  %v4553_v45 = vshrl.u32 %v4552_v57, 23  ;;  %vm14398_vm9 = vmmov %vm14393_vm6 }
 0x275   :  { %vm4398_vm3 = vc.u32 %v12612_v2, %v12603_v37  ;;  %vm3324_vm1 = vcmp.lt.s32.totalorder %v3323_v41, 2  ;;  %v14395_v4 = vxor.u32 2147483648, %v12390_v43  ;;  %v3727_v49 = vmul.f32 2.0, %v27_v38 }
 0x276   :  { %v1040_v7 = vsel %vm1033_vm15, %v1036_v63, %v1039_v0  ;;  %v4400_v62 = vsel %vm4398_vm3, %v4399_v32, %v12604_v15  ;;  %v9341_v27 = vadd.s32 4294967169, %v4553_v45  ;;  %vm3328_vm7 = vcmp.eq.s32.totalorder %v3323_v41, 2  ;;  %vm14399_vm15 = vmmov %vm14394_vm12 }
 0x277   :  { %v3327_v6 = vsel %vm3325_vm2, %v12387_v55, %v14395_v4  ;;  %v2714_v60 = vsel %vm1030_vm8, nan, %v2713_v19  ;;  %v4401_v10 = vadd.s32 %v4400_v62, %v4396_v42  ;;  %v4549_v58 = vand.u32 2147483647, %v12615_v29 }
 0x278   :  { %v14396_v33 = vxor.u32 2147483648, %v12387_v55  ;;  %v4559_v16 = vadd.s32 1, %v9341_v27  ;;  %v3752_v50 = vrot.slane %v9900_v56, 6  ;;  %v3753_v44 = vrot.slane %v27_v38, 6 }
 0x279   :  { %v4402_v13 = vadd.s32 536870912, %v4401_v10  ;;  %v3793_v46 = vrot.slane %v11912_v61, 3  ;;  %v3794_v15 = vrot.slane %v3727_v49, 3  ;;  %v1041_v51 = vsel %vm1030_vm8, nan, %v1040_v7 }
 0x27a   :  { %v3330_v12 = vsel %vm3328_vm7, %v14396_v33, %v12390_v43  ;;  %vm4560_vm0 = vcmp.gt.s32.totalorder %v4559_v16, 0  ;;  %v12662_v43 = vmul.f32 %v12560_v18, %v2714_v60  ;;  %v4556_v48 = vand.u32 8388607, %v4549_v58 }
 0x27b   :  { %v3331_v1 = vsel %vm3324_vm1, %v3327_v6, %v3330_v12  ;;  %v12664_v9 = vshrl.u32 %v4402_v13, 30  ;;  %v4561_v11 = vsel %vm4560_vm0, %v4559_v16, 0  ;;  %vm1865_vm11 = vcmp.lt.s32.totalorder %v12623_v53, 2 }
 0x27c   :  { %v3332_v41 = vsel %vm1654_vm10, nan, %v3331_v1  ;;  %vm1862_vm10 = vweird.f32 %v12261_v30  ;;  %v3693_v61 = vrot.slane %v12523_v39, 4  ;;  %v4563_v17 = vand.u32 31, %v4561_v11  ;;  %v9396_v30 = vld [vmem:[%s14226_s2 + $0x28] sm:$0xff] }
 0x27d   :  { %v12659_v55 = vmul.f32 %v12395_v26, %v3332_v41  ;;  %v12671_v0 = vpop.eup %9842  ;;  %vm1869_vm8 = vcmp.eq.s32.totalorder %v12623_v53, 2  ;;  %v4404_v26 = vshll.u32 %v12664_v9, 30  ;;  %vm14397_vm5 = vcmask 1041408  }
 0x27e   :  { %v3754_v25 = vsel %vm14397_vm5, %v3752_v50, %v3753_v44  ;;  %v3795_v57 = vsel %vm14398_vm9, %v3793_v46, %v3794_v15  ;;  %v12677_v38 = vpop.eup %9844  ;;  %vm1866_vm4 = vcmp.eq.s32.totalorder %v12623_v53, 0  ;;  %v1870_v63 = vxor.u32 2147483648, %v12671_v0 }
 0x27f   :  { %v1984_v42 = vmul.f32 %v12560_v18, %v1041_v51  ;;  %v4564_v19 = vsub.s32 32, %v4563_v17  ;;  %v1867_v32 = vxor.u32 2147483648, %v12677_v38  ;;  %v3681_v45 = vrot.slane %v12662_v43, 4 }
 0x280   :  { %v12684_v4 = vsub.s32 %v4401_v10, %v4404_v26  ;;  %v4557_v6 = vor.u32 8388608, %v4556_v48  ;;  %v1871_v49 = vsel %vm1869_vm8, %v1870_v63, %v12677_v38  ;;  %v4397_v7 = vadd.s32 %v12603_v37, %v12612_v2 }
 0x281   :  { %v4566_v62 = vshll.u32 %v14350_v35, %v4563_v17  ;;  %v12693_v27 = vsel %vm14399_vm15, %v3754_v25, %v3795_v57  ;;  %v1868_v18 = vsel %vm1866_vm4, %v12671_v0, %v1867_v32  ;;  %v4567_v10 = vshrl.u32 %v14333_v22, %v4564_v19 }
 0x282   :  { %v4407_v60 = vsub.s32 0, %v12684_v4  ;;  %v4569_v33 = vshll.u32 %v14333_v22, %v4563_v17  ;;  %v1872_v12 = vsel %vm1865_vm11, %v1868_v18, %v1871_v49  ;;  %v4570_v37 = vshrl.u32 %v14351_v21, %v4564_v19 }
 0x283   :  { %v4572_v2 = vshll.u32 %v14351_v21, %v4563_v17  ;;  %v4573_v16 = vshrl.u32 %v14364_v20, %v4564_v19  ;;  %v1873_v1 = vsel %vm1862_vm10, nan, %v1872_v12  ;;  %vm4343_vm14 = vcmp.lt.s32.totalorder %v12462_v47, 0 }
 0x284   :  { %v9334_v56 = vmin.u32 %v4407_v60, %v12684_v4  ;;  %v12710_v50 = vshll.u32 %v4557_v6, 8  ;;  %v12713_v44 = vand.u32 3, %v12509_v59  ;;  %v1992_v53 = vmul.f32 %v12563_v31, %v1873_v1 }
 0x285   :  { %v4427_v13 = vsub.s32 4, %v12664_v9  ;;  %v4562_v41 = vshrl.u32 %v4561_v11, 5  ;;  %v4240_v46 = vand.u32 2139095040, %v12693_v27  ;;  %v4565_v51 = vshrl.u32 %v14350_v35, %v4564_v19 }
 0x286   :  { %v4409_v15 = vclz %v9334_v56  ;;  %v4568_v48 = vor.u32 %v4567_v10, %v4566_v62  ;;  %v4571_v26 = vor.u32 %v4570_v37, %v4569_v33  ;;  %v3721_v25 = vsel %vm3674_vm13, %v1992_v53, %v3681_v45 }
 0x287   :  { %v4574_v57 = vor.u32 %v4573_v16, %v4572_v2  ;;  %v4575_v59 = vshll.u32 %v14364_v20, %v4563_v17  ;;  %v4576_v6 = vshrl.u32 %v14348_v52, %v4564_v19  ;;  %v12724_v49 = vpack.c.bf16 %v3721_v25, %v1984_v42 }
 0x288   :  { %v9335_v18 = vadd.s32 4294967294, %v4409_v15  ;;  %v4578_v11 = vshll.u32 %v14348_v52, %v4563_v17  ;;  %v4579_v60 = vshrl.u32 %v14349_v5, %v4564_v19  ;;  %vm4581_vm6 = vcmp.lt.s32.totalorder %v4562_v41, 1 }
 0x289   :  { %v4577_v12 = vor.u32 %v4576_v6, %v4575_v59  ;;  %vm4582_vm12 = vcmp.lt.s32.totalorder %v4562_v41, 2  ;;  %vm4583_vm2 = vcmp.lt.s32.totalorder %v4562_v41, 3  ;;  %5762 = vmatpush1.bf16.msra.mxu1 %v12724_v49  ;;  %vm4584_vm1 = vcmp.lt.s32.totalorder %v4562_v41, 4 }
 0x28a   :  { %vm9336_vm3 = vcmp.lt.s32.totalorder %v9335_v18, 0  ;;  %v4580_v62 = vor.u32 %v4579_v60, %v4578_v11  ;;  %v4585_v10 = vsel %vm4581_vm6, %v4565_v51, %v4568_v48  ;;  %v4586_v37 = vsel %vm4584_vm1, %v4574_v57, 2102212464 }
 0x28b   :  { %v4412_v33 = vsel %vm9336_vm3, 0, %v9335_v18  ;;  %v4589_v42 = vsel %vm4581_vm6, %v4568_v48, %v4571_v26  ;;  %v4590_v2 = vsel %vm4584_vm1, %v4577_v12, 920167782  ;;  %v4587_v1 = vsel %vm4583_vm2, %v4571_v26, %v4586_v37 }
 0x28c   :  { %v4413_v16 = vsub.s32 32, %v4412_v33  ;;  %v4414_v17 = vshll.u32 %v12684_v4, %v4412_v33  ;;  %v4417_v19 = vsub.s32 4294967266, %v4412_v33  ;;  %v4428_v56 = vsel %vm4343_vm14, %v4427_v13, %v12664_v9  ;;  %v9398_v33 = vld [vmem:[%s14226_s2 + $0x38] sm:$0xff] }
 0x28d   :  { %v4591_v53 = vsel %vm4583_vm2, %v4574_v57, %v4590_v2  ;;  %v4593_v15 = vsel %vm4581_vm6, %v4571_v26, %v4574_v57  ;;  %v4594_v51 = vsel %vm4584_vm1, %v4580_v62, 1326507024  ;;  %v4588_v4 = vsel %vm4582_vm12, %v4585_v10, %v4587_v1 }
 0x28e   :  { %v4415_v25 = vshrl.u32 %v4397_v7, %v4413_v16  ;;  %v4418_v59 = vadd.s32 127, %v4417_v19  ;;  %v4592_v48 = vsel %vm4582_vm12, %v4589_v42, %v4591_v53  ;;  %v4595_v6 = vsel %vm4583_vm2, %v4577_v12, %v4594_v51 }
 0x28f   :  { %v4596_v18 = vsel %vm4582_vm12, %v4593_v15, %v4595_v6  ;;  %v12743_v11 = vmul.u32.u64.low %v12710_v50, %v4592_v48  ;;  %v12744_v60 = vmul.u32.u64.high %v12710_v50, %v4592_v48, %v12743_v11  ;;  %v14400_v7 = vrot.slane %v11876_v8, 4  ;;  %v5515_v8 = vld [vmem:[%s14226_s2 + $0x10] sm:$0xff]  ;;  %v5516_v15 = vld [vmem:[%s14226_s2 + $0x18] sm:$0xff] }
 0x290   :  { %v4416_v9 = vor.u32 %v4415_v25, %v4414_v17  ;;  %v4419_v13 = vshll.u32 %v4418_v59, 23  ;;  %v12748_v26 = vmul.u32.u64.low %v12710_v50, %v4596_v18  ;;  %v12749_v57 = vmul.u32.u64.high %v12710_v50, %v4596_v18, %v12748_v26  ;;  %5553 = vperm.xlu1 %9709, %v5515_v8   ;;  %v12801_v59 = vld [vmem:[%s14224_s0 + $0x70] sm:$0x1] }
 0x291   :  { %v12756_v12 = vsel %vm3674_vm13, %v14400_v7, %v3693_v61  ;;  %v12759_v41 = vand.u32 3, %v12000_v24  ;;  %v4241_v62 = vshrl.u32 %v4240_v46, 23  ;;  %v14401_v10 = vand.u32 2147483647, %v12462_v47  ;;  %v9395_v24 = vld [vmem:[%s14226_s2 + $0x20] sm:$0xff] }
 0x292   :  { %v4420_v37 = vor.u32 4788187, %v4419_v13  ;;  %v4423_v42 = vcvt.s32.f32 %v4416_v9  ;;  %v4604_v2 = vmul.u32 %v12710_v50, %v4588_v4  ;;  %v4607_v61 = vadd.s32 1, %v12744_v60  ;;  %5874 = vperm.xlu0 %9708, %v9395_v24   ;;  %v9413_v26 = vld [vmem:[%s14226_s2 + $0x40] sm:$0xff] }
 0x293   :  { %vm12763_vm7 = vcmp.le.f32.partialorder %v14401_v10, 0.7853982  ;;  %v9329_v46 = vadd.s32 4294967169, %v4241_v62  ;;  %vm3531_vm0 = vcmp.eq.s32.totalorder %v12713_v44, 0  ;;  %vm4606_vm11 = vc.u32 %v12749_v57, %v12743_v11 }
 0x294   :  { %v4430_v39 = vsel %vm12763_vm7, 0, %v4428_v56  ;;  %v4421_v16 = vand.u32 2147483647, %v4420_v37  ;;  %vm3530_vm8 = vcmp.lt.s32.totalorder %v12713_v44, 2  ;;  %v3533_v50 = vsel %vm3531_vm0, %v12671_v0, %v1867_v32  ;;  %v9397_v32 = vld [vmem:[%s14226_s2 + $0x30] sm:$0xff]  ;;  %5558 = vperm.xlu1 %9709, %v5516_v15  }
 0x295   :  { %vm3634_vm5 = vcmp.eq.s32.totalorder %v12759_v41, 0  ;;  %v4608_v17 = vsel %vm4606_vm11, %v4607_v61, %v12744_v60  ;;  %v4247_v19 = vadd.s32 1, %v9329_v46  ;;  %vm3534_vm9 = vcmp.eq.s32.totalorder %v12713_v44, 2 }
 0x296   :  { %v4424_v1 = vmul.f32 %v4423_v42, %v4421_v16  ;;  %vm3637_vm4 = vcmp.eq.s32.totalorder %v12759_v41, 2  ;;  %v4609_v56 = vadd.s32 %v4608_v17, %v4604_v2  ;;  %v3536_v53 = vsel %vm3534_vm9, %v1870_v63, %v12677_v38  ;;  %5884 = vperm.xlu0 %9708, %v9397_v32  }
 0x297   :  { %v4434_v51 = vadd.s32 3, %v4430_v39  ;;  %v4237_v25 = vand.u32 2147483647, %v12693_v27  ;;  %vm4248_vm15 = vcmp.gt.s32.totalorder %v4247_v19, 0  ;;  %v3537_v0 = vsel %vm3530_vm8, %v3533_v50, %v3536_v53 }
 0x298   :  { %v4425_v38 = vxor.u32 2147483648, %v4424_v1  ;;  %v4610_v63 = vadd.s32 536870912, %v4609_v56  ;;  %v4249_v48 = vsel %vm4248_vm15, %v4247_v19, 0  ;;  %v3538_v6 = vsel %vm1862_vm10, nan, %v3537_v0  ;;  %5879 = vperm.xlu1 %9709, %v9396_v30   ;;  %v9431_v30 = vld [vmem:[%s14226_s2 + $0x60] sm:$0xff] }
 0x299   :  { %v14404_v4 = vxor.u32 2147483648, %v12147_v3  ;;  %v14405_v60 = vxor.u32 2147483648, %v12139_v28  ;;  %v4251_v9 = vand.u32 31, %v4249_v48  ;;  %v12822_v13 = vmul.f32 %v12563_v31, %v3538_v6 }
 0x29a   :  { %v4426_v7 = vsel %vm4343_vm14, %v4425_v38, %v4424_v1  ;;  %v12834_v62 = vshrl.u32 %v4610_v63, 30  ;;  %v12842_v10 = vand.u32 3, %v4434_v51  ;;  %v4244_v37 = vand.u32 8388607, %v4237_v25  ;;  %6181 = vperm.xlu0 %9708, %v9413_v26   ;;  %v9901_v51 = vld [vmem:[%s14224_s0 + $0x30] sm:$0xff] }
 0x29b   :  { %v12812_v18 = vsel %vm3634_vm5, %v12139_v28, %v14404_v4  ;;  %v12819_v44 = vsel %vm3637_vm4, %v14405_v60, %v12147_v3  ;;  %v12832_v28 = vand.u32 3, %v4430_v39  ;;  %v12837_v3 = vmul.f32 2.0, %v12801_v59  ;;  %v9415_v39 = vld [vmem:[%s14226_s2 + $0x50] sm:$0xff]  ;;  %v9414_v60 = vld [vmem:[%s14226_s2 + $0x48] sm:$0xff] }
 0x29c   :  { %v4429_v31 = vsel %vm12763_vm7, %v12462_v47, %v4426_v7  ;;  %v4252_v42 = vsub.s32 32, %v4251_v9  ;;  %v4612_v2 = vshll.u32 %v12834_v62, 30  ;;  %v12847_v8 = vshrl.u32 %v4249_v48, 5  ;;  %5889 = vperm.xlu1 %9709, %v9398_v33  }
 0x29d   :  { %9846 = vcosq.f32 %v4429_v31  ;;  %v4254_v24 = vshll.u32 %v14350_v35, %v4251_v9  ;;  %v4257_v46 = vshll.u32 %v14333_v22, %v4251_v9  ;;  %vm5266_vm10 = vcmp.eq.s32.totalorder %v12832_v28, 2 }
 0x29e   :  { %9848 = vsinq.f32 %v4429_v31  ;;  %v4255_v61 = vshrl.u32 %v14333_v22, %v4252_v42  ;;  %v4258_v16 = vshrl.u32 %v14351_v21, %v4252_v42  ;;  %v12860_v50 = vsub.s32 %v4609_v56, %v4612_v2  ;;  %6191 = vperm.xlu0 %9708, %v9415_v39  }
 0x29f   :  { %v4260_v17 = vshll.u32 %v14351_v21, %v4251_v9  ;;  %v4261_v19 = vshrl.u32 %v14364_v20, %v4252_v42  ;;  %v4263_v1 = vshll.u32 %v14364_v20, %v4251_v9  ;;  %vm4437_vm14 = vcmp.eq.s32.totalorder %v12842_v10, 0 }
 0x2a0   :  { %vm4440_vm6 = vcmp.eq.s32.totalorder %v12842_v10, 2  ;;  %vm5263_vm12 = vcmp.eq.s32.totalorder %v12832_v28, 0  ;;  %v4245_v53 = vor.u32 8388608, %v4244_v37  ;;  %v4264_v15 = vshrl.u32 %v14348_v52, %v4252_v42  ;;  %6186 = vperm.xlu1 %9709, %v9414_v60  }
 0x2a1   :  { %vm4436_vm2 = vcmp.lt.s32.totalorder %v12842_v10, 2  ;;  %vm5262_vm3 = vcmp.lt.s32.totalorder %v12832_v28, 2  ;;  %v4615_v56 = vsub.s32 0, %v12860_v50  ;;  %v4253_v32 = vshrl.u32 %v14350_v35, %v4252_v42  ;;  %v9434_v28 = vld [vmem:[%s14226_s2 + $0x78] sm:$0xff] }
 0x2a2   :  { %v3758_v0 = vrot.slane %v9901_v51, 6  ;;  %v3759_v38 = vrot.slane %v12801_v59, 6  ;;  %vm4433_vm1 = vweird.f32 %v12462_v47  ;;  %v4256_v63 = vor.u32 %v4255_v61, %v4254_v24  ;;  %6487 = vperm.xlu0 %9708, %v9431_v30  }
 0x2a3   :  { %v4259_v48 = vor.u32 %v4258_v16, %v4257_v46  ;;  %v4266_v6 = vshll.u32 %v14348_v52, %v4251_v9  ;;  %v4267_v4 = vshrl.u32 %v14349_v5, %v4252_v42  ;;  %v9342_v26 = vmin.u32 %v4615_v56, %v12860_v50 }
 0x2a4   :  { %v4262_v7 = vor.u32 %v4261_v19, %v4260_v17  ;;  %v4265_v59 = vor.u32 %v4264_v15, %v4263_v1  ;;  %vm4269_vm7 = vcmp.lt.s32.totalorder %v12847_v8, 1  ;;  %v4605_v31 = vadd.s32 %v12743_v11, %v12749_v57  ;;  %v9416_v11 = vld [vmem:[%s14226_s2 + $0x58] sm:$0xff]  ;;  %v9433_v57 = vld [vmem:[%s14226_s2 + $0x70] sm:$0xff] }
 0x2a5   :  { %v4268_v9 = vor.u32 %v4267_v4, %v4266_v6  ;;  %v12890_v37 = vshll.u32 %v4245_v53, 8  ;;  %v3799_v42 = vrot.slane %v12155_v36, 3  ;;  %vm3633_vm0 = vcmp.lt.s32.totalorder %v12759_v41, 2  ;;  %6196 = vperm.xlu1 %9709, %v9416_v11   ;;  %v9449_v6 = vld [vmem:[%s14226_s2 + $0x80] sm:$0xff]  ;;  %v9450_v36 = vld [vmem:[%s14226_s2 + $0x88] sm:$0xff] }
 0x2a6   :  { %v4617_v2 = vclz %v9342_v26  ;;  %vm4271_vm11 = vcmp.lt.s32.totalorder %v12847_v8, 3  ;;  %vm14406_vm8 = vcmask 1041408   ;;  %v3800_v33 = vrot.slane %v12837_v3, 3  ;;  %6497 = vperm.xlu0 %9708, %v9433_v57  }
 0x2a7   :  { %v12896_v24 = vsel %vm14406_vm8, %v3758_v0, %v3759_v38  ;;  %vm4270_vm5 = vcmp.lt.s32.totalorder %v12847_v8, 2  ;;  %vm4272_vm9 = vcmp.lt.s32.totalorder %v12847_v8, 4  ;;  %v4273_v39 = vsel %vm4269_vm7, %v4253_v32, %v4256_v63  ;;  %v9847_v46 = vpop.eup %9846 }
 0x2a8   :  { %v4277_v61 = vsel %vm4269_vm7, %v4256_v63, %v4259_v48  ;;  %v9343_v3 = vadd.s32 4294967294, %v4617_v2  ;;  %v4274_v16 = vsel %vm4272_vm9, %v4262_v7, 2102212464  ;;  %v4278_v17 = vsel %vm4272_vm9, %v4265_v59, 920167782  ;;  %v9849_v1 = vpop.eup %9848  ;;  %v9432_v63 = vld [vmem:[%s14226_s2 + $0x68] sm:$0xff] }
 0x2a9   :  { %v4281_v19 = vsel %vm4269_vm7, %v4259_v48, %v4262_v7  ;;  %v4441_v53 = vxor.u32 2147483648, %v9847_v46  ;;  %v4279_v15 = vsel %vm4271_vm11, %v4262_v7, %v4278_v17  ;;  %v4282_v56 = vsel %vm4272_vm9, %v4268_v9, 1326507024  ;;  %6492 = vperm.xlu1 %9709, %v9432_v63  }
 0x2aa   :  { %v3695_v51 = vrot.slane %v12822_v13, 4  ;;  %v4438_v32 = vxor.u32 2147483648, %v9849_v1  ;;  %vm9344_vm4 = vcmp.lt.s32.totalorder %v9343_v3, 0  ;;  %v4275_v0 = vsel %vm4271_vm11, %v4259_v48, %v4274_v16  ;;  %6793 = vperm.xlu0 %9708, %v9449_v6  }
 0x2ab   :  { %v4280_v38 = vsel %vm4270_vm5, %v4277_v61, %v4279_v15  ;;  %v4442_v13 = vsel %vm4440_vm6, %v4441_v53, %v9849_v1  ;;  %v5268_v4 = vsel %vm5266_vm10, %v4441_v53, %v9849_v1  ;;  %v4620_v60 = vsel %vm9344_vm4, 0, %v9343_v3 }
 0x2ac   :  { %v4283_v48 = vsel %vm4271_vm11, %v4265_v59, %v4282_v56  ;;  %v4439_v30 = vsel %vm4437_vm14, %v9847_v46, %v4438_v32  ;;  %v5265_v26 = vsel %vm5263_vm12, %v9847_v46, %v4438_v32  ;;  %v4621_v7 = vsub.s32 32, %v4620_v60 }
 0x2ad   :  { %v4622_v9 = vshll.u32 %v12860_v50, %v4620_v60  ;;  %v4443_v2 = vsel %vm4436_vm2, %v4439_v30, %v4442_v13  ;;  %v5269_v11 = vsel %vm5262_vm3, %v5265_v26, %v5268_v4  ;;  %v4625_v57 = vsub.s32 4294967266, %v4620_v60  ;;  %v9451_v50 = vld [vmem:[%s14226_s2 + $0x90] sm:$0xff]  ;;  %6502 = vperm.xlu1 %9709, %v9434_v28  }
 0x2ae   :  { %v4284_v61 = vsel %vm4270_vm5, %v4281_v19, %v4283_v48  ;;  %v4444_v59 = vsel %vm4433_vm1, nan, %v4443_v2  ;;  %v5270_v46 = vsel %vm4433_vm1, nan, %v5269_v11  ;;  %v4623_v3 = vshrl.u32 %v4605_v31, %v4621_v7  ;;  %6803 = vperm.xlu0 %9708, %v9451_v50   ;;  %v9469_v13 = vld [vmem:[%s14226_s2 + $0xb0] sm:$0xff]  ;;  %v9468_v11 = vld [vmem:[%s14226_s2 + $0xa8] sm:$0xff] }
 0x2af   :  { %v4276_v10 = vsel %vm4270_vm5, %v4273_v39, %v4275_v0  ;;  %v12955_v16 = vrot.slane %v5270_v46, 2  ;;  %v4626_v17 = vadd.s32 127, %v4625_v57  ;;  %v12969_v39 = vsel %vm3674_vm13, %v3681_v45, %v3695_v51 }
 0x2b0   :  { %v12958_v19 = vmul.u32.u64.low %v12890_v37, %v4284_v61  ;;  %v12959_v1 = vmul.u32.u64.high %v12890_v37, %v4284_v61, %v12958_v19  ;;  %v4624_v47 = vor.u32 %v4623_v3, %v4622_v9  ;;  %vm14407_vm15 = vcmask 1045504  }
 0x2b1   :  { %v12962_v31 = vmul.u32.u64.low %v12890_v37, %v4280_v38  ;;  %v12963_v8 = vmul.u32.u64.high %v12890_v37, %v4280_v38, %v12962_v31  ;;  %v12973_v53 = vsel %vm14407_vm15, %v4444_v59, %v12955_v16  ;;  %v3640_v15 = vsel %vm3633_vm0, %v12812_v18, %v12819_v44  ;;  %v9467_v18 = vld [vmem:[%s14226_s2 + $0xa0] sm:$0xff]  ;;  %6798 = vperm.xlu1 %9709, %v9450_v36   ;;  %v9470_v19 = vld [vmem:[%s14226_s2 + $0xb8] sm:$0xff] }
 0x2b2   :  { %v4627_v56 = vshll.u32 %v4626_v17, 23  ;;  %vm14408_vm10 = vcmask 1044480   ;;  %v12984_v43 = vpack.c.bf16 %v12973_v53, %v12756_v12  ;;  %v8526_v45 = vpack.c.bf16 %v12955_v16, %v12973_v53  ;;  %7099 = vperm.xlu0 %9708, %v9467_v18  }
 0x2b3   :  { %v3801_v32 = vsel %vm14408_vm10, %v3799_v42, %v3800_v33  ;;  %v4635_v51 = vsub.s32 4, %v12834_v62  ;;  %vm14409_vm14 = vcmask 1042432   ;;  %v4631_v12 = vcvt.s32.f32 %v4624_v47  ;;  %v9491_v47 = vld [vmem:[%s14226_s2 + $0xd0] sm:$0xff] }
 0x2b4   :  { %v12991_v41 = vsel %vm14409_vm14, %v12896_v24, %v3801_v32  ;;  %v4628_v44 = vor.u32 4788187, %v4627_v56  ;;  %v4292_v42 = vmul.u32 %v12890_v37, %v4276_v10  ;;  %vm4294_vm6 = vc.u32 %v12959_v1, %v12962_v31  ;;  %5710 = vmatprep.subr.bf16.mxu0 %v12984_v43 }
 0x2b5   :  { %vm14410_vm12 = vweird.f32 %v11710_v23  ;;  %v4295_v33 = vadd.s32 1, %v12963_v8  ;;  %v4448_v0 = vand.u32 2139095040, %v12991_v41  ;;  %vm4551_vm2 = vcmp.lt.s32.totalorder %v12615_v29, 0  ;;  %v9452_v23 = vld [vmem:[%s14226_s2 + $0x98] sm:$0xff] }
 0x2b6   :  { %v3641_v24 = vsel %vm14410_vm12, nan, %v3640_v15  ;;  %v4629_v38 = vand.u32 2147483647, %v4628_v44  ;;  %v4636_v37 = vsel %vm4551_vm2, %v4635_v51, %v12834_v62  ;;  %vm4550_vm3 = vcmp.le.f32.partialorder %v4549_v58, 0.7853982  ;;  %6808 = vperm.xlu1 %9709, %v9452_v23   ;;  %7109 = vperm.xlu0 %9708, %v9469_v13  }
 0x2b7   :  { %v4296_v63 = vsel %vm4294_vm6, %v4295_v33, %v12963_v8  ;;  %v4449_v6 = vshrl.u32 %v4448_v0, 23  ;;  %v3657_v4 = vmul.f32 %v12036_v34, %v3641_v24  ;;  %v4638_v26 = vsel %vm4550_vm3, 0, %v4636_v37  ;;  %v9489_v34 = vld [vmem:[%s14226_s2 + $0xc0] sm:$0xff]  ;;  %v9490_v24 = vld [vmem:[%s14226_s2 + $0xc8] sm:$0xff] }
 0x2b8   :  { %v4632_v60 = vmul.f32 %v4631_v12, %v4629_v38  ;;  %v4297_v48 = vadd.s32 %v4296_v63, %v4292_v42  ;;  %v4445_v9 = vand.u32 2147483647, %v12991_v41  ;;  %v4642_v46 = vadd.s32 3, %v4638_v26  ;;  %v9507_v33 = vld [vmem:[%s14226_s2 + $0xe0] sm:$0xff] }
 0x2b9   :  { %v9337_v30 = vadd.s32 4294967169, %v4449_v6  ;;  %v3697_v57 = vrot.slane %v3657_v4, 4  ;;  %v13033_v3 = vand.u32 3, %v4638_v26  ;;  %v14411_v15 = vrot.slane %v12151_v14, 4 }
 0x2ba   :  { %v4633_v62 = vxor.u32 2147483648, %v4632_v60  ;;  %v4298_v7 = vadd.s32 536870912, %v4297_v48  ;;  %v4452_v28 = vand.u32 8388607, %v4445_v9  ;;  %7104 = vperm.xlu1 %9709, %v9468_v11   ;;  %7406 = vperm.xlu0 %9708, %v9489_v34   ;;  %v13051_v32 = vand.u32 3, %v4642_v46  ;;  %v9508_v46 = vld [vmem:[%s14226_s2 + $0xe8] sm:$0xff] }
 0x2bb   :  { %v4455_v2 = vadd.s32 1, %v9337_v30  ;;  %v13049_v56 = vsel %vm3674_vm13, %v14411_v15, %v3697_v57  ;;  %vm5468_vm7 = vcmp.lt.s32.totalorder %v13033_v3, 2  ;;  %vm5469_vm0 = vcmp.eq.s32.totalorder %v13033_v3, 0 }
 0x2bc   :  { %v4634_v58 = vsel %vm4551_vm2, %v4633_v62, %v4632_v60  ;;  %v13030_v61 = vshrl.u32 %v4298_v7, 30  ;;  %v4453_v18 = vor.u32 8388608, %v4452_v28  ;;  %vm4641_vm11 = vweird.f32 %v12615_v29 }
 0x2bd   :  { %v4637_v59 = vsel %vm4550_vm3, %v12615_v29, %v4634_v58  ;;  %vm4456_vm1 = vcmp.gt.s32.totalorder %v4455_v2, 0  ;;  %vm5472_vm8 = vcmp.eq.s32.totalorder %v13033_v3, 2  ;;  %vm4644_vm5 = vcmp.lt.s32.totalorder %v13051_v32, 2  ;;  %v9510_v29 = vld [vmem:[%s14226_s2 + $0xf8] sm:$0xff] }
 0x2be   :  { %9850 = vcosq.f32 %v4637_v59  ;;  %v4300_v10 = vshll.u32 %v13030_v61, 30  ;;  %v4457_v50 = vsel %vm4456_vm1, %v4455_v2, 0  ;;  %7114 = vperm.xlu1 %9709, %v9470_v19   ;;  %7416 = vperm.xlu0 %9708, %v9491_v47   ;;  %vm4645_vm9 = vcmp.eq.s32.totalorder %v13051_v32, 0 }
 0x2bf   :  { %9852 = vsinq.f32 %v4637_v59  ;;  %v4459_v17 = vand.u32 31, %v4457_v50  ;;  %v13059_v14 = vshrl.u32 %v4457_v50, 5  ;;  %vm4648_vm4 = vcmp.eq.s32.totalorder %v13051_v32, 2 }
 0x2c0   :  { %v13044_v8 = vsub.s32 %v4297_v48, %v4300_v10  ;;  %v13079_v4 = vshll.u32 %v4453_v18, 8  ;;  %v9543_v10 = vld [vmem:[%s14226_s2 + $0x120] sm:$0xff]  ;;  %vm14412_vm2 = vcmask 1045504   ;;  %vm4239_vm1 = vcmp.lt.s32.totalorder %v12693_v27, 0 }
 0x2c1   :  { %v4460_v51 = vsub.s32 32, %v4459_v17  ;;  %v4462_v44 = vshll.u32 %v14350_v35, %v4459_v17  ;;  %v4465_v42 = vshll.u32 %v14333_v22, %v4459_v17  ;;  %v4468_v37 = vshll.u32 %v14351_v21, %v4459_v17 }
 0x2c2   :  { %v4303_v36 = vsub.s32 0, %v13044_v8  ;;  %7411 = vperm.xlu1 %9709, %v9490_v24   ;;  %7712 = vperm.xlu0 %9708, %v9507_v33   ;;  %v4474_v48 = vshll.u32 %v14348_v52, %v4459_v17  ;;  %vm4477_vm15 = vcmp.lt.s32.totalorder %v13059_v14, 1  ;;  %vm4478_vm10 = vcmp.lt.s32.totalorder %v13059_v14, 2  ;;  %v9545_v33 = vld [vmem:[%s14226_s2 + $0x130] sm:$0xff] }
 0x2c3   :  { %v4463_v12 = vshrl.u32 %v14333_v22, %v4460_v51  ;;  %v4466_v38 = vshrl.u32 %v14351_v21, %v4460_v51  ;;  %v4469_v63 = vshrl.u32 %v14364_v20, %v4460_v51  ;;  %v4293_v22 = vadd.s32 %v12962_v31, %v12959_v1  ;;  %v9492_v1 = vld [vmem:[%s14226_s2 + $0xd8] sm:$0xff] }
 0x2c4   :  { %v9330_v0 = vmin.u32 %v4303_v36, %v13044_v8  ;;  %v4461_v23 = vshrl.u32 %v14350_v35, %v4460_v51  ;;  %v4471_v21 = vshll.u32 %v14364_v20, %v4459_v17  ;;  %v4472_v60 = vshrl.u32 %v14348_v52, %v4460_v51  ;;  %v9509_v35 = vld [vmem:[%s14226_s2 + $0xf0] sm:$0xff] }
 0x2c5   :  { %v4464_v13 = vor.u32 %v4463_v12, %v4462_v44  ;;  %v4475_v30 = vshrl.u32 %v14349_v5, %v4460_v51  ;;  %v4467_v26 = vor.u32 %v4466_v38, %v4465_v42  ;;  %v4470_v7 = vor.u32 %v4469_v63, %v4468_v37 }
 0x2c6   :  { %v4305_v6 = vclz %v9330_v0  ;;  %v4473_v11 = vor.u32 %v4472_v60, %v4471_v21  ;;  %vm4479_vm14 = vcmp.lt.s32.totalorder %v13059_v14, 3  ;;  %vm4480_vm12 = vcmp.lt.s32.totalorder %v13059_v14, 4  ;;  %7421 = vperm.xlu1 %9709, %v9492_v1   ;;  %7722 = vperm.xlu0 %9708, %v9509_v35   ;;  %v9546_v14 = vld [vmem:[%s14226_s2 + $0x138] sm:$0xff] }
 0x2c7   :  { %v4476_v52 = vor.u32 %v4475_v30, %v4474_v48  ;;  %v4481_v59 = vsel %vm4477_vm15, %v4461_v23, %v4464_v13  ;;  %v4482_v36 = vsel %vm4480_vm12, %v4470_v7, 2102212464  ;;  %v4489_v24 = vsel %vm4477_vm15, %v4467_v26, %v4470_v7 }
 0x2c8   :  { %v9851_v31 = vpop.eup %9850  ;;  %v9331_v62 = vadd.s32 4294967294, %v4305_v6  ;;  %v4486_v42 = vsel %vm4480_vm12, %v4473_v11, 920167782  ;;  %v4483_v38 = vsel %vm4479_vm14, %v4467_v26, %v4482_v36 }
 0x2c9   :  { %v9853_v20 = vpop.eup %9852  ;;  %v4649_v2 = vxor.u32 2147483648, %v9851_v31  ;;  %v4487_v37 = vsel %vm4479_vm14, %v4470_v7, %v4486_v42  ;;  %v4490_v63 = vsel %vm4480_vm12, %v4476_v52, 1326507024  ;;  %v9564_v42 = vld [vmem:[%s14226_s2 + $0x158] sm:$0xff]  ;;  %vm4447_vm12 = vcmp.lt.s32.totalorder %v12991_v41, 0 }
 0x2ca   :  { %v4646_v5 = vxor.u32 2147483648, %v9853_v20  ;;  %vm9332_vm6 = vcmp.lt.s32.totalorder %v9331_v62, 0  ;;  %7717 = vperm.xlu1 %9709, %v9508_v46   ;;  %8249 = vperm.xlu0 %9708, %v9543_v10  }
 0x2cb   :  { %v4650_v34 = vsel %vm4648_vm4, %v4649_v2, %v9853_v20  ;;  %v5474_v57 = vsel %vm5472_vm8, %v4649_v2, %v9853_v20  ;;  %v4308_v58 = vsel %vm9332_vm6, 0, %v9331_v62  ;;  %v9544_v62 = vld [vmem:[%s14226_s2 + $0x128] sm:$0xff] }
 0x2cc   :  { %v4647_v28 = vsel %vm4645_vm9, %v9851_v31, %v4646_v5  ;;  %v5471_v50 = vsel %vm5469_vm0, %v9851_v31, %v4646_v5  ;;  %v4309_v17 = vsub.s32 32, %v4308_v58  ;;  %v4310_v19 = vshll.u32 %v13044_v8, %v4308_v58  ;;  %v13177_v5 = vpop.permute.xlu0 %5543 }
 0x2cd   :  { %v4651_v47 = vsel %vm4644_vm5, %v4647_v28, %v4650_v34  ;;  %v5475_v15 = vsel %vm5468_vm7, %v5471_v50, %v5474_v57  ;;  %v4313_v51 = vsub.s32 4294967266, %v4308_v58  ;;  %v4485_v8 = vsel %vm4477_vm15, %v4464_v13, %v4467_v26  ;;  %v9563_v57 = vld [vmem:[%s14226_s2 + $0x150] sm:$0xff]  ;;  %v9562_v50 = vld [vmem:[%s14226_s2 + $0x148] sm:$0xff] }
 0x2ce   :  { %v4652_v18 = vsel %vm4641_vm11, nan, %v4651_v47  ;;  %v5476_v44 = vsel %vm4641_vm11, nan, %v5475_v15  ;;  %v4311_v12 = vshrl.u32 %v4293_v22, %v4309_v17  ;;  %v4488_v23 = vsel %vm4478_vm10, %v4485_v8, %v4487_v37  ;;  %7727 = vperm.xlu1 %9709, %v9510_v29   ;;  %8259 = vperm.xlu0 %9708, %v9545_v33   ;;  %v9583_v17 = vld [vmem:[%s14226_s2 + $0x160] sm:$0xff]  ;;  %v5636_v15 = vpop.f32.mrb[0].mxu0 }
 0x2cf   :  { %v13124_v32 = vrot.slane %v5476_v44, 2  ;;  %v4314_v3 = vadd.s32 127, %v4313_v51  ;;  %v4491_v13 = vsel %vm4479_vm14, %v4473_v11, %v4490_v63  ;;  %v4484_v26 = vsel %vm4478_vm10, %v4481_v59, %v4483_v38  ;;  %v5689_v51 = vpop.f32.mrb[0].mxu1  ;;  %v5638_v44 = vpop.f32.mrb[1].mxu0  ;;  %vm14414_vm14 = vmmov %vm14412_vm2 }
 0x2d0   :  { %v4312_v0 = vor.u32 %v4311_v12, %v4310_v19  ;;  %v4492_v48 = vsel %vm4478_vm10, %v4489_v24, %v4491_v13  ;;  %v13172_v7 = vmul.u32.u64.low %v13079_v4, %v4488_v23  ;;  %v13173_v20 = vmul.u32.u64.high %v13079_v4, %v4488_v23, %v13172_v7  ;;  %v13201_v47 = vpop.permute.xlu0 %5548  ;;  %v5691_v12 = vpop.f32.mrb[1].mxu1 }
 0x2d1   :  { %v13144_v22 = vsel %vm14412_vm2, %v4652_v18, %v13124_v32  ;;  %v4315_v6 = vshll.u32 %v4314_v3, 23  ;;  %v13159_v35 = vmul.u32.u64.low %v13079_v4, %v4492_v48  ;;  %v13160_v31 = vmul.u32.u64.high %v13079_v4, %v4492_v48, %v13159_v35  ;;  %v5640_v24 = vpop.f32.mrb[2].mxu0  ;;  %v5693_v29 = vpop.f32.mrb[2].mxu1 }
 0x2d2   :  { %v13152_v21 = vpack.c.bf16 %v13144_v22, %v13049_v56  ;;  %v8528_v60 = vpack.c.bf16 %v13124_v32, %v13144_v22  ;;  %v4319_v1 = vcvt.s32.f32 %v4312_v0  ;;  %v9561_v56 = vld [vmem:[%s14226_s2 + $0x140] sm:$0xff]  ;;  %v4323_v11 = vsub.s32 4, %v13030_v61  ;;  %8254 = vperm.xlu1 %9709, %v9544_v62   ;;  %v5642_v13 = vpop.f32.mrb[3].mxu0  ;;  %v5695_v48 = vpop.f32.mrb[3].mxu1 }
 0x2d3   :  { %v4316_v30 = vor.u32 4788187, %v4315_v6  ;;  %8531 = vperm.xlu0 %9708, %v9561_v56   ;;  %v4500_v34 = vmul.u32 %v13079_v4, %v4484_v26  ;;  %vm4502_vm3 = vc.u32 %v13160_v31, %v13172_v7  ;;  %v4503_v58 = vadd.s32 1, %v13173_v20 }
 0x2d4   :  { %5763 = vmatprep.subr.bf16.mxu1 %v13152_v21  ;;  %vm4238_vm7 = vcmp.le.f32.partialorder %v4237_v25, 0.7853982  ;;  %v4324_v4 = vsel %vm4239_vm1, %v4323_v11, %v13030_v61  ;;  %v5637_v36 = vadd.f32 %v5636_v15, %v13177_v5  ;;  %v5690_v18 = vadd.f32 %v5689_v51, %v13177_v5 }
 0x2d5   :  { %v4317_v2 = vand.u32 2147483647, %v4316_v30  ;;  %v4504_v46 = vsel %vm4502_vm3, %v4503_v58, %v13173_v20  ;;  %v4326_v25 = vsel %vm4238_vm7, 0, %v4324_v4  ;;  %v5639_v33 = vadd.f32 %v5638_v44, %v13177_v5 }
 0x2d6   :  { %8264 = vperm.xlu1 %9709, %v9546_v14   ;;  %v4505_v28 = vadd.s32 %v4504_v46, %v4500_v34  ;;  %v4330_v8 = vadd.s32 3, %v4326_v25  ;;  %v5641_v0 = vadd.f32 %v5640_v24, %v13201_v47  ;;  %v5694_v38 = vadd.f32 %v5693_v29, %v13201_v47 }
 0x2d7   :  { %v4320_v52 = vmul.f32 %v4319_v1, %v4317_v2  ;;  %8541 = vperm.xlu0 %9708, %v9563_v57   ;;  %v5814_v63 = vmax.f32 %v5637_v36, 0.0  ;;  %v5816_v6 = vmax.f32 %v5690_v18, 0.0  ;;  %v5692_v23 = vadd.f32 %v5691_v12, %v13177_v5  ;;  %v9525_v2 = vld [vmem:[%s14226_s2 + $0x100] sm:$0xff] }
 0x2d8   :  { %v4506_v61 = vadd.s32 536870912, %v4505_v28  ;;  %v5822_v30 = vmax.f32 %v5641_v0, 0.0  ;;  %v5824_v1 = vmax.f32 %v5694_v38, 0.0  ;;  %v5643_v35 = vadd.f32 %v5642_v13, %v13201_v47 }
 0x2d9   :  { %v4321_v59 = vxor.u32 2147483648, %v4320_v52  ;;  %v5696_v62 = vadd.f32 %v5695_v48, %v13201_v47  ;;  %v4331_v56 = vand.u32 3, %v4330_v8  ;;  %v5158_v26 = vand.u32 3, %v4326_v25 }
 0x2da   :  { %8536 = vperm.xlu1 %9709, %v9562_v50   ;;  %v13205_v3 = vshrl.u32 %v4506_v61, 30  ;;  %v5815_v11 = vmax.f32 %v5639_v33, 0.0  ;;  %v13222_v34 = vpack.c.bf16 %v5824_v1, %v5816_v6  ;;  %v5823_v14 = vmax.f32 %v5643_v35, 0.0 }
 0x2db   :  { %v4322_v10 = vsel %vm4239_vm1, %v4321_v59, %v4320_v52  ;;  %8862 = vperm.xlu0 %9708, %v9583_v17   ;;  %v13220_v52 = vpack.c.bf16 %v5822_v30, %v5814_v63  ;;  %v5825_v58 = vmax.f32 %v5696_v62, 0.0  ;;  %v13224_v59 = vpop.f32.mrb[4].mxu0  ;;  %v13226_v4 = vpop.f32.mrb[4].mxu1  ;;  %v5817_v46 = vmax.f32 %v5692_v23, 0.0 }
 0x2dc   :  { %v4325_v19 = vsel %vm4238_vm7, %v12693_v27, %v4322_v10  ;;  %v4508_v37 = vshll.u32 %v13205_v3, 30  ;;  %v5857_v10 = vpack.c.bf16 %v5823_v14, %v5815_v11  ;;  %v13230_v50 = vpop.f32.mrb[5].mxu1  ;;  %vm4336_vm0 = vcmp.eq.s32.totalorder %v4331_v56, 2 }
 0x2dd   :  { %9854 = vcosq.f32 %v4325_v19  ;;  %vm5163_vm11 = vcmp.eq.s32.totalorder %v5158_v26, 2  ;;  %v13234_v61 = vpop.f32.mrb[6].mxu1  ;;  %vm4333_vm8 = vcmp.eq.s32.totalorder %v4331_v56, 0  ;;  %vm5160_vm5 = vcmp.eq.s32.totalorder %v5158_v26, 0 }
 0x2de   :  { %9856 = vsinq.f32 %v4325_v19  ;;  %8546 = vperm.xlu1 %9709, %v9564_v42   ;;  %v4509_v20 = vsub.s32 %v4505_v28, %v4508_v37  ;;  %v13228_v28 = vpop.f32.mrb[5].mxu0  ;;  %v13236_v36 = vpack.c.bf16 %v5825_v58, %v5817_v46  ;;  %v13240_v44 = vpop.f32.mrb[7].mxu1  ;;  %vm4332_vm9 = vcmp.lt.s32.totalorder %v4331_v56, 2 }
 0x2df   :  { %v13232_v25 = vpop.f32.mrb[6].mxu0  ;;  %vm5159_vm4 = vcmp.lt.s32.totalorder %v5158_v26, 2  ;;  %v3691_v42 = vrot.slane %v12659_v55, 4  ;;  %vm4329_vm15 = vweird.f32 %v12693_v27  ;;  %v4501_v13 = vadd.s32 %v13172_v7, %v13160_v31 }
 0x2e0   :  { %v4511_v57 = vsub.s32 0, %v4509_v20  ;;  %v13238_v18 = vpop.f32.mrb[7].mxu0  ;;  %v14413_v48 = vrot.slane %v12384_v40, 4  ;;  %v13259_v26 = vpack.c.bf16 %v12955_v16, %v12955_v16  ;;  %vm14417_vm2 = vcmask 293888  }
 0x2e1   :  { %vm4446_vm3 = vcmp.le.f32.partialorder %v4445_v9, 0.7853982  ;;  %vm14419_vm1 = vmmov %vm14417_vm2 }
 0x2e2   :  { %8018 = vperm.xlu1 %9709, %v9525_v2   ;;  %v9338_v19 = vmin.u32 %v4511_v57, %v4509_v20  ;;  %v3692_v55 = vsel %vm3674_vm13, %v14413_v48, %v3691_v42  ;;  %vm14415_vm13 = vcmask 1041408  }
 0x2e3   :  { %vm14416_vm6 = vmmov %vm14415_vm13 }
 0x2e4   :  { %v4513_v8 = vclz %v9338_v19 }
 0x2e6   :  { %v9339_v38 = vadd.s32 4294967294, %v4513_v8  ;;  %v14418_v8 = vmov 0  }
 0x2e7   :  { %v9855_v17 = vpop.eup %9854 }
 0x2e8   :  { %v9857_v15 = vpop.eup %9856  ;;  %v4337_v51 = vxor.u32 2147483648, %v9855_v17  ;;  %vm9340_vm10 = vcmp.lt.s32.totalorder %v9339_v38, 0 }
 0x2e9   :  { %v4334_v12 = vxor.u32 2147483648, %v9857_v15  ;;  %v4516_v30 = vsel %vm9340_vm10, 0, %v9339_v38  ;;  %vm14421_vm10 = vmmov %vm14416_vm6 }
 0x2ea   :  { %v4338_v24 = vsel %vm4336_vm0, %v4337_v51, %v9857_v15  ;;  %v5165_v29 = vsel %vm5163_vm11, %v4337_v51, %v9857_v15  ;;  %v4517_v1 = vsub.s32 32, %v4516_v30  ;;  %v4518_v35 = vshll.u32 %v4509_v20, %v4516_v30  ;;  %v9902_v15 = vld [vmem:[%s14225_s1] sm:$0xff]  }
 0x2eb   :  { %v4335_v33 = vsel %vm4333_vm8, %v9855_v17, %v4334_v12  ;;  %v5162_v0 = vsel %vm5160_vm5, %v9855_v17, %v4334_v12  ;;  %v4521_v62 = vsub.s32 4294967266, %v4516_v30  ;;  %v4531_v17 = vsub.s32 4, %v13205_v3 }
 0x2ec   :  { %v4339_v37 = vsel %vm4332_vm9, %v4335_v33, %v4338_v24  ;;  %v5166_v63 = vsel %vm5159_vm4, %v5162_v0, %v5165_v29  ;;  %v4519_v7 = vshrl.u32 %v4501_v13, %v4517_v1  ;;  %v13288_v33 = vld [vmem:[%s14225_s1 + $0x8] sm:$0xff]   ;;  %vm4537_vm4 = vweird.f32 %v12991_v41 }
 0x2ed   :  { %v4340_v6 = vsel %vm4329_vm15, nan, %v4339_v37  ;;  %v5167_v23 = vsel %vm4329_vm15, nan, %v5166_v63  ;;  %v4522_v2 = vadd.s32 127, %v4521_v62  ;;  %v4532_v12 = vsel %vm4447_vm12, %v4531_v17, %v13205_v3  ;;  %vm14420_vm15 = vmmov %vm14414_vm14 }
 0x2ee   :  { %v13251_v27 = vrot.slane %v5167_v23, 2  ;;  %v4520_v20 = vor.u32 %v4519_v7, %v4518_v35  ;;  %v4534_v24 = vsel %vm4446_vm3, 0, %v4532_v12 }
 0x2ef   :  { %v4523_v11 = vshll.u32 %v4522_v2, 23  ;;  %v4538_v29 = vadd.s32 3, %v4534_v24  ;;  %v5364_v3 = vand.u32 3, %v4534_v24 }
 0x2f0   :  { %v13255_v56 = vsel %vm14414_vm14, %v4340_v6, %v13251_v27  ;;  %v5537_v31 = vpack.c.bf16 %v13251_v27, %v13251_v27  ;;  %v4527_v58 = vcvt.s32.f32 %v4520_v20  ;;  %vm14422_vm14 = vmmov %vm14416_vm6 }
 0x2f1   :  { %v13264_v40 = vpack.c.bf16 %v13255_v56, %v3692_v55  ;;  %v4524_v57 = vor.u32 4788187, %v4523_v11  ;;  %v4539_v9 = vand.u32 3, %v4538_v29  ;;  %vm5369_vm0 = vcmp.eq.s32.totalorder %v5364_v3, 2 }
 0x2f2   :  { %v13270_v14 = vsel %vm14416_vm6, %v5537_v31, 0  ;;  %vm5366_vm8 = vcmp.eq.s32.totalorder %v5364_v3, 0  ;;  %vm5365_vm9 = vcmp.lt.s32.totalorder %v5364_v3, 2  ;;  %v13302_v31 = vpack.c.bf16 %v13124_v32, %v13124_v32  ;;  %vm14424_vm6 = vmmov %vm14419_vm1 }
 0x2f3   :  { %5711 = vmatpush1.bf16.msra.mxu0 %v13264_v40  ;;  %v4525_v46 = vand.u32 2147483647, %v4524_v57  ;;  %vm4544_vm7 = vcmp.eq.s32.totalorder %v4539_v9, 2  ;;  %vm4541_vm11 = vcmp.eq.s32.totalorder %v4539_v9, 0  ;;  %vm4540_vm5 = vcmp.lt.s32.totalorder %v4539_v9, 2 }
 0x2f4   :  { %9385 = vmatprep.subr.msk.bf16.mxu0 %vm14415_vm13, %v13259_v26  ;;  %vm14423_vm13 = vmmov %vm14419_vm1 }
 0x2f5   :  { %v4528_v19 = vmul.f32 %v4527_v58, %v4525_v46 }
 0x2f7   :  { %5713 = vmatpush1.bf16.msra.mxu0 %v13270_v14  ;;  %v4529_v51 = vxor.u32 2147483648, %v4528_v19 }
 0x2f8   :  { %5909 = vmatprep.subr.bf16.mxu0 %v5857_v10 }
 0x2f9   :  { %v4530_v10 = vsel %vm4447_vm12, %v4529_v51, %v4528_v19  ;;  %vm5902_vm12 = vcmask 261120  }
 0x2fa   :  { %9386 = vmatmul.mubr.msk.bf16.vlgmr.msra.gmra.mrb[8].mxu0 %vm14417_vm2, %v9902_v15  ;;  %v4533_v42 = vsel %vm4446_vm3, %v12991_v41, %v4530_v10  ;;  %vm14434_vm2 = vmmov %vm14421_vm10 }
 0x2fb   :  { %5750 = vmatprep.mubr.bf16.mxu0 %v14418_v8  ;;  %5910 = vmatpush1.bf16.msra.mxu0 %v13220_v52  ;;  %9858 = vcosq.f32 %v4533_v42  ;;  %vm14436_vm3 = vmmov %vm14434_vm2 }
 0x2fc   :  { %9860 = vsinq.f32 %v4533_v42 }
 0x302   :  { %9387 = vmatmul.mubr.msk.bf16.gmra.mrb[12].mxu0 %vm14419_vm1, %v13288_v33  ;;  %vm7127_vm1 = vcmask 556032  }
 0x303   :  { %5941 = vmatprep.mubr.bf16.mxu0 %v14418_v8 }
 0x305   :  { %v9859_v52 = vpop.eup %9858 }
 0x306   :  { %v9861_v0 = vpop.eup %9860  ;;  %v4545_v38 = vxor.u32 2147483648, %v9859_v52 }
 0x307   :  { %v4542_v37 = vxor.u32 2147483648, %v9861_v0 }
 0x308   :  { %v4546_v63 = vsel %vm4544_vm7, %v4545_v38, %v9861_v0  ;;  %v5371_v6 = vsel %vm5369_vm0, %v4545_v38, %v9861_v0  ;;  %vm14440_vm7 = vmmov %vm14434_vm2 }
 0x309   :  { %v4543_v23 = vsel %vm4541_vm11, %v9859_v52, %v4542_v37  ;;  %v5368_v13 = vsel %vm5366_vm8, %v9859_v52, %v4542_v37  ;;  %vm14442_vm0 = vmmov %vm14434_vm2 }
 0x30a   :  { %v4547_v48 = vsel %vm4540_vm5, %v4543_v23, %v4546_v63  ;;  %v5372_v55 = vsel %vm5365_vm9, %v5368_v13, %v5371_v6  ;;  %vm14448_vm11 = vmmov %vm14420_vm15  ;;  %vm8559_vm5 = vcmask 359424  }
 0x30b   :  { %v4548_v30 = vsel %vm4537_vm4, nan, %v4547_v48  ;;  %v5373_v1 = vsel %vm4537_vm4, nan, %v5372_v55  ;;  %vm14449_vm8 = vmmov %vm14448_vm11 }
 0x30c   :  { %v13294_v35 = vrot.slane %v5373_v1, 2  ;;  %vm14450_vm9 = vmmov %vm14449_vm8 }
 0x30d   :  { %vm14451_vm4 = vmmov %vm14449_vm8 }
 0x30e   :  { %v13298_v62 = vsel %vm14420_vm15, %v4548_v30, %v13294_v35  ;;  %v5539_v41 = vpack.c.bf16 %v13294_v35, %v13294_v35  ;;  %vm14457_vm15 = vmmov %vm14451_vm4 }
 0x30f   :  { %v13308_v7 = vpack.c.bf16 %v13298_v62, %v12969_v39  ;;  %v13311_v2 = vpop.permute.xlu1 %5553 }
 0x310   :  { %v13316_v20 = vsel %vm14422_vm14, %v5539_v41, 0  ;;  %v5647_v11 = vadd.f32 %v13224_v59, %v13311_v2  ;;  %v5700_v57 = vadd.f32 %v13226_v4, %v13311_v2  ;;  %v5649_v39 = vadd.f32 %v13228_v28, %v13311_v2  ;;  %vm14459_vm14 = vmmov %vm14451_vm4 }
 0x311   :  { %5764 = vmatpush1.bf16.msra.mxu1 %v13308_v7  ;;  %v5702_v58 = vadd.f32 %v13230_v50, %v13311_v2 }
 0x312   :  { %9388 = vmatprep.subr.msk.bf16.mxu1 %vm14421_vm10, %v13302_v31  ;;  %v5830_v28 = vmax.f32 %v5647_v11, 0.0  ;;  %v5832_v50 = vmax.f32 %v5700_v57, 0.0  ;;  %v5831_v51 = vmax.f32 %v5649_v39, 0.0  ;;  %vm14458_vm10 = vmmov %vm14451_vm4 }
 0x313   :  { %v13327_v46 = vpop.permute.xlu1 %5558  ;;  %v5833_v12 = vmax.f32 %v5702_v58, 0.0 }
 0x314   :  { %v5651_v17 = vadd.f32 %v13232_v25, %v13327_v46  ;;  %v5704_v19 = vadd.f32 %v13234_v61, %v13327_v46  ;;  %v5653_v59 = vadd.f32 %v13238_v18, %v13327_v46  ;;  %v5706_v4 = vadd.f32 %v13240_v44, %v13327_v46  ;;  %v13347_v44 = vld [vmem:[%s14225_s1 + $0x10] sm:$0xff]  }
 0x315   :  { %5766 = vmatpush1.bf16.msra.mxu1 %v13316_v20 }
 0x316   :  { %5962 = vmatprep.subr.bf16.mxu1 %v13236_v36  ;;  %v5838_v10 = vmax.f32 %v5651_v17, 0.0  ;;  %v5840_v42 = vmax.f32 %v5704_v19, 0.0  ;;  %v5839_v25 = vmax.f32 %v5653_v59, 0.0  ;;  %v5841_v24 = vmax.f32 %v5706_v4, 0.0 }
 0x318   :  { %9389 = vmatmul.mubr.msk.bf16.vlgmr.msra.gmra.mrb[8].mxu1 %vm14423_vm13, %v9902_v15  ;;  %v5864_v61 = vpack.c.bf16 %v5838_v10, %v5830_v28  ;;  %v5866_v36 = vpack.c.bf16 %v5840_v42, %v5832_v50  ;;  %v5865_v18 = vpack.c.bf16 %v5839_v25, %v5831_v51  ;;  %v5867_v29 = vpack.c.bf16 %v5841_v24, %v5833_v12  ;;  %vm14460_vm13 = vmmov %vm14451_vm4 }
 0x319   :  { %5803 = vmatprep.mubr.bf16.mxu1 %v14418_v8  ;;  %5963 = vmatpush1.bf16.msra.mxu1 %v13222_v34  ;;  %v13358_v34 = vld [vmem:[%s14225_s1 + $0x18] sm:$0xff]  }
 0x31a   :  { %5911 = vmatprep.subr.bf16.mxu0 %v5865_v18  ;;  %5964 = vmatprep.subr.bf16.mxu1 %v5867_v29 }
 0x31b   :  { %5912 = vmatpush1.bf16.msra.mxu0 %v5864_v61 }
 0x31d   :  { %5965 = vmatpush1.bf16.msra.mxu1 %v5866_v36 }
 0x31e   :  { %9401 = vmatmul.mubr.msk.bf16.vlgmr.msra.gmra.mrb[16].mxu0 %vm5902_vm12, %v13347_v44 }
 0x31f   :  { %5951 = vmatprep.mubr.bf16.mxu0 %v14418_v8 }
 0x320   :  { %9390 = vmatmul.mubr.msk.bf16.gmra.mrb[12].mxu1 %vm14424_vm6, %v13288_v33  ;;  %vm14461_vm6 = vcmask 1040384  }
 0x321   :  { %5994 = vmatprep.mubr.bf16.mxu1 %v14418_v8 }
 0x326   :  { %9402 = vmatmul.mubr.msk.bf16.gmra.mrb[20].mxu0 %vm5902_vm12, %v13358_v34 }
 0x327   :  { %6047 = vmatprep.mubr.bf16.mxu0 %v14418_v8 }
 0x328   :  { %9403 = vmatmul.mubr.msk.bf16.vlgmr.msra.gmra.mrb[16].mxu1 %vm5902_vm12, %v13347_v44 }
 0x329   :  { %6004 = vmatprep.mubr.bf16.mxu1 %v14418_v8 }
 0x330   :  { %9404 = vmatmul.mubr.msk.bf16.gmra.mrb[20].mxu1 %vm5902_vm12, %v13358_v34 }
 0x331   :  { %6100 = vmatprep.mubr.bf16.mxu1 %v14418_v8 }
 0x3cd   :  { %v5742_v15 = vpop.f32.mrb[8].mxu0 }
 0x3ce   :  { %v5743_v33 = vadd.f32 %v5742_v15, %v13177_v5  ;;  %v5744_v9 = vpop.f32.mrb[9].mxu0 }
 0x3cf   :  { %v5745_v3 = vadd.f32 %v5744_v9, %v13177_v5  ;;  %v5746_v52 = vpop.f32.mrb[10].mxu0 }
 0x3d0   :  { %v5747_v0 = vadd.f32 %v5746_v52, %v13201_v47  ;;  %v5748_v38 = vpop.f32.mrb[11].mxu0  ;;  %v5818_v63 = vmax.f32 %v5743_v33, 0.0 }
 0x3d1   :  { %v5749_v37 = vadd.f32 %v5748_v38, %v13201_v47  ;;  %v5819_v23 = vmax.f32 %v5745_v3, 0.0 }
 0x3d2   :  { %v5826_v6 = vmax.f32 %v5747_v0, 0.0 }
 0x3d3   :  { %v5827_v13 = vmax.f32 %v5749_v37, 0.0 }
 0x3d4   :  { %v5860_v48 = vpack.c.bf16 %v5826_v6, %v5818_v63 }
 0x3d5   :  { %v5861_v55 = vpack.c.bf16 %v5827_v13, %v5819_v23  ;;  %v5752_v30 = vpop.f32.mrb[12].mxu0 }
 0x3d6   :  { %v5753_v1 = vadd.f32 %v5752_v30, %v13311_v2  ;;  %v5754_v41 = vpop.f32.mrb[13].mxu0 }
 0x3d7   :  { %v5755_v11 = vadd.f32 %v5754_v41, %v13311_v2  ;;  %v5756_v57 = vpop.f32.mrb[14].mxu0  ;;  %6015 = vmatprep.subr.bf16.mxu0 %v5861_v55 }
 0x3d8   :  { %v5757_v39 = vadd.f32 %v5756_v57, %v13327_v46  ;;  %v5758_v58 = vpop.f32.mrb[15].mxu0  ;;  %6016 = vmatpush1.bf16.msra.mxu0 %v5860_v48  ;;  %v5834_v19 = vmax.f32 %v5753_v1, 0.0 }
 0x3d9   :  { %v5759_v17 = vadd.f32 %v5758_v58, %v13327_v46  ;;  %v5835_v4 = vmax.f32 %v5755_v11, 0.0 }
 0x3da   :  { %v5842_v59 = vmax.f32 %v5757_v39, 0.0 }
 0x3db   :  { %v5843_v28 = vmax.f32 %v5759_v17, 0.0 }
 0x3dc   :  { %v5868_v50 = vpack.c.bf16 %v5842_v59, %v5834_v19 }
 0x3dd   :  { %v5869_v51 = vpack.c.bf16 %v5843_v28, %v5835_v4 }
 0x3df   :  { %6017 = vmatprep.subr.bf16.mxu0 %v5869_v51 }
 0x3e0   :  { %6018 = vmatpush1.bf16.msra.mxu0 %v5868_v50 }
 0x3e3   :  { %9405 = vmatmul.mubr.msk.bf16.vlgmr.msra.gmra.mrb[24].mxu0 %vm5902_vm12, %v13347_v44 }
 0x3e4   :  { %6057 = vmatprep.mubr.bf16.mxu0 %v14418_v8 }
 0x3eb   :  { %9406 = vmatmul.mubr.msk.bf16.gmra.mrb[28].mxu0 %vm5902_vm12, %v13358_v34  ;;  %v5795_v12 = vpop.f32.mrb[8].mxu1 }
 0x3ec   :  { %6247 = vmatprep.mubr.bf16.mxu0 %v14418_v8  ;;  %v5796_v10 = vadd.f32 %v5795_v12, %v13177_v5  ;;  %v5797_v42 = vpop.f32.mrb[9].mxu1 }
 0x3ed   :  { %v5798_v25 = vadd.f32 %v5797_v42, %v13177_v5  ;;  %v5799_v24 = vpop.f32.mrb[10].mxu1 }
 0x3ee   :  { %v5800_v61 = vadd.f32 %v5799_v24, %v13201_v47  ;;  %v5801_v36 = vpop.f32.mrb[11].mxu1  ;;  %v5820_v29 = vmax.f32 %v5796_v10, 0.0 }
 0x3ef   :  { %v5802_v18 = vadd.f32 %v5801_v36, %v13201_v47  ;;  %v5821_v33 = vmax.f32 %v5798_v25, 0.0 }
 0x3f0   :  { %v5828_v15 = vmax.f32 %v5800_v61, 0.0 }
 0x3f1   :  { %v5829_v9 = vmax.f32 %v5802_v18, 0.0  ;;  %v5943_v11 = vpop.f32.mrb[16].mxu0 }
 0x3f2   :  { %v5862_v3 = vpack.c.bf16 %v5828_v15, %v5820_v29  ;;  %v5945_v17 = vpop.f32.mrb[17].mxu0 }
 0x3f3   :  { %v5863_v52 = vpack.c.bf16 %v5829_v9, %v5821_v33  ;;  %v5805_v0 = vpop.f32.mrb[12].mxu1  ;;  %v5947_v4 = vpop.f32.mrb[18].mxu0 }
 0x3f4   :  { %v5806_v38 = vadd.f32 %v5805_v0, %v13311_v2  ;;  %v5807_v37 = vpop.f32.mrb[13].mxu1  ;;  %v5949_v51 = vpop.f32.mrb[19].mxu0 }
 0x3f5   :  { %v5808_v63 = vadd.f32 %v5807_v37, %v13311_v2  ;;  %v5809_v6 = vpop.f32.mrb[14].mxu1  ;;  %6068 = vmatprep.subr.bf16.mxu1 %v5863_v52  ;;  %v13394_v2 = vpop.permute.xlu0 %5874 }
 0x3f6   :  { %v5810_v5 = vadd.f32 %v5809_v6, %v13327_v46  ;;  %v5811_v23 = vpop.f32.mrb[15].mxu1  ;;  %6069 = vmatpush1.bf16.msra.mxu1 %v5862_v3  ;;  %v5836_v13 = vmax.f32 %v5806_v38, 0.0  ;;  %v5944_v39 = vadd.f32 %v5943_v11, %v13394_v2 }
 0x3f7   :  { %v5812_v47 = vadd.f32 %v5811_v23, %v13327_v46  ;;  %v5837_v55 = vmax.f32 %v5808_v63, 0.0  ;;  %v13396_v46 = vpop.permute.xlu1 %5879 }
 0x3f8   :  { %v5844_v48 = vmax.f32 %v5810_v5, 0.0  ;;  %v5948_v28 = vadd.f32 %v5947_v4, %v13396_v46  ;;  %v5950_v10 = vadd.f32 %v5949_v51, %v13396_v46  ;;  %v6121_v25 = vmax.f32 %v5944_v39, 0.0 }
 0x3f9   :  { %v5845_v30 = vmax.f32 %v5812_v47, 0.0  ;;  %v13406_v9 = vpop.permute.xlu0 %5884  ;;  %v5953_v63 = vpop.f32.mrb[20].mxu0 }
 0x3fa   :  { %v5870_v1 = vpack.c.bf16 %v5844_v48, %v5836_v13  ;;  %v6129_v61 = vmax.f32 %v5948_v28, 0.0  ;;  %v6130_v15 = vmax.f32 %v5950_v10, 0.0  ;;  %v5954_v5 = vadd.f32 %v5953_v63, %v13406_v9  ;;  %v5955_v47 = vpop.f32.mrb[21].mxu0 }
 0x3fb   :  { %v5871_v41 = vpack.c.bf16 %v5845_v30, %v5837_v55  ;;  %v5996_v57 = vpop.f32.mrb[16].mxu1  ;;  %v13408_v3 = vpop.permute.xlu1 %5889  ;;  %v5956_v48 = vadd.f32 %v5955_v47, %v13406_v9 }
 0x3fc   :  { %v5997_v58 = vadd.f32 %v5996_v57, %v13394_v2  ;;  %v5998_v19 = vpop.f32.mrb[17].mxu1  ;;  %v6163_v52 = vpack.c.bf16 %v6129_v61, %v6121_v25  ;;  %v5957_v30 = vpop.f32.mrb[22].mxu0  ;;  %v13432_v61 = vld [vmem:[%s14225_s1 + $0x28] sm:$0xff]  }
 0x3fd   :  { %6070 = vmatprep.subr.bf16.mxu1 %v5871_v41  ;;  %v5999_v59 = vadd.f32 %v5998_v19, %v13394_v2  ;;  %v5958_v41 = vadd.f32 %v5957_v30, %v13408_v3  ;;  %v5959_v57 = vpop.f32.mrb[23].mxu0  ;;  %v6137_v19 = vmax.f32 %v5954_v5, 0.0 }
 0x3fe   :  { %6071 = vmatpush1.bf16.msra.mxu1 %v5870_v1  ;;  %v6123_v24 = vmax.f32 %v5997_v58, 0.0  ;;  %v5960_v58 = vadd.f32 %v5959_v57, %v13408_v3 }
 0x3ff   :  { %v6124_v29 = vmax.f32 %v5999_v59, 0.0  ;;  %v6145_v59 = vmax.f32 %v5958_v41, 0.0 }
 0x401   :  { %9407 = vmatmul.mubr.msk.bf16.vlgmr.msra.gmra.mrb[24].mxu1 %vm5902_vm12, %v13347_v44  ;;  %v5946_v44 = vadd.f32 %v5945_v17, %v13394_v2 }
 0x402   :  { %6110 = vmatprep.mubr.bf16.mxu1 %v14418_v8 }
 0x403   :  { %v6122_v18 = vmax.f32 %v5946_v44, 0.0 }
 0x405   :  { %v6164_v38 = vpack.c.bf16 %v6130_v15, %v6122_v18 }
 0x407   :  { %6215 = vmatprep.subr.bf16.mxu0 %v6164_v38 }
 0x408   :  { %6216 = vmatpush1.bf16.msra.mxu0 %v6163_v52 }
 0x409   :  { %9408 = vmatmul.mubr.msk.bf16.gmra.mrb[28].mxu1 %vm5902_vm12, %v13358_v34  ;;  %v6000_v34 = vpop.f32.mrb[18].mxu1 }
 0x40a   :  { %6300 = vmatprep.mubr.bf16.mxu1 %v14418_v8  ;;  %v6001_v50 = vadd.f32 %v6000_v34, %v13396_v46  ;;  %v6002_v12 = vpop.f32.mrb[19].mxu1  ;;  %v6138_v34 = vmax.f32 %v5956_v48, 0.0 }
 0x40b   :  { %v6003_v42 = vadd.f32 %v6002_v12, %v13396_v46  ;;  %v6006_v6 = vpop.f32.mrb[20].mxu1  ;;  %v6171_v12 = vpack.c.bf16 %v6145_v59, %v6137_v19 }
 0x40c   :  { %v6131_v36 = vmax.f32 %v6001_v50, 0.0  ;;  %v6007_v23 = vadd.f32 %v6006_v6, %v13406_v9  ;;  %v6008_v13 = vpop.f32.mrb[21].mxu1  ;;  %v6146_v50 = vmax.f32 %v5960_v58, 0.0 }
 0x40d   :  { %v6132_v33 = vmax.f32 %v6003_v42, 0.0  ;;  %v6009_v55 = vadd.f32 %v6008_v13, %v13406_v9  ;;  %v6010_v1 = vpop.f32.mrb[22].mxu1 }
 0x40e   :  { %v6165_v0 = vpack.c.bf16 %v6131_v36, %v6123_v24  ;;  %v6011_v11 = vadd.f32 %v6010_v1, %v13408_v3  ;;  %v6012_v39 = vpop.f32.mrb[23].mxu1  ;;  %v6139_v44 = vmax.f32 %v6007_v23, 0.0  ;;  %v6172_v42 = vpack.c.bf16 %v6146_v50, %v6138_v34  ;;  %v13421_v24 = vld [vmem:[%s14225_s1 + $0x20] sm:$0xff]  }
 0x40f   :  { %v6166_v37 = vpack.c.bf16 %v6132_v33, %v6124_v29  ;;  %v6013_v17 = vadd.f32 %v6012_v39, %v13408_v3  ;;  %v6140_v28 = vmax.f32 %v6009_v55, 0.0 }
 0x410   :  { %v6147_v4 = vmax.f32 %v6011_v11, 0.0  ;;  %6217 = vmatprep.subr.bf16.mxu0 %v6172_v42 }
 0x411   :  { %6268 = vmatprep.subr.bf16.mxu1 %v6166_v37  ;;  %v6148_v51 = vmax.f32 %v6013_v17, 0.0  ;;  %6218 = vmatpush1.bf16.msra.mxu0 %v6171_v12 }
 0x412   :  { %6269 = vmatpush1.bf16.msra.mxu1 %v6165_v0  ;;  %v6173_v10 = vpack.c.bf16 %v6147_v4, %v6139_v44 }
 0x413   :  { %v6174_v25 = vpack.c.bf16 %v6148_v51, %v6140_v28 }
 0x414   :  { %9419 = vmatmul.mubr.msk.bf16.vlgmr.msra.gmra.mrb[32].mxu0 %vm5902_vm12, %v13421_v24 }
 0x415   :  { %6270 = vmatprep.subr.bf16.mxu1 %v6174_v25  ;;  %6257 = vmatprep.mubr.bf16.mxu0 %v14418_v8 }
 0x416   :  { %6271 = vmatpush1.bf16.msra.mxu1 %v6173_v10 }
 0x419   :  { %9421 = vmatmul.mubr.msk.bf16.vlgmr.msra.gmra.mrb[32].mxu1 %vm5902_vm12, %v13421_v24 }
 0x41a   :  { %6310 = vmatprep.mubr.bf16.mxu1 %v14418_v8 }
 0x41c   :  { %9420 = vmatmul.mubr.msk.bf16.gmra.mrb[36].mxu0 %vm5902_vm12, %v13432_v61 }
 0x41d   :  { %6353 = vmatprep.mubr.bf16.mxu0 %v14418_v8 }
 0x421   :  { %9422 = vmatmul.mubr.msk.bf16.gmra.mrb[36].mxu1 %vm5902_vm12, %v13432_v61 }
 0x422   :  { %6406 = vmatprep.mubr.bf16.mxu1 %v14418_v8 }
 0x4b6   :  { %v6049_v36 = vpop.f32.mrb[24].mxu0 }
 0x4b7   :  { %v6050_v18 = vadd.f32 %v6049_v36, %v13394_v2  ;;  %v6051_v29 = vpop.f32.mrb[25].mxu0 }
 0x4b8   :  { %v6052_v15 = vadd.f32 %v6051_v29, %v13394_v2  ;;  %v6053_v33 = vpop.f32.mrb[26].mxu0 }
 0x4b9   :  { %v6054_v52 = vadd.f32 %v6053_v33, %v13396_v46  ;;  %v6055_v0 = vpop.f32.mrb[27].mxu0  ;;  %v6125_v37 = vmax.f32 %v6050_v18, 0.0 }
 0x4ba   :  { %v6056_v38 = vadd.f32 %v6055_v0, %v13396_v46  ;;  %v6126_v6 = vmax.f32 %v6052_v15, 0.0 }
 0x4bb   :  { %v6133_v63 = vmax.f32 %v6054_v52, 0.0 }
 0x4bc   :  { %v6134_v5 = vmax.f32 %v6056_v38, 0.0 }
 0x4bd   :  { %v6167_v23 = vpack.c.bf16 %v6133_v63, %v6125_v37 }
 0x4be   :  { %v6168_v47 = vpack.c.bf16 %v6134_v5, %v6126_v6  ;;  %v6059_v13 = vpop.f32.mrb[28].mxu0 }
 0x4bf   :  { %v6060_v48 = vadd.f32 %v6059_v13, %v13406_v9  ;;  %v6061_v55 = vpop.f32.mrb[29].mxu0 }
 0x4c0   :  { %v6062_v30 = vadd.f32 %v6061_v55, %v13406_v9  ;;  %v6063_v1 = vpop.f32.mrb[30].mxu0  ;;  %6321 = vmatprep.subr.bf16.mxu0 %v6168_v47 }
 0x4c1   :  { %v6064_v41 = vadd.f32 %v6063_v1, %v13408_v3  ;;  %v6065_v11 = vpop.f32.mrb[31].mxu0  ;;  %6322 = vmatpush1.bf16.msra.mxu0 %v6167_v23  ;;  %v6141_v39 = vmax.f32 %v6060_v48, 0.0 }
 0x4c2   :  { %v6066_v57 = vadd.f32 %v6065_v11, %v13408_v3  ;;  %v6142_v17 = vmax.f32 %v6062_v30, 0.0 }
 0x4c3   :  { %v6149_v58 = vmax.f32 %v6064_v41, 0.0 }
 0x4c4   :  { %v6150_v19 = vmax.f32 %v6066_v57, 0.0 }
 0x4c5   :  { %v6175_v44 = vpack.c.bf16 %v6149_v58, %v6141_v39 }
 0x4c6   :  { %v6176_v59 = vpack.c.bf16 %v6150_v19, %v6142_v17 }
 0x4c8   :  { %6323 = vmatprep.subr.bf16.mxu0 %v6176_v59 }
 0x4c9   :  { %6324 = vmatpush1.bf16.msra.mxu0 %v6175_v44 }
 0x4cc   :  { %9423 = vmatmul.mubr.msk.bf16.vlgmr.msra.gmra.mrb[40].mxu0 %vm5902_vm12, %v13421_v24 }
 0x4cd   :  { %6363 = vmatprep.mubr.bf16.mxu0 %v14418_v8 }
 0x4d4   :  { %9424 = vmatmul.mubr.msk.bf16.gmra.mrb[44].mxu0 %vm5902_vm12, %v13432_v61  ;;  %v6102_v4 = vpop.f32.mrb[24].mxu1 }
 0x4d5   :  { %6553 = vmatprep.mubr.bf16.mxu0 %v14418_v8  ;;  %v6103_v34 = vadd.f32 %v6102_v4, %v13394_v2  ;;  %v6104_v28 = vpop.f32.mrb[25].mxu1 }
 0x4d6   :  { %v6105_v50 = vadd.f32 %v6104_v28, %v13394_v2  ;;  %v6106_v51 = vpop.f32.mrb[26].mxu1 }
 0x4d7   :  { %v6107_v12 = vadd.f32 %v6106_v51, %v13396_v46  ;;  %v6108_v10 = vpop.f32.mrb[27].mxu1  ;;  %v6127_v25 = vmax.f32 %v6103_v34, 0.0 }
 0x4d8   :  { %v6109_v42 = vadd.f32 %v6108_v10, %v13396_v46  ;;  %v6128_v18 = vmax.f32 %v6105_v50, 0.0 }
 0x4d9   :  { %v6135_v36 = vmax.f32 %v6107_v12, 0.0 }
 0x4da   :  { %v6136_v29 = vmax.f32 %v6109_v42, 0.0 }
 0x4db   :  { %v6169_v15 = vpack.c.bf16 %v6135_v36, %v6127_v25 }
 0x4dc   :  { %v6170_v33 = vpack.c.bf16 %v6136_v29, %v6128_v18  ;;  %v6112_v52 = vpop.f32.mrb[28].mxu1 }
 0x4dd   :  { %v6113_v0 = vadd.f32 %v6112_v52, %v13406_v9  ;;  %v6114_v38 = vpop.f32.mrb[29].mxu1 }
 0x4de   :  { %v6115_v37 = vadd.f32 %v6114_v38, %v13406_v9  ;;  %v6116_v63 = vpop.f32.mrb[30].mxu1  ;;  %6374 = vmatprep.subr.bf16.mxu1 %v6170_v33  ;;  %v13468_v9 = vpop.permute.xlu0 %6181 }
 0x4df   :  { %v6117_v2 = vadd.f32 %v6116_v63, %v13408_v3  ;;  %v6118_v6 = vpop.f32.mrb[31].mxu1  ;;  %6375 = vmatpush1.bf16.msra.mxu1 %v6169_v15  ;;  %v6143_v5 = vmax.f32 %v6113_v0, 0.0 }
 0x4e0   :  { %v6119_v46 = vadd.f32 %v6118_v6, %v13408_v3  ;;  %v6144_v47 = vmax.f32 %v6115_v37, 0.0  ;;  %v13470_v3 = vpop.permute.xlu1 %6186 }
 0x4e1   :  { %v6151_v23 = vmax.f32 %v6117_v2, 0.0 }
 0x4e2   :  { %v6152_v13 = vmax.f32 %v6119_v46, 0.0  ;;  %v13480_v29 = vpop.permute.xlu0 %6191 }
 0x4e3   :  { %v6177_v48 = vpack.c.bf16 %v6151_v23, %v6143_v5 }
 0x4e4   :  { %v6178_v55 = vpack.c.bf16 %v6152_v13, %v6144_v47  ;;  %v13482_v15 = vpop.permute.xlu1 %6196 }
 0x4e6   :  { %6376 = vmatprep.subr.bf16.mxu1 %v6178_v55 }
 0x4e7   :  { %6377 = vmatpush1.bf16.msra.mxu1 %v6177_v48  ;;  %v6249_v30 = vpop.f32.mrb[32].mxu0 }
 0x4e8   :  { %v6250_v41 = vadd.f32 %v6249_v30, %v13468_v9  ;;  %v6251_v57 = vpop.f32.mrb[33].mxu0 }
 0x4e9   :  { %v6253_v17 = vpop.f32.mrb[34].mxu0 }
 0x4ea   :  { %9425 = vmatmul.mubr.msk.bf16.vlgmr.msra.gmra.mrb[40].mxu1 %vm5902_vm12, %v13421_v24  ;;  %v6252_v24 = vadd.f32 %v6251_v57, %v13468_v9  ;;  %v6254_v19 = vadd.f32 %v6253_v17, %v13470_v3  ;;  %v6255_v59 = vpop.f32.mrb[35].mxu0  ;;  %v6427_v50 = vmax.f32 %v6250_v41, 0.0 }
 0x4eb   :  { %6416 = vmatprep.mubr.bf16.mxu1 %v14418_v8  ;;  %v6256_v34 = vadd.f32 %v6255_v59, %v13470_v3 }
 0x4ec   :  { %v6302_v1 = vpop.f32.mrb[32].mxu1  ;;  %v6435_v12 = vmax.f32 %v6254_v19, 0.0  ;;  %v6428_v42 = vmax.f32 %v6252_v24, 0.0 }
 0x4ed   :  { %v6303_v11 = vadd.f32 %v6302_v1, %v13468_v9  ;;  %v6304_v39 = vpop.f32.mrb[33].mxu1  ;;  %v6436_v36 = vmax.f32 %v6256_v34, 0.0 }
 0x4ee   :  { %v6305_v58 = vadd.f32 %v6304_v39, %v13468_v9  ;;  %v6469_v33 = vpack.c.bf16 %v6435_v12, %v6427_v50  ;;  %v13506_v12 = vld [vmem:[%s14225_s1 + $0x38] sm:$0xff]  }
 0x4ef   :  { %v6429_v51 = vmax.f32 %v6303_v11, 0.0  ;;  %v6470_v0 = vpack.c.bf16 %v6436_v36, %v6428_v42  ;;  %v6259_v37 = vpop.f32.mrb[36].mxu0 }
 0x4f0   :  { %v6430_v25 = vmax.f32 %v6305_v58, 0.0  ;;  %v6260_v2 = vadd.f32 %v6259_v37, %v13480_v29  ;;  %v6261_v46 = vpop.f32.mrb[37].mxu0 }
 0x4f1   :  { %v6262_v23 = vadd.f32 %v6261_v46, %v13480_v29  ;;  %v6263_v13 = vpop.f32.mrb[38].mxu0  ;;  %6521 = vmatprep.subr.bf16.mxu0 %v6470_v0 }
 0x4f2   :  { %9426 = vmatmul.mubr.msk.bf16.gmra.mrb[44].mxu1 %vm5902_vm12, %v13432_v61  ;;  %v6306_v61 = vpop.f32.mrb[34].mxu1  ;;  %v6264_v55 = vadd.f32 %v6263_v13, %v13482_v15  ;;  %v6265_v1 = vpop.f32.mrb[39].mxu0  ;;  %6522 = vmatpush1.bf16.msra.mxu0 %v6469_v33  ;;  %v6443_v39 = vmax.f32 %v6260_v2, 0.0 }
 0x4f3   :  { %6606 = vmatprep.mubr.bf16.mxu1 %v14418_v8  ;;  %v6307_v44 = vadd.f32 %v6306_v61, %v13470_v3  ;;  %v6308_v4 = vpop.f32.mrb[35].mxu1  ;;  %v6266_v11 = vadd.f32 %v6265_v1, %v13482_v15  ;;  %v6444_v61 = vmax.f32 %v6262_v23, 0.0 }
 0x4f4   :  { %v6309_v28 = vadd.f32 %v6308_v4, %v13470_v3  ;;  %v6312_v63 = vpop.f32.mrb[36].mxu1  ;;  %v6451_v58 = vmax.f32 %v6264_v55, 0.0 }
 0x4f5   :  { %v6437_v10 = vmax.f32 %v6307_v44, 0.0  ;;  %v6313_v6 = vadd.f32 %v6312_v63, %v13480_v29  ;;  %v6314_v5 = vpop.f32.mrb[37].mxu1  ;;  %v6452_v44 = vmax.f32 %v6266_v11, 0.0 }
 0x4f6   :  { %v6438_v18 = vmax.f32 %v6309_v28, 0.0  ;;  %v6315_v47 = vadd.f32 %v6314_v5, %v13480_v29  ;;  %v6316_v48 = vpop.f32.mrb[38].mxu1  ;;  %v6477_v4 = vpack.c.bf16 %v6451_v58, %v6443_v39 }
 0x4f7   :  { %v6471_v52 = vpack.c.bf16 %v6437_v10, %v6429_v51  ;;  %v6317_v30 = vadd.f32 %v6316_v48, %v13482_v15  ;;  %v6318_v41 = vpop.f32.mrb[39].mxu1  ;;  %v6445_v24 = vmax.f32 %v6313_v6, 0.0  ;;  %v6478_v28 = vpack.c.bf16 %v6452_v44, %v6444_v61  ;;  %v13495_v51 = vld [vmem:[%s14225_s1 + $0x30] sm:$0xff]  }
 0x4f8   :  { %v6472_v38 = vpack.c.bf16 %v6438_v18, %v6430_v25  ;;  %v6319_v57 = vadd.f32 %v6318_v41, %v13482_v15  ;;  %v6446_v19 = vmax.f32 %v6315_v47, 0.0 }
 0x4f9   :  { %v6453_v17 = vmax.f32 %v6317_v30, 0.0  ;;  %6523 = vmatprep.subr.bf16.mxu0 %v6478_v28 }
 0x4fa   :  { %6574 = vmatprep.subr.bf16.mxu1 %v6472_v38  ;;  %v6454_v59 = vmax.f32 %v6319_v57, 0.0  ;;  %6524 = vmatpush1.bf16.msra.mxu0 %v6477_v4 }
 0x4fb   :  { %6575 = vmatpush1.bf16.msra.mxu1 %v6471_v52  ;;  %v6479_v34 = vpack.c.bf16 %v6453_v17, %v6445_v24 }
 0x4fc   :  { %v6480_v50 = vpack.c.bf16 %v6454_v59, %v6446_v19 }
 0x4fd   :  { %9437 = vmatmul.mubr.msk.bf16.vlgmr.msra.gmra.mrb[48].mxu0 %vm5902_vm12, %v13495_v51 }
 0x4fe   :  { %6576 = vmatprep.subr.bf16.mxu1 %v6480_v50  ;;  %6563 = vmatprep.mubr.bf16.mxu0 %v14418_v8 }
 0x4ff   :  { %6577 = vmatpush1.bf16.msra.mxu1 %v6479_v34 }
 0x502   :  { %9439 = vmatmul.mubr.msk.bf16.vlgmr.msra.gmra.mrb[48].mxu1 %vm5902_vm12, %v13495_v51 }
 0x503   :  { %6616 = vmatprep.mubr.bf16.mxu1 %v14418_v8 }
 0x505   :  { %9438 = vmatmul.mubr.msk.bf16.gmra.mrb[52].mxu0 %vm5902_vm12, %v13506_v12 }
 0x506   :  { %6659 = vmatprep.mubr.bf16.mxu0 %v14418_v8 }
 0x50a   :  { %9440 = vmatmul.mubr.msk.bf16.gmra.mrb[52].mxu1 %vm5902_vm12, %v13506_v12 }
 0x50b   :  { %6712 = vmatprep.mubr.bf16.mxu1 %v14418_v8 }
 0x59f   :  { %v6355_v10 = vpop.f32.mrb[40].mxu0 }
 0x5a0   :  { %v6356_v42 = vadd.f32 %v6355_v10, %v13468_v9  ;;  %v6357_v25 = vpop.f32.mrb[41].mxu0 }
 0x5a1   :  { %v6358_v36 = vadd.f32 %v6357_v25, %v13468_v9  ;;  %v6359_v18 = vpop.f32.mrb[42].mxu0 }
 0x5a2   :  { %v6360_v33 = vadd.f32 %v6359_v18, %v13470_v3  ;;  %v6361_v52 = vpop.f32.mrb[43].mxu0  ;;  %v6431_v38 = vmax.f32 %v6356_v42, 0.0 }
 0x5a3   :  { %v6362_v0 = vadd.f32 %v6361_v52, %v13470_v3  ;;  %v6432_v63 = vmax.f32 %v6358_v36, 0.0 }
 0x5a4   :  { %v6439_v37 = vmax.f32 %v6360_v33, 0.0 }
 0x5a5   :  { %v6440_v2 = vmax.f32 %v6362_v0, 0.0 }
 0x5a6   :  { %v6473_v6 = vpack.c.bf16 %v6439_v37, %v6431_v38 }
 0x5a7   :  { %v6474_v46 = vpack.c.bf16 %v6440_v2, %v6432_v63  ;;  %v6365_v5 = vpop.f32.mrb[44].mxu0 }
 0x5a8   :  { %v6366_v23 = vadd.f32 %v6365_v5, %v13480_v29  ;;  %v6367_v47 = vpop.f32.mrb[45].mxu0 }
 0x5a9   :  { %v6368_v13 = vadd.f32 %v6367_v47, %v13480_v29  ;;  %v6369_v48 = vpop.f32.mrb[46].mxu0  ;;  %6627 = vmatprep.subr.bf16.mxu0 %v6474_v46 }
 0x5aa   :  { %v6370_v55 = vadd.f32 %v6369_v48, %v13482_v15  ;;  %v6371_v30 = vpop.f32.mrb[47].mxu0  ;;  %6628 = vmatpush1.bf16.msra.mxu0 %v6473_v6  ;;  %v6447_v41 = vmax.f32 %v6366_v23, 0.0 }
 0x5ab   :  { %v6372_v1 = vadd.f32 %v6371_v30, %v13482_v15  ;;  %v6448_v57 = vmax.f32 %v6368_v13, 0.0 }
 0x5ac   :  { %v6455_v11 = vmax.f32 %v6370_v55, 0.0 }
 0x5ad   :  { %v6456_v39 = vmax.f32 %v6372_v1, 0.0 }
 0x5ae   :  { %v6481_v24 = vpack.c.bf16 %v6455_v11, %v6447_v41 }
 0x5af   :  { %v6482_v58 = vpack.c.bf16 %v6456_v39, %v6448_v57 }
 0x5b1   :  { %6629 = vmatprep.subr.bf16.mxu0 %v6482_v58 }
 0x5b2   :  { %6630 = vmatpush1.bf16.msra.mxu0 %v6481_v24 }
 0x5b5   :  { %9441 = vmatmul.mubr.msk.bf16.vlgmr.msra.gmra.mrb[56].mxu0 %vm5902_vm12, %v13495_v51 }
 0x5b6   :  { %6669 = vmatprep.mubr.bf16.mxu0 %v14418_v8 }
 0x5bd   :  { %9442 = vmatmul.mubr.msk.bf16.gmra.mrb[60].mxu0 %vm5902_vm12, %v13506_v12  ;;  %v6408_v17 = vpop.f32.mrb[40].mxu1 }
 0x5be   :  { %6859 = vmatprep.mubr.bf16.mxu0 %v14418_v8  ;;  %v6409_v61 = vadd.f32 %v6408_v17, %v13468_v9  ;;  %v6410_v19 = vpop.f32.mrb[41].mxu1 }
 0x5bf   :  { %v6411_v44 = vadd.f32 %v6410_v19, %v13468_v9  ;;  %v6412_v59 = vpop.f32.mrb[42].mxu1 }
 0x5c0   :  { %v6413_v4 = vadd.f32 %v6412_v59, %v13470_v3  ;;  %v6414_v34 = vpop.f32.mrb[43].mxu1  ;;  %v6433_v50 = vmax.f32 %v6409_v61, 0.0 }
 0x5c1   :  { %v6415_v28 = vadd.f32 %v6414_v34, %v13470_v3  ;;  %v6434_v42 = vmax.f32 %v6411_v44, 0.0 }
 0x5c2   :  { %v6441_v10 = vmax.f32 %v6413_v4, 0.0 }
 0x5c3   :  { %v6442_v25 = vmax.f32 %v6415_v28, 0.0 }
 0x5c4   :  { %v6475_v36 = vpack.c.bf16 %v6441_v10, %v6433_v50 }
 0x5c5   :  { %v6476_v18 = vpack.c.bf16 %v6442_v25, %v6434_v42  ;;  %v6418_v33 = vpop.f32.mrb[44].mxu1 }
 0x5c6   :  { %v6419_v52 = vadd.f32 %v6418_v33, %v13480_v29  ;;  %v6420_v0 = vpop.f32.mrb[45].mxu1 }
 0x5c7   :  { %v6421_v38 = vadd.f32 %v6420_v0, %v13480_v29  ;;  %v6422_v37 = vpop.f32.mrb[46].mxu1  ;;  %6680 = vmatprep.subr.bf16.mxu1 %v6476_v18  ;;  %v13542_v29 = vpop.permute.xlu0 %6487 }
 0x5c8   :  { %v6423_v9 = vadd.f32 %v6422_v37, %v13482_v15  ;;  %v6424_v63 = vpop.f32.mrb[47].mxu1  ;;  %6681 = vmatpush1.bf16.msra.mxu1 %v6475_v36  ;;  %v6449_v2 = vmax.f32 %v6419_v52, 0.0 }
 0x5c9   :  { %v6425_v3 = vadd.f32 %v6424_v63, %v13482_v15  ;;  %v6450_v46 = vmax.f32 %v6421_v38, 0.0  ;;  %v13544_v15 = vpop.permute.xlu1 %6492 }
 0x5ca   :  { %v6457_v6 = vmax.f32 %v6423_v9, 0.0 }
 0x5cb   :  { %v6458_v5 = vmax.f32 %v6425_v3, 0.0  ;;  %v13554_v25 = vpop.permute.xlu0 %6497 }
 0x5cc   :  { %v6483_v23 = vpack.c.bf16 %v6457_v6, %v6449_v2 }
 0x5cd   :  { %v6484_v47 = vpack.c.bf16 %v6458_v5, %v6450_v46  ;;  %v13556_v36 = vpop.permute.xlu1 %6502 }
 0x5cf   :  { %6682 = vmatprep.subr.bf16.mxu1 %v6484_v47 }
 0x5d0   :  { %6683 = vmatpush1.bf16.msra.mxu1 %v6483_v23  ;;  %v6555_v13 = vpop.f32.mrb[48].mxu0 }
 0x5d1   :  { %v6556_v55 = vadd.f32 %v6555_v13, %v13542_v29  ;;  %v6557_v1 = vpop.f32.mrb[49].mxu0 }
 0x5d2   :  { %v6559_v57 = vpop.f32.mrb[50].mxu0 }
 0x5d3   :  { %9443 = vmatmul.mubr.msk.bf16.vlgmr.msra.gmra.mrb[56].mxu1 %vm5902_vm12, %v13495_v51  ;;  %v6558_v51 = vadd.f32 %v6557_v1, %v13542_v29  ;;  %v6560_v39 = vadd.f32 %v6559_v57, %v13544_v15  ;;  %v6561_v58 = vpop.f32.mrb[51].mxu0  ;;  %v6733_v44 = vmax.f32 %v6556_v55, 0.0 }
 0x5d4   :  { %6722 = vmatprep.mubr.bf16.mxu1 %v14418_v8  ;;  %v6562_v61 = vadd.f32 %v6561_v58, %v13544_v15 }
 0x5d5   :  { %v6608_v48 = vpop.f32.mrb[48].mxu1  ;;  %v6741_v4 = vmax.f32 %v6560_v39, 0.0  ;;  %v6734_v28 = vmax.f32 %v6558_v51, 0.0 }
 0x5d6   :  { %v6609_v30 = vadd.f32 %v6608_v48, %v13542_v29  ;;  %v6610_v41 = vpop.f32.mrb[49].mxu1  ;;  %v6742_v10 = vmax.f32 %v6562_v61, 0.0 }
 0x5d7   :  { %v6611_v11 = vadd.f32 %v6610_v41, %v13542_v29  ;;  %v6775_v18 = vpack.c.bf16 %v6741_v4, %v6733_v44  ;;  %v13580_v4 = vld [vmem:[%s14225_s1 + $0x48] sm:$0xff]  }
 0x5d8   :  { %v6735_v59 = vmax.f32 %v6609_v30, 0.0  ;;  %v6776_v52 = vpack.c.bf16 %v6742_v10, %v6734_v28  ;;  %v6565_v38 = vpop.f32.mrb[52].mxu0 }
 0x5d9   :  { %v6736_v50 = vmax.f32 %v6611_v11, 0.0  ;;  %v6566_v9 = vadd.f32 %v6565_v38, %v13554_v25  ;;  %v6567_v3 = vpop.f32.mrb[53].mxu0 }
 0x5da   :  { %v6568_v6 = vadd.f32 %v6567_v3, %v13554_v25  ;;  %v6569_v5 = vpop.f32.mrb[54].mxu0  ;;  %6827 = vmatprep.subr.bf16.mxu0 %v6776_v52 }
 0x5db   :  { %9444 = vmatmul.mubr.msk.bf16.gmra.mrb[60].mxu1 %vm5902_vm12, %v13506_v12  ;;  %v6612_v12 = vpop.f32.mrb[50].mxu1  ;;  %v6570_v47 = vadd.f32 %v6569_v5, %v13556_v36  ;;  %v6571_v48 = vpop.f32.mrb[55].mxu0  ;;  %6828 = vmatpush1.bf16.msra.mxu0 %v6775_v18  ;;  %v6749_v41 = vmax.f32 %v6566_v9, 0.0 }
 0x5dc   :  { %6912 = vmatprep.mubr.bf16.mxu1 %v14418_v8  ;;  %v6613_v24 = vadd.f32 %v6612_v12, %v13544_v15  ;;  %v6614_v17 = vpop.f32.mrb[51].mxu1  ;;  %v6572_v30 = vadd.f32 %v6571_v48, %v13556_v36  ;;  %v6750_v12 = vmax.f32 %v6568_v6, 0.0 }
 0x5dd   :  { %v6615_v19 = vadd.f32 %v6614_v17, %v13544_v15  ;;  %v6618_v37 = vpop.f32.mrb[52].mxu1  ;;  %v6757_v11 = vmax.f32 %v6570_v47, 0.0 }
 0x5de   :  { %v6743_v34 = vmax.f32 %v6613_v24, 0.0  ;;  %v6619_v63 = vadd.f32 %v6618_v37, %v13554_v25  ;;  %v6620_v2 = vpop.f32.mrb[53].mxu1  ;;  %v6758_v24 = vmax.f32 %v6572_v30, 0.0 }
 0x5df   :  { %v6744_v42 = vmax.f32 %v6615_v19, 0.0  ;;  %v6621_v46 = vadd.f32 %v6620_v2, %v13554_v25  ;;  %v6622_v23 = vpop.f32.mrb[54].mxu1  ;;  %v6783_v17 = vpack.c.bf16 %v6757_v11, %v6749_v41 }
 0x5e0   :  { %v6777_v33 = vpack.c.bf16 %v6743_v34, %v6735_v59  ;;  %v6623_v13 = vadd.f32 %v6622_v23, %v13556_v36  ;;  %v6624_v55 = vpop.f32.mrb[55].mxu1  ;;  %v6751_v51 = vmax.f32 %v6619_v63, 0.0  ;;  %v6784_v19 = vpack.c.bf16 %v6758_v24, %v6750_v12  ;;  %v13569_v59 = vld [vmem:[%s14225_s1 + $0x40] sm:$0xff]  }
 0x5e1   :  { %v6778_v0 = vpack.c.bf16 %v6744_v42, %v6736_v50  ;;  %v6625_v1 = vadd.f32 %v6624_v55, %v13556_v36  ;;  %v6752_v39 = vmax.f32 %v6621_v46, 0.0 }
 0x5e2   :  { %v6759_v57 = vmax.f32 %v6623_v13, 0.0  ;;  %6829 = vmatprep.subr.bf16.mxu0 %v6784_v19 }
 0x5e3   :  { %6880 = vmatprep.subr.bf16.mxu1 %v6778_v0  ;;  %v6760_v58 = vmax.f32 %v6625_v1, 0.0  ;;  %6830 = vmatpush1.bf16.msra.mxu0 %v6783_v17 }
 0x5e4   :  { %6881 = vmatpush1.bf16.msra.mxu1 %v6777_v33  ;;  %v6785_v61 = vpack.c.bf16 %v6759_v57, %v6751_v51 }
 0x5e5   :  { %v6786_v44 = vpack.c.bf16 %v6760_v58, %v6752_v39 }
 0x5e6   :  { %9455 = vmatmul.mubr.msk.bf16.vlgmr.msra.gmra.mrb[64].mxu0 %vm5902_vm12, %v13569_v59 }
 0x5e7   :  { %6882 = vmatprep.subr.bf16.mxu1 %v6786_v44  ;;  %6869 = vmatprep.mubr.bf16.mxu0 %v14418_v8 }
 0x5e8   :  { %6883 = vmatpush1.bf16.msra.mxu1 %v6785_v61 }
 0x5eb   :  { %9457 = vmatmul.mubr.msk.bf16.vlgmr.msra.gmra.mrb[64].mxu1 %vm5902_vm12, %v13569_v59 }
 0x5ec   :  { %6922 = vmatprep.mubr.bf16.mxu1 %v14418_v8 }
 0x5ee   :  { %9456 = vmatmul.mubr.msk.bf16.gmra.mrb[68].mxu0 %vm5902_vm12, %v13580_v4 }
 0x5ef   :  { %6965 = vmatprep.mubr.bf16.mxu0 %v14418_v8 }
 0x5f3   :  { %9458 = vmatmul.mubr.msk.bf16.gmra.mrb[68].mxu1 %vm5902_vm12, %v13580_v4 }
 0x5f4   :  { %7018 = vmatprep.mubr.bf16.mxu1 %v14418_v8 }
 0x688   :  { %v6661_v34 = vpop.f32.mrb[56].mxu0 }
 0x689   :  { %v6662_v28 = vadd.f32 %v6661_v34, %v13542_v29  ;;  %v6663_v50 = vpop.f32.mrb[57].mxu0 }
 0x68a   :  { %v6664_v10 = vadd.f32 %v6663_v50, %v13542_v29  ;;  %v6665_v42 = vpop.f32.mrb[58].mxu0 }
 0x68b   :  { %v6666_v18 = vadd.f32 %v6665_v42, %v13544_v15  ;;  %v6667_v33 = vpop.f32.mrb[59].mxu0  ;;  %v6737_v0 = vmax.f32 %v6662_v28, 0.0 }
 0x68c   :  { %v6668_v52 = vadd.f32 %v6667_v33, %v13544_v15  ;;  %v6738_v37 = vmax.f32 %v6664_v10, 0.0 }
 0x68d   :  { %v6745_v38 = vmax.f32 %v6666_v18, 0.0 }
 0x68e   :  { %v6746_v9 = vmax.f32 %v6668_v52, 0.0 }
 0x68f   :  { %v6779_v63 = vpack.c.bf16 %v6745_v38, %v6737_v0 }
 0x690   :  { %v6780_v3 = vpack.c.bf16 %v6746_v9, %v6738_v37  ;;  %v6671_v2 = vpop.f32.mrb[60].mxu0 }
 0x691   :  { %v6672_v6 = vadd.f32 %v6671_v2, %v13554_v25  ;;  %v6673_v46 = vpop.f32.mrb[61].mxu0 }
 0x692   :  { %v6674_v5 = vadd.f32 %v6673_v46, %v13554_v25  ;;  %v6675_v23 = vpop.f32.mrb[62].mxu0  ;;  %6933 = vmatprep.subr.bf16.mxu0 %v6780_v3 }
 0x693   :  { %v6676_v47 = vadd.f32 %v6675_v23, %v13556_v36  ;;  %v6677_v13 = vpop.f32.mrb[63].mxu0  ;;  %6934 = vmatpush1.bf16.msra.mxu0 %v6779_v63  ;;  %v6753_v55 = vmax.f32 %v6672_v6, 0.0 }
 0x694   :  { %v6678_v48 = vadd.f32 %v6677_v13, %v13556_v36  ;;  %v6754_v1 = vmax.f32 %v6674_v5, 0.0 }
 0x695   :  { %v6761_v30 = vmax.f32 %v6676_v47, 0.0 }
 0x696   :  { %v6762_v41 = vmax.f32 %v6678_v48, 0.0 }
 0x697   :  { %v6787_v51 = vpack.c.bf16 %v6761_v30, %v6753_v55 }
 0x698   :  { %v6788_v11 = vpack.c.bf16 %v6762_v41, %v6754_v1 }
 0x69a   :  { %6935 = vmatprep.subr.bf16.mxu0 %v6788_v11 }
 0x69b   :  { %6936 = vmatpush1.bf16.msra.mxu0 %v6787_v51 }
 0x69e   :  { %9459 = vmatmul.mubr.msk.bf16.vlgmr.msra.gmra.mrb[72].mxu0 %vm5902_vm12, %v13569_v59 }
 0x69f   :  { %6975 = vmatprep.mubr.bf16.mxu0 %v14418_v8 }
 0x6a6   :  { %9460 = vmatmul.mubr.msk.bf16.gmra.mrb[76].mxu0 %vm5902_vm12, %v13580_v4  ;;  %v6714_v57 = vpop.f32.mrb[56].mxu1 }
 0x6a7   :  { %7166 = vmatprep.mubr.bf16.mxu0 %v14418_v8  ;;  %v6715_v12 = vadd.f32 %v6714_v57, %v13542_v29  ;;  %v6716_v39 = vpop.f32.mrb[57].mxu1 }
 0x6a8   :  { %v6717_v24 = vadd.f32 %v6716_v39, %v13542_v29  ;;  %v6718_v58 = vpop.f32.mrb[58].mxu1 }
 0x6a9   :  { %v6719_v17 = vadd.f32 %v6718_v58, %v13544_v15  ;;  %v6720_v61 = vpop.f32.mrb[59].mxu1  ;;  %v6739_v44 = vmax.f32 %v6715_v12, 0.0 }
 0x6aa   :  { %v6721_v19 = vadd.f32 %v6720_v61, %v13544_v15  ;;  %v6740_v28 = vmax.f32 %v6717_v24, 0.0 }
 0x6ab   :  { %v6747_v34 = vmax.f32 %v6719_v17, 0.0 }
 0x6ac   :  { %v6748_v50 = vmax.f32 %v6721_v19, 0.0 }
 0x6ad   :  { %v6781_v10 = vpack.c.bf16 %v6747_v34, %v6739_v44 }
 0x6ae   :  { %v6782_v42 = vpack.c.bf16 %v6748_v50, %v6740_v28  ;;  %v6724_v18 = vpop.f32.mrb[60].mxu1 }
 0x6af   :  { %v6725_v33 = vadd.f32 %v6724_v18, %v13554_v25  ;;  %v6726_v52 = vpop.f32.mrb[61].mxu1 }
 0x6b0   :  { %v6727_v0 = vadd.f32 %v6726_v52, %v13554_v25  ;;  %v6728_v38 = vpop.f32.mrb[62].mxu1  ;;  %6986 = vmatprep.subr.bf16.mxu1 %v6782_v42  ;;  %v13616_v25 = vpop.permute.xlu0 %6793 }
 0x6b1   :  { %v6729_v29 = vadd.f32 %v6728_v38, %v13556_v36  ;;  %v6730_v37 = vpop.f32.mrb[63].mxu1  ;;  %6987 = vmatpush1.bf16.msra.mxu1 %v6781_v10  ;;  %v6755_v9 = vmax.f32 %v6725_v33, 0.0 }
 0x6b2   :  { %v6731_v15 = vadd.f32 %v6730_v37, %v13556_v36  ;;  %v6756_v3 = vmax.f32 %v6727_v0, 0.0  ;;  %v13618_v36 = vpop.permute.xlu1 %6798 }
 0x6b3   :  { %v6763_v63 = vmax.f32 %v6729_v29, 0.0 }
 0x6b4   :  { %v6764_v2 = vmax.f32 %v6731_v15, 0.0  ;;  %v13628_v50 = vpop.permute.xlu0 %6803 }
 0x6b5   :  { %v6789_v6 = vpack.c.bf16 %v6763_v63, %v6755_v9 }
 0x6b6   :  { %v6790_v46 = vpack.c.bf16 %v6764_v2, %v6756_v3  ;;  %v13630_v10 = vpop.permute.xlu1 %6808 }
 0x6b8   :  { %6988 = vmatprep.subr.bf16.mxu1 %v6790_v46 }
 0x6b9   :  { %6989 = vmatpush1.bf16.msra.mxu1 %v6789_v6  ;;  %v6861_v5 = vpop.f32.mrb[64].mxu0 }
 0x6ba   :  { %v6862_v47 = vadd.f32 %v6861_v5, %v13616_v25  ;;  %v6863_v48 = vpop.f32.mrb[65].mxu0 }
 0x6bb   :  { %v6865_v1 = vpop.f32.mrb[66].mxu0 }
 0x6bc   :  { %9461 = vmatmul.mubr.msk.bf16.vlgmr.msra.gmra.mrb[72].mxu1 %vm5902_vm12, %v13569_v59  ;;  %v6864_v59 = vadd.f32 %v6863_v48, %v13616_v25  ;;  %v6866_v41 = vadd.f32 %v6865_v1, %v13618_v36  ;;  %v6867_v11 = vpop.f32.mrb[67].mxu0  ;;  %v7039_v24 = vmax.f32 %v6862_v47, 0.0 }
 0x6bd   :  { %7028 = vmatprep.mubr.bf16.mxu1 %v14418_v8  ;;  %v6868_v12 = vadd.f32 %v6867_v11, %v13618_v36 }
 0x6be   :  { %v6914_v23 = vpop.f32.mrb[64].mxu1  ;;  %v7047_v17 = vmax.f32 %v6866_v41, 0.0  ;;  %v7040_v19 = vmax.f32 %v6864_v59, 0.0 }
 0x6bf   :  { %v6915_v13 = vadd.f32 %v6914_v23, %v13616_v25  ;;  %v6916_v55 = vpop.f32.mrb[65].mxu1  ;;  %v7048_v34 = vmax.f32 %v6868_v12, 0.0 }
 0x6c0   :  { %v6917_v30 = vadd.f32 %v6916_v55, %v13616_v25  ;;  %v7081_v42 = vpack.c.bf16 %v7047_v17, %v7039_v24  ;;  %v14426_v17 = vld [vmem:[#allocation3_spill] sm:$0xff] }
 0x6c1   :  { %v7041_v58 = vmax.f32 %v6915_v13, 0.0  ;;  %v7082_v33 = vpack.c.bf16 %v7048_v34, %v7040_v19  ;;  %v6871_v0 = vpop.f32.mrb[68].mxu0  ;;  %v14428_v19 = vld [vmem:[#allocation5_spill] sm:$0xff]  ;;  %v14430_v34 = vld [vmem:[#allocation11_spill] sm:$0xff] }
 0x6c2   :  { %v7042_v44 = vmax.f32 %v6917_v30, 0.0  ;;  %v6872_v29 = vadd.f32 %v6871_v0, %v13628_v50  ;;  %v6873_v15 = vpop.f32.mrb[69].mxu0  ;;  %v14438_v0 = vld [vmem:[#allocation21_spill] sm:$0xff] }
 0x6c3   :  { %v6874_v63 = vadd.f32 %v6873_v15, %v13628_v50  ;;  %v6875_v2 = vpop.f32.mrb[70].mxu0  ;;  %7134 = vmatprep.subr.bf16.mxu0 %v7082_v33  ;;  %v14435_v33 = vld [vmem:[#allocation19_spill] sm:$0xff] }
 0x6c4   :  { %9462 = vmatmul.mubr.msk.bf16.gmra.mrb[76].mxu1 %vm5902_vm12, %v13580_v4  ;;  %v6918_v4 = vpop.f32.mrb[66].mxu1  ;;  %v6876_v46 = vadd.f32 %v6875_v2, %v13630_v10  ;;  %v6877_v23 = vpop.f32.mrb[71].mxu0  ;;  %7135 = vmatpush1.bf16.msra.mxu0 %v7081_v42  ;;  %v7055_v55 = vmax.f32 %v6872_v29, 0.0  ;;  %v14432_v42 = vld [vmem:[#allocation20_spill] sm:$0xff]  ;;  %v13668_v29 = vld [vmem:[%s14225_s1 + $0x58] sm:$0xff]  }
 0x6c5   :  { %7219 = vmatprep.mubr.bf16.mxu1 %v14418_v8  ;;  %v6919_v51 = vadd.f32 %v6918_v4, %v13618_v36  ;;  %v6920_v57 = vpop.f32.mrb[67].mxu1  ;;  %v6878_v13 = vadd.f32 %v6877_v23, %v13630_v10  ;;  %v7056_v4 = vmax.f32 %v6874_v63, 0.0 }
 0x6c6   :  { %v6921_v39 = vadd.f32 %v6920_v57, %v13618_v36  ;;  %v6924_v38 = vpop.f32.mrb[68].mxu1  ;;  %v7063_v30 = vmax.f32 %v6876_v46, 0.0 }
 0x6c7   :  { %v7049_v61 = vmax.f32 %v6919_v51, 0.0  ;;  %v6925_v37 = vadd.f32 %v6924_v38, %v13628_v50  ;;  %v6926_v9 = vpop.f32.mrb[69].mxu1  ;;  %v7064_v51 = vmax.f32 %v6878_v13, 0.0  ;;  %v13657_v38 = vld [vmem:[%s14225_s1 + $0x50] sm:$0xff]  }
 0x6c8   :  { %v7050_v28 = vmax.f32 %v6921_v39, 0.0  ;;  %v6927_v3 = vadd.f32 %v6926_v9, %v13628_v50  ;;  %v6928_v6 = vpop.f32.mrb[70].mxu1  ;;  %v7089_v57 = vpack.c.bf16 %v7063_v30, %v7055_v55 }
 0x6c9   :  { %v7083_v18 = vpack.c.bf16 %v7049_v61, %v7041_v58  ;;  %v6929_v5 = vadd.f32 %v6928_v6, %v13630_v10  ;;  %v6930_v47 = vpop.f32.mrb[71].mxu1  ;;  %v7057_v59 = vmax.f32 %v6925_v37, 0.0  ;;  %v7090_v39 = vpack.c.bf16 %v7064_v51, %v7056_v4  ;;  %v14425_v58 = vld [vmem:[#allocation2_spill] sm:$0xff]  ;;  %v14427_v61 = vld [vmem:[#allocation4_spill] sm:$0xff] }
 0x6ca   :  { %v7084_v52 = vpack.c.bf16 %v7050_v28, %v7042_v44  ;;  %v6931_v48 = vadd.f32 %v6930_v47, %v13630_v10  ;;  %v7058_v41 = vmax.f32 %v6927_v3, 0.0  ;;  %v14429_v44 = vld [vmem:[#allocation8_spill] sm:$0xff]  ;;  %v14431_v28 = vld [vmem:[#allocation15_spill] sm:$0xff] }
 0x6cb   :  { %v7065_v1 = vmax.f32 %v6929_v5, 0.0  ;;  %7136 = vmatprep.subr.bf16.mxu0 %v7090_v39 }
 0x6cc   :  { %7187 = vmatprep.subr.bf16.mxu1 %v7084_v52  ;;  %v7066_v11 = vmax.f32 %v6931_v48, 0.0  ;;  %7137 = vmatpush1.bf16.msra.mxu0 %v7089_v57  ;;  %v14437_v52 = vld [vmem:[#allocation16_spill] sm:$0xff] }
 0x6cd   :  { %7188 = vmatpush1.bf16.msra.mxu1 %v7083_v18  ;;  %v7091_v12 = vpack.c.bf16 %v7065_v1, %v7057_v59  ;;  %7138 = vmatprep.subr.bf16.mxu0 %v14425_v58  ;;  %v14433_v18 = vld [vmem:[#allocation12_spill] sm:$0xff] }
 0x6ce   :  { %v7092_v24 = vpack.c.bf16 %v7066_v11, %v7058_v41 }
 0x6d0   :  { %7189 = vmatprep.subr.bf16.mxu1 %v7092_v24  ;;  %7139 = vmatpush1.bf16.msra.mxu0 %v14427_v61 }
 0x6d1   :  { %7190 = vmatpush1.bf16.msra.mxu1 %v7091_v12  ;;  %7140 = vmatprep.subr.bf16.mxu0 %v14429_v44 }
 0x6d2   :  { %7191 = vmatprep.subr.bf16.mxu1 %v14426_v17 }
 0x6d4   :  { %7141 = vmatpush1.bf16.msra.mxu0 %v14431_v28 }
 0x6d5   :  { %7192 = vmatpush1.bf16.msra.mxu1 %v14428_v19  ;;  %9473 = vmatprep.subr.msk.bf16.mxu0 %vm14434_vm2, %v14433_v18  ;;  %v14439_v19 = vld [vmem:[#allocation22_spill] sm:$0xff]  ;;  %vm14463_vm2 = vmmov %vm14461_vm6 }
 0x6d6   :  { %7193 = vmatprep.subr.bf16.mxu1 %v14430_v34 }
 0x6d8   :  { %7143 = vmatpush1.bf16.msra.mxu0 %v14437_v52 }
 0x6d9   :  { %7194 = vmatpush1.bf16.msra.mxu1 %v14432_v42 }
 0x6da   :  { %9476 = vmatprep.subr.msk.bf16.mxu1 %vm14436_vm3, %v14435_v33  ;;  %vm14464_vm3 = vmmov %vm14463_vm2 }
 0x6db   :  { %9474 = vmatmul.mubr.msk.bf16.vlgmr.msra.gmra.mrb[80].mxu0 %vm7127_vm1, %v13657_v38 }
 0x6dc   :  { %7176 = vmatprep.mubr.bf16.mxu0 %v14418_v8 }
 0x6dd   :  { %7196 = vmatpush1.bf16.msra.mxu1 %v14438_v0 }
 0x6e0   :  { %9477 = vmatmul.mubr.msk.bf16.vlgmr.msra.gmra.mrb[80].mxu1 %vm7127_vm1, %v13657_v38 }
 0x6e1   :  { %7229 = vmatprep.mubr.bf16.mxu1 %v14418_v8 }
 0x6e3   :  { %9475 = vmatmul.mubr.msk.bf16.gmra.mrb[84].mxu0 %vm7127_vm1, %v13668_v29 }
 0x6e4   :  { %7272 = vmatprep.mubr.bf16.mxu0 %v14418_v8 }
 0x6e8   :  { %9478 = vmatmul.mubr.msk.bf16.gmra.mrb[84].mxu1 %vm7127_vm1, %v13668_v29 }
 0x6e9   :  { %7325 = vmatprep.mubr.bf16.mxu1 %v14418_v8 }
 0x771   :  { %v6967_v37 = vpop.f32.mrb[72].mxu0 }
 0x772   :  { %v6968_v15 = vadd.f32 %v6967_v37, %v13616_v25  ;;  %v6969_v9 = vpop.f32.mrb[73].mxu0 }
 0x773   :  { %v6970_v63 = vadd.f32 %v6969_v9, %v13616_v25  ;;  %v6971_v3 = vpop.f32.mrb[74].mxu0 }
 0x774   :  { %v6972_v2 = vadd.f32 %v6971_v3, %v13618_v36  ;;  %v6973_v6 = vpop.f32.mrb[75].mxu0  ;;  %v7043_v5 = vmax.f32 %v6968_v15, 0.0 }
 0x775   :  { %v6974_v46 = vadd.f32 %v6973_v6, %v13618_v36  ;;  %v7044_v47 = vmax.f32 %v6970_v63, 0.0 }
 0x776   :  { %v7051_v23 = vmax.f32 %v6972_v2, 0.0 }
 0x777   :  { %v7052_v13 = vmax.f32 %v6974_v46, 0.0 }
 0x778   :  { %v7085_v48 = vpack.c.bf16 %v7051_v23, %v7043_v5 }
 0x779   :  { %v7086_v55 = vpack.c.bf16 %v7052_v13, %v7044_v47  ;;  %v6977_v59 = vpop.f32.mrb[76].mxu0 }
 0x77a   :  { %v6978_v30 = vadd.f32 %v6977_v59, %v13628_v50  ;;  %v6979_v1 = vpop.f32.mrb[77].mxu0 }
 0x77b   :  { %v6980_v4 = vadd.f32 %v6979_v1, %v13628_v50  ;;  %v6981_v41 = vpop.f32.mrb[78].mxu0  ;;  %7240 = vmatprep.subr.bf16.mxu0 %v7086_v55  ;;  %v14441_v55 = vld [vmem:[#allocation23_spill] sm:$0xff] }
 0x77c   :  { %v6982_v51 = vadd.f32 %v6981_v41, %v13630_v10  ;;  %v6983_v11 = vpop.f32.mrb[79].mxu0  ;;  %7241 = vmatpush1.bf16.msra.mxu0 %v7085_v48  ;;  %v7059_v12 = vmax.f32 %v6978_v30, 0.0 }
 0x77d   :  { %v6984_v57 = vadd.f32 %v6983_v11, %v13630_v10  ;;  %v7060_v24 = vmax.f32 %v6980_v4, 0.0 }
 0x77e   :  { %v7067_v39 = vmax.f32 %v6982_v51, 0.0 }
 0x77f   :  { %v7068_v58 = vmax.f32 %v6984_v57, 0.0 }
 0x780   :  { %v7093_v17 = vpack.c.bf16 %v7067_v39, %v7059_v12 }
 0x781   :  { %v7094_v61 = vpack.c.bf16 %v7068_v58, %v7060_v24 }
 0x783   :  { %7242 = vmatprep.subr.bf16.mxu0 %v7094_v61 }
 0x784   :  { %7243 = vmatpush1.bf16.msra.mxu0 %v7093_v17 }
 0x785   :  { %7244 = vmatprep.subr.bf16.mxu0 %v14439_v19 }
 0x788   :  { %7245 = vmatpush1.bf16.msra.mxu0 %v12440_v54 }
 0x789   :  { %7246 = vmatprep.subr.bf16.mxu0 %v12984_v43 }
 0x78c   :  { %7247 = vmatpush1.bf16.msra.mxu0 %v13264_v40 }
 0x78d   :  { %9479 = vmatprep.subr.msk.bf16.mxu0 %vm14440_vm7, %v13259_v26 }
 0x78f   :  { %v7020_v44 = vpop.f32.mrb[72].mxu1 }
 0x790   :  { %7249 = vmatpush1.bf16.msra.mxu0 %v13270_v14  ;;  %v7021_v34 = vadd.f32 %v7020_v44, %v13616_v25  ;;  %v7022_v28 = vpop.f32.mrb[73].mxu1 }
 0x791   :  { %v7023_v54 = vadd.f32 %v7022_v28, %v13616_v25  ;;  %v7024_v42 = vpop.f32.mrb[74].mxu1 }
 0x792   :  { %v7025_v43 = vadd.f32 %v7024_v42, %v13618_v36  ;;  %v7026_v40 = vpop.f32.mrb[75].mxu1  ;;  %v7045_v26 = vmax.f32 %v7021_v34, 0.0 }
 0x793   :  { %9480 = vmatmul.mubr.msk.bf16.vlgmr.msra.gmra.mrb[88].mxu0 %vm7127_vm1, %v13657_v38  ;;  %v7027_v18 = vadd.f32 %v7026_v40, %v13618_v36  ;;  %v7046_v14 = vmax.f32 %v7023_v54, 0.0 }
 0x794   :  { %7282 = vmatprep.mubr.bf16.mxu0 %v14418_v8  ;;  %v7053_v33 = vmax.f32 %v7025_v43, 0.0 }
 0x795   :  { %v7054_v52 = vmax.f32 %v7027_v18, 0.0 }
 0x796   :  { %v7087_v0 = vpack.c.bf16 %v7053_v33, %v7045_v26 }
 0x797   :  { %v7088_v37 = vpack.c.bf16 %v7054_v52, %v7046_v14  ;;  %v7030_v15 = vpop.f32.mrb[76].mxu1 }
 0x798   :  { %v7031_v9 = vadd.f32 %v7030_v15, %v13628_v50  ;;  %v7032_v63 = vpop.f32.mrb[77].mxu1 }
 0x799   :  { %v7033_v25 = vadd.f32 %v7032_v63, %v13628_v50  ;;  %v7034_v3 = vpop.f32.mrb[78].mxu1  ;;  %7293 = vmatprep.subr.bf16.mxu1 %v7088_v37 }
 0x79a   :  { %v7035_v36 = vadd.f32 %v7034_v3, %v13630_v10  ;;  %v7036_v2 = vpop.f32.mrb[79].mxu1  ;;  %7294 = vmatpush1.bf16.msra.mxu1 %v7087_v0  ;;  %v7061_v46 = vmax.f32 %v7031_v9, 0.0 }
 0x79b   :  { %9481 = vmatmul.mubr.msk.bf16.gmra.mrb[92].mxu0 %vm7127_vm1, %v13668_v29  ;;  %v7037_v6 = vadd.f32 %v7036_v2, %v13630_v10  ;;  %v7062_v23 = vmax.f32 %v7033_v25, 0.0 }
 0x79c   :  { %7472 = vmatprep.mubr.bf16.mxu0 %v14418_v8  ;;  %v7069_v5 = vmax.f32 %v7035_v36, 0.0 }
 0x79d   :  { %v7070_v47 = vmax.f32 %v7037_v6, 0.0 }
 0x79e   :  { %v7095_v13 = vpack.c.bf16 %v7069_v5, %v7061_v46 }
 0x79f   :  { %v7096_v48 = vpack.c.bf16 %v7070_v47, %v7062_v23 }
 0x7a1   :  { %7295 = vmatprep.subr.bf16.mxu1 %v7096_v48 }
 0x7a2   :  { %7296 = vmatpush1.bf16.msra.mxu1 %v7095_v13 }
 0x7a3   :  { %7297 = vmatprep.subr.bf16.mxu1 %v14441_v55 }
 0x7a6   :  { %7298 = vmatpush1.bf16.msra.mxu1 %v12724_v49  ;;  %v13718_v49 = vpop.permute.xlu0 %7099 }
 0x7a7   :  { %7299 = vmatprep.subr.bf16.mxu1 %v13152_v21  ;;  %v13720_v21 = vpop.permute.xlu1 %7104 }
 0x7aa   :  { %7300 = vmatpush1.bf16.msra.mxu1 %v13308_v7  ;;  %v13730_v28 = vpop.permute.xlu0 %7109 }
 0x7ab   :  { %9482 = vmatprep.subr.msk.bf16.mxu1 %vm14442_vm0, %v13302_v31  ;;  %v13732_v54 = vpop.permute.xlu1 %7114 }
 0x7ae   :  { %7302 = vmatpush1.bf16.msra.mxu1 %v13316_v20  ;;  %v7168_v7 = vpop.f32.mrb[80].mxu0 }
 0x7af   :  { %v7169_v31 = vadd.f32 %v7168_v7, %v13718_v49  ;;  %v7170_v10 = vpop.f32.mrb[81].mxu0 }
 0x7b0   :  { %v7172_v1 = vpop.f32.mrb[82].mxu0 }
 0x7b1   :  { %9483 = vmatmul.mubr.msk.bf16.vlgmr.msra.gmra.mrb[88].mxu1 %vm7127_vm1, %v13657_v38  ;;  %v7171_v38 = vadd.f32 %v7170_v10, %v13718_v49  ;;  %v7173_v4 = vadd.f32 %v7172_v1, %v13720_v21  ;;  %v7174_v51 = vpop.f32.mrb[83].mxu0  ;;  %v7346_v39 = vmax.f32 %v7169_v31, 0.0  ;;  %v13756_v1 = vld [vmem:[%s14225_s1 + $0x68] sm:$0xff]  }
 0x7b2   :  { %7335 = vmatprep.mubr.bf16.mxu1 %v14418_v8  ;;  %v7175_v57 = vadd.f32 %v7174_v51, %v13720_v21 }
 0x7b3   :  { %v7221_v50 = vpop.f32.mrb[80].mxu1  ;;  %v7354_v58 = vmax.f32 %v7173_v4, 0.0  ;;  %v7347_v61 = vmax.f32 %v7171_v38, 0.0 }
 0x7b4   :  { %v7222_v20 = vadd.f32 %v7221_v50, %v13718_v49  ;;  %v7223_v59 = vpop.f32.mrb[81].mxu1  ;;  %v7355_v44 = vmax.f32 %v7175_v57, 0.0 }
 0x7b5   :  { %v7224_v30 = vadd.f32 %v7223_v59, %v13718_v49  ;;  %v7388_v42 = vpack.c.bf16 %v7354_v58, %v7346_v39 }
 0x7b6   :  { %v7348_v24 = vmax.f32 %v7222_v20, 0.0  ;;  %v7389_v40 = vpack.c.bf16 %v7355_v44, %v7347_v61  ;;  %v7178_v26 = vpop.f32.mrb[84].mxu0 }
 0x7b7   :  { %v7349_v19 = vmax.f32 %v7224_v30, 0.0  ;;  %v7179_v14 = vadd.f32 %v7178_v26, %v13730_v28  ;;  %v7180_v0 = vpop.f32.mrb[85].mxu0  ;;  %v13745_v30 = vld [vmem:[%s14225_s1 + $0x60] sm:$0xff]  }
 0x7b8   :  { %v7181_v15 = vadd.f32 %v7180_v0, %v13730_v28  ;;  %v7182_v63 = vpop.f32.mrb[86].mxu0  ;;  %7440 = vmatprep.subr.bf16.mxu0 %v7389_v40 }
 0x7b9   :  { %9484 = vmatmul.mubr.msk.bf16.gmra.mrb[92].mxu1 %vm7127_vm1, %v13668_v29  ;;  %v7225_v29 = vpop.f32.mrb[82].mxu1  ;;  %v7183_v3 = vadd.f32 %v7182_v63, %v13732_v54  ;;  %v7184_v2 = vpop.f32.mrb[87].mxu0  ;;  %7441 = vmatpush1.bf16.msra.mxu0 %v7388_v42  ;;  %v7362_v23 = vmax.f32 %v7179_v14, 0.0  ;;  %vm14465_vm1 = vmmov %vm14463_vm2 }
 0x7ba   :  { %7525 = vmatprep.mubr.bf16.mxu1 %v14418_v8  ;;  %v7226_v41 = vadd.f32 %v7225_v29, %v13720_v21  ;;  %v7227_v11 = vpop.f32.mrb[83].mxu1  ;;  %v7185_v46 = vadd.f32 %v7184_v2, %v13732_v54  ;;  %v7363_v55 = vmax.f32 %v7181_v15, 0.0  ;;  %vm14466_vm7 = vmmov %vm14465_vm1 }
 0x7bb   :  { %v7228_v12 = vadd.f32 %v7227_v11, %v13720_v21  ;;  %v7231_v33 = vpop.f32.mrb[84].mxu1  ;;  %v7370_v13 = vmax.f32 %v7183_v3, 0.0  ;;  %vm14467_vm0 = vmmov %vm14465_vm1 }
 0x7bc   :  { %v7356_v17 = vmax.f32 %v7226_v41, 0.0  ;;  %v7232_v52 = vadd.f32 %v7231_v33, %v13730_v28  ;;  %v7233_v37 = vpop.f32.mrb[85].mxu1  ;;  %v7371_v50 = vmax.f32 %v7185_v46, 0.0 }
 0x7bd   :  { %v7357_v34 = vmax.f32 %v7228_v12, 0.0  ;;  %v7234_v9 = vadd.f32 %v7233_v37, %v13730_v28  ;;  %v7235_v25 = vpop.f32.mrb[86].mxu1  ;;  %v7396_v20 = vpack.c.bf16 %v7370_v13, %v7362_v23 }
 0x7be   :  { %v7390_v43 = vpack.c.bf16 %v7356_v17, %v7348_v24  ;;  %v7236_v36 = vadd.f32 %v7235_v25, %v13732_v54  ;;  %v7237_v6 = vpop.f32.mrb[87].mxu1  ;;  %v7364_v47 = vmax.f32 %v7232_v52, 0.0  ;;  %v7397_v59 = vpack.c.bf16 %v7371_v50, %v7363_v55 }
 0x7bf   :  { %v7391_v18 = vpack.c.bf16 %v7357_v34, %v7349_v19  ;;  %v7238_v5 = vadd.f32 %v7237_v6, %v13732_v54  ;;  %v7365_v7 = vmax.f32 %v7234_v9, 0.0 }
 0x7c0   :  { %v7372_v48 = vmax.f32 %v7236_v36, 0.0  ;;  %7442 = vmatprep.subr.bf16.mxu0 %v7397_v59 }
 0x7c1   :  { %7493 = vmatprep.subr.bf16.mxu1 %v7391_v18  ;;  %v7373_v31 = vmax.f32 %v7238_v5, 0.0  ;;  %7443 = vmatpush1.bf16.msra.mxu0 %v7396_v20 }
 0x7c2   :  { %7494 = vmatpush1.bf16.msra.mxu1 %v7390_v43  ;;  %v7398_v10 = vpack.c.bf16 %v7372_v48, %v7364_v47 }
 0x7c3   :  { %v7399_v38 = vpack.c.bf16 %v7373_v31, %v7365_v7 }
 0x7c4   :  { %9495 = vmatmul.mubr.msk.bf16.vlgmr.msra.gmra.mrb[96].mxu0 %vm5902_vm12, %v13745_v30 }
 0x7c5   :  { %7495 = vmatprep.subr.bf16.mxu1 %v7399_v38  ;;  %7482 = vmatprep.mubr.bf16.mxu0 %v14418_v8 }
 0x7c6   :  { %7496 = vmatpush1.bf16.msra.mxu1 %v7398_v10 }
 0x7c9   :  { %9497 = vmatmul.mubr.msk.bf16.vlgmr.msra.gmra.mrb[96].mxu1 %vm5902_vm12, %v13745_v30 }
 0x7ca   :  { %7535 = vmatprep.mubr.bf16.mxu1 %v14418_v8 }
 0x7cc   :  { %9496 = vmatmul.mubr.msk.bf16.gmra.mrb[100].mxu0 %vm5902_vm12, %v13756_v1 }
 0x7cd   :  { %7578 = vmatprep.mubr.bf16.mxu0 %v14418_v8 }
 0x7d1   :  { %9498 = vmatmul.mubr.msk.bf16.gmra.mrb[100].mxu1 %vm5902_vm12, %v13756_v1 }
 0x7d2   :  { %7631 = vmatprep.mubr.bf16.mxu1 %v14418_v8 }
 0x866   :  { %v7274_v29 = vpop.f32.mrb[88].mxu0 }
 0x867   :  { %v7275_v4 = vadd.f32 %v7274_v29, %v13718_v49  ;;  %v7276_v41 = vpop.f32.mrb[89].mxu0 }
 0x868   :  { %v7277_v51 = vadd.f32 %v7276_v41, %v13718_v49  ;;  %v7278_v11 = vpop.f32.mrb[90].mxu0 }
 0x869   :  { %v7279_v57 = vadd.f32 %v7278_v11, %v13720_v21  ;;  %v7280_v12 = vpop.f32.mrb[91].mxu0  ;;  %v7350_v24 = vmax.f32 %v7275_v4, 0.0 }
 0x86a   :  { %v7281_v39 = vadd.f32 %v7280_v12, %v13720_v21  ;;  %v7351_v17 = vmax.f32 %v7277_v51, 0.0 }
 0x86b   :  { %v7358_v58 = vmax.f32 %v7279_v57, 0.0 }
 0x86c   :  { %v7359_v61 = vmax.f32 %v7281_v39, 0.0 }
 0x86d   :  { %v7392_v19 = vpack.c.bf16 %v7358_v58, %v7350_v24 }
 0x86e   :  { %v7393_v44 = vpack.c.bf16 %v7359_v61, %v7351_v17  ;;  %v7284_v34 = vpop.f32.mrb[92].mxu0 }
 0x86f   :  { %v7285_v42 = vadd.f32 %v7284_v34, %v13730_v28  ;;  %v7286_v43 = vpop.f32.mrb[93].mxu0 }
 0x870   :  { %v7287_v40 = vadd.f32 %v7286_v43, %v13730_v28  ;;  %v7288_v18 = vpop.f32.mrb[94].mxu0  ;;  %7546 = vmatprep.subr.bf16.mxu0 %v7393_v44 }
 0x871   :  { %v7289_v26 = vadd.f32 %v7288_v18, %v13732_v54  ;;  %v7290_v33 = vpop.f32.mrb[95].mxu0  ;;  %7547 = vmatpush1.bf16.msra.mxu0 %v7392_v19  ;;  %v7366_v52 = vmax.f32 %v7285_v42, 0.0 }
 0x872   :  { %v7291_v14 = vadd.f32 %v7290_v33, %v13732_v54  ;;  %v7367_v37 = vmax.f32 %v7287_v40, 0.0 }
 0x873   :  { %v7374_v0 = vmax.f32 %v7289_v26, 0.0 }
 0x874   :  { %v7375_v15 = vmax.f32 %v7291_v14, 0.0 }
 0x875   :  { %v7400_v9 = vpack.c.bf16 %v7374_v0, %v7366_v52 }
 0x876   :  { %v7401_v63 = vpack.c.bf16 %v7375_v15, %v7367_v37 }
 0x878   :  { %7548 = vmatprep.subr.bf16.mxu0 %v7401_v63 }
 0x879   :  { %7549 = vmatpush1.bf16.msra.mxu0 %v7400_v9 }
 0x87c   :  { %9499 = vmatmul.mubr.msk.bf16.vlgmr.msra.gmra.mrb[104].mxu0 %vm5902_vm12, %v13745_v30 }
 0x87d   :  { %7588 = vmatprep.mubr.bf16.mxu0 %v14418_v8 }
 0x884   :  { %9500 = vmatmul.mubr.msk.bf16.gmra.mrb[108].mxu0 %vm5902_vm12, %v13756_v1  ;;  %v7327_v25 = vpop.f32.mrb[88].mxu1 }
 0x885   :  { %7778 = vmatprep.mubr.bf16.mxu0 %v14418_v8  ;;  %v7328_v3 = vadd.f32 %v7327_v25, %v13718_v49  ;;  %v7329_v36 = vpop.f32.mrb[89].mxu1 }
 0x886   :  { %v7330_v2 = vadd.f32 %v7329_v36, %v13718_v49  ;;  %v7331_v6 = vpop.f32.mrb[90].mxu1 }
 0x887   :  { %v7332_v46 = vadd.f32 %v7331_v6, %v13720_v21  ;;  %v7333_v5 = vpop.f32.mrb[91].mxu1  ;;  %v7352_v47 = vmax.f32 %v7328_v3, 0.0 }
 0x888   :  { %v7334_v23 = vadd.f32 %v7333_v5, %v13720_v21  ;;  %v7353_v48 = vmax.f32 %v7330_v2, 0.0 }
 0x889   :  { %v7360_v13 = vmax.f32 %v7332_v46, 0.0 }
 0x88a   :  { %v7361_v55 = vmax.f32 %v7334_v23, 0.0 }
 0x88b   :  { %v7394_v7 = vpack.c.bf16 %v7360_v13, %v7352_v47 }
 0x88c   :  { %v7395_v50 = vpack.c.bf16 %v7361_v55, %v7353_v48  ;;  %v7337_v31 = vpop.f32.mrb[92].mxu1 }
 0x88d   :  { %v7338_v20 = vadd.f32 %v7337_v31, %v13730_v28  ;;  %v7339_v10 = vpop.f32.mrb[93].mxu1 }
 0x88e   :  { %v7340_v59 = vadd.f32 %v7339_v10, %v13730_v28  ;;  %v7341_v38 = vpop.f32.mrb[94].mxu1  ;;  %7599 = vmatprep.subr.bf16.mxu1 %v7395_v50  ;;  %v13792_v28 = vpop.permute.xlu0 %7406 }
 0x88f   :  { %v7342_v49 = vadd.f32 %v7341_v38, %v13732_v54  ;;  %v7343_v29 = vpop.f32.mrb[95].mxu1  ;;  %7600 = vmatpush1.bf16.msra.mxu1 %v7394_v7  ;;  %v7368_v4 = vmax.f32 %v7338_v20, 0.0 }
 0x890   :  { %v7344_v21 = vadd.f32 %v7343_v29, %v13732_v54  ;;  %v7369_v51 = vmax.f32 %v7340_v59, 0.0  ;;  %v13794_v54 = vpop.permute.xlu1 %7411 }
 0x891   :  { %v7376_v41 = vmax.f32 %v7342_v49, 0.0 }
 0x892   :  { %v7377_v11 = vmax.f32 %v7344_v21, 0.0  ;;  %v13804_v3 = vpop.permute.xlu0 %7416 }
 0x893   :  { %v7402_v57 = vpack.c.bf16 %v7376_v41, %v7368_v4 }
 0x894   :  { %v7403_v12 = vpack.c.bf16 %v7377_v11, %v7369_v51  ;;  %v13806_v36 = vpop.permute.xlu1 %7421 }
 0x896   :  { %7601 = vmatprep.subr.bf16.mxu1 %v7403_v12 }
 0x897   :  { %7602 = vmatpush1.bf16.msra.mxu1 %v7402_v57  ;;  %v7474_v39 = vpop.f32.mrb[96].mxu0 }
 0x898   :  { %v7475_v58 = vadd.f32 %v7474_v39, %v13792_v28  ;;  %v7476_v61 = vpop.f32.mrb[97].mxu0 }
 0x899   :  { %v7478_v34 = vpop.f32.mrb[98].mxu0 }
 0x89a   :  { %9501 = vmatmul.mubr.msk.bf16.vlgmr.msra.gmra.mrb[104].mxu1 %vm5902_vm12, %v13745_v30  ;;  %v7477_v30 = vadd.f32 %v7476_v61, %v13792_v28  ;;  %v7479_v42 = vadd.f32 %v7478_v34, %v13794_v54  ;;  %v7480_v40 = vpop.f32.mrb[99].mxu0  ;;  %v7652_v14 = vmax.f32 %v7475_v58, 0.0  ;;  %v13830_v34 = vld [vmem:[%s14225_s1 + $0x78] sm:$0xff]  }
 0x89b   :  { %7641 = vmatprep.mubr.bf16.mxu1 %v14418_v8  ;;  %v7481_v26 = vadd.f32 %v7480_v40, %v13794_v54 }
 0x89c   :  { %v7527_v24 = vpop.f32.mrb[96].mxu1  ;;  %v7660_v0 = vmax.f32 %v7479_v42, 0.0  ;;  %v7653_v15 = vmax.f32 %v7477_v30, 0.0 }
 0x89d   :  { %v7528_v17 = vadd.f32 %v7527_v24, %v13792_v28  ;;  %v7529_v19 = vpop.f32.mrb[97].mxu1  ;;  %v7661_v63 = vmax.f32 %v7481_v26, 0.0 }
 0x89e   :  { %v7530_v44 = vadd.f32 %v7529_v19, %v13792_v28  ;;  %v7694_v2 = vpack.c.bf16 %v7660_v0, %v7652_v14 }
 0x89f   :  { %v7654_v52 = vmax.f32 %v7528_v17, 0.0  ;;  %v7695_v46 = vpack.c.bf16 %v7661_v63, %v7653_v15  ;;  %v7484_v23 = vpop.f32.mrb[100].mxu0 }
 0x8a0   :  { %v7655_v9 = vmax.f32 %v7530_v44, 0.0  ;;  %v7485_v13 = vadd.f32 %v7484_v23, %v13804_v3  ;;  %v7486_v55 = vpop.f32.mrb[101].mxu0  ;;  %v13819_v44 = vld [vmem:[%s14225_s1 + $0x70] sm:$0xff]  }
 0x8a1   :  { %v7487_v50 = vadd.f32 %v7486_v55, %v13804_v3  ;;  %v7488_v20 = vpop.f32.mrb[102].mxu0  ;;  %7746 = vmatprep.subr.bf16.mxu0 %v7695_v46 }
 0x8a2   :  { %9502 = vmatmul.mubr.msk.bf16.gmra.mrb[108].mxu1 %vm5902_vm12, %v13756_v1  ;;  %v7531_v1 = vpop.f32.mrb[98].mxu1  ;;  %v7489_v59 = vadd.f32 %v7488_v20, %v13806_v36  ;;  %v7490_v49 = vpop.f32.mrb[103].mxu0  ;;  %7747 = vmatpush1.bf16.msra.mxu0 %v7694_v2  ;;  %v7668_v41 = vmax.f32 %v7485_v13, 0.0 }
 0x8a3   :  { %7831 = vmatprep.mubr.bf16.mxu1 %v14418_v8  ;;  %v7532_v43 = vadd.f32 %v7531_v1, %v13794_v54  ;;  %v7533_v18 = vpop.f32.mrb[99].mxu1  ;;  %v7491_v21 = vadd.f32 %v7490_v49, %v13806_v36  ;;  %v7669_v12 = vmax.f32 %v7487_v50, 0.0 }
 0x8a4   :  { %v7534_v33 = vadd.f32 %v7533_v18, %v13794_v54  ;;  %v7537_v47 = vpop.f32.mrb[100].mxu1  ;;  %v7676_v11 = vmax.f32 %v7489_v59, 0.0 }
 0x8a5   :  { %v7662_v37 = vmax.f32 %v7532_v43, 0.0  ;;  %v7538_v48 = vadd.f32 %v7537_v47, %v13804_v3  ;;  %v7539_v7 = vpop.f32.mrb[101].mxu1  ;;  %v7677_v24 = vmax.f32 %v7491_v21, 0.0 }
 0x8a6   :  { %v7663_v25 = vmax.f32 %v7534_v33, 0.0  ;;  %v7540_v31 = vadd.f32 %v7539_v7, %v13804_v3  ;;  %v7541_v10 = vpop.f32.mrb[102].mxu1  ;;  %v7702_v17 = vpack.c.bf16 %v7676_v11, %v7668_v41 }
 0x8a7   :  { %v7696_v6 = vpack.c.bf16 %v7662_v37, %v7654_v52  ;;  %v7542_v38 = vadd.f32 %v7541_v10, %v13806_v36  ;;  %v7543_v29 = vpop.f32.mrb[103].mxu1  ;;  %v7670_v51 = vmax.f32 %v7538_v48, 0.0  ;;  %v7703_v19 = vpack.c.bf16 %v7677_v24, %v7669_v12 }
 0x8a8   :  { %v7697_v5 = vpack.c.bf16 %v7663_v25, %v7655_v9  ;;  %v7544_v4 = vadd.f32 %v7543_v29, %v13806_v36  ;;  %v7671_v39 = vmax.f32 %v7540_v31, 0.0 }
 0x8a9   :  { %v7678_v57 = vmax.f32 %v7542_v38, 0.0  ;;  %7748 = vmatprep.subr.bf16.mxu0 %v7703_v19 }
 0x8aa   :  { %7799 = vmatprep.subr.bf16.mxu1 %v7697_v5  ;;  %v7679_v58 = vmax.f32 %v7544_v4, 0.0  ;;  %7749 = vmatpush1.bf16.msra.mxu0 %v7702_v17 }
 0x8ab   :  { %7800 = vmatpush1.bf16.msra.mxu1 %v7696_v6  ;;  %v7704_v61 = vpack.c.bf16 %v7678_v57, %v7670_v51 }
 0x8ac   :  { %v7705_v30 = vpack.c.bf16 %v7679_v58, %v7671_v39 }
 0x8ad   :  { %9513 = vmatmul.mubr.msk.bf16.vlgmr.msra.gmra.mrb[112].mxu0 %vm5902_vm12, %v13819_v44 }
 0x8ae   :  { %7801 = vmatprep.subr.bf16.mxu1 %v7705_v30  ;;  %7788 = vmatprep.mubr.bf16.mxu0 %v14418_v8 }
 0x8af   :  { %7802 = vmatpush1.bf16.msra.mxu1 %v7704_v61 }
 0x8b2   :  { %9515 = vmatmul.mubr.msk.bf16.vlgmr.msra.gmra.mrb[112].mxu1 %vm5902_vm12, %v13819_v44 }
 0x8b3   :  { %7841 = vmatprep.mubr.bf16.mxu1 %v14418_v8 }
 0x8b5   :  { %9514 = vmatmul.mubr.msk.bf16.gmra.mrb[116].mxu0 %vm5902_vm12, %v13830_v34 }
 0x8b6   :  { %7884 = vmatprep.mubr.bf16.mxu0 %v14418_v8 }
 0x8ba   :  { %9516 = vmatmul.mubr.msk.bf16.gmra.mrb[116].mxu1 %vm5902_vm12, %v13830_v34 }
 0x8bb   :  { %7937 = vmatprep.mubr.bf16.mxu1 %v14418_v8 }
 0x94f   :  { %v7580_v1 = vpop.f32.mrb[104].mxu0 }
 0x950   :  { %v7581_v42 = vadd.f32 %v7580_v1, %v13792_v28  ;;  %v7582_v43 = vpop.f32.mrb[105].mxu0 }
 0x951   :  { %v7583_v40 = vadd.f32 %v7582_v43, %v13792_v28  ;;  %v7584_v18 = vpop.f32.mrb[106].mxu0 }
 0x952   :  { %v7585_v26 = vadd.f32 %v7584_v18, %v13794_v54  ;;  %v7586_v33 = vpop.f32.mrb[107].mxu0  ;;  %v7656_v52 = vmax.f32 %v7581_v42, 0.0 }
 0x953   :  { %v7587_v14 = vadd.f32 %v7586_v33, %v13794_v54  ;;  %v7657_v37 = vmax.f32 %v7583_v40, 0.0 }
 0x954   :  { %v7664_v0 = vmax.f32 %v7585_v26, 0.0 }
 0x955   :  { %v7665_v15 = vmax.f32 %v7587_v14, 0.0 }
 0x956   :  { %v7698_v9 = vpack.c.bf16 %v7664_v0, %v7656_v52 }
 0x957   :  { %v7699_v63 = vpack.c.bf16 %v7665_v15, %v7657_v37  ;;  %v7590_v25 = vpop.f32.mrb[108].mxu0 }
 0x958   :  { %v7591_v2 = vadd.f32 %v7590_v25, %v13804_v3  ;;  %v7592_v6 = vpop.f32.mrb[109].mxu0 }
 0x959   :  { %v7593_v46 = vadd.f32 %v7592_v6, %v13804_v3  ;;  %v7594_v5 = vpop.f32.mrb[110].mxu0  ;;  %7852 = vmatprep.subr.bf16.mxu0 %v7699_v63 }
 0x95a   :  { %v7595_v23 = vadd.f32 %v7594_v5, %v13806_v36  ;;  %v7596_v47 = vpop.f32.mrb[111].mxu0  ;;  %7853 = vmatpush1.bf16.msra.mxu0 %v7698_v9  ;;  %v7672_v48 = vmax.f32 %v7591_v2, 0.0 }
 0x95b   :  { %v7597_v13 = vadd.f32 %v7596_v47, %v13806_v36  ;;  %v7673_v7 = vmax.f32 %v7593_v46, 0.0 }
 0x95c   :  { %v7680_v55 = vmax.f32 %v7595_v23, 0.0 }
 0x95d   :  { %v7681_v50 = vmax.f32 %v7597_v13, 0.0 }
 0x95e   :  { %v7706_v31 = vpack.c.bf16 %v7680_v55, %v7672_v48 }
 0x95f   :  { %v7707_v20 = vpack.c.bf16 %v7681_v50, %v7673_v7 }
 0x961   :  { %7854 = vmatprep.subr.bf16.mxu0 %v7707_v20 }
 0x962   :  { %7855 = vmatpush1.bf16.msra.mxu0 %v7706_v31 }
 0x965   :  { %9517 = vmatmul.mubr.msk.bf16.vlgmr.msra.gmra.mrb[120].mxu0 %vm5902_vm12, %v13819_v44 }
 0x966   :  { %7894 = vmatprep.mubr.bf16.mxu0 %v14418_v8 }
 0x96d   :  { %9518 = vmatmul.mubr.msk.bf16.gmra.mrb[124].mxu0 %vm5902_vm12, %v13830_v34  ;;  %v7633_v10 = vpop.f32.mrb[104].mxu1 }
 0x96e   :  { %8081 = vmatprep.mubr.bf16.mxu0 %v14418_v8  ;;  %v7634_v59 = vadd.f32 %v7633_v10, %v13792_v28  ;;  %v7635_v38 = vpop.f32.mrb[105].mxu1 }
 0x96f   :  { %v7636_v49 = vadd.f32 %v7635_v38, %v13792_v28  ;;  %v7637_v29 = vpop.f32.mrb[106].mxu1 }
 0x970   :  { %v7638_v21 = vadd.f32 %v7637_v29, %v13794_v54  ;;  %v7639_v4 = vpop.f32.mrb[107].mxu1  ;;  %v7658_v51 = vmax.f32 %v7634_v59, 0.0 }
 0x971   :  { %v7640_v41 = vadd.f32 %v7639_v4, %v13794_v54  ;;  %v7659_v57 = vmax.f32 %v7636_v49, 0.0 }
 0x972   :  { %v7666_v11 = vmax.f32 %v7638_v21, 0.0 }
 0x973   :  { %v7667_v12 = vmax.f32 %v7640_v41, 0.0 }
 0x974   :  { %v7700_v39 = vpack.c.bf16 %v7666_v11, %v7658_v51 }
 0x975   :  { %v7701_v24 = vpack.c.bf16 %v7667_v12, %v7659_v57  ;;  %v7643_v58 = vpop.f32.mrb[108].mxu1 }
 0x976   :  { %v7644_v17 = vadd.f32 %v7643_v58, %v13804_v3  ;;  %v7645_v61 = vpop.f32.mrb[109].mxu1 }
 0x977   :  { %v7646_v19 = vadd.f32 %v7645_v61, %v13804_v3  ;;  %v7647_v30 = vpop.f32.mrb[110].mxu1  ;;  %7905 = vmatprep.subr.bf16.mxu1 %v7701_v24  ;;  %v13866_v3 = vpop.permute.xlu0 %7712 }
 0x978   :  { %v7648_v28 = vadd.f32 %v7647_v30, %v13806_v36  ;;  %v7649_v1 = vpop.f32.mrb[111].mxu1  ;;  %7906 = vmatpush1.bf16.msra.mxu1 %v7700_v39  ;;  %v7674_v42 = vmax.f32 %v7644_v17, 0.0 }
 0x979   :  { %v7650_v54 = vadd.f32 %v7649_v1, %v13806_v36  ;;  %v7675_v40 = vmax.f32 %v7646_v19, 0.0  ;;  %v13868_v36 = vpop.permute.xlu1 %7717 }
 0x97a   :  { %v7682_v43 = vmax.f32 %v7648_v28, 0.0 }
 0x97b   :  { %v7683_v18 = vmax.f32 %v7650_v54, 0.0  ;;  %v13878_v59 = vpop.permute.xlu0 %7722 }
 0x97c   :  { %v7708_v26 = vpack.c.bf16 %v7682_v43, %v7674_v42 }
 0x97d   :  { %v7709_v33 = vpack.c.bf16 %v7683_v18, %v7675_v40  ;;  %v13880_v38 = vpop.permute.xlu1 %7727 }
 0x97f   :  { %7907 = vmatprep.subr.bf16.mxu1 %v7709_v33 }
 0x980   :  { %7908 = vmatpush1.bf16.msra.mxu1 %v7708_v26  ;;  %v7780_v14 = vpop.f32.mrb[112].mxu0 }
 0x981   :  { %v7781_v0 = vadd.f32 %v7780_v14, %v13866_v3  ;;  %v7782_v15 = vpop.f32.mrb[113].mxu0 }
 0x982   :  { %v7784_v25 = vpop.f32.mrb[114].mxu0 }
 0x983   :  { %9519 = vmatmul.mubr.msk.bf16.vlgmr.msra.gmra.mrb[120].mxu1 %vm5902_vm12, %v13819_v44  ;;  %v7783_v44 = vadd.f32 %v7782_v15, %v13866_v3  ;;  %v7785_v2 = vadd.f32 %v7784_v25, %v13868_v36  ;;  %v7786_v46 = vpop.f32.mrb[115].mxu0  ;;  %v7958_v13 = vmax.f32 %v7781_v0, 0.0  ;;  %v13922_v25 = vld [vmem:[%s14225_s1 + $0x88] sm:$0xff]  }
 0x984   :  { %7947 = vmatprep.mubr.bf16.mxu1 %v14418_v8  ;;  %v7787_v23 = vadd.f32 %v7786_v46, %v13868_v36 }
 0x985   :  { %v7833_v52 = vpop.f32.mrb[112].mxu1  ;;  %v7966_v55 = vmax.f32 %v7785_v2, 0.0  ;;  %v7959_v50 = vmax.f32 %v7783_v44, 0.0 }
 0x986   :  { %v7834_v37 = vadd.f32 %v7833_v52, %v13866_v3  ;;  %v7835_v9 = vpop.f32.mrb[113].mxu1  ;;  %v7967_v20 = vmax.f32 %v7787_v23, 0.0 }
 0x987   :  { %v7836_v63 = vadd.f32 %v7835_v9, %v13866_v3  ;;  %v13882_v49 = vpack.c.bf16 %v7966_v55, %v7958_v13 }
 0x988   :  { %v7960_v48 = vmax.f32 %v7834_v37, 0.0  ;;  %v13886_v21 = vpack.c.bf16 %v7967_v20, %v7959_v50  ;;  %v7790_v41 = vpop.f32.mrb[116].mxu0 }
 0x989   :  { %v7961_v31 = vmax.f32 %v7836_v63, 0.0  ;;  %v7791_v11 = vadd.f32 %v7790_v41, %v13878_v59  ;;  %v7792_v12 = vpop.f32.mrb[117].mxu0  ;;  %v13911_v63 = vld [vmem:[%s14225_s1 + $0x80] sm:$0xff]  }
 0x98a   :  { %v7793_v24 = vadd.f32 %v7792_v12, %v13878_v59  ;;  %v7794_v17 = vpop.f32.mrb[118].mxu0  ;;  %8049 = vmatprep.subr.bf16.mxu0 %v13886_v21 }
 0x98b   :  { %9520 = vmatmul.mubr.msk.bf16.gmra.mrb[124].mxu1 %vm5902_vm12, %v13830_v34  ;;  %v7837_v34 = vpop.f32.mrb[114].mxu1  ;;  %v7795_v19 = vadd.f32 %v7794_v17, %v13880_v38  ;;  %v7796_v28 = vpop.f32.mrb[119].mxu0  ;;  %8050 = vmatpush1.bf16.msra.mxu0 %v13882_v49  ;;  %v7974_v43 = vmax.f32 %v7791_v11, 0.0 }
 0x98c   :  { %8128 = vmatprep.mubr.bf16.mxu1 %v14418_v8  ;;  %v7838_v6 = vadd.f32 %v7837_v34, %v13868_v36  ;;  %v7839_v5 = vpop.f32.mrb[115].mxu1  ;;  %v7797_v54 = vadd.f32 %v7796_v28, %v13880_v38  ;;  %v7975_v33 = vmax.f32 %v7793_v24, 0.0 }
 0x98d   :  { %v7840_v47 = vadd.f32 %v7839_v5, %v13868_v36  ;;  %v7843_v51 = vpop.f32.mrb[116].mxu1  ;;  %v7982_v18 = vmax.f32 %v7795_v19, 0.0 }
 0x98e   :  { %v7968_v7 = vmax.f32 %v7838_v6, 0.0  ;;  %v7844_v57 = vadd.f32 %v7843_v51, %v13878_v59  ;;  %v7845_v39 = vpop.f32.mrb[117].mxu1  ;;  %v7983_v52 = vmax.f32 %v7797_v54, 0.0 }
 0x98f   :  { %v7969_v10 = vmax.f32 %v7840_v47, 0.0  ;;  %v7846_v58 = vadd.f32 %v7845_v39, %v13878_v59  ;;  %v7847_v61 = vpop.f32.mrb[118].mxu1  ;;  %v8008_v37 = vpack.c.bf16 %v7982_v18, %v7974_v43 }
 0x990   :  { %v13884_v29 = vpack.c.bf16 %v7968_v7, %v7960_v48  ;;  %v7848_v30 = vadd.f32 %v7847_v61, %v13880_v38  ;;  %v7849_v1 = vpop.f32.mrb[119].mxu1  ;;  %v7976_v40 = vmax.f32 %v7844_v57, 0.0  ;;  %v8009_v9 = vpack.c.bf16 %v7983_v52, %v7975_v33 }
 0x991   :  { %v13888_v4 = vpack.c.bf16 %v7969_v10, %v7961_v31  ;;  %v7850_v42 = vadd.f32 %v7849_v1, %v13880_v38  ;;  %v7977_v14 = vmax.f32 %v7846_v58, 0.0 }
 0x992   :  { %v7984_v26 = vmax.f32 %v7848_v30, 0.0  ;;  %8051 = vmatprep.subr.bf16.mxu0 %v8009_v9 }
 0x993   :  { %8096 = vmatprep.subr.bf16.mxu1 %v13888_v4  ;;  %v7985_v0 = vmax.f32 %v7850_v42, 0.0  ;;  %8052 = vmatpush1.bf16.msra.mxu0 %v8008_v37 }
 0x994   :  { %8097 = vmatpush1.bf16.msra.mxu1 %v13884_v29  ;;  %v13902_v15 = vpack.c.bf16 %v7984_v26, %v7976_v40 }
 0x995   :  { %v13904_v44 = vpack.c.bf16 %v7985_v0, %v7977_v14 }
 0x996   :  { %9531 = vmatmul.mubr.msk.bf16.vlgmr.msra.gmra.mrb[128].mxu0 %vm5902_vm12, %v13911_v63 }
 0x997   :  { %8098 = vmatprep.subr.bf16.mxu1 %v13904_v44  ;;  %8089 = vmatprep.mubr.bf16.mxu0 %v14418_v8 }
 0x998   :  { %8099 = vmatpush1.bf16.msra.mxu1 %v13902_v15 }
 0x99b   :  { %9533 = vmatmul.mubr.msk.bf16.vlgmr.msra.gmra.mrb[128].mxu1 %vm5902_vm12, %v13911_v63 }
 0x99c   :  { %8136 = vmatprep.mubr.bf16.mxu1 %v14418_v8 }
 0x99e   :  { %9532 = vmatmul.mubr.msk.bf16.gmra.mrb[132].mxu0 %vm5902_vm12, %v13922_v25 }
 0x99f   :  { %8175 = vmatprep.mubr.bf16.mxu0 %v14418_v8 }
 0x9a3   :  { %9534 = vmatmul.mubr.msk.bf16.gmra.mrb[132].mxu1 %vm5902_vm12, %v13922_v25 }
 0x9a4   :  { %8222 = vmatprep.mubr.bf16.mxu1 %v14418_v8 }
 0xa38   :  { %v7886_v34 = vpop.f32.mrb[120].mxu0 }
 0xa39   :  { %v7887_v2 = vadd.f32 %v7886_v34, %v13866_v3  ;;  %v7888_v6 = vpop.f32.mrb[121].mxu0 }
 0xa3a   :  { %v7889_v46 = vadd.f32 %v7888_v6, %v13866_v3  ;;  %v7890_v5 = vpop.f32.mrb[122].mxu0 }
 0xa3b   :  { %v7891_v23 = vadd.f32 %v7890_v5, %v13868_v36  ;;  %v7892_v47 = vpop.f32.mrb[123].mxu0  ;;  %v7962_v48 = vmax.f32 %v7887_v2, 0.0 }
 0xa3c   :  { %v7893_v13 = vadd.f32 %v7892_v47, %v13868_v36  ;;  %v7963_v7 = vmax.f32 %v7889_v46, 0.0 }
 0xa3d   :  { %v7970_v55 = vmax.f32 %v7891_v23, 0.0 }
 0xa3e   :  { %v7971_v50 = vmax.f32 %v7893_v13, 0.0 }
 0xa3f   :  { %v8004_v31 = vpack.c.bf16 %v7970_v55, %v7962_v48 }
 0xa40   :  { %v8005_v20 = vpack.c.bf16 %v7971_v50, %v7963_v7  ;;  %v7896_v10 = vpop.f32.mrb[124].mxu0 }
 0xa41   :  { %v7897_v41 = vadd.f32 %v7896_v10, %v13878_v59  ;;  %v7898_v51 = vpop.f32.mrb[125].mxu0 }
 0xa42   :  { %v7899_v11 = vadd.f32 %v7898_v51, %v13878_v59  ;;  %v7900_v57 = vpop.f32.mrb[126].mxu0  ;;  %8143 = vmatprep.subr.bf16.mxu0 %v8005_v20 }
 0xa43   :  { %v7901_v12 = vadd.f32 %v7900_v57, %v13880_v38  ;;  %v7902_v39 = vpop.f32.mrb[127].mxu0  ;;  %8144 = vmatpush1.bf16.msra.mxu0 %v8004_v31  ;;  %v7978_v58 = vmax.f32 %v7897_v41, 0.0 }
 0xa44   :  { %v7903_v24 = vadd.f32 %v7902_v39, %v13880_v38  ;;  %v7979_v61 = vmax.f32 %v7899_v11, 0.0 }
 0xa45   :  { %v7986_v17 = vmax.f32 %v7901_v12, 0.0 }
 0xa46   :  { %v7987_v19 = vmax.f32 %v7903_v24, 0.0 }
 0xa47   :  { %v8012_v30 = vpack.c.bf16 %v7986_v17, %v7978_v58 }
 0xa48   :  { %v8013_v28 = vpack.c.bf16 %v7987_v19, %v7979_v61 }
 0xa4a   :  { %8145 = vmatprep.subr.bf16.mxu0 %v8013_v28 }
 0xa4b   :  { %8146 = vmatpush1.bf16.msra.mxu0 %v8012_v30 }
 0xa4c   :  { %8283 = vmatprep.subr.bf16.mxu0 %v13886_v21  ;;  %v9728_v21 = vld [vmem:[%s14225_s1 + $0x90] sm:$0xff]  }
 0xa4e   :  { %9535 = vmatmul.mubr.msk.bf16.vlgmr.msra.gmra.mrb[136].mxu0 %vm5902_vm12, %v13911_v63 }
 0xa4f   :  { %8284 = vmatpush1.bf16.msra.mxu0 %v13882_v49  ;;  %8183 = vmatprep.mubr.bf16.mxu0 %v14418_v8 }
 0xa50   :  { %8285 = vmatprep.subr.bf16.mxu0 %v8009_v9 }
 0xa53   :  { %8286 = vmatpush1.bf16.msra.mxu0 %v8008_v37 }
 0xa54   :  { %8389 = vmatprep.subr.bf16.mxu0 %v8005_v20 }
 0xa56   :  { %9536 = vmatmul.mubr.msk.bf16.gmra.mrb[140].mxu0 %vm5902_vm12, %v13922_v25  ;;  %v7939_v1 = vpop.f32.mrb[120].mxu1 }
 0xa57   :  { %8315 = vmatprep.mubr.bf16.mxu0 %v14418_v8  ;;  %v7940_v54 = vadd.f32 %v7939_v1, %v13866_v3  ;;  %v7941_v42 = vpop.f32.mrb[121].mxu1 }
 0xa58   :  { %v7942_v49 = vadd.f32 %v7941_v42, %v13866_v3  ;;  %v7943_v43 = vpop.f32.mrb[122].mxu1  ;;  %v9729_v3 = vld [vmem:[%s14225_s1 + $0x98] sm:$0xff]  }
 0xa59   :  { %v7944_v40 = vadd.f32 %v7943_v43, %v13868_v36  ;;  %v7945_v18 = vpop.f32.mrb[123].mxu1  ;;  %v7964_v33 = vmax.f32 %v7940_v54, 0.0  ;;  %v13998_v54 = vpop.permute.xlu0 %8249 }
 0xa5a   :  { %v7946_v26 = vadd.f32 %v7945_v18, %v13868_v36  ;;  %v7965_v52 = vmax.f32 %v7942_v49, 0.0  ;;  %v14000_v49 = vpop.permute.xlu1 %8254 }
 0xa5b   :  { %v7972_v14 = vmax.f32 %v7944_v40, 0.0 }
 0xa5c   :  { %v7973_v0 = vmax.f32 %v7946_v26, 0.0 }
 0xa5d   :  { %v8006_v37 = vpack.c.bf16 %v7972_v14, %v7964_v33 }
 0xa5e   :  { %9549 = vmatmul.mubr.msk.bf16.vlgmr.msra.gmra.mrb[144].mxu0 %vm5902_vm12, %v9728_v21  ;;  %v8007_v9 = vpack.c.bf16 %v7973_v0, %v7965_v52  ;;  %v7949_v34 = vpop.f32.mrb[124].mxu1 }
 0xa5f   :  { %8390 = vmatpush1.bf16.msra.mxu0 %v8004_v31  ;;  %8325 = vmatprep.mubr.bf16.mxu0 %v14418_v8  ;;  %v7950_v2 = vadd.f32 %v7949_v34, %v13878_v59  ;;  %v7951_v36 = vpop.f32.mrb[125].mxu1 }
 0xa60   :  { %8391 = vmatprep.subr.bf16.mxu0 %v8013_v28  ;;  %v7952_v6 = vadd.f32 %v7951_v36, %v13878_v59  ;;  %v7953_v46 = vpop.f32.mrb[126].mxu1  ;;  %8190 = vmatprep.subr.bf16.mxu1 %v8007_v9 }
 0xa61   :  { %v7954_v5 = vadd.f32 %v7953_v46, %v13880_v38  ;;  %v7955_v23 = vpop.f32.mrb[127].mxu1  ;;  %8191 = vmatpush1.bf16.msra.mxu1 %v8006_v37  ;;  %v7980_v13 = vmax.f32 %v7950_v2, 0.0 }
 0xa62   :  { %v7956_v47 = vadd.f32 %v7955_v23, %v13880_v38  ;;  %v7981_v55 = vmax.f32 %v7952_v6, 0.0 }
 0xa63   :  { %8392 = vmatpush1.bf16.msra.mxu0 %v8012_v30  ;;  %v7988_v48 = vmax.f32 %v7954_v5, 0.0 }
 0xa64   :  { %v7989_v7 = vmax.f32 %v7956_v47, 0.0 }
 0xa65   :  { %v8014_v50 = vpack.c.bf16 %v7988_v48, %v7980_v13  ;;  %v14443_v48 = vld [vmem:[#allocation14_spill] sm:$0xff] }
 0xa66   :  { %9550 = vmatmul.mubr.msk.bf16.gmra.mrb[148].mxu0 %vm5902_vm12, %v9729_v3  ;;  %v8015_v31 = vpack.c.bf16 %v7989_v7, %v7981_v55  ;;  %v14444_v55 = vld [vmem:[#allocation13_spill] sm:$0xff] }
 0xa67   :  { %8421 = vmatprep.mubr.bf16.mxu0 %v14418_v8  ;;  %v8521_v7 = vpack.c.bf16 %v14444_v55, %v14443_v48 }
 0xa68   :  { %8192 = vmatprep.subr.bf16.mxu1 %v8015_v31 }
 0xa69   :  { %8193 = vmatpush1.bf16.msra.mxu1 %v8014_v50  ;;  %v13986_v59 = vpop.f32.mrb[128].mxu0 }
 0xa6a   :  { %8336 = vmatprep.subr.bf16.mxu1 %v13888_v4 }
 0xa6c   :  { %9537 = vmatmul.mubr.msk.bf16.vlgmr.msra.gmra.mrb[136].mxu1 %vm5902_vm12, %v13911_v63 }
 0xa6d   :  { %8337 = vmatpush1.bf16.msra.mxu1 %v13884_v29  ;;  %8230 = vmatprep.mubr.bf16.mxu1 %v14418_v8  ;;  %v13990_v29 = vpop.f32.mrb[129].mxu0 }
 0xa6e   :  { %9553 = vmatmul.mubr.msk.bf16.vlgmr.msra.gmra.mrb[152].mxu0 %vm5902_vm12, %v9728_v21  ;;  %8338 = vmatprep.subr.bf16.mxu1 %v13904_v44  ;;  %v13988_v38 = vpop.f32.mrb[128].mxu1 }
 0xa6f   :  { %8431 = vmatprep.mubr.bf16.mxu0 %v14418_v8  ;;  %v13992_v4 = vpop.f32.mrb[129].mxu1 }
 0xa70   :  { %v8134_v44 = vpop.f32.mrb[130].mxu1 }
 0xa71   :  { %8339 = vmatpush1.bf16.msra.mxu1 %v13902_v15  ;;  %v8087_v15 = vpop.f32.mrb[130].mxu0 }
 0xa72   :  { %8442 = vmatprep.subr.bf16.mxu1 %v8007_v9  ;;  %v8088_v63 = vpop.f32.mrb[131].mxu0  ;;  %v14006_v9 = vpop.permute.xlu0 %8259 }
 0xa73   :  { %v8091_v20 = vpop.f32.mrb[132].mxu0  ;;  %v14445_v63 = vld [vmem:[#allocation6_spill] sm:$0xff] }
 0xa74   :  { %9538 = vmatmul.mubr.msk.bf16.gmra.mrb[140].mxu1 %vm5902_vm12, %v13922_v25  ;;  %v8135_v25 = vpop.f32.mrb[131].mxu1  ;;  %v8092_v41 = vpop.f32.mrb[133].mxu0 }
 0xa75   :  { %8368 = vmatprep.mubr.bf16.mxu1 %v14418_v8  ;;  %v8093_v11 = vpop.f32.mrb[134].mxu0  ;;  %v14446_v25 = vld [vmem:[#allocation7_spill] sm:$0xff] }
 0xa76   :  { %9554 = vmatmul.mubr.msk.bf16.gmra.mrb[156].mxu0 %vm5902_vm12, %v9729_v3  ;;  %v8138_v10 = vpop.f32.mrb[132].mxu1  ;;  %v8094_v12 = vpop.f32.mrb[135].mxu0  ;;  %v14447_v20 = vpack.c.bf16 %v14445_v63, %v14446_v25 }
 0xa77   :  { %8622 = vmatprep.mubr.bf16.mxu0 %v14418_v8  ;;  %v8139_v51 = vpop.f32.mrb[133].mxu1  ;;  %v8567_v10 = vsel %vm14449_vm8, %v8521_v7, 0 }
 0xa78   :  { %v8140_v57 = vpop.f32.mrb[134].mxu1 }
 0xa79   :  { %v8141_v39 = vpop.f32.mrb[135].mxu1 }
 0xa7c   :  { %9551 = vmatmul.mubr.msk.bf16.vlgmr.msra.gmra.mrb[144].mxu1 %vm5902_vm12, %v9728_v21 }
 0xa7d   :  { %8443 = vmatpush1.bf16.msra.mxu1 %v8006_v37  ;;  %8378 = vmatprep.mubr.bf16.mxu1 %v14418_v8 }
 0xa7e   :  { %8444 = vmatprep.subr.bf16.mxu1 %v8015_v31 }
 0xa81   :  { %8445 = vmatpush1.bf16.msra.mxu1 %v8014_v50 }
 0xa84   :  { %9552 = vmatmul.mubr.msk.bf16.gmra.mrb[148].mxu1 %vm5902_vm12, %v9729_v3 }
 0xa85   :  { %8474 = vmatprep.mubr.bf16.mxu1 %v14418_v8 }
 0xa8c   :  { %9555 = vmatmul.mubr.msk.bf16.vlgmr.msra.gmra.mrb[152].mxu1 %vm5902_vm12, %v9728_v21 }
 0xa8d   :  { %8484 = vmatprep.mubr.bf16.mxu1 %v14418_v8 }
 0xa94   :  { %9556 = vmatmul.mubr.msk.bf16.gmra.mrb[156].mxu1 %vm5902_vm12, %v9729_v3  ;;  %v14008_v3 = vpop.permute.xlu1 %8264 }
 0xa95   :  { %8675 = vmatprep.mubr.bf16.mxu1 %v14418_v8 }
 0xb21   :  { %v13994_v24 = vpop.f32.mrb[136].mxu0 }
 0xb22   :  { %v13996_v58 = vpop.f32.mrb[137].mxu0 }
 0xb23   :  { %v8181_v17 = vpop.f32.mrb[138].mxu0 }
 0xb24   :  { %v8182_v61 = vpop.f32.mrb[139].mxu0 }
 0xb25   :  { %v14032_v61 = vld [vmem:[%s14225_s1 + $0xa0] sm:$0xff]  }
 0xb29   :  { %v8185_v19 = vpop.f32.mrb[140].mxu0 }
 0xb2a   :  { %v8186_v30 = vpop.f32.mrb[141].mxu0 }
 0xb2b   :  { %v8187_v28 = vpop.f32.mrb[142].mxu0 }
 0xb2c   :  { %v8188_v1 = vpop.f32.mrb[143].mxu0 }
 0xb31   :  { %v8317_v21 = vpop.f32.mrb[144].mxu0 }
 0xb32   :  { %v8319_v42 = vpop.f32.mrb[145].mxu0  ;;  %v8318_v40 = vadd.f32 %v8317_v21, %v13998_v54 }
 0xb33   :  { %v8321_v43 = vpop.f32.mrb[146].mxu0  ;;  %v8320_v33 = vadd.f32 %v8319_v42, %v13998_v54 }
 0xb34   :  { %v8322_v18 = vadd.f32 %v8321_v43, %v14000_v49  ;;  %v8323_v26 = vpop.f32.mrb[147].mxu0 }
 0xb35   :  { %v8324_v14 = vadd.f32 %v8323_v26, %v14000_v49 }
 0xb36   :  { %v8505_v52 = vpack.c.bf16 %v8322_v18, %v8318_v40 }
 0xb37   :  { %v8506_v0 = vpack.c.bf16 %v8324_v14, %v8320_v33 }
 0xb39   :  { %v8327_v37 = vpop.f32.mrb[148].mxu0  ;;  %8590 = vmatprep.subr.bf16.mxu0 %v8506_v0 }
 0xb3a   :  { %v8329_v34 = vpop.f32.mrb[149].mxu0  ;;  %8591 = vmatpush1.bf16.msra.mxu0 %v8505_v52  ;;  %v8328_v36 = vadd.f32 %v8327_v37, %v14006_v9  ;;  %v14044_v37 = vld [vmem:[%s14225_s1 + $0xa8] sm:$0xff]  }
 0xb3b   :  { %v8331_v2 = vpop.f32.mrb[150].mxu0  ;;  %v8330_v5 = vadd.f32 %v8329_v34, %v14006_v9 }
 0xb3c   :  { %v8332_v6 = vadd.f32 %v8331_v2, %v14008_v3  ;;  %v8333_v46 = vpop.f32.mrb[151].mxu0 }
 0xb3d   :  { %v8334_v23 = vadd.f32 %v8333_v46, %v14008_v3 }
 0xb3e   :  { %v8513_v47 = vpack.c.bf16 %v8332_v6, %v8328_v36  ;;  %v8525_v6 = vpack.c.bf16 %v13251_v27, %v13255_v56 }
 0xb3f   :  { %v8514_v13 = vpack.c.bf16 %v8334_v23, %v8330_v5  ;;  %v14016_v15 = vpop.f32.mrb[136].mxu1 }
 0xb40   :  { %v14023_v41 = vpop.f32.mrb[137].mxu1  ;;  %v8579_v5 = vsel %vm14451_vm4, %v8525_v6, 0 }
 0xb41   :  { %v8423_v50 = vpop.f32.mrb[152].mxu0  ;;  %8592 = vmatprep.subr.bf16.mxu0 %v8514_v13  ;;  %v8228_v12 = vpop.f32.mrb[138].mxu1 }
 0xb42   :  { %v8425_v31 = vpop.f32.mrb[153].mxu0  ;;  %8593 = vmatpush1.bf16.msra.mxu0 %v8513_v47  ;;  %v8424_v51 = vadd.f32 %v8423_v50, %v13998_v54  ;;  %v8229_v19 = vpop.f32.mrb[139].mxu1 }
 0xb43   :  { %v8427_v44 = vpop.f32.mrb[154].mxu0  ;;  %9567 = vmatprep.subr.msk.bf16.mxu0 %vm14448_vm11, %v14447_v20  ;;  %v8426_v39 = vadd.f32 %v8425_v31, %v13998_v54  ;;  %vm14468_vm11 = vmmov %vm14467_vm0 }
 0xb44   :  { %v8428_v11 = vadd.f32 %v8427_v44, %v14000_v49  ;;  %v8429_v57 = vpop.f32.mrb[155].mxu0 }
 0xb45   :  { %v8430_v17 = vadd.f32 %v8429_v57, %v14000_v49  ;;  %v14453_v57 = vld [vmem:[#allocation17_spill] sm:$0xff] }
 0xb46   :  { %v8509_v30 = vpack.c.bf16 %v8428_v11, %v8424_v51  ;;  %8595 = vmatpush1.bf16.msra.mxu0 %v8567_v10  ;;  %v14452_v11 = vld [vmem:[#allocation18_spill] sm:$0xff] }
 0xb47   :  { %v8510_v28 = vpack.c.bf16 %v8430_v17, %v8426_v39  ;;  %v8232_v42 = vpop.f32.mrb[140].mxu1  ;;  %v8523_v12 = vpack.c.bf16 %v14453_v57, %v14452_v11 }
 0xb48   :  { %v8233_v40 = vpop.f32.mrb[141].mxu1 }
 0xb49   :  { %v8433_v1 = vpop.f32.mrb[156].mxu0  ;;  %9568 = vmatmul.mubr.msk.bf16.vlgmr.msra.gmra.mrb[160].mxu0 %vm8559_vm5, %v14032_v61  ;;  %8696 = vmatprep.subr.bf16.mxu0 %v8510_v28  ;;  %v8234_v14 = vpop.f32.mrb[142].mxu1  ;;  %v14455_v28 = vld [vmem:[#allocation10_spill] sm:$0xff] }
 0xb4a   :  { %v8435_v21 = vpop.f32.mrb[157].mxu0  ;;  %8697 = vmatpush1.bf16.msra.mxu0 %v8509_v30  ;;  %8632 = vmatprep.mubr.bf16.mxu0 %v14418_v8  ;;  %v8434_v18 = vadd.f32 %v8433_v1, %v14006_v9  ;;  %v8235_v34 = vpop.f32.mrb[143].mxu1  ;;  %v14454_v30 = vld [vmem:[#allocation9_spill] sm:$0xff] }
 0xb4b   :  { %v8437_v43 = vpop.f32.mrb[158].mxu0  ;;  %v8436_v52 = vadd.f32 %v8435_v21, %v14006_v9  ;;  %v14456_v1 = vpack.c.bf16 %v14454_v30, %v14455_v28  ;;  %v8573_v21 = vsel %vm14458_vm10, %v8523_v12, 0 }
 0xb4c   :  { %v8438_v26 = vadd.f32 %v8437_v43, %v14008_v3  ;;  %v8439_v33 = vpop.f32.mrb[159].mxu0 }
 0xb4d   :  { %v8440_v0 = vadd.f32 %v8439_v33, %v14008_v3 }
 0xb4e   :  { %v8517_v2 = vpack.c.bf16 %v8438_v26, %v8434_v18 }
 0xb4f   :  { %v8518_v36 = vpack.c.bf16 %v8440_v0, %v8436_v52  ;;  %v8370_v46 = vpop.f32.mrb[144].mxu1 }
 0xb50   :  { %v8372_v23 = vpop.f32.mrb[145].mxu1  ;;  %v8371_v13 = vadd.f32 %v8370_v46, %v13998_v54 }
 0xb51   :  { %9569 = vmatmul.mubr.msk.bf16.gmra.mrb[164].mxu0 %vm8559_vm5, %v14044_v37  ;;  %8698 = vmatprep.subr.bf16.mxu0 %v8518_v36  ;;  %v8374_v47 = vpop.f32.mrb[146].mxu1  ;;  %v8373_v48 = vadd.f32 %v8372_v23, %v13998_v54  ;;  %v8527_v23 = vpack.c.bf16 %v13294_v35, %v13298_v62  ;;  %v14104_v35 = vpop.permute.xlu0 %8531 }
 0xb52   :  { %8699 = vmatpush1.bf16.msra.mxu0 %v8517_v2  ;;  %8728 = vmatprep.mubr.bf16.mxu0 %v14418_v8  ;;  %v8375_v27 = vadd.f32 %v8374_v47, %v14000_v49  ;;  %v8376_v56 = vpop.f32.mrb[147].mxu1 }
 0xb53   :  { %9573 = vmatprep.subr.msk.bf16.mxu0 %vm14450_vm9, %v8526_v45  ;;  %v8377_v55 = vadd.f32 %v8376_v56, %v14000_v49 }
 0xb54   :  { %v8507_v7 = vpack.c.bf16 %v8375_v27, %v8371_v13 }
 0xb55   :  { %v8508_v50 = vpack.c.bf16 %v8377_v55, %v8373_v48 }
 0xb56   :  { %8701 = vmatpush1.bf16.msra.mxu0 %v8579_v5 }
 0xb57   :  { %v8380_v16 = vpop.f32.mrb[148].mxu1  ;;  %8643 = vmatprep.subr.bf16.mxu1 %v8508_v50  ;;  %v14112_v50 = vpop.permute.xlu0 %8541 }
 0xb58   :  { %v8382_v53 = vpop.f32.mrb[149].mxu1  ;;  %8644 = vmatpush1.bf16.msra.mxu1 %v8507_v7  ;;  %v8381_v31 = vadd.f32 %v8380_v16, %v14006_v9 }
 0xb59   :  { %9574 = vmatmul.mubr.msk.bf16.vlgmr.msra.gmra.mrb[168].mxu0 %vm8559_vm5, %v14032_v61  ;;  %v8384_v45 = vpop.f32.mrb[150].mxu1  ;;  %v8383_v25 = vadd.f32 %v8382_v53, %v14006_v9 }
 0xb5a   :  { %8738 = vmatprep.mubr.bf16.mxu0 %v14418_v8  ;;  %v8385_v44 = vadd.f32 %v8384_v45, %v14008_v3  ;;  %v8386_v63 = vpop.f32.mrb[151].mxu1 }
 0xb5b   :  { %v8387_v20 = vadd.f32 %v8386_v63, %v14008_v3 }
 0xb5c   :  { %v8515_v10 = vpack.c.bf16 %v8385_v44, %v8381_v31 }
 0xb5d   :  { %v8516_v51 = vpack.c.bf16 %v8387_v20, %v8383_v25 }
 0xb5f   :  { %v8476_v39 = vpop.f32.mrb[152].mxu1  ;;  %8645 = vmatprep.subr.bf16.mxu1 %v8516_v51 }
 0xb60   :  { %v8478_v17 = vpop.f32.mrb[153].mxu1  ;;  %8646 = vmatpush1.bf16.msra.mxu1 %v8515_v10  ;;  %v8477_v42 = vadd.f32 %v8476_v39, %v13998_v54 }
 0xb61   :  { %9575 = vmatmul.mubr.msk.bf16.gmra.mrb[172].mxu0 %vm8559_vm5, %v14044_v37  ;;  %v8480_v19 = vpop.f32.mrb[154].mxu1  ;;  %9570 = vmatprep.subr.msk.bf16.mxu1 %vm14457_vm15, %v14456_v1  ;;  %v8479_v18 = vadd.f32 %v8478_v17, %v13998_v54 }
 0xb62   :  { %8925 = vmatprep.mubr.bf16.mxu0 %v14418_v8  ;;  %v8481_v43 = vadd.f32 %v8480_v19, %v14000_v49  ;;  %v8482_v40 = vpop.f32.mrb[155].mxu1 }
 0xb63   :  { %v8483_v26 = vadd.f32 %v8482_v40, %v14000_v49 }
 0xb64   :  { %v8511_v33 = vpack.c.bf16 %v8481_v43, %v8477_v42  ;;  %8648 = vmatpush1.bf16.msra.mxu1 %v8573_v21  ;;  %v14125_v43 = vld [vmem:[%s14225_s1 + $0xb0] sm:$0xff]  }
 0xb65   :  { %v8512_v14 = vpack.c.bf16 %v8483_v26, %v8479_v18 }
 0xb67   :  { %v8486_v52 = vpop.f32.mrb[156].mxu1  ;;  %9571 = vmatmul.mubr.msk.bf16.vlgmr.msra.gmra.mrb[160].mxu1 %vm8559_vm5, %v14032_v61  ;;  %8749 = vmatprep.subr.bf16.mxu1 %v8512_v14 }
 0xb68   :  { %v8488_v0 = vpop.f32.mrb[157].mxu1  ;;  %8750 = vmatpush1.bf16.msra.mxu1 %v8511_v33  ;;  %8685 = vmatprep.mubr.bf16.mxu1 %v14418_v8  ;;  %v8487_v2 = vadd.f32 %v8486_v52, %v14006_v9 }
 0xb69   :  { %v8490_v34 = vpop.f32.mrb[158].mxu1  ;;  %v8489_v49 = vadd.f32 %v8488_v0, %v14006_v9  ;;  %v8585_v9 = vsel %vm14460_vm13, %v8527_v23, 0 }
 0xb6a   :  { %v8491_v36 = vadd.f32 %v8490_v34, %v14008_v3  ;;  %v8492_v54 = vpop.f32.mrb[159].mxu1 }
 0xb6b   :  { %v8493_v6 = vadd.f32 %v8492_v54, %v14008_v3 }
 0xb6c   :  { %v8519_v46 = vpack.c.bf16 %v8491_v36, %v8487_v2 }
 0xb6d   :  { %v8520_v5 = vpack.c.bf16 %v8493_v6, %v8489_v49 }
 0xb6f   :  { %9572 = vmatmul.mubr.msk.bf16.gmra.mrb[164].mxu1 %vm8559_vm5, %v14044_v37  ;;  %8751 = vmatprep.subr.bf16.mxu1 %v8520_v5  ;;  %v14137_v5 = vld [vmem:[%s14225_s1 + $0xb8] sm:$0xff]  }
 0xb70   :  { %8752 = vmatpush1.bf16.msra.mxu1 %v8519_v46  ;;  %8781 = vmatprep.mubr.bf16.mxu1 %v14418_v8 }
 0xb71   :  { %9576 = vmatprep.subr.msk.bf16.mxu1 %vm14459_vm14, %v8528_v60  ;;  %v14107_v60 = vpop.permute.xlu1 %8536 }
 0xb74   :  { %8754 = vmatpush1.bf16.msra.mxu1 %v8585_v9 }
 0xb75   :  { %v14115_v44 = vpop.permute.xlu1 %8546 }
 0xb77   :  { %9577 = vmatmul.mubr.msk.bf16.vlgmr.msra.gmra.mrb[168].mxu1 %vm8559_vm5, %v14032_v61 }
 0xb78   :  { %8791 = vmatprep.mubr.bf16.mxu1 %v14418_v8 }
 0xb7f   :  { %9578 = vmatmul.mubr.msk.bf16.gmra.mrb[172].mxu1 %vm8559_vm5, %v14044_v37 }
 0xb80   :  { %8972 = vmatprep.mubr.bf16.mxu1 %v14418_v8 }
 0xc1c   :  { %v8624_v62 = vpop.f32.mrb[160].mxu0 }
 0xc1d   :  { %v8625_v32 = vadd.f32 %v8624_v62, %v14104_v35  ;;  %v8626_v22 = vpop.f32.mrb[161].mxu0 }
 0xc1e   :  { %v8627_v3 = vadd.f32 %v8626_v22, %v14104_v35  ;;  %v8628_v47 = vpop.f32.mrb[162].mxu0 }
 0xc1f   :  { %v8629_v61 = vadd.f32 %v8628_v47, %v14107_v60  ;;  %v8630_v13 = vpop.f32.mrb[163].mxu0  ;;  %v8802_v56 = vmax.f32 %v8625_v32, 0.0 }
 0xc20   :  { %v8631_v27 = vadd.f32 %v8630_v13, %v14107_v60  ;;  %v8803_v48 = vmax.f32 %v8627_v3, 0.0 }
 0xc21   :  { %v8810_v37 = vmax.f32 %v8629_v61, 0.0 }
 0xc22   :  { %v8811_v55 = vmax.f32 %v8631_v27, 0.0 }
 0xc23   :  { %v8844_v7 = vpack.c.bf16 %v8810_v37, %v8802_v56 }
 0xc24   :  { %v8845_v16 = vpack.c.bf16 %v8811_v55, %v8803_v48  ;;  %v8634_v53 = vpop.f32.mrb[164].mxu0 }
 0xc25   :  { %v8635_v45 = vadd.f32 %v8634_v53, %v14112_v50  ;;  %v8636_v31 = vpop.f32.mrb[165].mxu0 }
 0xc26   :  { %v8637_v63 = vadd.f32 %v8636_v31, %v14112_v50  ;;  %v8638_v25 = vpop.f32.mrb[166].mxu0  ;;  %8893 = vmatprep.subr.bf16.mxu0 %v8845_v16 }
 0xc27   :  { %v8639_v20 = vadd.f32 %v8638_v25, %v14115_v44  ;;  %v8640_v10 = vpop.f32.mrb[167].mxu0  ;;  %8894 = vmatpush1.bf16.msra.mxu0 %v8844_v7  ;;  %v8818_v11 = vmax.f32 %v8635_v45, 0.0 }
 0xc28   :  { %v8641_v51 = vadd.f32 %v8640_v10, %v14115_v44  ;;  %v8819_v12 = vmax.f32 %v8637_v63, 0.0 }
 0xc29   :  { %v8826_v57 = vmax.f32 %v8639_v20, 0.0 }
 0xc2a   :  { %v8827_v39 = vmax.f32 %v8641_v51, 0.0 }
 0xc2b   :  { %v8852_v17 = vpack.c.bf16 %v8826_v57, %v8818_v11 }
 0xc2c   :  { %v8853_v19 = vpack.c.bf16 %v8827_v39, %v8819_v12  ;;  %v8730_v30 = vpop.f32.mrb[168].mxu0 }
 0xc2d   :  { %v8731_v28 = vadd.f32 %v8730_v30, %v14104_v35  ;;  %v8732_v1 = vpop.f32.mrb[169].mxu0 }
 0xc2e   :  { %v8733_v21 = vadd.f32 %v8732_v1, %v14104_v35  ;;  %v8734_v42 = vpop.f32.mrb[170].mxu0  ;;  %8895 = vmatprep.subr.bf16.mxu0 %v8853_v19 }
 0xc2f   :  { %v8735_v40 = vadd.f32 %v8734_v42, %v14107_v60  ;;  %v8736_v18 = vpop.f32.mrb[171].mxu0  ;;  %8896 = vmatpush1.bf16.msra.mxu0 %v8852_v17  ;;  %v8806_v33 = vmax.f32 %v8731_v28, 0.0 }
 0xc30   :  { %v8737_v26 = vadd.f32 %v8736_v18, %v14107_v60  ;;  %v8807_v52 = vmax.f32 %v8733_v21, 0.0 }
 0xc31   :  { %v8814_v14 = vmax.f32 %v8735_v40, 0.0 }
 0xc32   :  { %v8815_v0 = vmax.f32 %v8737_v26, 0.0  ;;  %9589 = vmatmul.mubr.msk.bf16.vlgmr.msra.gmra.mrb[176].mxu0 %vm5902_vm12, %v14125_v43 }
 0xc33   :  { %v8848_v34 = vpack.c.bf16 %v8814_v14, %v8806_v33  ;;  %8933 = vmatprep.mubr.bf16.mxu0 %v14418_v8 }
 0xc34   :  { %v8849_v2 = vpack.c.bf16 %v8815_v0, %v8807_v52  ;;  %v8740_v36 = vpop.f32.mrb[172].mxu0 }
 0xc35   :  { %v8741_v54 = vadd.f32 %v8740_v36, %v14112_v50  ;;  %v8742_v49 = vpop.f32.mrb[173].mxu0 }
 0xc36   :  { %v8743_v6 = vadd.f32 %v8742_v49, %v14112_v50  ;;  %v8744_v46 = vpop.f32.mrb[174].mxu0  ;;  %8987 = vmatprep.subr.bf16.mxu0 %v8849_v2 }
 0xc37   :  { %v8745_v23 = vadd.f32 %v8744_v46, %v14115_v44  ;;  %v8746_v9 = vpop.f32.mrb[175].mxu0  ;;  %8988 = vmatpush1.bf16.msra.mxu0 %v8848_v34  ;;  %v8822_v32 = vmax.f32 %v8741_v54, 0.0 }
 0xc38   :  { %v8747_v62 = vadd.f32 %v8746_v9, %v14115_v44  ;;  %v8823_v3 = vmax.f32 %v8743_v6, 0.0 }
 0xc39   :  { %v8830_v22 = vmax.f32 %v8745_v23, 0.0 }
 0xc3a   :  { %v8831_v47 = vmax.f32 %v8747_v62, 0.0  ;;  %9590 = vmatmul.mubr.msk.bf16.gmra.mrb[180].mxu0 %vm5902_vm12, %v14137_v5  ;;  %v8677_v27 = vpop.f32.mrb[160].mxu1 }
 0xc3b   :  { %v8856_v61 = vpack.c.bf16 %v8830_v22, %v8822_v32  ;;  %9019 = vmatprep.mubr.bf16.mxu0 %v14418_v8  ;;  %v8678_v56 = vadd.f32 %v8677_v27, %v14104_v35  ;;  %v8679_v37 = vpop.f32.mrb[161].mxu1 }
 0xc3c   :  { %v8857_v13 = vpack.c.bf16 %v8831_v47, %v8823_v3  ;;  %v8680_v48 = vadd.f32 %v8679_v37, %v14104_v35  ;;  %v8681_v55 = vpop.f32.mrb[162].mxu1 }
 0xc3d   :  { %v8682_v7 = vadd.f32 %v8681_v55, %v14107_v60  ;;  %v8683_v16 = vpop.f32.mrb[163].mxu1  ;;  %v8804_v45 = vmax.f32 %v8678_v56, 0.0 }
 0xc3e   :  { %8989 = vmatprep.subr.bf16.mxu0 %v8857_v13  ;;  %v8684_v53 = vadd.f32 %v8683_v16, %v14107_v60  ;;  %v8805_v63 = vmax.f32 %v8680_v48, 0.0 }
 0xc3f   :  { %8990 = vmatpush1.bf16.msra.mxu0 %v8856_v61  ;;  %v8812_v31 = vmax.f32 %v8682_v7, 0.0 }
 0xc40   :  { %v8813_v25 = vmax.f32 %v8684_v53, 0.0 }
 0xc41   :  { %v8846_v20 = vpack.c.bf16 %v8812_v31, %v8804_v45 }
 0xc42   :  { %9593 = vmatmul.mubr.msk.bf16.vlgmr.msra.gmra.mrb[184].mxu0 %vm5902_vm12, %v14125_v43  ;;  %v8847_v10 = vpack.c.bf16 %v8813_v25, %v8805_v63  ;;  %v8687_v51 = vpop.f32.mrb[164].mxu1 }
 0xc43   :  { %9027 = vmatprep.mubr.bf16.mxu0 %v14418_v8  ;;  %v8688_v11 = vadd.f32 %v8687_v51, %v14112_v50  ;;  %v8689_v57 = vpop.f32.mrb[165].mxu1 }
 0xc44   :  { %v8690_v12 = vadd.f32 %v8689_v57, %v14112_v50  ;;  %v8691_v39 = vpop.f32.mrb[166].mxu1  ;;  %8940 = vmatprep.subr.bf16.mxu1 %v8847_v10 }
 0xc45   :  { %v8692_v17 = vadd.f32 %v8691_v39, %v14115_v44  ;;  %v8693_v19 = vpop.f32.mrb[167].mxu1  ;;  %8941 = vmatpush1.bf16.msra.mxu1 %v8846_v20  ;;  %v8820_v28 = vmax.f32 %v8688_v11, 0.0 }
 0xc46   :  { %v8694_v30 = vadd.f32 %v8693_v19, %v14115_v44  ;;  %v8821_v21 = vmax.f32 %v8690_v12, 0.0 }
 0xc47   :  { %v8828_v1 = vmax.f32 %v8692_v17, 0.0 }
 0xc48   :  { %v8829_v42 = vmax.f32 %v8694_v30, 0.0 }
 0xc49   :  { %v8854_v40 = vpack.c.bf16 %v8828_v1, %v8820_v28 }
 0xc4a   :  { %9594 = vmatmul.mubr.msk.bf16.gmra.mrb[188].mxu0 %vm5902_vm12, %v14137_v5  ;;  %v8855_v18 = vpack.c.bf16 %v8829_v42, %v8821_v21  ;;  %v8783_v26 = vpop.f32.mrb[168].mxu1 }
 0xc4b   :  { %v8784_v33 = vadd.f32 %v8783_v26, %v14104_v35  ;;  %v8785_v14 = vpop.f32.mrb[169].mxu1 }
 0xc4c   :  { %v8786_v52 = vadd.f32 %v8785_v14, %v14104_v35  ;;  %v8787_v0 = vpop.f32.mrb[170].mxu1  ;;  %8942 = vmatprep.subr.bf16.mxu1 %v8855_v18  ;;  %v14182_v14 = vpop.permute.xlu1 %8018 }
 0xc4d   :  { %v8788_v34 = vadd.f32 %v8787_v0, %v14107_v60  ;;  %v8789_v2 = vpop.f32.mrb[171].mxu1  ;;  %8943 = vmatpush1.bf16.msra.mxu1 %v8854_v40  ;;  %v8808_v54 = vmax.f32 %v8784_v33, 0.0  ;;  %v8084_v0 = vadd.f32 %v13986_v59, %v14182_v14 }
 0xc4e   :  { %v8790_v36 = vadd.f32 %v8789_v2, %v14107_v60  ;;  %v8809_v6 = vmax.f32 %v8786_v52, 0.0  ;;  %v8086_v2 = vadd.f32 %v13990_v29, %v14182_v14 }
 0xc4f   :  { %v8816_v49 = vmax.f32 %v8788_v34, 0.0 }
 0xc50   :  { %v8817_v46 = vmax.f32 %v8790_v36, 0.0  ;;  %9591 = vmatmul.mubr.msk.bf16.vlgmr.msra.gmra.mrb[176].mxu1 %vm5902_vm12, %v14125_v43 }
 0xc51   :  { %v8850_v23 = vpack.c.bf16 %v8816_v49, %v8808_v54  ;;  %8980 = vmatprep.mubr.bf16.mxu1 %v14418_v8 }
 0xc52   :  { %v8851_v9 = vpack.c.bf16 %v8817_v46, %v8809_v6  ;;  %v8793_v35 = vpop.f32.mrb[172].mxu1 }
 0xc53   :  { %v8794_v62 = vadd.f32 %v8793_v35, %v14112_v50  ;;  %v8795_v32 = vpop.f32.mrb[173].mxu1 }
 0xc54   :  { %v8796_v22 = vadd.f32 %v8795_v32, %v14112_v50  ;;  %v8797_v3 = vpop.f32.mrb[174].mxu1  ;;  %9034 = vmatprep.subr.bf16.mxu1 %v8851_v9  ;;  %v14176_v50 = vpop.permute.xlu0 %8862 }
 0xc55   :  { %v8798_v60 = vadd.f32 %v8797_v3, %v14115_v44  ;;  %v8799_v47 = vpop.f32.mrb[175].mxu1  ;;  %9035 = vmatpush1.bf16.msra.mxu1 %v8850_v23  ;;  %v8824_v13 = vmax.f32 %v8794_v62, 0.0 }
 0xc56   :  { %v8800_v61 = vadd.f32 %v8799_v47, %v14115_v44  ;;  %v8825_v56 = vmax.f32 %v8796_v22, 0.0 }
 0xc57   :  { %v8832_v27 = vmax.f32 %v8798_v60, 0.0 }
 0xc58   :  { %v8833_v37 = vmax.f32 %v8800_v61, 0.0  ;;  %9592 = vmatmul.mubr.msk.bf16.gmra.mrb[180].mxu1 %vm5902_vm12, %v14137_v5 }
 0xc59   :  { %v8858_v48 = vpack.c.bf16 %v8832_v27, %v8824_v13  ;;  %9066 = vmatprep.mubr.bf16.mxu1 %v14418_v8 }
 0xc5a   :  { %v8859_v55 = vpack.c.bf16 %v8833_v37, %v8825_v56 }
 0xc5c   :  { %9036 = vmatprep.subr.bf16.mxu1 %v8859_v55 }
 0xc5d   :  { %9037 = vmatpush1.bf16.msra.mxu1 %v8858_v48  ;;  %v8178_v48 = vadd.f32 %v13994_v24, %v14182_v14 }
 0xc60   :  { %9595 = vmatmul.mubr.msk.bf16.vlgmr.msra.gmra.mrb[184].mxu1 %vm5902_vm12, %v14125_v43 }
 0xc61   :  { %9074 = vmatprep.mubr.bf16.mxu1 %v14418_v8 }
 0xc68   :  { %9596 = vmatmul.mubr.msk.bf16.gmra.mrb[188].mxu1 %vm5902_vm12, %v14137_v5  ;;  %vm14462_vm12 = vmmov %vm14461_vm6 }
 0xd05   :  { %v8927_v44 = vpop.f32.mrb[176].mxu0 }
 0xd06   :  { %v8928_v7 = vadd.f32 %v8927_v44, %v14176_v50  ;;  %v8929_v16 = vpop.f32.mrb[177].mxu0 }
 0xd07   :  { %v8930_v53 = vadd.f32 %v8929_v16, %v14176_v50  ;;  %v8931_v45 = vpop.f32.mrb[178].mxu0 }
 0xd08   :  { %v9597_v31 = vmul.f32 -1.442695, %v8928_v7  ;;  %v8932_v63 = vpop.f32.mrb[179].mxu0  ;;  %v8180_v7 = vadd.f32 %v13996_v58, %v14182_v14 }
 0xd09   :  { %v9598_v25 = vmul.f32 -1.442695, %v8930_v53 }
 0xd0a   :  { %9862 = vpow2.f32 %v9597_v31 }
 0xd0b   :  { %9864 = vpow2.f32 %v9598_v25 }
 0xd0d   :  { %v8935_v43 = vpop.f32.mrb[180].mxu0 }
 0xd0e   :  { %v8936_v20 = vpop.f32.mrb[181].mxu0 }
 0xd0f   :  { %v8937_v8 = vpop.f32.mrb[182].mxu0 }
 0xd10   :  { %v8938_v10 = vpop.f32.mrb[183].mxu0 }
 0xd14   :  { %v9863_v51 = vpop.eup %9862 }
 0xd15   :  { %v9865_v5 = vpop.eup %9864  ;;  %v9105_v11 = vadd.f32 1.0, %v9863_v51  ;;  %v9021_v57 = vpop.f32.mrb[184].mxu0 }
 0xd16   :  { %v9106_v12 = vadd.f32 1.0, %v9865_v5  ;;  %v9022_v39 = vadd.f32 %v9021_v57, %v14176_v50  ;;  %v9023_v17 = vpop.f32.mrb[185].mxu0 }
 0xd17   :  { %9866 = vrcp.f32 %v9105_v11  ;;  %v9024_v19 = vadd.f32 %v9023_v17, %v14176_v50  ;;  %v9025_v30 = vpop.f32.mrb[186].mxu0 }
 0xd18   :  { %9868 = vrcp.f32 %v9106_v12  ;;  %v9601_v28 = vmul.f32 -1.442695, %v9022_v39  ;;  %v9026_v1 = vpop.f32.mrb[187].mxu0 }
 0xd19   :  { %v9602_v21 = vmul.f32 -1.442695, %v9024_v19  ;;  %v8131_v1 = vadd.f32 %v13988_v38, %v14182_v14 }
 0xd1a   :  { %9870 = vpow2.f32 %v9601_v28 }
 0xd1b   :  { %9872 = vpow2.f32 %v9602_v21 }
 0xd1d   :  { %v9029_v42 = vpop.f32.mrb[188].mxu0 }
 0xd1e   :  { %v9030_v40 = vpop.f32.mrb[189].mxu0 }
 0xd1f   :  { %v9031_v18 = vpop.f32.mrb[190].mxu0 }
 0xd20   :  { %v9032_v26 = vpop.f32.mrb[191].mxu0 }
 0xd21   :  { %v9867_v33 = vpop.eup %9866 }
 0xd22   :  { %v9869_v52 = vpop.eup %9868  ;;  %v9137_v34 = vrot.slane %v9867_v33, 7 }
 0xd23   :  { %v9138_v36 = vrot.slane %v9869_v52, 7  ;;  %v8974_v62 = vpop.f32.mrb[176].mxu1 }
 0xd24   :  { %v9871_v54 = vpop.eup %9870  ;;  %v9153_v49 = vsel %vm14461_vm6, %v8084_v0, %v9137_v34  ;;  %v8975_v32 = vadd.f32 %v8974_v62, %v14176_v50  ;;  %v8976_v59 = vpop.f32.mrb[177].mxu1 }
 0xd25   :  { %v9873_v6 = vpop.eup %9872  ;;  %v9154_v46 = vsel %vm14462_vm12, %v8086_v2, %v9138_v36  ;;  %v9109_v23 = vadd.f32 1.0, %v9871_v54  ;;  %v8977_v29 = vadd.f32 %v8976_v59, %v14176_v50  ;;  %v8978_v22 = vpop.f32.mrb[178].mxu1  ;;  %v8227_v54 = vadd.f32 %v14023_v41, %v14182_v14 }
 0xd26   :  { %v9169_v9 = vcombine.low %v9153_v49, %v9154_v46  ;;  %v9110_v35 = vadd.f32 1.0, %v9873_v6  ;;  %v9599_v3 = vmul.f32 -1.442695, %v8975_v32  ;;  %v8979_v60 = vpop.f32.mrb[179].mxu1 }
 0xd27   :  { %9874 = vrcp.f32 %v9109_v23  ;;  %v9600_v47 = vmul.f32 -1.442695, %v8977_v29 }
 0xd28   :  { %9177 = vst [vmem:[%s14227_s3] sm:$0xff] %v9169_v9  ;;  %9876 = vrcp.f32 %v9110_v35 }
 0xd29   :  { %9878 = vpow2.f32 %v9599_v3 }
 0xd2a   :  { %9880 = vpow2.f32 %v9600_v47 }
 0xd2b   :  { %v8982_v61 = vpop.f32.mrb[180].mxu1 }
 0xd2c   :  { %v8983_v13 = vpop.f32.mrb[181].mxu1 }
 0xd2d   :  { %v8984_v56 = vpop.f32.mrb[182].mxu1 }
 0xd2e   :  { %v8985_v55 = vpop.f32.mrb[183].mxu1 }
 0xd31   :  { %v9875_v27 = vpop.eup %9874 }
 0xd32   :  { %v9877_v37 = vpop.eup %9876  ;;  %v9141_v44 = vrot.slane %v9875_v27, 7 }
 0xd33   :  { %v9142_v16 = vrot.slane %v9877_v37, 7  ;;  %v9879_v31 = vpop.eup %9878  ;;  %v9068_v20 = vpop.f32.mrb[184].mxu1 }
 0xd34   :  { %v9157_v53 = vsel %vm14463_vm2, %v8178_v48, %v9141_v44  ;;  %v9881_v25 = vpop.eup %9880  ;;  %v9107_v43 = vadd.f32 1.0, %v9879_v31  ;;  %v9069_v10 = vadd.f32 %v9068_v20, %v14176_v50  ;;  %v9070_v24 = vpop.f32.mrb[185].mxu1 }
 0xd35   :  { %v9158_v45 = vsel %vm14464_vm3, %v8180_v7, %v9142_v16  ;;  %v9108_v8 = vadd.f32 1.0, %v9881_v25  ;;  %v9071_v58 = vadd.f32 %v9070_v24, %v14176_v50  ;;  %v9072_v51 = vpop.f32.mrb[186].mxu1  ;;  %v8133_v50 = vadd.f32 %v13992_v4, %v14182_v14 }
 0xd36   :  { %v9171_v63 = vcombine.low %v9157_v53, %v9158_v45  ;;  %9882 = vrcp.f32 %v9107_v43  ;;  %v9603_v5 = vmul.f32 -1.442695, %v9069_v10  ;;  %v9073_v11 = vpop.f32.mrb[187].mxu1  ;;  %v8225_v4 = vadd.f32 %v14016_v15, %v14182_v14 }
 0xd37   :  { %9884 = vrcp.f32 %v9108_v8  ;;  %v9604_v57 = vmul.f32 -1.442695, %v9071_v58 }
 0xd38   :  { %9179 = vst [vmem:[%s14227_s3 + $0x10] sm:$0xff] %v9171_v63  ;;  %9886 = vpow2.f32 %v9603_v5 }
 0xd39   :  { %9888 = vpow2.f32 %v9604_v57 }
 0xd3b   :  { %v9076_v12 = vpop.f32.mrb[188].mxu1 }
 0xd3c   :  { %v9077_v39 = vpop.f32.mrb[189].mxu1 }
 0xd3d   :  { %v9078_v17 = vpop.f32.mrb[190].mxu1 }
 0xd3e   :  { %v9079_v19 = vpop.f32.mrb[191].mxu1 }
 0xd40   :  { %v9883_v30 = vpop.eup %9882 }
 0xd41   :  { %v9885_v28 = vpop.eup %9884  ;;  %v9139_v21 = vrot.slane %v9883_v30, 7 }
 0xd42   :  { %v9140_v42 = vrot.slane %v9885_v28, 7  ;;  %v9887_v40 = vpop.eup %9886 }
 0xd43   :  { %v9155_v18 = vsel %vm14465_vm1, %v8131_v1, %v9139_v21  ;;  %v9889_v26 = vpop.eup %9888  ;;  %v9111_v52 = vadd.f32 1.0, %v9887_v40 }
 0xd44   :  { %v9156_v33 = vsel %vm14466_vm7, %v8133_v50, %v9140_v42  ;;  %v9112_v34 = vadd.f32 1.0, %v9889_v26 }
 0xd45   :  { %v9170_v0 = vcombine.low %v9155_v18, %v9156_v33  ;;  %9890 = vrcp.f32 %v9111_v52 }
 0xd46   :  { %9892 = vrcp.f32 %v9112_v34 }
 0xd47   :  { %9178 = vst [vmem:[%s14227_s3 + $0x8] sm:$0xff] %v9170_v0 }
 0xd4f   :  { %v9891_v38 = vpop.eup %9890 }
 0xd50   :  { %v9893_v2 = vpop.eup %9892  ;;  %v9143_v36 = vrot.slane %v9891_v38, 7 }
 0xd51   :  { %v9144_v49 = vrot.slane %v9893_v2, 7 }
 0xd52   :  { %v9159_v6 = vsel %vm14467_vm0, %v8225_v4, %v9143_v36 }
 0xd53   :  { %v9160_v46 = vsel %vm14468_vm11, %v8227_v54, %v9144_v49 }
 0xd54   :  { %v9172_v23 = vcombine.low %v9159_v6, %v9160_v46 }
 0xd56   :  { %9180 = vst [vmem:[%s14227_s3 + $0x18] sm:$0xff] %v9172_v23 }

</bundles_post_ra>
